<compile_context>
chip_gen: v6e
topology: v6e:2x2x1
jax: 0.10.0
libtpu: 0.0.40
codegen_flags: <defaults>
</compile_context>

<pallas_src>
import math

import jax
import jax.numpy as jnp
import numpy as np
from jax.experimental import pallas as pl
from jax.experimental.pallas import tpu as pltpu

KSIZE = 7
PAD = (KSIZE - 1) // 2            # 3
TAPS = 2 * KSIZE * KSIZE          # 98 BN-folded taps per gate (2 pooled ch)
BN_EPS = 1e-5


def _round_up(v, m):
    return ((v + m - 1) // m) * m


# ---------------------------------------------------------------------------
# In-kernel helper: dense 7x7 "same" conv (2 pooled channels -> 1) + sigmoid.
# ---------------------------------------------------------------------------
def _conv7x7_sigmoid(m_max, m_mean, w_ref, w_base, bias, out_scale):
    """sigmoid(conv7x7([m_max, m_mean]) + bias) * out_scale on (..., R, S) maps.

    Maps are dense: R on sublanes, S on lanes.  Row taps are static slices of
    a zero-row-padded buffer; lane taps are pltpu.roll shifts into a >= PAD
    zero lane margin (circular roll wraps zeros, reproducing 'same' padding),
    so the 98 taps never issue lane-unaligned slice copies and the shifts go
    to the XLU slot (co-issue with the VPU fma).
    """
    *lead, R, S = m_max.shape
    sp = max(_round_up(S + PAD, 128), 128)        # lane-aligned width >= S+PAD
    acc = jnp.zeros((*lead, R, sp), jnp.float32)
    for ci, m in enumerate((m_max, m_mean)):
        lane_pad = jnp.zeros((*lead, R, sp - S), jnp.float32)
        mp = jnp.concatenate([m, lane_pad], axis=m.ndim - 1)
        row_pad = jnp.zeros((*lead, PAD, sp), jnp.float32)
        mp = jnp.concatenate([row_pad, mp, row_pad], axis=m.ndim - 2)
        for a in range(KSIZE):                                    # row taps
            rows = jax.lax.slice_in_dim(mp, a, a + R, axis=mp.ndim - 2)
            for b in range(KSIZE):                                # lane taps
                shf = (PAD - b) % sp
                tap = rows if shf == 0 else pltpu.roll(rows, shf,
                                                       axis=rows.ndim - 1)
                wgt = w_ref[w_base + ci * KSIZE * KSIZE + a * KSIZE + b]
                acc = acc + wgt * tap
    return jax.nn.sigmoid(acc[..., :S] + bias) * out_scale


# ---------------------------------------------------------------------------
# Fused TripletAttention kernel: Nb batch samples per grid step.
# ---------------------------------------------------------------------------
def _triplet_attention_kernel(w_ref, b_ref, x_ref, o_ref):
    # w_ref: (294,) f32 SMEM  [gate_h | gate_w (spatially transposed) | gate_s]
    # b_ref: (3,)   f32 SMEM  BN-folded biases
    # x_ref / o_ref: (Nb, C, H, W) VMEM blocks
    x = x_ref[...].astype(jnp.float32)
    _, C, H, W = x.shape
    third = 1.0 / 3.0            # fold the (o1+o2+o3)/3 average into small maps

    # SpatialGate (pool over C)  -> dense (Nb, H, W) scale map.
    s_scale = _conv7x7_sigmoid(jnp.max(x, axis=1),
                               jnp.sum(x, axis=1) * (1.0 / C),
                               w_ref, 2 * TAPS, b_ref[2], third)
    # ChannelGateH (pool over H) -> dense (Nb, C, W) scale map.
    h_scale = _conv7x7_sigmoid(jnp.max(x, axis=2),
                               jnp.sum(x, axis=2) * (1.0 / H),
                               w_ref, 0 * TAPS, b_ref[0], third)
    # ChannelGateW (pool over W) -> dense (Nb, C, H) scale map.
    w_scale = _conv7x7_sigmoid(jnp.max(x, axis=3),
                               jnp.sum(x, axis=3) * (1.0 / W),
                               w_ref, 1 * TAPS, b_ref[1], third)

    # out[n,c,h,w] = x[n,c,h,w] * (s[h,w] + h[c,w] + w[c,h]) / 3
    comb = (s_scale[:, None, :, :] + h_scale[:, :, None, :]
            + w_scale[:, :, :, None])
    o_ref[...] = (x * comb).astype(o_ref.dtype)


# ---------------------------------------------------------------------------
# Host-side helpers / wrapper.
# ---------------------------------------------------------------------------
def _pack_params(params):
    """Flatten the three BN-folded (2,7,7) tap sets into one SMEM array.

    gate_w's spatial taps are transposed: the fused kernel runs that gate's
    conv on (C, H)-oriented maps, whereas the PyTorch branch works in (H, C).
    """
    wh, bh = params["gate_h"]
    ww, bw = params["gate_w"]
    ws, bs = params["gate_s"]
    ww_t = jnp.transpose(ww, (0, 2, 1))
    w_flat = jnp.concatenate(
        [wh.reshape(-1), ww_t.reshape(-1), ws.reshape(-1)]).astype(jnp.float32)
    b_all = jnp.concatenate([bh, bw, bs]).astype(jnp.float32)
    return w_flat, b_all


def _pick_batch_block(n, per_sample_bytes, budget=8 << 20):
    """Largest divisor of n under the VMEM budget, keeping >=2 grid steps
    when n > 1 so both v7x TensorCores get work on the parallel axis."""
    best = 1
    for nb in range(2, n + 1):
        if n % nb:
            continue
        if nb * per_sample_bytes > budget:
            break
        if n // nb >= 2:
            best = nb
    return best


def triplet_attention(x, params):
    """Fused TripletAttention forward on an NCHW tensor (one pallas_call)."""
    N, C, H, W = x.shape
    w_flat, b_all = _pack_params(params)
    # Rough per-sample VMEM footprint: double-buffered in+out tiles plus the
    # in-kernel f32 x and comb intermediates.
    per_sample = C * H * W * (4 * x.dtype.itemsize + 8)
    nb = _pick_batch_block(N, per_sample)
    grid_spec = pltpu.PrefetchScalarGridSpec(
        num_scalar_prefetch=2,
        grid=(N // nb,),
        in_specs=[pl.BlockSpec((nb, C, H, W), lambda b, *_: (b, 0, 0, 0))],
        out_specs=pl.BlockSpec((nb, C, H, W), lambda b, *_: (b, 0, 0, 0)),
    )
    return pl.pallas_call(
        _triplet_attention_kernel,
        grid_spec=grid_spec,
        out_shape=jax.ShapeDtypeStruct(x.shape, x.dtype),
        compiler_params=pltpu.CompilerParams(dimension_semantics=("parallel",)),
    )(w_flat, b_all, x)


# ---------------------------------------------------------------------------
# Pure-JAX reference (mirrors the PyTorch module) for the correctness check.
# ---------------------------------------------------------------------------
def _spatial_gate_ref(x, w, bias):
    w4 = w.reshape(1, 2, KSIZE, KSIZE)
    mx = jnp.max(x, axis=1, keepdims=True)
    mn = jnp.mean(x, axis=1, keepdims=True)
    pooled = jnp.concatenate([mx, mn], axis=1)
    conv = jax.lax.conv_general_dilated(
        pooled, w4, (1, 1), ((PAD, PAD), (PAD, PAD)),
        dimension_numbers=("NCHW", "OIHW", "NCHW"))
    return x * jax.nn.sigmoid(conv + bias.reshape(1, 1, 1, 1))


def _triplet_attention_ref(x, params):
    xp1 = jnp.transpose(x, (0, 2, 1, 3))
    o11 = jnp.transpose(_spatial_gate_ref(xp1, *params["gate_h"]), (0, 2, 1, 3))
    xp2 = jnp.transpose(x, (0, 3, 2, 1))
    o21 = jnp.transpose(_spatial_gate_ref(xp2, *params["gate_w"]), (0, 3, 2, 1))
    o3 = _spatial_gate_ref(x, *params["gate_s"])
    return (1.0 / 3.0) * (o3 + o11 + o21)


# ---------------------------------------------------------------------------
# Deterministic init: Conv2d(2->1, 7x7, bias=False) + BatchNorm2d folded into
# the conv weights/bias (inference-mode semantics) with non-trivial BN stats.
# ---------------------------------------------------------------------------
def _init_gate_params(key):
    kw_, kg, kb, km, kv = jax.random.split(key, 5)
    fan_in = 2 * KSIZE * KSIZE
    bound = 1.0 / math.sqrt(fan_in)
    w = jax.random.uniform(kw_, (2, KSIZE, KSIZE), jnp.float32,
                           minval=-bound, maxval=bound)
    gamma = jax.random.uniform(kg, (1,), jnp.float32, minval=0.5, maxval=1.5)
    beta = 0.1 * jax.random.normal(kb, (1,), jnp.float32)
    r_mean = 0.1 * jax.random.normal(km, (1,), jnp.float32)
    r_var = jax.random.uniform(kv, (1,), jnp.float32, minval=0.5, maxval=1.5)
    a = gamma / jnp.sqrt(r_var + BN_EPS)
    w_fold = w * a.reshape(1, 1, 1)           # (2, 7, 7)
    b_fold = beta - a * r_mean                # (1,)
    return w_fold, b_fold


if __name__ == "__main__":
    key = jax.random.PRNGKey(0)
    kx, kh, kw, ks, kx2 = jax.random.split(key, 5)
    params = {
        "gate_h": _init_gate_params(kh),
        "gate_w": _init_gate_params(kw),
        "gate_s": _init_gate_params(ks),
    }

    def check(xin, rtol, atol):
        out = jax.block_until_ready(triplet_attention(xin, params))
        ref = jax.block_until_ready(
            _triplet_attention_ref(xin.astype(jnp.float32), params))
        assert out.shape == xin.shape and out.dtype == xin.dtype
        np.testing.assert_allclose(np.asarray(out.astype(jnp.float32)),
                                   np.asarray(ref), rtol=rtol, atol=atol)

    # Primary small NCHW case.
    x1 = jax.random.normal(kx, (2, 4, 16, 16), jnp.float32)
    check(x1, 1e-4, 1e-5)
    # Non-square, C not a multiple of 8, W > 128 (exercises the wide-lane
    # roll margins and the H != W weight orientations).
    x2 = jax.random.normal(kx2, (2, 5, 12, 132), jnp.float32)
    check(x2, 1e-4, 1e-5)
    # bf16 HBM I/O path (v6e/v7x review item): f32 math inside the kernel.
    check(x1.astype(jnp.bfloat16), 3e-2, 3e-2)

    print("KERNEL_OK")
</pallas_src>

<mosaic_0001>
module attributes {stable_mosaic.version = 11 : i64} {
  func.func @_triplet_attention_kernel(%arg0: i32, %arg1: memref<294xf32, #tpu.memory_space<smem>>, %arg2: memref<3xf32, #tpu.memory_space<smem>>, %arg3: memref<1x4x16x16xf32, #tpu.memory_space<vmem>>, %arg4: memref<1x4x16x16xf32, #tpu.memory_space<vmem>>) attributes {dimension_semantics = [#tpu.dimension_semantics<parallel>], iteration_bounds = array<i64: 2>, scalar_prefetch = 2 : i64, scratch_operands = 0 : i64, tpu.core_type = #tpu.core_type<tc>, window_params = [{transform_indices = @transform_0, window_bounds = array<i64: 1, 4, 16, 16>}, {transform_indices = @transform_1, window_bounds = array<i64: 1, 4, 16, 16>}]} {
    %c0 = arith.constant 0 : index
    %c0_0 = arith.constant 0 : index
    %c0_1 = arith.constant 0 : index
    %c0_2 = arith.constant 0 : index
    %0 = vector.load %arg3[%c0, %c0_0, %c0_1, %c0_2] : memref<1x4x16x16xf32, #tpu.memory_space<vmem>>, vector<1x4x16x16xf32>
    %cst = arith.constant dense<0xFF800000> : vector<1x16x16xf32>
    %1 = vector.multi_reduction <maximumf>, %0, %cst [1] : vector<1x4x16x16xf32> to vector<1x16x16xf32>
    %cst_3 = arith.constant dense<0.000000e+00> : vector<1x16x16xf32>
    %2 = vector.multi_reduction <add>, %0, %cst_3 [1] : vector<1x4x16x16xf32> to vector<1x16x16xf32>
    %cst_4 = arith.constant 2.500000e-01 : f32
    %3 = vector.broadcast %cst_4 : f32 to vector<1x16x16xf32>
    %4 = arith.mulf %2, %3 : vector<1x16x16xf32>
    %c2 = arith.constant 2 : index
    %5 = memref.load %arg2[%c2] : memref<3xf32, #tpu.memory_space<smem>>
    %cst_5 = arith.constant 0.000000e+00 : f32
    %6 = vector.broadcast %cst_5 : f32 to vector<1x16x128xf32>
    %cst_6 = arith.constant 0.000000e+00 : f32
    %7 = vector.broadcast %cst_6 : f32 to vector<1x16x112xf32>
    %8 = tpu.concatenate %1, %7 in 2 : vector<1x16x16xf32>, vector<1x16x112xf32> -> vector<1x16x128xf32>
    %cst_7 = arith.constant 0.000000e+00 : f32
    %9 = vector.broadcast %cst_7 : f32 to vector<1x3x128xf32>
    %10 = tpu.concatenate %9, %8, %9 in 1 : vector<1x3x128xf32>, vector<1x16x128xf32>, vector<1x3x128xf32> -> vector<1x22x128xf32>
    %11 = vector.extract_strided_slice %10 {offsets = [0, 0, 0], sizes = [1, 16, 128], strides = [1, 1, 1]} : vector<1x22x128xf32> to vector<1x16x128xf32>
    %c3_i32 = arith.constant 3 : i32
    %12 = tpu.dynamic_rotate %11 by %c3_i32 dim 2 : vector<1x16x128xf32>, i32 -> vector<1x16x128xf32>
    %c196 = arith.constant 196 : index
    %13 = memref.load %arg1[%c196] : memref<294xf32, #tpu.memory_space<smem>>
    %14 = vector.broadcast %13 : f32 to vector<1x16x128xf32>
    %15 = arith.mulf %14, %12 : vector<1x16x128xf32>
    %16 = arith.addf %6, %15 : vector<1x16x128xf32>
    %c2_i32 = arith.constant 2 : i32
    %17 = tpu.dynamic_rotate %11 by %c2_i32 dim 2 : vector<1x16x128xf32>, i32 -> vector<1x16x128xf32>
    %c197 = arith.constant 197 : index
    %18 = memref.load %arg1[%c197] : memref<294xf32, #tpu.memory_space<smem>>
    %19 = vector.broadcast %18 : f32 to vector<1x16x128xf32>
    %20 = arith.mulf %19, %17 : vector<1x16x128xf32>
    %21 = arith.addf %16, %20 : vector<1x16x128xf32>
    %c1_i32 = arith.constant 1 : i32
    %22 = tpu.dynamic_rotate %11 by %c1_i32 dim 2 : vector<1x16x128xf32>, i32 -> vector<1x16x128xf32>
    %c198 = arith.constant 198 : index
    %23 = memref.load %arg1[%c198] : memref<294xf32, #tpu.memory_space<smem>>
    %24 = vector.broadcast %23 : f32 to vector<1x16x128xf32>
    %25 = arith.mulf %24, %22 : vector<1x16x128xf32>
    %26 = arith.addf %21, %25 : vector<1x16x128xf32>
    %c199 = arith.constant 199 : index
    %27 = memref.load %arg1[%c199] : memref<294xf32, #tpu.memory_space<smem>>
    %28 = vector.broadcast %27 : f32 to vector<1x16x128xf32>
    %29 = arith.mulf %28, %11 : vector<1x16x128xf32>
    %30 = arith.addf %26, %29 : vector<1x16x128xf32>
    %c127_i32 = arith.constant 127 : i32
    %31 = tpu.dynamic_rotate %11 by %c127_i32 dim 2 : vector<1x16x128xf32>, i32 -> vector<1x16x128xf32>
    %c200 = arith.constant 200 : index
    %32 = memref.load %arg1[%c200] : memref<294xf32, #tpu.memory_space<smem>>
    %33 = vector.broadcast %32 : f32 to vector<1x16x128xf32>
    %34 = arith.mulf %33, %31 : vector<1x16x128xf32>
    %35 = arith.addf %30, %34 : vector<1x16x128xf32>
    %c126_i32 = arith.constant 126 : i32
    %36 = tpu.dynamic_rotate %11 by %c126_i32 dim 2 : vector<1x16x128xf32>, i32 -> vector<1x16x128xf32>
    %c201 = arith.constant 201 : index
    %37 = memref.load %arg1[%c201] : memref<294xf32, #tpu.memory_space<smem>>
    %38 = vector.broadcast %37 : f32 to vector<1x16x128xf32>
    %39 = arith.mulf %38, %36 : vector<1x16x128xf32>
    %40 = arith.addf %35, %39 : vector<1x16x128xf32>
    %c125_i32 = arith.constant 125 : i32
    %41 = tpu.dynamic_rotate %11 by %c125_i32 dim 2 : vector<1x16x128xf32>, i32 -> vector<1x16x128xf32>
    %c202 = arith.constant 202 : index
    %42 = memref.load %arg1[%c202] : memref<294xf32, #tpu.memory_space<smem>>
    %43 = vector.broadcast %42 : f32 to vector<1x16x128xf32>
    %44 = arith.mulf %43, %41 : vector<1x16x128xf32>
    %45 = arith.addf %40, %44 : vector<1x16x128xf32>
    %46 = vector.extract_strided_slice %10 {offsets = [0, 1, 0], sizes = [1, 16, 128], strides = [1, 1, 1]} : vector<1x22x128xf32> to vector<1x16x128xf32>
    %c3_i32_8 = arith.constant 3 : i32
    %47 = tpu.dynamic_rotate %46 by %c3_i32_8 dim 2 : vector<1x16x128xf32>, i32 -> vector<1x16x128xf32>
    %c203 = arith.constant 203 : index
    %48 = memref.load %arg1[%c203] : memref<294xf32, #tpu.memory_space<smem>>
    %49 = vector.broadcast %48 : f32 to vector<1x16x128xf32>
    %50 = arith.mulf %49, %47 : vector<1x16x128xf32>
    %51 = arith.addf %45, %50 : vector<1x16x128xf32>
    %c2_i32_9 = arith.constant 2 : i32
    %52 = tpu.dynamic_rotate %46 by %c2_i32_9 dim 2 : vector<1x16x128xf32>, i32 -> vector<1x16x128xf32>
    %c204 = arith.constant 204 : index
    %53 = memref.load %arg1[%c204] : memref<294xf32, #tpu.memory_space<smem>>
    %54 = vector.broadcast %53 : f32 to vector<1x16x128xf32>
    %55 = arith.mulf %54, %52 : vector<1x16x128xf32>
    %56 = arith.addf %51, %55 : vector<1x16x128xf32>
    %c1_i32_10 = arith.constant 1 : i32
    %57 = tpu.dynamic_rotate %46 by %c1_i32_10 dim 2 : vector<1x16x128xf32>, i32 -> vector<1x16x128xf32>
    %c205 = arith.constant 205 : index
    %58 = memref.load %arg1[%c205] : memref<294xf32, #tpu.memory_space<smem>>
    %59 = vector.broadcast %58 : f32 to vector<1x16x128xf32>
    %60 = arith.mulf %59, %57 : vector<1x16x128xf32>
    %61 = arith.addf %56, %60 : vector<1x16x128xf32>
    %c206 = arith.constant 206 : index
    %62 = memref.load %arg1[%c206] : memref<294xf32, #tpu.memory_space<smem>>
    %63 = vector.broadcast %62 : f32 to vector<1x16x128xf32>
    %64 = arith.mulf %63, %46 : vector<1x16x128xf32>
    %65 = arith.addf %61, %64 : vector<1x16x128xf32>
    %c127_i32_11 = arith.constant 127 : i32
    %66 = tpu.dynamic_rotate %46 by %c127_i32_11 dim 2 : vector<1x16x128xf32>, i32 -> vector<1x16x128xf32>
    %c207 = arith.constant 207 : index
    %67 = memref.load %arg1[%c207] : memref<294xf32, #tpu.memory_space<smem>>
    %68 = vector.broadcast %67 : f32 to vector<1x16x128xf32>
    %69 = arith.mulf %68, %66 : vector<1x16x128xf32>
    %70 = arith.addf %65, %69 : vector<1x16x128xf32>
    %c126_i32_12 = arith.constant 126 : i32
    %71 = tpu.dynamic_rotate %46 by %c126_i32_12 dim 2 : vector<1x16x128xf32>, i32 -> vector<1x16x128xf32>
    %c208 = arith.constant 208 : index
    %72 = memref.load %arg1[%c208] : memref<294xf32, #tpu.memory_space<smem>>
    %73 = vector.broadcast %72 : f32 to vector<1x16x128xf32>
    %74 = arith.mulf %73, %71 : vector<1x16x128xf32>
    %75 = arith.addf %70, %74 : vector<1x16x128xf32>
    %c125_i32_13 = arith.constant 125 : i32
    %76 = tpu.dynamic_rotate %46 by %c125_i32_13 dim 2 : vector<1x16x128xf32>, i32 -> vector<1x16x128xf32>
    %c209 = arith.constant 209 : index
    %77 = memref.load %arg1[%c209] : memref<294xf32, #tpu.memory_space<smem>>
    %78 = vector.broadcast %77 : f32 to vector<1x16x128xf32>
    %79 = arith.mulf %78, %76 : vector<1x16x128xf32>
    %80 = arith.addf %75, %79 : vector<1x16x128xf32>
    %81 = vector.extract_strided_slice %10 {offsets = [0, 2, 0], sizes = [1, 16, 128], strides = [1, 1, 1]} : vector<1x22x128xf32> to vector<1x16x128xf32>
    %c3_i32_14 = arith.constant 3 : i32
    %82 = tpu.dynamic_rotate %81 by %c3_i32_14 dim 2 : vector<1x16x128xf32>, i32 -> vector<1x16x128xf32>
    %c210 = arith.constant 210 : index
    %83 = memref.load %arg1[%c210] : memref<294xf32, #tpu.memory_space<smem>>
    %84 = vector.broadcast %83 : f32 to vector<1x16x128xf32>
    %85 = arith.mulf %84, %82 : vector<1x16x128xf32>
    %86 = arith.addf %80, %85 : vector<1x16x128xf32>
    %c2_i32_15 = arith.constant 2 : i32
    %87 = tpu.dynamic_rotate %81 by %c2_i32_15 dim 2 : vector<1x16x128xf32>, i32 -> vector<1x16x128xf32>
    %c211 = arith.constant 211 : index
    %88 = memref.load %arg1[%c211] : memref<294xf32, #tpu.memory_space<smem>>
    %89 = vector.broadcast %88 : f32 to vector<1x16x128xf32>
    %90 = arith.mulf %89, %87 : vector<1x16x128xf32>
    %91 = arith.addf %86, %90 : vector<1x16x128xf32>
    %c1_i32_16 = arith.constant 1 : i32
    %92 = tpu.dynamic_rotate %81 by %c1_i32_16 dim 2 : vector<1x16x128xf32>, i32 -> vector<1x16x128xf32>
    %c212 = arith.constant 212 : index
    %93 = memref.load %arg1[%c212] : memref<294xf32, #tpu.memory_space<smem>>
    %94 = vector.broadcast %93 : f32 to vector<1x16x128xf32>
    %95 = arith.mulf %94, %92 : vector<1x16x128xf32>
    %96 = arith.addf %91, %95 : vector<1x16x128xf32>
    %c213 = arith.constant 213 : index
    %97 = memref.load %arg1[%c213] : memref<294xf32, #tpu.memory_space<smem>>
    %98 = vector.broadcast %97 : f32 to vector<1x16x128xf32>
    %99 = arith.mulf %98, %81 : vector<1x16x128xf32>
    %100 = arith.addf %96, %99 : vector<1x16x128xf32>
    %c127_i32_17 = arith.constant 127 : i32
    %101 = tpu.dynamic_rotate %81 by %c127_i32_17 dim 2 : vector<1x16x128xf32>, i32 -> vector<1x16x128xf32>
    %c214 = arith.constant 214 : index
    %102 = memref.load %arg1[%c214] : memref<294xf32, #tpu.memory_space<smem>>
    %103 = vector.broadcast %102 : f32 to vector<1x16x128xf32>
    %104 = arith.mulf %103, %101 : vector<1x16x128xf32>
    %105 = arith.addf %100, %104 : vector<1x16x128xf32>
    %c126_i32_18 = arith.constant 126 : i32
    %106 = tpu.dynamic_rotate %81 by %c126_i32_18 dim 2 : vector<1x16x128xf32>, i32 -> vector<1x16x128xf32>
    %c215 = arith.constant 215 : index
    %107 = memref.load %arg1[%c215] : memref<294xf32, #tpu.memory_space<smem>>
    %108 = vector.broadcast %107 : f32 to vector<1x16x128xf32>
    %109 = arith.mulf %108, %106 : vector<1x16x128xf32>
    %110 = arith.addf %105, %109 : vector<1x16x128xf32>
    %c125_i32_19 = arith.constant 125 : i32
    %111 = tpu.dynamic_rotate %81 by %c125_i32_19 dim 2 : vector<1x16x128xf32>, i32 -> vector<1x16x128xf32>
    %c216 = arith.constant 216 : index
    %112 = memref.load %arg1[%c216] : memref<294xf32, #tpu.memory_space<smem>>
    %113 = vector.broadcast %112 : f32 to vector<1x16x128xf32>
    %114 = arith.mulf %113, %111 : vector<1x16x128xf32>
    %115 = arith.addf %110, %114 : vector<1x16x128xf32>
    %116 = vector.extract_strided_slice %10 {offsets = [0, 3, 0], sizes = [1, 16, 128], strides = [1, 1, 1]} : vector<1x22x128xf32> to vector<1x16x128xf32>
    %c3_i32_20 = arith.constant 3 : i32
    %117 = tpu.dynamic_rotate %116 by %c3_i32_20 dim 2 : vector<1x16x128xf32>, i32 -> vector<1x16x128xf32>
    %c217 = arith.constant 217 : index
    %118 = memref.load %arg1[%c217] : memref<294xf32, #tpu.memory_space<smem>>
    %119 = vector.broadcast %118 : f32 to vector<1x16x128xf32>
    %120 = arith.mulf %119, %117 : vector<1x16x128xf32>
    %121 = arith.addf %115, %120 : vector<1x16x128xf32>
    %c2_i32_21 = arith.constant 2 : i32
    %122 = tpu.dynamic_rotate %116 by %c2_i32_21 dim 2 : vector<1x16x128xf32>, i32 -> vector<1x16x128xf32>
    %c218 = arith.constant 218 : index
    %123 = memref.load %arg1[%c218] : memref<294xf32, #tpu.memory_space<smem>>
    %124 = vector.broadcast %123 : f32 to vector<1x16x128xf32>
    %125 = arith.mulf %124, %122 : vector<1x16x128xf32>
    %126 = arith.addf %121, %125 : vector<1x16x128xf32>
    %c1_i32_22 = arith.constant 1 : i32
    %127 = tpu.dynamic_rotate %116 by %c1_i32_22 dim 2 : vector<1x16x128xf32>, i32 -> vector<1x16x128xf32>
    %c219 = arith.constant 219 : index
    %128 = memref.load %arg1[%c219] : memref<294xf32, #tpu.memory_space<smem>>
    %129 = vector.broadcast %128 : f32 to vector<1x16x128xf32>
    %130 = arith.mulf %129, %127 : vector<1x16x128xf32>
    %131 = arith.addf %126, %130 : vector<1x16x128xf32>
    %c220 = arith.constant 220 : index
    %132 = memref.load %arg1[%c220] : memref<294xf32, #tpu.memory_space<smem>>
    %133 = vector.broadcast %132 : f32 to vector<1x16x128xf32>
    %134 = arith.mulf %133, %116 : vector<1x16x128xf32>
    %135 = arith.addf %131, %134 : vector<1x16x128xf32>
    %c127_i32_23 = arith.constant 127 : i32
    %136 = tpu.dynamic_rotate %116 by %c127_i32_23 dim 2 : vector<1x16x128xf32>, i32 -> vector<1x16x128xf32>
    %c221 = arith.constant 221 : index
    %137 = memref.load %arg1[%c221] : memref<294xf32, #tpu.memory_space<smem>>
    %138 = vector.broadcast %137 : f32 to vector<1x16x128xf32>
    %139 = arith.mulf %138, %136 : vector<1x16x128xf32>
    %140 = arith.addf %135, %139 : vector<1x16x128xf32>
    %c126_i32_24 = arith.constant 126 : i32
    %141 = tpu.dynamic_rotate %116 by %c126_i32_24 dim 2 : vector<1x16x128xf32>, i32 -> vector<1x16x128xf32>
    %c222 = arith.constant 222 : index
    %142 = memref.load %arg1[%c222] : memref<294xf32, #tpu.memory_space<smem>>
    %143 = vector.broadcast %142 : f32 to vector<1x16x128xf32>
    %144 = arith.mulf %143, %141 : vector<1x16x128xf32>
    %145 = arith.addf %140, %144 : vector<1x16x128xf32>
    %c125_i32_25 = arith.constant 125 : i32
    %146 = tpu.dynamic_rotate %116 by %c125_i32_25 dim 2 : vector<1x16x128xf32>, i32 -> vector<1x16x128xf32>
    %c223 = arith.constant 223 : index
    %147 = memref.load %arg1[%c223] : memref<294xf32, #tpu.memory_space<smem>>
    %148 = vector.broadcast %147 : f32 to vector<1x16x128xf32>
    %149 = arith.mulf %148, %146 : vector<1x16x128xf32>
    %150 = arith.addf %145, %149 : vector<1x16x128xf32>
    %151 = vector.extract_strided_slice %10 {offsets = [0, 4, 0], sizes = [1, 16, 128], strides = [1, 1, 1]} : vector<1x22x128xf32> to vector<1x16x128xf32>
    %c3_i32_26 = arith.constant 3 : i32
    %152 = tpu.dynamic_rotate %151 by %c3_i32_26 dim 2 : vector<1x16x128xf32>, i32 -> vector<1x16x128xf32>
    %c224 = arith.constant 224 : index
    %153 = memref.load %arg1[%c224] : memref<294xf32, #tpu.memory_space<smem>>
    %154 = vector.broadcast %153 : f32 to vector<1x16x128xf32>
    %155 = arith.mulf %154, %152 : vector<1x16x128xf32>
    %156 = arith.addf %150, %155 : vector<1x16x128xf32>
    %c2_i32_27 = arith.constant 2 : i32
    %157 = tpu.dynamic_rotate %151 by %c2_i32_27 dim 2 : vector<1x16x128xf32>, i32 -> vector<1x16x128xf32>
    %c225 = arith.constant 225 : index
    %158 = memref.load %arg1[%c225] : memref<294xf32, #tpu.memory_space<smem>>
    %159 = vector.broadcast %158 : f32 to vector<1x16x128xf32>
    %160 = arith.mulf %159, %157 : vector<1x16x128xf32>
    %161 = arith.addf %156, %160 : vector<1x16x128xf32>
    %c1_i32_28 = arith.constant 1 : i32
    %162 = tpu.dynamic_rotate %151 by %c1_i32_28 dim 2 : vector<1x16x128xf32>, i32 -> vector<1x16x128xf32>
    %c226 = arith.constant 226 : index
    %163 = memref.load %arg1[%c226] : memref<294xf32, #tpu.memory_space<smem>>
    %164 = vector.broadcast %163 : f32 to vector<1x16x128xf32>
    %165 = arith.mulf %164, %162 : vector<1x16x128xf32>
    %166 = arith.addf %161, %165 : vector<1x16x128xf32>
    %c227 = arith.constant 227 : index
    %167 = memref.load %arg1[%c227] : memref<294xf32, #tpu.memory_space<smem>>
    %168 = vector.broadcast %167 : f32 to vector<1x16x128xf32>
    %169 = arith.mulf %168, %151 : vector<1x16x128xf32>
    %170 = arith.addf %166, %169 : vector<1x16x128xf32>
    %c127_i32_29 = arith.constant 127 : i32
    %171 = tpu.dynamic_rotate %151 by %c127_i32_29 dim 2 : vector<1x16x128xf32>, i32 -> vector<1x16x128xf32>
    %c228 = arith.constant 228 : index
    %172 = memref.load %arg1[%c228] : memref<294xf32, #tpu.memory_space<smem>>
    %173 = vector.broadcast %172 : f32 to vector<1x16x128xf32>
    %174 = arith.mulf %173, %171 : vector<1x16x128xf32>
    %175 = arith.addf %170, %174 : vector<1x16x128xf32>
    %c126_i32_30 = arith.constant 126 : i32
    %176 = tpu.dynamic_rotate %151 by %c126_i32_30 dim 2 : vector<1x16x128xf32>, i32 -> vector<1x16x128xf32>
    %c229 = arith.constant 229 : index
    %177 = memref.load %arg1[%c229] : memref<294xf32, #tpu.memory_space<smem>>
    %178 = vector.broadcast %177 : f32 to vector<1x16x128xf32>
    %179 = arith.mulf %178, %176 : vector<1x16x128xf32>
    %180 = arith.addf %175, %179 : vector<1x16x128xf32>
    %c125_i32_31 = arith.constant 125 : i32
    %181 = tpu.dynamic_rotate %151 by %c125_i32_31 dim 2 : vector<1x16x128xf32>, i32 -> vector<1x16x128xf32>
    %c230 = arith.constant 230 : index
    %182 = memref.load %arg1[%c230] : memref<294xf32, #tpu.memory_space<smem>>
    %183 = vector.broadcast %182 : f32 to vector<1x16x128xf32>
    %184 = arith.mulf %183, %181 : vector<1x16x128xf32>
    %185 = arith.addf %180, %184 : vector<1x16x128xf32>
    %186 = vector.extract_strided_slice %10 {offsets = [0, 5, 0], sizes = [1, 16, 128], strides = [1, 1, 1]} : vector<1x22x128xf32> to vector<1x16x128xf32>
    %c3_i32_32 = arith.constant 3 : i32
    %187 = tpu.dynamic_rotate %186 by %c3_i32_32 dim 2 : vector<1x16x128xf32>, i32 -> vector<1x16x128xf32>
    %c231 = arith.constant 231 : index
    %188 = memref.load %arg1[%c231] : memref<294xf32, #tpu.memory_space<smem>>
    %189 = vector.broadcast %188 : f32 to vector<1x16x128xf32>
    %190 = arith.mulf %189, %187 : vector<1x16x128xf32>
    %191 = arith.addf %185, %190 : vector<1x16x128xf32>
    %c2_i32_33 = arith.constant 2 : i32
    %192 = tpu.dynamic_rotate %186 by %c2_i32_33 dim 2 : vector<1x16x128xf32>, i32 -> vector<1x16x128xf32>
    %c232 = arith.constant 232 : index
    %193 = memref.load %arg1[%c232] : memref<294xf32, #tpu.memory_space<smem>>
    %194 = vector.broadcast %193 : f32 to vector<1x16x128xf32>
    %195 = arith.mulf %194, %192 : vector<1x16x128xf32>
    %196 = arith.addf %191, %195 : vector<1x16x128xf32>
    %c1_i32_34 = arith.constant 1 : i32
    %197 = tpu.dynamic_rotate %186 by %c1_i32_34 dim 2 : vector<1x16x128xf32>, i32 -> vector<1x16x128xf32>
    %c233 = arith.constant 233 : index
    %198 = memref.load %arg1[%c233] : memref<294xf32, #tpu.memory_space<smem>>
    %199 = vector.broadcast %198 : f32 to vector<1x16x128xf32>
    %200 = arith.mulf %199, %197 : vector<1x16x128xf32>
    %201 = arith.addf %196, %200 : vector<1x16x128xf32>
    %c234 = arith.constant 234 : index
    %202 = memref.load %arg1[%c234] : memref<294xf32, #tpu.memory_space<smem>>
    %203 = vector.broadcast %202 : f32 to vector<1x16x128xf32>
    %204 = arith.mulf %203, %186 : vector<1x16x128xf32>
    %205 = arith.addf %201, %204 : vector<1x16x128xf32>
    %c127_i32_35 = arith.constant 127 : i32
    %206 = tpu.dynamic_rotate %186 by %c127_i32_35 dim 2 : vector<1x16x128xf32>, i32 -> vector<1x16x128xf32>
    %c235 = arith.constant 235 : index
    %207 = memref.load %arg1[%c235] : memref<294xf32, #tpu.memory_space<smem>>
    %208 = vector.broadcast %207 : f32 to vector<1x16x128xf32>
    %209 = arith.mulf %208, %206 : vector<1x16x128xf32>
    %210 = arith.addf %205, %209 : vector<1x16x128xf32>
    %c126_i32_36 = arith.constant 126 : i32
    %211 = tpu.dynamic_rotate %186 by %c126_i32_36 dim 2 : vector<1x16x128xf32>, i32 -> vector<1x16x128xf32>
    %c236 = arith.constant 236 : index
    %212 = memref.load %arg1[%c236] : memref<294xf32, #tpu.memory_space<smem>>
    %213 = vector.broadcast %212 : f32 to vector<1x16x128xf32>
    %214 = arith.mulf %213, %211 : vector<1x16x128xf32>
    %215 = arith.addf %210, %214 : vector<1x16x128xf32>
    %c125_i32_37 = arith.constant 125 : i32
    %216 = tpu.dynamic_rotate %186 by %c125_i32_37 dim 2 : vector<1x16x128xf32>, i32 -> vector<1x16x128xf32>
    %c237 = arith.constant 237 : index
    %217 = memref.load %arg1[%c237] : memref<294xf32, #tpu.memory_space<smem>>
    %218 = vector.broadcast %217 : f32 to vector<1x16x128xf32>
    %219 = arith.mulf %218, %216 : vector<1x16x128xf32>
    %220 = arith.addf %215, %219 : vector<1x16x128xf32>
    %221 = vector.extract_strided_slice %10 {offsets = [0, 6, 0], sizes = [1, 16, 128], strides = [1, 1, 1]} : vector<1x22x128xf32> to vector<1x16x128xf32>
    %c3_i32_38 = arith.constant 3 : i32
    %222 = tpu.dynamic_rotate %221 by %c3_i32_38 dim 2 : vector<1x16x128xf32>, i32 -> vector<1x16x128xf32>
    %c238 = arith.constant 238 : index
    %223 = memref.load %arg1[%c238] : memref<294xf32, #tpu.memory_space<smem>>
    %224 = vector.broadcast %223 : f32 to vector<1x16x128xf32>
    %225 = arith.mulf %224, %222 : vector<1x16x128xf32>
    %226 = arith.addf %220, %225 : vector<1x16x128xf32>
    %c2_i32_39 = arith.constant 2 : i32
    %227 = tpu.dynamic_rotate %221 by %c2_i32_39 dim 2 : vector<1x16x128xf32>, i32 -> vector<1x16x128xf32>
    %c239 = arith.constant 239 : index
    %228 = memref.load %arg1[%c239] : memref<294xf32, #tpu.memory_space<smem>>
    %229 = vector.broadcast %228 : f32 to vector<1x16x128xf32>
    %230 = arith.mulf %229, %227 : vector<1x16x128xf32>
    %231 = arith.addf %226, %230 : vector<1x16x128xf32>
    %c1_i32_40 = arith.constant 1 : i32
    %232 = tpu.dynamic_rotate %221 by %c1_i32_40 dim 2 : vector<1x16x128xf32>, i32 -> vector<1x16x128xf32>
    %c240 = arith.constant 240 : index
    %233 = memref.load %arg1[%c240] : memref<294xf32, #tpu.memory_space<smem>>
    %234 = vector.broadcast %233 : f32 to vector<1x16x128xf32>
    %235 = arith.mulf %234, %232 : vector<1x16x128xf32>
    %236 = arith.addf %231, %235 : vector<1x16x128xf32>
    %c241 = arith.constant 241 : index
    %237 = memref.load %arg1[%c241] : memref<294xf32, #tpu.memory_space<smem>>
    %238 = vector.broadcast %237 : f32 to vector<1x16x128xf32>
    %239 = arith.mulf %238, %221 : vector<1x16x128xf32>
    %240 = arith.addf %236, %239 : vector<1x16x128xf32>
    %c127_i32_41 = arith.constant 127 : i32
    %241 = tpu.dynamic_rotate %221 by %c127_i32_41 dim 2 : vector<1x16x128xf32>, i32 -> vector<1x16x128xf32>
    %c242 = arith.constant 242 : index
    %242 = memref.load %arg1[%c242] : memref<294xf32, #tpu.memory_space<smem>>
    %243 = vector.broadcast %242 : f32 to vector<1x16x128xf32>
    %244 = arith.mulf %243, %241 : vector<1x16x128xf32>
    %245 = arith.addf %240, %244 : vector<1x16x128xf32>
    %c126_i32_42 = arith.constant 126 : i32
    %246 = tpu.dynamic_rotate %221 by %c126_i32_42 dim 2 : vector<1x16x128xf32>, i32 -> vector<1x16x128xf32>
    %c243 = arith.constant 243 : index
    %247 = memref.load %arg1[%c243] : memref<294xf32, #tpu.memory_space<smem>>
    %248 = vector.broadcast %247 : f32 to vector<1x16x128xf32>
    %249 = arith.mulf %248, %246 : vector<1x16x128xf32>
    %250 = arith.addf %245, %249 : vector<1x16x128xf32>
    %c125_i32_43 = arith.constant 125 : i32
    %251 = tpu.dynamic_rotate %221 by %c125_i32_43 dim 2 : vector<1x16x128xf32>, i32 -> vector<1x16x128xf32>
    %c244 = arith.constant 244 : index
    %252 = memref.load %arg1[%c244] : memref<294xf32, #tpu.memory_space<smem>>
    %253 = vector.broadcast %252 : f32 to vector<1x16x128xf32>
    %254 = arith.mulf %253, %251 : vector<1x16x128xf32>
    %255 = arith.addf %250, %254 : vector<1x16x128xf32>
    %cst_44 = arith.constant 0.000000e+00 : f32
    %256 = vector.broadcast %cst_44 : f32 to vector<1x16x112xf32>
    %257 = tpu.concatenate %4, %256 in 2 : vector<1x16x16xf32>, vector<1x16x112xf32> -> vector<1x16x128xf32>
    %cst_45 = arith.constant 0.000000e+00 : f32
    %258 = vector.broadcast %cst_45 : f32 to vector<1x3x128xf32>
    %259 = tpu.concatenate %258, %257, %258 in 1 : vector<1x3x128xf32>, vector<1x16x128xf32>, vector<1x3x128xf32> -> vector<1x22x128xf32>
    %260 = vector.extract_strided_slice %259 {offsets = [0, 0, 0], sizes = [1, 16, 128], strides = [1, 1, 1]} : vector<1x22x128xf32> to vector<1x16x128xf32>
    %c3_i32_46 = arith.constant 3 : i32
    %261 = tpu.dynamic_rotate %260 by %c3_i32_46 dim 2 : vector<1x16x128xf32>, i32 -> vector<1x16x128xf32>
    %c245 = arith.constant 245 : index
    %262 = memref.load %arg1[%c245] : memref<294xf32, #tpu.memory_space<smem>>
    %263 = vector.broadcast %262 : f32 to vector<1x16x128xf32>
    %264 = arith.mulf %263, %261 : vector<1x16x128xf32>
    %265 = arith.addf %255, %264 : vector<1x16x128xf32>
    %c2_i32_47 = arith.constant 2 : i32
    %266 = tpu.dynamic_rotate %260 by %c2_i32_47 dim 2 : vector<1x16x128xf32>, i32 -> vector<1x16x128xf32>
    %c246 = arith.constant 246 : index
    %267 = memref.load %arg1[%c246] : memref<294xf32, #tpu.memory_space<smem>>
    %268 = vector.broadcast %267 : f32 to vector<1x16x128xf32>
    %269 = arith.mulf %268, %266 : vector<1x16x128xf32>
    %270 = arith.addf %265, %269 : vector<1x16x128xf32>
    %c1_i32_48 = arith.constant 1 : i32
    %271 = tpu.dynamic_rotate %260 by %c1_i32_48 dim 2 : vector<1x16x128xf32>, i32 -> vector<1x16x128xf32>
    %c247 = arith.constant 247 : index
    %272 = memref.load %arg1[%c247] : memref<294xf32, #tpu.memory_space<smem>>
    %273 = vector.broadcast %272 : f32 to vector<1x16x128xf32>
    %274 = arith.mulf %273, %271 : vector<1x16x128xf32>
    %275 = arith.addf %270, %274 : vector<1x16x128xf32>
    %c248 = arith.constant 248 : index
    %276 = memref.load %arg1[%c248] : memref<294xf32, #tpu.memory_space<smem>>
    %277 = vector.broadcast %276 : f32 to vector<1x16x128xf32>
    %278 = arith.mulf %277, %260 : vector<1x16x128xf32>
    %279 = arith.addf %275, %278 : vector<1x16x128xf32>
    %c127_i32_49 = arith.constant 127 : i32
    %280 = tpu.dynamic_rotate %260 by %c127_i32_49 dim 2 : vector<1x16x128xf32>, i32 -> vector<1x16x128xf32>
    %c249 = arith.constant 249 : index
    %281 = memref.load %arg1[%c249] : memref<294xf32, #tpu.memory_space<smem>>
    %282 = vector.broadcast %281 : f32 to vector<1x16x128xf32>
    %283 = arith.mulf %282, %280 : vector<1x16x128xf32>
    %284 = arith.addf %279, %283 : vector<1x16x128xf32>
    %c126_i32_50 = arith.constant 126 : i32
    %285 = tpu.dynamic_rotate %260 by %c126_i32_50 dim 2 : vector<1x16x128xf32>, i32 -> vector<1x16x128xf32>
    %c250 = arith.constant 250 : index
    %286 = memref.load %arg1[%c250] : memref<294xf32, #tpu.memory_space<smem>>
    %287 = vector.broadcast %286 : f32 to vector<1x16x128xf32>
    %288 = arith.mulf %287, %285 : vector<1x16x128xf32>
    %289 = arith.addf %284, %288 : vector<1x16x128xf32>
    %c125_i32_51 = arith.constant 125 : i32
    %290 = tpu.dynamic_rotate %260 by %c125_i32_51 dim 2 : vector<1x16x128xf32>, i32 -> vector<1x16x128xf32>
    %c251 = arith.constant 251 : index
    %291 = memref.load %arg1[%c251] : memref<294xf32, #tpu.memory_space<smem>>
    %292 = vector.broadcast %291 : f32 to vector<1x16x128xf32>
    %293 = arith.mulf %292, %290 : vector<1x16x128xf32>
    %294 = arith.addf %289, %293 : vector<1x16x128xf32>
    %295 = vector.extract_strided_slice %259 {offsets = [0, 1, 0], sizes = [1, 16, 128], strides = [1, 1, 1]} : vector<1x22x128xf32> to vector<1x16x128xf32>
    %c3_i32_52 = arith.constant 3 : i32
    %296 = tpu.dynamic_rotate %295 by %c3_i32_52 dim 2 : vector<1x16x128xf32>, i32 -> vector<1x16x128xf32>
    %c252 = arith.constant 252 : index
    %297 = memref.load %arg1[%c252] : memref<294xf32, #tpu.memory_space<smem>>
    %298 = vector.broadcast %297 : f32 to vector<1x16x128xf32>
    %299 = arith.mulf %298, %296 : vector<1x16x128xf32>
    %300 = arith.addf %294, %299 : vector<1x16x128xf32>
    %c2_i32_53 = arith.constant 2 : i32
    %301 = tpu.dynamic_rotate %295 by %c2_i32_53 dim 2 : vector<1x16x128xf32>, i32 -> vector<1x16x128xf32>
    %c253 = arith.constant 253 : index
    %302 = memref.load %arg1[%c253] : memref<294xf32, #tpu.memory_space<smem>>
    %303 = vector.broadcast %302 : f32 to vector<1x16x128xf32>
    %304 = arith.mulf %303, %301 : vector<1x16x128xf32>
    %305 = arith.addf %300, %304 : vector<1x16x128xf32>
    %c1_i32_54 = arith.constant 1 : i32
    %306 = tpu.dynamic_rotate %295 by %c1_i32_54 dim 2 : vector<1x16x128xf32>, i32 -> vector<1x16x128xf32>
    %c254 = arith.constant 254 : index
    %307 = memref.load %arg1[%c254] : memref<294xf32, #tpu.memory_space<smem>>
    %308 = vector.broadcast %307 : f32 to vector<1x16x128xf32>
    %309 = arith.mulf %308, %306 : vector<1x16x128xf32>
    %310 = arith.addf %305, %309 : vector<1x16x128xf32>
    %c255 = arith.constant 255 : index
    %311 = memref.load %arg1[%c255] : memref<294xf32, #tpu.memory_space<smem>>
    %312 = vector.broadcast %311 : f32 to vector<1x16x128xf32>
    %313 = arith.mulf %312, %295 : vector<1x16x128xf32>
    %314 = arith.addf %310, %313 : vector<1x16x128xf32>
    %c127_i32_55 = arith.constant 127 : i32
    %315 = tpu.dynamic_rotate %295 by %c127_i32_55 dim 2 : vector<1x16x128xf32>, i32 -> vector<1x16x128xf32>
    %c256 = arith.constant 256 : index
    %316 = memref.load %arg1[%c256] : memref<294xf32, #tpu.memory_space<smem>>
    %317 = vector.broadcast %316 : f32 to vector<1x16x128xf32>
    %318 = arith.mulf %317, %315 : vector<1x16x128xf32>
    %319 = arith.addf %314, %318 : vector<1x16x128xf32>
    %c126_i32_56 = arith.constant 126 : i32
    %320 = tpu.dynamic_rotate %295 by %c126_i32_56 dim 2 : vector<1x16x128xf32>, i32 -> vector<1x16x128xf32>
    %c257 = arith.constant 257 : index
    %321 = memref.load %arg1[%c257] : memref<294xf32, #tpu.memory_space<smem>>
    %322 = vector.broadcast %321 : f32 to vector<1x16x128xf32>
    %323 = arith.mulf %322, %320 : vector<1x16x128xf32>
    %324 = arith.addf %319, %323 : vector<1x16x128xf32>
    %c125_i32_57 = arith.constant 125 : i32
    %325 = tpu.dynamic_rotate %295 by %c125_i32_57 dim 2 : vector<1x16x128xf32>, i32 -> vector<1x16x128xf32>
    %c258 = arith.constant 258 : index
    %326 = memref.load %arg1[%c258] : memref<294xf32, #tpu.memory_space<smem>>
    %327 = vector.broadcast %326 : f32 to vector<1x16x128xf32>
    %328 = arith.mulf %327, %325 : vector<1x16x128xf32>
    %329 = arith.addf %324, %328 : vector<1x16x128xf32>
    %330 = vector.extract_strided_slice %259 {offsets = [0, 2, 0], sizes = [1, 16, 128], strides = [1, 1, 1]} : vector<1x22x128xf32> to vector<1x16x128xf32>
    %c3_i32_58 = arith.constant 3 : i32
    %331 = tpu.dynamic_rotate %330 by %c3_i32_58 dim 2 : vector<1x16x128xf32>, i32 -> vector<1x16x128xf32>
    %c259 = arith.constant 259 : index
    %332 = memref.load %arg1[%c259] : memref<294xf32, #tpu.memory_space<smem>>
    %333 = vector.broadcast %332 : f32 to vector<1x16x128xf32>
    %334 = arith.mulf %333, %331 : vector<1x16x128xf32>
    %335 = arith.addf %329, %334 : vector<1x16x128xf32>
    %c2_i32_59 = arith.constant 2 : i32
    %336 = tpu.dynamic_rotate %330 by %c2_i32_59 dim 2 : vector<1x16x128xf32>, i32 -> vector<1x16x128xf32>
    %c260 = arith.constant 260 : index
    %337 = memref.load %arg1[%c260] : memref<294xf32, #tpu.memory_space<smem>>
    %338 = vector.broadcast %337 : f32 to vector<1x16x128xf32>
    %339 = arith.mulf %338, %336 : vector<1x16x128xf32>
    %340 = arith.addf %335, %339 : vector<1x16x128xf32>
    %c1_i32_60 = arith.constant 1 : i32
    %341 = tpu.dynamic_rotate %330 by %c1_i32_60 dim 2 : vector<1x16x128xf32>, i32 -> vector<1x16x128xf32>
    %c261 = arith.constant 261 : index
    %342 = memref.load %arg1[%c261] : memref<294xf32, #tpu.memory_space<smem>>
    %343 = vector.broadcast %342 : f32 to vector<1x16x128xf32>
    %344 = arith.mulf %343, %341 : vector<1x16x128xf32>
    %345 = arith.addf %340, %344 : vector<1x16x128xf32>
    %c262 = arith.constant 262 : index
    %346 = memref.load %arg1[%c262] : memref<294xf32, #tpu.memory_space<smem>>
    %347 = vector.broadcast %346 : f32 to vector<1x16x128xf32>
    %348 = arith.mulf %347, %330 : vector<1x16x128xf32>
    %349 = arith.addf %345, %348 : vector<1x16x128xf32>
    %c127_i32_61 = arith.constant 127 : i32
    %350 = tpu.dynamic_rotate %330 by %c127_i32_61 dim 2 : vector<1x16x128xf32>, i32 -> vector<1x16x128xf32>
    %c263 = arith.constant 263 : index
    %351 = memref.load %arg1[%c263] : memref<294xf32, #tpu.memory_space<smem>>
    %352 = vector.broadcast %351 : f32 to vector<1x16x128xf32>
    %353 = arith.mulf %352, %350 : vector<1x16x128xf32>
    %354 = arith.addf %349, %353 : vector<1x16x128xf32>
    %c126_i32_62 = arith.constant 126 : i32
    %355 = tpu.dynamic_rotate %330 by %c126_i32_62 dim 2 : vector<1x16x128xf32>, i32 -> vector<1x16x128xf32>
    %c264 = arith.constant 264 : index
    %356 = memref.load %arg1[%c264] : memref<294xf32, #tpu.memory_space<smem>>
    %357 = vector.broadcast %356 : f32 to vector<1x16x128xf32>
    %358 = arith.mulf %357, %355 : vector<1x16x128xf32>
    %359 = arith.addf %354, %358 : vector<1x16x128xf32>
    %c125_i32_63 = arith.constant 125 : i32
    %360 = tpu.dynamic_rotate %330 by %c125_i32_63 dim 2 : vector<1x16x128xf32>, i32 -> vector<1x16x128xf32>
    %c265 = arith.constant 265 : index
    %361 = memref.load %arg1[%c265] : memref<294xf32, #tpu.memory_space<smem>>
    %362 = vector.broadcast %361 : f32 to vector<1x16x128xf32>
    %363 = arith.mulf %362, %360 : vector<1x16x128xf32>
    %364 = arith.addf %359, %363 : vector<1x16x128xf32>
    %365 = vector.extract_strided_slice %259 {offsets = [0, 3, 0], sizes = [1, 16, 128], strides = [1, 1, 1]} : vector<1x22x128xf32> to vector<1x16x128xf32>
    %c3_i32_64 = arith.constant 3 : i32
    %366 = tpu.dynamic_rotate %365 by %c3_i32_64 dim 2 : vector<1x16x128xf32>, i32 -> vector<1x16x128xf32>
    %c266 = arith.constant 266 : index
    %367 = memref.load %arg1[%c266] : memref<294xf32, #tpu.memory_space<smem>>
    %368 = vector.broadcast %367 : f32 to vector<1x16x128xf32>
    %369 = arith.mulf %368, %366 : vector<1x16x128xf32>
    %370 = arith.addf %364, %369 : vector<1x16x128xf32>
    %c2_i32_65 = arith.constant 2 : i32
    %371 = tpu.dynamic_rotate %365 by %c2_i32_65 dim 2 : vector<1x16x128xf32>, i32 -> vector<1x16x128xf32>
    %c267 = arith.constant 267 : index
    %372 = memref.load %arg1[%c267] : memref<294xf32, #tpu.memory_space<smem>>
    %373 = vector.broadcast %372 : f32 to vector<1x16x128xf32>
    %374 = arith.mulf %373, %371 : vector<1x16x128xf32>
    %375 = arith.addf %370, %374 : vector<1x16x128xf32>
    %c1_i32_66 = arith.constant 1 : i32
    %376 = tpu.dynamic_rotate %365 by %c1_i32_66 dim 2 : vector<1x16x128xf32>, i32 -> vector<1x16x128xf32>
    %c268 = arith.constant 268 : index
    %377 = memref.load %arg1[%c268] : memref<294xf32, #tpu.memory_space<smem>>
    %378 = vector.broadcast %377 : f32 to vector<1x16x128xf32>
    %379 = arith.mulf %378, %376 : vector<1x16x128xf32>
    %380 = arith.addf %375, %379 : vector<1x16x128xf32>
    %c269 = arith.constant 269 : index
    %381 = memref.load %arg1[%c269] : memref<294xf32, #tpu.memory_space<smem>>
    %382 = vector.broadcast %381 : f32 to vector<1x16x128xf32>
    %383 = arith.mulf %382, %365 : vector<1x16x128xf32>
    %384 = arith.addf %380, %383 : vector<1x16x128xf32>
    %c127_i32_67 = arith.constant 127 : i32
    %385 = tpu.dynamic_rotate %365 by %c127_i32_67 dim 2 : vector<1x16x128xf32>, i32 -> vector<1x16x128xf32>
    %c270 = arith.constant 270 : index
    %386 = memref.load %arg1[%c270] : memref<294xf32, #tpu.memory_space<smem>>
    %387 = vector.broadcast %386 : f32 to vector<1x16x128xf32>
    %388 = arith.mulf %387, %385 : vector<1x16x128xf32>
    %389 = arith.addf %384, %388 : vector<1x16x128xf32>
    %c126_i32_68 = arith.constant 126 : i32
    %390 = tpu.dynamic_rotate %365 by %c126_i32_68 dim 2 : vector<1x16x128xf32>, i32 -> vector<1x16x128xf32>
    %c271 = arith.constant 271 : index
    %391 = memref.load %arg1[%c271] : memref<294xf32, #tpu.memory_space<smem>>
    %392 = vector.broadcast %391 : f32 to vector<1x16x128xf32>
    %393 = arith.mulf %392, %390 : vector<1x16x128xf32>
    %394 = arith.addf %389, %393 : vector<1x16x128xf32>
    %c125_i32_69 = arith.constant 125 : i32
    %395 = tpu.dynamic_rotate %365 by %c125_i32_69 dim 2 : vector<1x16x128xf32>, i32 -> vector<1x16x128xf32>
    %c272 = arith.constant 272 : index
    %396 = memref.load %arg1[%c272] : memref<294xf32, #tpu.memory_space<smem>>
    %397 = vector.broadcast %396 : f32 to vector<1x16x128xf32>
    %398 = arith.mulf %397, %395 : vector<1x16x128xf32>
    %399 = arith.addf %394, %398 : vector<1x16x128xf32>
    %400 = vector.extract_strided_slice %259 {offsets = [0, 4, 0], sizes = [1, 16, 128], strides = [1, 1, 1]} : vector<1x22x128xf32> to vector<1x16x128xf32>
    %c3_i32_70 = arith.constant 3 : i32
    %401 = tpu.dynamic_rotate %400 by %c3_i32_70 dim 2 : vector<1x16x128xf32>, i32 -> vector<1x16x128xf32>
    %c273 = arith.constant 273 : index
    %402 = memref.load %arg1[%c273] : memref<294xf32, #tpu.memory_space<smem>>
    %403 = vector.broadcast %402 : f32 to vector<1x16x128xf32>
    %404 = arith.mulf %403, %401 : vector<1x16x128xf32>
    %405 = arith.addf %399, %404 : vector<1x16x128xf32>
    %c2_i32_71 = arith.constant 2 : i32
    %406 = tpu.dynamic_rotate %400 by %c2_i32_71 dim 2 : vector<1x16x128xf32>, i32 -> vector<1x16x128xf32>
    %c274 = arith.constant 274 : index
    %407 = memref.load %arg1[%c274] : memref<294xf32, #tpu.memory_space<smem>>
    %408 = vector.broadcast %407 : f32 to vector<1x16x128xf32>
    %409 = arith.mulf %408, %406 : vector<1x16x128xf32>
    %410 = arith.addf %405, %409 : vector<1x16x128xf32>
    %c1_i32_72 = arith.constant 1 : i32
    %411 = tpu.dynamic_rotate %400 by %c1_i32_72 dim 2 : vector<1x16x128xf32>, i32 -> vector<1x16x128xf32>
    %c275 = arith.constant 275 : index
    %412 = memref.load %arg1[%c275] : memref<294xf32, #tpu.memory_space<smem>>
    %413 = vector.broadcast %412 : f32 to vector<1x16x128xf32>
    %414 = arith.mulf %413, %411 : vector<1x16x128xf32>
    %415 = arith.addf %410, %414 : vector<1x16x128xf32>
    %c276 = arith.constant 276 : index
    %416 = memref.load %arg1[%c276] : memref<294xf32, #tpu.memory_space<smem>>
    %417 = vector.broadcast %416 : f32 to vector<1x16x128xf32>
    %418 = arith.mulf %417, %400 : vector<1x16x128xf32>
    %419 = arith.addf %415, %418 : vector<1x16x128xf32>
    %c127_i32_73 = arith.constant 127 : i32
    %420 = tpu.dynamic_rotate %400 by %c127_i32_73 dim 2 : vector<1x16x128xf32>, i32 -> vector<1x16x128xf32>
    %c277 = arith.constant 277 : index
    %421 = memref.load %arg1[%c277] : memref<294xf32, #tpu.memory_space<smem>>
    %422 = vector.broadcast %421 : f32 to vector<1x16x128xf32>
    %423 = arith.mulf %422, %420 : vector<1x16x128xf32>
    %424 = arith.addf %419, %423 : vector<1x16x128xf32>
    %c126_i32_74 = arith.constant 126 : i32
    %425 = tpu.dynamic_rotate %400 by %c126_i32_74 dim 2 : vector<1x16x128xf32>, i32 -> vector<1x16x128xf32>
    %c278 = arith.constant 278 : index
    %426 = memref.load %arg1[%c278] : memref<294xf32, #tpu.memory_space<smem>>
    %427 = vector.broadcast %426 : f32 to vector<1x16x128xf32>
    %428 = arith.mulf %427, %425 : vector<1x16x128xf32>
    %429 = arith.addf %424, %428 : vector<1x16x128xf32>
    %c125_i32_75 = arith.constant 125 : i32
    %430 = tpu.dynamic_rotate %400 by %c125_i32_75 dim 2 : vector<1x16x128xf32>, i32 -> vector<1x16x128xf32>
    %c279 = arith.constant 279 : index
    %431 = memref.load %arg1[%c279] : memref<294xf32, #tpu.memory_space<smem>>
    %432 = vector.broadcast %431 : f32 to vector<1x16x128xf32>
    %433 = arith.mulf %432, %430 : vector<1x16x128xf32>
    %434 = arith.addf %429, %433 : vector<1x16x128xf32>
    %435 = vector.extract_strided_slice %259 {offsets = [0, 5, 0], sizes = [1, 16, 128], strides = [1, 1, 1]} : vector<1x22x128xf32> to vector<1x16x128xf32>
    %c3_i32_76 = arith.constant 3 : i32
    %436 = tpu.dynamic_rotate %435 by %c3_i32_76 dim 2 : vector<1x16x128xf32>, i32 -> vector<1x16x128xf32>
    %c280 = arith.constant 280 : index
    %437 = memref.load %arg1[%c280] : memref<294xf32, #tpu.memory_space<smem>>
    %438 = vector.broadcast %437 : f32 to vector<1x16x128xf32>
    %439 = arith.mulf %438, %436 : vector<1x16x128xf32>
    %440 = arith.addf %434, %439 : vector<1x16x128xf32>
    %c2_i32_77 = arith.constant 2 : i32
    %441 = tpu.dynamic_rotate %435 by %c2_i32_77 dim 2 : vector<1x16x128xf32>, i32 -> vector<1x16x128xf32>
    %c281 = arith.constant 281 : index
    %442 = memref.load %arg1[%c281] : memref<294xf32, #tpu.memory_space<smem>>
    %443 = vector.broadcast %442 : f32 to vector<1x16x128xf32>
    %444 = arith.mulf %443, %441 : vector<1x16x128xf32>
    %445 = arith.addf %440, %444 : vector<1x16x128xf32>
    %c1_i32_78 = arith.constant 1 : i32
    %446 = tpu.dynamic_rotate %435 by %c1_i32_78 dim 2 : vector<1x16x128xf32>, i32 -> vector<1x16x128xf32>
    %c282 = arith.constant 282 : index
    %447 = memref.load %arg1[%c282] : memref<294xf32, #tpu.memory_space<smem>>
    %448 = vector.broadcast %447 : f32 to vector<1x16x128xf32>
    %449 = arith.mulf %448, %446 : vector<1x16x128xf32>
    %450 = arith.addf %445, %449 : vector<1x16x128xf32>
    %c283 = arith.constant 283 : index
    %451 = memref.load %arg1[%c283] : memref<294xf32, #tpu.memory_space<smem>>
    %452 = vector.broadcast %451 : f32 to vector<1x16x128xf32>
    %453 = arith.mulf %452, %435 : vector<1x16x128xf32>
    %454 = arith.addf %450, %453 : vector<1x16x128xf32>
    %c127_i32_79 = arith.constant 127 : i32
    %455 = tpu.dynamic_rotate %435 by %c127_i32_79 dim 2 : vector<1x16x128xf32>, i32 -> vector<1x16x128xf32>
    %c284 = arith.constant 284 : index
    %456 = memref.load %arg1[%c284] : memref<294xf32, #tpu.memory_space<smem>>
    %457 = vector.broadcast %456 : f32 to vector<1x16x128xf32>
    %458 = arith.mulf %457, %455 : vector<1x16x128xf32>
    %459 = arith.addf %454, %458 : vector<1x16x128xf32>
    %c126_i32_80 = arith.constant 126 : i32
    %460 = tpu.dynamic_rotate %435 by %c126_i32_80 dim 2 : vector<1x16x128xf32>, i32 -> vector<1x16x128xf32>
    %c285 = arith.constant 285 : index
    %461 = memref.load %arg1[%c285] : memref<294xf32, #tpu.memory_space<smem>>
    %462 = vector.broadcast %461 : f32 to vector<1x16x128xf32>
    %463 = arith.mulf %462, %460 : vector<1x16x128xf32>
    %464 = arith.addf %459, %463 : vector<1x16x128xf32>
    %c125_i32_81 = arith.constant 125 : i32
    %465 = tpu.dynamic_rotate %435 by %c125_i32_81 dim 2 : vector<1x16x128xf32>, i32 -> vector<1x16x128xf32>
    %c286 = arith.constant 286 : index
    %466 = memref.load %arg1[%c286] : memref<294xf32, #tpu.memory_space<smem>>
    %467 = vector.broadcast %466 : f32 to vector<1x16x128xf32>
    %468 = arith.mulf %467, %465 : vector<1x16x128xf32>
    %469 = arith.addf %464, %468 : vector<1x16x128xf32>
    %470 = vector.extract_strided_slice %259 {offsets = [0, 6, 0], sizes = [1, 16, 128], strides = [1, 1, 1]} : vector<1x22x128xf32> to vector<1x16x128xf32>
    %c3_i32_82 = arith.constant 3 : i32
    %471 = tpu.dynamic_rotate %470 by %c3_i32_82 dim 2 : vector<1x16x128xf32>, i32 -> vector<1x16x128xf32>
    %c287 = arith.constant 287 : index
    %472 = memref.load %arg1[%c287] : memref<294xf32, #tpu.memory_space<smem>>
    %473 = vector.broadcast %472 : f32 to vector<1x16x128xf32>
    %474 = arith.mulf %473, %471 : vector<1x16x128xf32>
    %475 = arith.addf %469, %474 : vector<1x16x128xf32>
    %c2_i32_83 = arith.constant 2 : i32
    %476 = tpu.dynamic_rotate %470 by %c2_i32_83 dim 2 : vector<1x16x128xf32>, i32 -> vector<1x16x128xf32>
    %c288 = arith.constant 288 : index
    %477 = memref.load %arg1[%c288] : memref<294xf32, #tpu.memory_space<smem>>
    %478 = vector.broadcast %477 : f32 to vector<1x16x128xf32>
    %479 = arith.mulf %478, %476 : vector<1x16x128xf32>
    %480 = arith.addf %475, %479 : vector<1x16x128xf32>
    %c1_i32_84 = arith.constant 1 : i32
    %481 = tpu.dynamic_rotate %470 by %c1_i32_84 dim 2 : vector<1x16x128xf32>, i32 -> vector<1x16x128xf32>
    %c289 = arith.constant 289 : index
    %482 = memref.load %arg1[%c289] : memref<294xf32, #tpu.memory_space<smem>>
    %483 = vector.broadcast %482 : f32 to vector<1x16x128xf32>
    %484 = arith.mulf %483, %481 : vector<1x16x128xf32>
    %485 = arith.addf %480, %484 : vector<1x16x128xf32>
    %c290 = arith.constant 290 : index
    %486 = memref.load %arg1[%c290] : memref<294xf32, #tpu.memory_space<smem>>
    %487 = vector.broadcast %486 : f32 to vector<1x16x128xf32>
    %488 = arith.mulf %487, %470 : vector<1x16x128xf32>
    %489 = arith.addf %485, %488 : vector<1x16x128xf32>
    %c127_i32_85 = arith.constant 127 : i32
    %490 = tpu.dynamic_rotate %470 by %c127_i32_85 dim 2 : vector<1x16x128xf32>, i32 -> vector<1x16x128xf32>
    %c291 = arith.constant 291 : index
    %491 = memref.load %arg1[%c291] : memref<294xf32, #tpu.memory_space<smem>>
    %492 = vector.broadcast %491 : f32 to vector<1x16x128xf32>
    %493 = arith.mulf %492, %490 : vector<1x16x128xf32>
    %494 = arith.addf %489, %493 : vector<1x16x128xf32>
    %c126_i32_86 = arith.constant 126 : i32
    %495 = tpu.dynamic_rotate %470 by %c126_i32_86 dim 2 : vector<1x16x128xf32>, i32 -> vector<1x16x128xf32>
    %c292 = arith.constant 292 : index
    %496 = memref.load %arg1[%c292] : memref<294xf32, #tpu.memory_space<smem>>
    %497 = vector.broadcast %496 : f32 to vector<1x16x128xf32>
    %498 = arith.mulf %497, %495 : vector<1x16x128xf32>
    %499 = arith.addf %494, %498 : vector<1x16x128xf32>
    %c125_i32_87 = arith.constant 125 : i32
    %500 = tpu.dynamic_rotate %470 by %c125_i32_87 dim 2 : vector<1x16x128xf32>, i32 -> vector<1x16x128xf32>
    %c293 = arith.constant 293 : index
    %501 = memref.load %arg1[%c293] : memref<294xf32, #tpu.memory_space<smem>>
    %502 = vector.broadcast %501 : f32 to vector<1x16x128xf32>
    %503 = arith.mulf %502, %500 : vector<1x16x128xf32>
    %504 = arith.addf %499, %503 : vector<1x16x128xf32>
    %505 = vector.extract_strided_slice %504 {offsets = [0, 0, 0], sizes = [1, 16, 16], strides = [1, 1, 1]} : vector<1x16x128xf32> to vector<1x16x16xf32>
    %506 = vector.broadcast %5 : f32 to vector<1x16x16xf32>
    %507 = arith.addf %505, %506 : vector<1x16x16xf32>
    %508 = arith.negf %507 : vector<1x16x16xf32>
    %509 = math.exp %508 : vector<1x16x16xf32>
    %cst_88 = arith.constant 1.000000e+00 : f32
    %510 = vector.broadcast %cst_88 : f32 to vector<1x16x16xf32>
    %511 = arith.addf %510, %509 : vector<1x16x16xf32>
    %512 = arith.divf %510, %511 : vector<1x16x16xf32>
    %cst_89 = arith.constant 0.333333343 : f32
    %513 = vector.broadcast %cst_89 : f32 to vector<1x16x16xf32>
    %514 = arith.mulf %512, %513 : vector<1x16x16xf32>
    %cst_90 = arith.constant dense<0xFF800000> : vector<1x4x16xf32>
    %515 = vector.multi_reduction <maximumf>, %0, %cst_90 [2] : vector<1x4x16x16xf32> to vector<1x4x16xf32>
    %cst_91 = arith.constant dense<0.000000e+00> : vector<1x4x16xf32>
    %516 = vector.multi_reduction <add>, %0, %cst_91 [2] : vector<1x4x16x16xf32> to vector<1x4x16xf32>
    %cst_92 = arith.constant 6.250000e-02 : f32
    %517 = vector.broadcast %cst_92 : f32 to vector<1x4x16xf32>
    %518 = arith.mulf %516, %517 : vector<1x4x16xf32>
    %c0_93 = arith.constant 0 : index
    %519 = memref.load %arg2[%c0_93] : memref<3xf32, #tpu.memory_space<smem>>
    %cst_94 = arith.constant 0.000000e+00 : f32
    %520 = vector.broadcast %cst_94 : f32 to vector<1x4x128xf32>
    %cst_95 = arith.constant 0.000000e+00 : f32
    %521 = vector.broadcast %cst_95 : f32 to vector<1x4x112xf32>
    %522 = tpu.concatenate %515, %521 in 2 : vector<1x4x16xf32>, vector<1x4x112xf32> -> vector<1x4x128xf32>
    %cst_96 = arith.constant 0.000000e+00 : f32
    %523 = vector.broadcast %cst_96 : f32 to vector<1x3x128xf32>
    %524 = tpu.concatenate %523, %522, %523 in 1 : vector<1x3x128xf32>, vector<1x4x128xf32>, vector<1x3x128xf32> -> vector<1x10x128xf32>
    %525 = vector.extract_strided_slice %524 {offsets = [0, 0, 0], sizes = [1, 4, 128], strides = [1, 1, 1]} : vector<1x10x128xf32> to vector<1x4x128xf32>
    %c3_i32_97 = arith.constant 3 : i32
    %526 = tpu.dynamic_rotate %525 by %c3_i32_97 dim 2 : vector<1x4x128xf32>, i32 -> vector<1x4x128xf32>
    %c0_98 = arith.constant 0 : index
    %527 = memref.load %arg1[%c0_98] : memref<294xf32, #tpu.memory_space<smem>>
    %528 = vector.broadcast %527 : f32 to vector<1x4x128xf32>
    %529 = arith.mulf %528, %526 : vector<1x4x128xf32>
    %530 = arith.addf %520, %529 : vector<1x4x128xf32>
    %c2_i32_99 = arith.constant 2 : i32
    %531 = tpu.dynamic_rotate %525 by %c2_i32_99 dim 2 : vector<1x4x128xf32>, i32 -> vector<1x4x128xf32>
    %c1 = arith.constant 1 : index
    %532 = memref.load %arg1[%c1] : memref<294xf32, #tpu.memory_space<smem>>
    %533 = vector.broadcast %532 : f32 to vector<1x4x128xf32>
    %534 = arith.mulf %533, %531 : vector<1x4x128xf32>
    %535 = arith.addf %530, %534 : vector<1x4x128xf32>
    %c1_i32_100 = arith.constant 1 : i32
    %536 = tpu.dynamic_rotate %525 by %c1_i32_100 dim 2 : vector<1x4x128xf32>, i32 -> vector<1x4x128xf32>
    %c2_101 = arith.constant 2 : index
    %537 = memref.load %arg1[%c2_101] : memref<294xf32, #tpu.memory_space<smem>>
    %538 = vector.broadcast %537 : f32 to vector<1x4x128xf32>
    %539 = arith.mulf %538, %536 : vector<1x4x128xf32>
    %540 = arith.addf %535, %539 : vector<1x4x128xf32>
    %c3 = arith.constant 3 : index
    %541 = memref.load %arg1[%c3] : memref<294xf32, #tpu.memory_space<smem>>
    %542 = vector.broadcast %541 : f32 to vector<1x4x128xf32>
    %543 = arith.mulf %542, %525 : vector<1x4x128xf32>
    %544 = arith.addf %540, %543 : vector<1x4x128xf32>
    %c127_i32_102 = arith.constant 127 : i32
    %545 = tpu.dynamic_rotate %525 by %c127_i32_102 dim 2 : vector<1x4x128xf32>, i32 -> vector<1x4x128xf32>
    %c4 = arith.constant 4 : index
    %546 = memref.load %arg1[%c4] : memref<294xf32, #tpu.memory_space<smem>>
    %547 = vector.broadcast %546 : f32 to vector<1x4x128xf32>
    %548 = arith.mulf %547, %545 : vector<1x4x128xf32>
    %549 = arith.addf %544, %548 : vector<1x4x128xf32>
    %c126_i32_103 = arith.constant 126 : i32
    %550 = tpu.dynamic_rotate %525 by %c126_i32_103 dim 2 : vector<1x4x128xf32>, i32 -> vector<1x4x128xf32>
    %c5 = arith.constant 5 : index
    %551 = memref.load %arg1[%c5] : memref<294xf32, #tpu.memory_space<smem>>
    %552 = vector.broadcast %551 : f32 to vector<1x4x128xf32>
    %553 = arith.mulf %552, %550 : vector<1x4x128xf32>
    %554 = arith.addf %549, %553 : vector<1x4x128xf32>
    %c125_i32_104 = arith.constant 125 : i32
    %555 = tpu.dynamic_rotate %525 by %c125_i32_104 dim 2 : vector<1x4x128xf32>, i32 -> vector<1x4x128xf32>
    %c6 = arith.constant 6 : index
    %556 = memref.load %arg1[%c6] : memref<294xf32, #tpu.memory_space<smem>>
    %557 = vector.broadcast %556 : f32 to vector<1x4x128xf32>
    %558 = arith.mulf %557, %555 : vector<1x4x128xf32>
    %559 = arith.addf %554, %558 : vector<1x4x128xf32>
    %560 = vector.extract_strided_slice %524 {offsets = [0, 1, 0], sizes = [1, 4, 128], strides = [1, 1, 1]} : vector<1x10x128xf32> to vector<1x4x128xf32>
    %c3_i32_105 = arith.constant 3 : i32
    %561 = tpu.dynamic_rotate %560 by %c3_i32_105 dim 2 : vector<1x4x128xf32>, i32 -> vector<1x4x128xf32>
    %c7 = arith.constant 7 : index
    %562 = memref.load %arg1[%c7] : memref<294xf32, #tpu.memory_space<smem>>
    %563 = vector.broadcast %562 : f32 to vector<1x4x128xf32>
    %564 = arith.mulf %563, %561 : vector<1x4x128xf32>
    %565 = arith.addf %559, %564 : vector<1x4x128xf32>
    %c2_i32_106 = arith.constant 2 : i32
    %566 = tpu.dynamic_rotate %560 by %c2_i32_106 dim 2 : vector<1x4x128xf32>, i32 -> vector<1x4x128xf32>
    %c8 = arith.constant 8 : index
    %567 = memref.load %arg1[%c8] : memref<294xf32, #tpu.memory_space<smem>>
    %568 = vector.broadcast %567 : f32 to vector<1x4x128xf32>
    %569 = arith.mulf %568, %566 : vector<1x4x128xf32>
    %570 = arith.addf %565, %569 : vector<1x4x128xf32>
    %c1_i32_107 = arith.constant 1 : i32
    %571 = tpu.dynamic_rotate %560 by %c1_i32_107 dim 2 : vector<1x4x128xf32>, i32 -> vector<1x4x128xf32>
    %c9 = arith.constant 9 : index
    %572 = memref.load %arg1[%c9] : memref<294xf32, #tpu.memory_space<smem>>
    %573 = vector.broadcast %572 : f32 to vector<1x4x128xf32>
    %574 = arith.mulf %573, %571 : vector<1x4x128xf32>
    %575 = arith.addf %570, %574 : vector<1x4x128xf32>
    %c10 = arith.constant 10 : index
    %576 = memref.load %arg1[%c10] : memref<294xf32, #tpu.memory_space<smem>>
    %577 = vector.broadcast %576 : f32 to vector<1x4x128xf32>
    %578 = arith.mulf %577, %560 : vector<1x4x128xf32>
    %579 = arith.addf %575, %578 : vector<1x4x128xf32>
    %c127_i32_108 = arith.constant 127 : i32
    %580 = tpu.dynamic_rotate %560 by %c127_i32_108 dim 2 : vector<1x4x128xf32>, i32 -> vector<1x4x128xf32>
    %c11 = arith.constant 11 : index
    %581 = memref.load %arg1[%c11] : memref<294xf32, #tpu.memory_space<smem>>
    %582 = vector.broadcast %581 : f32 to vector<1x4x128xf32>
    %583 = arith.mulf %582, %580 : vector<1x4x128xf32>
    %584 = arith.addf %579, %583 : vector<1x4x128xf32>
    %c126_i32_109 = arith.constant 126 : i32
    %585 = tpu.dynamic_rotate %560 by %c126_i32_109 dim 2 : vector<1x4x128xf32>, i32 -> vector<1x4x128xf32>
    %c12 = arith.constant 12 : index
    %586 = memref.load %arg1[%c12] : memref<294xf32, #tpu.memory_space<smem>>
    %587 = vector.broadcast %586 : f32 to vector<1x4x128xf32>
    %588 = arith.mulf %587, %585 : vector<1x4x128xf32>
    %589 = arith.addf %584, %588 : vector<1x4x128xf32>
    %c125_i32_110 = arith.constant 125 : i32
    %590 = tpu.dynamic_rotate %560 by %c125_i32_110 dim 2 : vector<1x4x128xf32>, i32 -> vector<1x4x128xf32>
    %c13 = arith.constant 13 : index
    %591 = memref.load %arg1[%c13] : memref<294xf32, #tpu.memory_space<smem>>
    %592 = vector.broadcast %591 : f32 to vector<1x4x128xf32>
    %593 = arith.mulf %592, %590 : vector<1x4x128xf32>
    %594 = arith.addf %589, %593 : vector<1x4x128xf32>
    %595 = vector.extract_strided_slice %524 {offsets = [0, 2, 0], sizes = [1, 4, 128], strides = [1, 1, 1]} : vector<1x10x128xf32> to vector<1x4x128xf32>
    %c3_i32_111 = arith.constant 3 : i32
    %596 = tpu.dynamic_rotate %595 by %c3_i32_111 dim 2 : vector<1x4x128xf32>, i32 -> vector<1x4x128xf32>
    %c14 = arith.constant 14 : index
    %597 = memref.load %arg1[%c14] : memref<294xf32, #tpu.memory_space<smem>>
    %598 = vector.broadcast %597 : f32 to vector<1x4x128xf32>
    %599 = arith.mulf %598, %596 : vector<1x4x128xf32>
    %600 = arith.addf %594, %599 : vector<1x4x128xf32>
    %c2_i32_112 = arith.constant 2 : i32
    %601 = tpu.dynamic_rotate %595 by %c2_i32_112 dim 2 : vector<1x4x128xf32>, i32 -> vector<1x4x128xf32>
    %c15 = arith.constant 15 : index
    %602 = memref.load %arg1[%c15] : memref<294xf32, #tpu.memory_space<smem>>
    %603 = vector.broadcast %602 : f32 to vector<1x4x128xf32>
    %604 = arith.mulf %603, %601 : vector<1x4x128xf32>
    %605 = arith.addf %600, %604 : vector<1x4x128xf32>
    %c1_i32_113 = arith.constant 1 : i32
    %606 = tpu.dynamic_rotate %595 by %c1_i32_113 dim 2 : vector<1x4x128xf32>, i32 -> vector<1x4x128xf32>
    %c16 = arith.constant 16 : index
    %607 = memref.load %arg1[%c16] : memref<294xf32, #tpu.memory_space<smem>>
    %608 = vector.broadcast %607 : f32 to vector<1x4x128xf32>
    %609 = arith.mulf %608, %606 : vector<1x4x128xf32>
    %610 = arith.addf %605, %609 : vector<1x4x128xf32>
    %c17 = arith.constant 17 : index
    %611 = memref.load %arg1[%c17] : memref<294xf32, #tpu.memory_space<smem>>
    %612 = vector.broadcast %611 : f32 to vector<1x4x128xf32>
    %613 = arith.mulf %612, %595 : vector<1x4x128xf32>
    %614 = arith.addf %610, %613 : vector<1x4x128xf32>
    %c127_i32_114 = arith.constant 127 : i32
    %615 = tpu.dynamic_rotate %595 by %c127_i32_114 dim 2 : vector<1x4x128xf32>, i32 -> vector<1x4x128xf32>
    %c18 = arith.constant 18 : index
    %616 = memref.load %arg1[%c18] : memref<294xf32, #tpu.memory_space<smem>>
    %617 = vector.broadcast %616 : f32 to vector<1x4x128xf32>
    %618 = arith.mulf %617, %615 : vector<1x4x128xf32>
    %619 = arith.addf %614, %618 : vector<1x4x128xf32>
    %c126_i32_115 = arith.constant 126 : i32
    %620 = tpu.dynamic_rotate %595 by %c126_i32_115 dim 2 : vector<1x4x128xf32>, i32 -> vector<1x4x128xf32>
    %c19 = arith.constant 19 : index
    %621 = memref.load %arg1[%c19] : memref<294xf32, #tpu.memory_space<smem>>
    %622 = vector.broadcast %621 : f32 to vector<1x4x128xf32>
    %623 = arith.mulf %622, %620 : vector<1x4x128xf32>
    %624 = arith.addf %619, %623 : vector<1x4x128xf32>
    %c125_i32_116 = arith.constant 125 : i32
    %625 = tpu.dynamic_rotate %595 by %c125_i32_116 dim 2 : vector<1x4x128xf32>, i32 -> vector<1x4x128xf32>
    %c20 = arith.constant 20 : index
    %626 = memref.load %arg1[%c20] : memref<294xf32, #tpu.memory_space<smem>>
    %627 = vector.broadcast %626 : f32 to vector<1x4x128xf32>
    %628 = arith.mulf %627, %625 : vector<1x4x128xf32>
    %629 = arith.addf %624, %628 : vector<1x4x128xf32>
    %630 = vector.extract_strided_slice %524 {offsets = [0, 3, 0], sizes = [1, 4, 128], strides = [1, 1, 1]} : vector<1x10x128xf32> to vector<1x4x128xf32>
    %c3_i32_117 = arith.constant 3 : i32
    %631 = tpu.dynamic_rotate %630 by %c3_i32_117 dim 2 : vector<1x4x128xf32>, i32 -> vector<1x4x128xf32>
    %c21 = arith.constant 21 : index
    %632 = memref.load %arg1[%c21] : memref<294xf32, #tpu.memory_space<smem>>
    %633 = vector.broadcast %632 : f32 to vector<1x4x128xf32>
    %634 = arith.mulf %633, %631 : vector<1x4x128xf32>
    %635 = arith.addf %629, %634 : vector<1x4x128xf32>
    %c2_i32_118 = arith.constant 2 : i32
    %636 = tpu.dynamic_rotate %630 by %c2_i32_118 dim 2 : vector<1x4x128xf32>, i32 -> vector<1x4x128xf32>
    %c22 = arith.constant 22 : index
    %637 = memref.load %arg1[%c22] : memref<294xf32, #tpu.memory_space<smem>>
    %638 = vector.broadcast %637 : f32 to vector<1x4x128xf32>
    %639 = arith.mulf %638, %636 : vector<1x4x128xf32>
    %640 = arith.addf %635, %639 : vector<1x4x128xf32>
    %c1_i32_119 = arith.constant 1 : i32
    %641 = tpu.dynamic_rotate %630 by %c1_i32_119 dim 2 : vector<1x4x128xf32>, i32 -> vector<1x4x128xf32>
    %c23 = arith.constant 23 : index
    %642 = memref.load %arg1[%c23] : memref<294xf32, #tpu.memory_space<smem>>
    %643 = vector.broadcast %642 : f32 to vector<1x4x128xf32>
    %644 = arith.mulf %643, %641 : vector<1x4x128xf32>
    %645 = arith.addf %640, %644 : vector<1x4x128xf32>
    %c24 = arith.constant 24 : index
    %646 = memref.load %arg1[%c24] : memref<294xf32, #tpu.memory_space<smem>>
    %647 = vector.broadcast %646 : f32 to vector<1x4x128xf32>
    %648 = arith.mulf %647, %630 : vector<1x4x128xf32>
    %649 = arith.addf %645, %648 : vector<1x4x128xf32>
    %c127_i32_120 = arith.constant 127 : i32
    %650 = tpu.dynamic_rotate %630 by %c127_i32_120 dim 2 : vector<1x4x128xf32>, i32 -> vector<1x4x128xf32>
    %c25 = arith.constant 25 : index
    %651 = memref.load %arg1[%c25] : memref<294xf32, #tpu.memory_space<smem>>
    %652 = vector.broadcast %651 : f32 to vector<1x4x128xf32>
    %653 = arith.mulf %652, %650 : vector<1x4x128xf32>
    %654 = arith.addf %649, %653 : vector<1x4x128xf32>
    %c126_i32_121 = arith.constant 126 : i32
    %655 = tpu.dynamic_rotate %630 by %c126_i32_121 dim 2 : vector<1x4x128xf32>, i32 -> vector<1x4x128xf32>
    %c26 = arith.constant 26 : index
    %656 = memref.load %arg1[%c26] : memref<294xf32, #tpu.memory_space<smem>>
    %657 = vector.broadcast %656 : f32 to vector<1x4x128xf32>
    %658 = arith.mulf %657, %655 : vector<1x4x128xf32>
    %659 = arith.addf %654, %658 : vector<1x4x128xf32>
    %c125_i32_122 = arith.constant 125 : i32
    %660 = tpu.dynamic_rotate %630 by %c125_i32_122 dim 2 : vector<1x4x128xf32>, i32 -> vector<1x4x128xf32>
    %c27 = arith.constant 27 : index
    %661 = memref.load %arg1[%c27] : memref<294xf32, #tpu.memory_space<smem>>
    %662 = vector.broadcast %661 : f32 to vector<1x4x128xf32>
    %663 = arith.mulf %662, %660 : vector<1x4x128xf32>
    %664 = arith.addf %659, %663 : vector<1x4x128xf32>
    %665 = vector.extract_strided_slice %524 {offsets = [0, 4, 0], sizes = [1, 4, 128], strides = [1, 1, 1]} : vector<1x10x128xf32> to vector<1x4x128xf32>
    %c3_i32_123 = arith.constant 3 : i32
    %666 = tpu.dynamic_rotate %665 by %c3_i32_123 dim 2 : vector<1x4x128xf32>, i32 -> vector<1x4x128xf32>
    %c28 = arith.constant 28 : index
    %667 = memref.load %arg1[%c28] : memref<294xf32, #tpu.memory_space<smem>>
    %668 = vector.broadcast %667 : f32 to vector<1x4x128xf32>
    %669 = arith.mulf %668, %666 : vector<1x4x128xf32>
    %670 = arith.addf %664, %669 : vector<1x4x128xf32>
    %c2_i32_124 = arith.constant 2 : i32
    %671 = tpu.dynamic_rotate %665 by %c2_i32_124 dim 2 : vector<1x4x128xf32>, i32 -> vector<1x4x128xf32>
    %c29 = arith.constant 29 : index
    %672 = memref.load %arg1[%c29] : memref<294xf32, #tpu.memory_space<smem>>
    %673 = vector.broadcast %672 : f32 to vector<1x4x128xf32>
    %674 = arith.mulf %673, %671 : vector<1x4x128xf32>
    %675 = arith.addf %670, %674 : vector<1x4x128xf32>
    %c1_i32_125 = arith.constant 1 : i32
    %676 = tpu.dynamic_rotate %665 by %c1_i32_125 dim 2 : vector<1x4x128xf32>, i32 -> vector<1x4x128xf32>
    %c30 = arith.constant 30 : index
    %677 = memref.load %arg1[%c30] : memref<294xf32, #tpu.memory_space<smem>>
    %678 = vector.broadcast %677 : f32 to vector<1x4x128xf32>
    %679 = arith.mulf %678, %676 : vector<1x4x128xf32>
    %680 = arith.addf %675, %679 : vector<1x4x128xf32>
    %c31 = arith.constant 31 : index
    %681 = memref.load %arg1[%c31] : memref<294xf32, #tpu.memory_space<smem>>
    %682 = vector.broadcast %681 : f32 to vector<1x4x128xf32>
    %683 = arith.mulf %682, %665 : vector<1x4x128xf32>
    %684 = arith.addf %680, %683 : vector<1x4x128xf32>
    %c127_i32_126 = arith.constant 127 : i32
    %685 = tpu.dynamic_rotate %665 by %c127_i32_126 dim 2 : vector<1x4x128xf32>, i32 -> vector<1x4x128xf32>
    %c32 = arith.constant 32 : index
    %686 = memref.load %arg1[%c32] : memref<294xf32, #tpu.memory_space<smem>>
    %687 = vector.broadcast %686 : f32 to vector<1x4x128xf32>
    %688 = arith.mulf %687, %685 : vector<1x4x128xf32>
    %689 = arith.addf %684, %688 : vector<1x4x128xf32>
    %c126_i32_127 = arith.constant 126 : i32
    %690 = tpu.dynamic_rotate %665 by %c126_i32_127 dim 2 : vector<1x4x128xf32>, i32 -> vector<1x4x128xf32>
    %c33 = arith.constant 33 : index
    %691 = memref.load %arg1[%c33] : memref<294xf32, #tpu.memory_space<smem>>
    %692 = vector.broadcast %691 : f32 to vector<1x4x128xf32>
    %693 = arith.mulf %692, %690 : vector<1x4x128xf32>
    %694 = arith.addf %689, %693 : vector<1x4x128xf32>
    %c125_i32_128 = arith.constant 125 : i32
    %695 = tpu.dynamic_rotate %665 by %c125_i32_128 dim 2 : vector<1x4x128xf32>, i32 -> vector<1x4x128xf32>
    %c34 = arith.constant 34 : index
    %696 = memref.load %arg1[%c34] : memref<294xf32, #tpu.memory_space<smem>>
    %697 = vector.broadcast %696 : f32 to vector<1x4x128xf32>
    %698 = arith.mulf %697, %695 : vector<1x4x128xf32>
    %699 = arith.addf %694, %698 : vector<1x4x128xf32>
    %700 = vector.extract_strided_slice %524 {offsets = [0, 5, 0], sizes = [1, 4, 128], strides = [1, 1, 1]} : vector<1x10x128xf32> to vector<1x4x128xf32>
    %c3_i32_129 = arith.constant 3 : i32
    %701 = tpu.dynamic_rotate %700 by %c3_i32_129 dim 2 : vector<1x4x128xf32>, i32 -> vector<1x4x128xf32>
    %c35 = arith.constant 35 : index
    %702 = memref.load %arg1[%c35] : memref<294xf32, #tpu.memory_space<smem>>
    %703 = vector.broadcast %702 : f32 to vector<1x4x128xf32>
    %704 = arith.mulf %703, %701 : vector<1x4x128xf32>
    %705 = arith.addf %699, %704 : vector<1x4x128xf32>
    %c2_i32_130 = arith.constant 2 : i32
    %706 = tpu.dynamic_rotate %700 by %c2_i32_130 dim 2 : vector<1x4x128xf32>, i32 -> vector<1x4x128xf32>
    %c36 = arith.constant 36 : index
    %707 = memref.load %arg1[%c36] : memref<294xf32, #tpu.memory_space<smem>>
    %708 = vector.broadcast %707 : f32 to vector<1x4x128xf32>
    %709 = arith.mulf %708, %706 : vector<1x4x128xf32>
    %710 = arith.addf %705, %709 : vector<1x4x128xf32>
    %c1_i32_131 = arith.constant 1 : i32
    %711 = tpu.dynamic_rotate %700 by %c1_i32_131 dim 2 : vector<1x4x128xf32>, i32 -> vector<1x4x128xf32>
    %c37 = arith.constant 37 : index
    %712 = memref.load %arg1[%c37] : memref<294xf32, #tpu.memory_space<smem>>
    %713 = vector.broadcast %712 : f32 to vector<1x4x128xf32>
    %714 = arith.mulf %713, %711 : vector<1x4x128xf32>
    %715 = arith.addf %710, %714 : vector<1x4x128xf32>
    %c38 = arith.constant 38 : index
    %716 = memref.load %arg1[%c38] : memref<294xf32, #tpu.memory_space<smem>>
    %717 = vector.broadcast %716 : f32 to vector<1x4x128xf32>
    %718 = arith.mulf %717, %700 : vector<1x4x128xf32>
    %719 = arith.addf %715, %718 : vector<1x4x128xf32>
    %c127_i32_132 = arith.constant 127 : i32
    %720 = tpu.dynamic_rotate %700 by %c127_i32_132 dim 2 : vector<1x4x128xf32>, i32 -> vector<1x4x128xf32>
    %c39 = arith.constant 39 : index
    %721 = memref.load %arg1[%c39] : memref<294xf32, #tpu.memory_space<smem>>
    %722 = vector.broadcast %721 : f32 to vector<1x4x128xf32>
    %723 = arith.mulf %722, %720 : vector<1x4x128xf32>
    %724 = arith.addf %719, %723 : vector<1x4x128xf32>
    %c126_i32_133 = arith.constant 126 : i32
    %725 = tpu.dynamic_rotate %700 by %c126_i32_133 dim 2 : vector<1x4x128xf32>, i32 -> vector<1x4x128xf32>
    %c40 = arith.constant 40 : index
    %726 = memref.load %arg1[%c40] : memref<294xf32, #tpu.memory_space<smem>>
    %727 = vector.broadcast %726 : f32 to vector<1x4x128xf32>
    %728 = arith.mulf %727, %725 : vector<1x4x128xf32>
    %729 = arith.addf %724, %728 : vector<1x4x128xf32>
    %c125_i32_134 = arith.constant 125 : i32
    %730 = tpu.dynamic_rotate %700 by %c125_i32_134 dim 2 : vector<1x4x128xf32>, i32 -> vector<1x4x128xf32>
    %c41 = arith.constant 41 : index
    %731 = memref.load %arg1[%c41] : memref<294xf32, #tpu.memory_space<smem>>
    %732 = vector.broadcast %731 : f32 to vector<1x4x128xf32>
    %733 = arith.mulf %732, %730 : vector<1x4x128xf32>
    %734 = arith.addf %729, %733 : vector<1x4x128xf32>
    %735 = vector.extract_strided_slice %524 {offsets = [0, 6, 0], sizes = [1, 4, 128], strides = [1, 1, 1]} : vector<1x10x128xf32> to vector<1x4x128xf32>
    %c3_i32_135 = arith.constant 3 : i32
    %736 = tpu.dynamic_rotate %735 by %c3_i32_135 dim 2 : vector<1x4x128xf32>, i32 -> vector<1x4x128xf32>
    %c42 = arith.constant 42 : index
    %737 = memref.load %arg1[%c42] : memref<294xf32, #tpu.memory_space<smem>>
    %738 = vector.broadcast %737 : f32 to vector<1x4x128xf32>
    %739 = arith.mulf %738, %736 : vector<1x4x128xf32>
    %740 = arith.addf %734, %739 : vector<1x4x128xf32>
    %c2_i32_136 = arith.constant 2 : i32
    %741 = tpu.dynamic_rotate %735 by %c2_i32_136 dim 2 : vector<1x4x128xf32>, i32 -> vector<1x4x128xf32>
    %c43 = arith.constant 43 : index
    %742 = memref.load %arg1[%c43] : memref<294xf32, #tpu.memory_space<smem>>
    %743 = vector.broadcast %742 : f32 to vector<1x4x128xf32>
    %744 = arith.mulf %743, %741 : vector<1x4x128xf32>
    %745 = arith.addf %740, %744 : vector<1x4x128xf32>
    %c1_i32_137 = arith.constant 1 : i32
    %746 = tpu.dynamic_rotate %735 by %c1_i32_137 dim 2 : vector<1x4x128xf32>, i32 -> vector<1x4x128xf32>
    %c44 = arith.constant 44 : index
    %747 = memref.load %arg1[%c44] : memref<294xf32, #tpu.memory_space<smem>>
    %748 = vector.broadcast %747 : f32 to vector<1x4x128xf32>
    %749 = arith.mulf %748, %746 : vector<1x4x128xf32>
    %750 = arith.addf %745, %749 : vector<1x4x128xf32>
    %c45 = arith.constant 45 : index
    %751 = memref.load %arg1[%c45] : memref<294xf32, #tpu.memory_space<smem>>
    %752 = vector.broadcast %751 : f32 to vector<1x4x128xf32>
    %753 = arith.mulf %752, %735 : vector<1x4x128xf32>
    %754 = arith.addf %750, %753 : vector<1x4x128xf32>
    %c127_i32_138 = arith.constant 127 : i32
    %755 = tpu.dynamic_rotate %735 by %c127_i32_138 dim 2 : vector<1x4x128xf32>, i32 -> vector<1x4x128xf32>
    %c46 = arith.constant 46 : index
    %756 = memref.load %arg1[%c46] : memref<294xf32, #tpu.memory_space<smem>>
    %757 = vector.broadcast %756 : f32 to vector<1x4x128xf32>
    %758 = arith.mulf %757, %755 : vector<1x4x128xf32>
    %759 = arith.addf %754, %758 : vector<1x4x128xf32>
    %c126_i32_139 = arith.constant 126 : i32
    %760 = tpu.dynamic_rotate %735 by %c126_i32_139 dim 2 : vector<1x4x128xf32>, i32 -> vector<1x4x128xf32>
    %c47 = arith.constant 47 : index
    %761 = memref.load %arg1[%c47] : memref<294xf32, #tpu.memory_space<smem>>
    %762 = vector.broadcast %761 : f32 to vector<1x4x128xf32>
    %763 = arith.mulf %762, %760 : vector<1x4x128xf32>
    %764 = arith.addf %759, %763 : vector<1x4x128xf32>
    %c125_i32_140 = arith.constant 125 : i32
    %765 = tpu.dynamic_rotate %735 by %c125_i32_140 dim 2 : vector<1x4x128xf32>, i32 -> vector<1x4x128xf32>
    %c48 = arith.constant 48 : index
    %766 = memref.load %arg1[%c48] : memref<294xf32, #tpu.memory_space<smem>>
    %767 = vector.broadcast %766 : f32 to vector<1x4x128xf32>
    %768 = arith.mulf %767, %765 : vector<1x4x128xf32>
    %769 = arith.addf %764, %768 : vector<1x4x128xf32>
    %cst_141 = arith.constant 0.000000e+00 : f32
    %770 = vector.broadcast %cst_141 : f32 to vector<1x4x112xf32>
    %771 = tpu.concatenate %518, %770 in 2 : vector<1x4x16xf32>, vector<1x4x112xf32> -> vector<1x4x128xf32>
    %cst_142 = arith.constant 0.000000e+00 : f32
    %772 = vector.broadcast %cst_142 : f32 to vector<1x3x128xf32>
    %773 = tpu.concatenate %772, %771, %772 in 1 : vector<1x3x128xf32>, vector<1x4x128xf32>, vector<1x3x128xf32> -> vector<1x10x128xf32>
    %774 = vector.extract_strided_slice %773 {offsets = [0, 0, 0], sizes = [1, 4, 128], strides = [1, 1, 1]} : vector<1x10x128xf32> to vector<1x4x128xf32>
    %c3_i32_143 = arith.constant 3 : i32
    %775 = tpu.dynamic_rotate %774 by %c3_i32_143 dim 2 : vector<1x4x128xf32>, i32 -> vector<1x4x128xf32>
    %c49 = arith.constant 49 : index
    %776 = memref.load %arg1[%c49] : memref<294xf32, #tpu.memory_space<smem>>
    %777 = vector.broadcast %776 : f32 to vector<1x4x128xf32>
    %778 = arith.mulf %777, %775 : vector<1x4x128xf32>
    %779 = arith.addf %769, %778 : vector<1x4x128xf32>
    %c2_i32_144 = arith.constant 2 : i32
    %780 = tpu.dynamic_rotate %774 by %c2_i32_144 dim 2 : vector<1x4x128xf32>, i32 -> vector<1x4x128xf32>
    %c50 = arith.constant 50 : index
    %781 = memref.load %arg1[%c50] : memref<294xf32, #tpu.memory_space<smem>>
    %782 = vector.broadcast %781 : f32 to vector<1x4x128xf32>
    %783 = arith.mulf %782, %780 : vector<1x4x128xf32>
    %784 = arith.addf %779, %783 : vector<1x4x128xf32>
    %c1_i32_145 = arith.constant 1 : i32
    %785 = tpu.dynamic_rotate %774 by %c1_i32_145 dim 2 : vector<1x4x128xf32>, i32 -> vector<1x4x128xf32>
    %c51 = arith.constant 51 : index
    %786 = memref.load %arg1[%c51] : memref<294xf32, #tpu.memory_space<smem>>
    %787 = vector.broadcast %786 : f32 to vector<1x4x128xf32>
    %788 = arith.mulf %787, %785 : vector<1x4x128xf32>
    %789 = arith.addf %784, %788 : vector<1x4x128xf32>
    %c52 = arith.constant 52 : index
    %790 = memref.load %arg1[%c52] : memref<294xf32, #tpu.memory_space<smem>>
    %791 = vector.broadcast %790 : f32 to vector<1x4x128xf32>
    %792 = arith.mulf %791, %774 : vector<1x4x128xf32>
    %793 = arith.addf %789, %792 : vector<1x4x128xf32>
    %c127_i32_146 = arith.constant 127 : i32
    %794 = tpu.dynamic_rotate %774 by %c127_i32_146 dim 2 : vector<1x4x128xf32>, i32 -> vector<1x4x128xf32>
    %c53 = arith.constant 53 : index
    %795 = memref.load %arg1[%c53] : memref<294xf32, #tpu.memory_space<smem>>
    %796 = vector.broadcast %795 : f32 to vector<1x4x128xf32>
    %797 = arith.mulf %796, %794 : vector<1x4x128xf32>
    %798 = arith.addf %793, %797 : vector<1x4x128xf32>
    %c126_i32_147 = arith.constant 126 : i32
    %799 = tpu.dynamic_rotate %774 by %c126_i32_147 dim 2 : vector<1x4x128xf32>, i32 -> vector<1x4x128xf32>
    %c54 = arith.constant 54 : index
    %800 = memref.load %arg1[%c54] : memref<294xf32, #tpu.memory_space<smem>>
    %801 = vector.broadcast %800 : f32 to vector<1x4x128xf32>
    %802 = arith.mulf %801, %799 : vector<1x4x128xf32>
    %803 = arith.addf %798, %802 : vector<1x4x128xf32>
    %c125_i32_148 = arith.constant 125 : i32
    %804 = tpu.dynamic_rotate %774 by %c125_i32_148 dim 2 : vector<1x4x128xf32>, i32 -> vector<1x4x128xf32>
    %c55 = arith.constant 55 : index
    %805 = memref.load %arg1[%c55] : memref<294xf32, #tpu.memory_space<smem>>
    %806 = vector.broadcast %805 : f32 to vector<1x4x128xf32>
    %807 = arith.mulf %806, %804 : vector<1x4x128xf32>
    %808 = arith.addf %803, %807 : vector<1x4x128xf32>
    %809 = vector.extract_strided_slice %773 {offsets = [0, 1, 0], sizes = [1, 4, 128], strides = [1, 1, 1]} : vector<1x10x128xf32> to vector<1x4x128xf32>
    %c3_i32_149 = arith.constant 3 : i32
    %810 = tpu.dynamic_rotate %809 by %c3_i32_149 dim 2 : vector<1x4x128xf32>, i32 -> vector<1x4x128xf32>
    %c56 = arith.constant 56 : index
    %811 = memref.load %arg1[%c56] : memref<294xf32, #tpu.memory_space<smem>>
    %812 = vector.broadcast %811 : f32 to vector<1x4x128xf32>
    %813 = arith.mulf %812, %810 : vector<1x4x128xf32>
    %814 = arith.addf %808, %813 : vector<1x4x128xf32>
    %c2_i32_150 = arith.constant 2 : i32
    %815 = tpu.dynamic_rotate %809 by %c2_i32_150 dim 2 : vector<1x4x128xf32>, i32 -> vector<1x4x128xf32>
    %c57 = arith.constant 57 : index
    %816 = memref.load %arg1[%c57] : memref<294xf32, #tpu.memory_space<smem>>
    %817 = vector.broadcast %816 : f32 to vector<1x4x128xf32>
    %818 = arith.mulf %817, %815 : vector<1x4x128xf32>
    %819 = arith.addf %814, %818 : vector<1x4x128xf32>
    %c1_i32_151 = arith.constant 1 : i32
    %820 = tpu.dynamic_rotate %809 by %c1_i32_151 dim 2 : vector<1x4x128xf32>, i32 -> vector<1x4x128xf32>
    %c58 = arith.constant 58 : index
    %821 = memref.load %arg1[%c58] : memref<294xf32, #tpu.memory_space<smem>>
    %822 = vector.broadcast %821 : f32 to vector<1x4x128xf32>
    %823 = arith.mulf %822, %820 : vector<1x4x128xf32>
    %824 = arith.addf %819, %823 : vector<1x4x128xf32>
    %c59 = arith.constant 59 : index
    %825 = memref.load %arg1[%c59] : memref<294xf32, #tpu.memory_space<smem>>
    %826 = vector.broadcast %825 : f32 to vector<1x4x128xf32>
    %827 = arith.mulf %826, %809 : vector<1x4x128xf32>
    %828 = arith.addf %824, %827 : vector<1x4x128xf32>
    %c127_i32_152 = arith.constant 127 : i32
    %829 = tpu.dynamic_rotate %809 by %c127_i32_152 dim 2 : vector<1x4x128xf32>, i32 -> vector<1x4x128xf32>
    %c60 = arith.constant 60 : index
    %830 = memref.load %arg1[%c60] : memref<294xf32, #tpu.memory_space<smem>>
    %831 = vector.broadcast %830 : f32 to vector<1x4x128xf32>
    %832 = arith.mulf %831, %829 : vector<1x4x128xf32>
    %833 = arith.addf %828, %832 : vector<1x4x128xf32>
    %c126_i32_153 = arith.constant 126 : i32
    %834 = tpu.dynamic_rotate %809 by %c126_i32_153 dim 2 : vector<1x4x128xf32>, i32 -> vector<1x4x128xf32>
    %c61 = arith.constant 61 : index
    %835 = memref.load %arg1[%c61] : memref<294xf32, #tpu.memory_space<smem>>
    %836 = vector.broadcast %835 : f32 to vector<1x4x128xf32>
    %837 = arith.mulf %836, %834 : vector<1x4x128xf32>
    %838 = arith.addf %833, %837 : vector<1x4x128xf32>
    %c125_i32_154 = arith.constant 125 : i32
    %839 = tpu.dynamic_rotate %809 by %c125_i32_154 dim 2 : vector<1x4x128xf32>, i32 -> vector<1x4x128xf32>
    %c62 = arith.constant 62 : index
    %840 = memref.load %arg1[%c62] : memref<294xf32, #tpu.memory_space<smem>>
    %841 = vector.broadcast %840 : f32 to vector<1x4x128xf32>
    %842 = arith.mulf %841, %839 : vector<1x4x128xf32>
    %843 = arith.addf %838, %842 : vector<1x4x128xf32>
    %844 = vector.extract_strided_slice %773 {offsets = [0, 2, 0], sizes = [1, 4, 128], strides = [1, 1, 1]} : vector<1x10x128xf32> to vector<1x4x128xf32>
    %c3_i32_155 = arith.constant 3 : i32
    %845 = tpu.dynamic_rotate %844 by %c3_i32_155 dim 2 : vector<1x4x128xf32>, i32 -> vector<1x4x128xf32>
    %c63 = arith.constant 63 : index
    %846 = memref.load %arg1[%c63] : memref<294xf32, #tpu.memory_space<smem>>
    %847 = vector.broadcast %846 : f32 to vector<1x4x128xf32>
    %848 = arith.mulf %847, %845 : vector<1x4x128xf32>
    %849 = arith.addf %843, %848 : vector<1x4x128xf32>
    %c2_i32_156 = arith.constant 2 : i32
    %850 = tpu.dynamic_rotate %844 by %c2_i32_156 dim 2 : vector<1x4x128xf32>, i32 -> vector<1x4x128xf32>
    %c64 = arith.constant 64 : index
    %851 = memref.load %arg1[%c64] : memref<294xf32, #tpu.memory_space<smem>>
    %852 = vector.broadcast %851 : f32 to vector<1x4x128xf32>
    %853 = arith.mulf %852, %850 : vector<1x4x128xf32>
    %854 = arith.addf %849, %853 : vector<1x4x128xf32>
    %c1_i32_157 = arith.constant 1 : i32
    %855 = tpu.dynamic_rotate %844 by %c1_i32_157 dim 2 : vector<1x4x128xf32>, i32 -> vector<1x4x128xf32>
    %c65 = arith.constant 65 : index
    %856 = memref.load %arg1[%c65] : memref<294xf32, #tpu.memory_space<smem>>
    %857 = vector.broadcast %856 : f32 to vector<1x4x128xf32>
    %858 = arith.mulf %857, %855 : vector<1x4x128xf32>
    %859 = arith.addf %854, %858 : vector<1x4x128xf32>
    %c66 = arith.constant 66 : index
    %860 = memref.load %arg1[%c66] : memref<294xf32, #tpu.memory_space<smem>>
    %861 = vector.broadcast %860 : f32 to vector<1x4x128xf32>
    %862 = arith.mulf %861, %844 : vector<1x4x128xf32>
    %863 = arith.addf %859, %862 : vector<1x4x128xf32>
    %c127_i32_158 = arith.constant 127 : i32
    %864 = tpu.dynamic_rotate %844 by %c127_i32_158 dim 2 : vector<1x4x128xf32>, i32 -> vector<1x4x128xf32>
    %c67 = arith.constant 67 : index
    %865 = memref.load %arg1[%c67] : memref<294xf32, #tpu.memory_space<smem>>
    %866 = vector.broadcast %865 : f32 to vector<1x4x128xf32>
    %867 = arith.mulf %866, %864 : vector<1x4x128xf32>
    %868 = arith.addf %863, %867 : vector<1x4x128xf32>
    %c126_i32_159 = arith.constant 126 : i32
    %869 = tpu.dynamic_rotate %844 by %c126_i32_159 dim 2 : vector<1x4x128xf32>, i32 -> vector<1x4x128xf32>
    %c68 = arith.constant 68 : index
    %870 = memref.load %arg1[%c68] : memref<294xf32, #tpu.memory_space<smem>>
    %871 = vector.broadcast %870 : f32 to vector<1x4x128xf32>
    %872 = arith.mulf %871, %869 : vector<1x4x128xf32>
    %873 = arith.addf %868, %872 : vector<1x4x128xf32>
    %c125_i32_160 = arith.constant 125 : i32
    %874 = tpu.dynamic_rotate %844 by %c125_i32_160 dim 2 : vector<1x4x128xf32>, i32 -> vector<1x4x128xf32>
    %c69 = arith.constant 69 : index
    %875 = memref.load %arg1[%c69] : memref<294xf32, #tpu.memory_space<smem>>
    %876 = vector.broadcast %875 : f32 to vector<1x4x128xf32>
    %877 = arith.mulf %876, %874 : vector<1x4x128xf32>
    %878 = arith.addf %873, %877 : vector<1x4x128xf32>
    %879 = vector.extract_strided_slice %773 {offsets = [0, 3, 0], sizes = [1, 4, 128], strides = [1, 1, 1]} : vector<1x10x128xf32> to vector<1x4x128xf32>
    %c3_i32_161 = arith.constant 3 : i32
    %880 = tpu.dynamic_rotate %879 by %c3_i32_161 dim 2 : vector<1x4x128xf32>, i32 -> vector<1x4x128xf32>
    %c70 = arith.constant 70 : index
    %881 = memref.load %arg1[%c70] : memref<294xf32, #tpu.memory_space<smem>>
    %882 = vector.broadcast %881 : f32 to vector<1x4x128xf32>
    %883 = arith.mulf %882, %880 : vector<1x4x128xf32>
    %884 = arith.addf %878, %883 : vector<1x4x128xf32>
    %c2_i32_162 = arith.constant 2 : i32
    %885 = tpu.dynamic_rotate %879 by %c2_i32_162 dim 2 : vector<1x4x128xf32>, i32 -> vector<1x4x128xf32>
    %c71 = arith.constant 71 : index
    %886 = memref.load %arg1[%c71] : memref<294xf32, #tpu.memory_space<smem>>
    %887 = vector.broadcast %886 : f32 to vector<1x4x128xf32>
    %888 = arith.mulf %887, %885 : vector<1x4x128xf32>
    %889 = arith.addf %884, %888 : vector<1x4x128xf32>
    %c1_i32_163 = arith.constant 1 : i32
    %890 = tpu.dynamic_rotate %879 by %c1_i32_163 dim 2 : vector<1x4x128xf32>, i32 -> vector<1x4x128xf32>
    %c72 = arith.constant 72 : index
    %891 = memref.load %arg1[%c72] : memref<294xf32, #tpu.memory_space<smem>>
    %892 = vector.broadcast %891 : f32 to vector<1x4x128xf32>
    %893 = arith.mulf %892, %890 : vector<1x4x128xf32>
    %894 = arith.addf %889, %893 : vector<1x4x128xf32>
    %c73 = arith.constant 73 : index
    %895 = memref.load %arg1[%c73] : memref<294xf32, #tpu.memory_space<smem>>
    %896 = vector.broadcast %895 : f32 to vector<1x4x128xf32>
    %897 = arith.mulf %896, %879 : vector<1x4x128xf32>
    %898 = arith.addf %894, %897 : vector<1x4x128xf32>
    %c127_i32_164 = arith.constant 127 : i32
    %899 = tpu.dynamic_rotate %879 by %c127_i32_164 dim 2 : vector<1x4x128xf32>, i32 -> vector<1x4x128xf32>
    %c74 = arith.constant 74 : index
    %900 = memref.load %arg1[%c74] : memref<294xf32, #tpu.memory_space<smem>>
    %901 = vector.broadcast %900 : f32 to vector<1x4x128xf32>
    %902 = arith.mulf %901, %899 : vector<1x4x128xf32>
    %903 = arith.addf %898, %902 : vector<1x4x128xf32>
    %c126_i32_165 = arith.constant 126 : i32
    %904 = tpu.dynamic_rotate %879 by %c126_i32_165 dim 2 : vector<1x4x128xf32>, i32 -> vector<1x4x128xf32>
    %c75 = arith.constant 75 : index
    %905 = memref.load %arg1[%c75] : memref<294xf32, #tpu.memory_space<smem>>
    %906 = vector.broadcast %905 : f32 to vector<1x4x128xf32>
    %907 = arith.mulf %906, %904 : vector<1x4x128xf32>
    %908 = arith.addf %903, %907 : vector<1x4x128xf32>
    %c125_i32_166 = arith.constant 125 : i32
    %909 = tpu.dynamic_rotate %879 by %c125_i32_166 dim 2 : vector<1x4x128xf32>, i32 -> vector<1x4x128xf32>
    %c76 = arith.constant 76 : index
    %910 = memref.load %arg1[%c76] : memref<294xf32, #tpu.memory_space<smem>>
    %911 = vector.broadcast %910 : f32 to vector<1x4x128xf32>
    %912 = arith.mulf %911, %909 : vector<1x4x128xf32>
    %913 = arith.addf %908, %912 : vector<1x4x128xf32>
    %914 = vector.extract_strided_slice %773 {offsets = [0, 4, 0], sizes = [1, 4, 128], strides = [1, 1, 1]} : vector<1x10x128xf32> to vector<1x4x128xf32>
    %c3_i32_167 = arith.constant 3 : i32
    %915 = tpu.dynamic_rotate %914 by %c3_i32_167 dim 2 : vector<1x4x128xf32>, i32 -> vector<1x4x128xf32>
    %c77 = arith.constant 77 : index
    %916 = memref.load %arg1[%c77] : memref<294xf32, #tpu.memory_space<smem>>
    %917 = vector.broadcast %916 : f32 to vector<1x4x128xf32>
    %918 = arith.mulf %917, %915 : vector<1x4x128xf32>
    %919 = arith.addf %913, %918 : vector<1x4x128xf32>
    %c2_i32_168 = arith.constant 2 : i32
    %920 = tpu.dynamic_rotate %914 by %c2_i32_168 dim 2 : vector<1x4x128xf32>, i32 -> vector<1x4x128xf32>
    %c78 = arith.constant 78 : index
    %921 = memref.load %arg1[%c78] : memref<294xf32, #tpu.memory_space<smem>>
    %922 = vector.broadcast %921 : f32 to vector<1x4x128xf32>
    %923 = arith.mulf %922, %920 : vector<1x4x128xf32>
    %924 = arith.addf %919, %923 : vector<1x4x128xf32>
    %c1_i32_169 = arith.constant 1 : i32
    %925 = tpu.dynamic_rotate %914 by %c1_i32_169 dim 2 : vector<1x4x128xf32>, i32 -> vector<1x4x128xf32>
    %c79 = arith.constant 79 : index
    %926 = memref.load %arg1[%c79] : memref<294xf32, #tpu.memory_space<smem>>
    %927 = vector.broadcast %926 : f32 to vector<1x4x128xf32>
    %928 = arith.mulf %927, %925 : vector<1x4x128xf32>
    %929 = arith.addf %924, %928 : vector<1x4x128xf32>
    %c80 = arith.constant 80 : index
    %930 = memref.load %arg1[%c80] : memref<294xf32, #tpu.memory_space<smem>>
    %931 = vector.broadcast %930 : f32 to vector<1x4x128xf32>
    %932 = arith.mulf %931, %914 : vector<1x4x128xf32>
    %933 = arith.addf %929, %932 : vector<1x4x128xf32>
    %c127_i32_170 = arith.constant 127 : i32
    %934 = tpu.dynamic_rotate %914 by %c127_i32_170 dim 2 : vector<1x4x128xf32>, i32 -> vector<1x4x128xf32>
    %c81 = arith.constant 81 : index
    %935 = memref.load %arg1[%c81] : memref<294xf32, #tpu.memory_space<smem>>
    %936 = vector.broadcast %935 : f32 to vector<1x4x128xf32>
    %937 = arith.mulf %936, %934 : vector<1x4x128xf32>
    %938 = arith.addf %933, %937 : vector<1x4x128xf32>
    %c126_i32_171 = arith.constant 126 : i32
    %939 = tpu.dynamic_rotate %914 by %c126_i32_171 dim 2 : vector<1x4x128xf32>, i32 -> vector<1x4x128xf32>
    %c82 = arith.constant 82 : index
    %940 = memref.load %arg1[%c82] : memref<294xf32, #tpu.memory_space<smem>>
    %941 = vector.broadcast %940 : f32 to vector<1x4x128xf32>
    %942 = arith.mulf %941, %939 : vector<1x4x128xf32>
    %943 = arith.addf %938, %942 : vector<1x4x128xf32>
    %c125_i32_172 = arith.constant 125 : i32
    %944 = tpu.dynamic_rotate %914 by %c125_i32_172 dim 2 : vector<1x4x128xf32>, i32 -> vector<1x4x128xf32>
    %c83 = arith.constant 83 : index
    %945 = memref.load %arg1[%c83] : memref<294xf32, #tpu.memory_space<smem>>
    %946 = vector.broadcast %945 : f32 to vector<1x4x128xf32>
    %947 = arith.mulf %946, %944 : vector<1x4x128xf32>
    %948 = arith.addf %943, %947 : vector<1x4x128xf32>
    %949 = vector.extract_strided_slice %773 {offsets = [0, 5, 0], sizes = [1, 4, 128], strides = [1, 1, 1]} : vector<1x10x128xf32> to vector<1x4x128xf32>
    %c3_i32_173 = arith.constant 3 : i32
    %950 = tpu.dynamic_rotate %949 by %c3_i32_173 dim 2 : vector<1x4x128xf32>, i32 -> vector<1x4x128xf32>
    %c84 = arith.constant 84 : index
    %951 = memref.load %arg1[%c84] : memref<294xf32, #tpu.memory_space<smem>>
    %952 = vector.broadcast %951 : f32 to vector<1x4x128xf32>
    %953 = arith.mulf %952, %950 : vector<1x4x128xf32>
    %954 = arith.addf %948, %953 : vector<1x4x128xf32>
    %c2_i32_174 = arith.constant 2 : i32
    %955 = tpu.dynamic_rotate %949 by %c2_i32_174 dim 2 : vector<1x4x128xf32>, i32 -> vector<1x4x128xf32>
    %c85 = arith.constant 85 : index
    %956 = memref.load %arg1[%c85] : memref<294xf32, #tpu.memory_space<smem>>
    %957 = vector.broadcast %956 : f32 to vector<1x4x128xf32>
    %958 = arith.mulf %957, %955 : vector<1x4x128xf32>
    %959 = arith.addf %954, %958 : vector<1x4x128xf32>
    %c1_i32_175 = arith.constant 1 : i32
    %960 = tpu.dynamic_rotate %949 by %c1_i32_175 dim 2 : vector<1x4x128xf32>, i32 -> vector<1x4x128xf32>
    %c86 = arith.constant 86 : index
    %961 = memref.load %arg1[%c86] : memref<294xf32, #tpu.memory_space<smem>>
    %962 = vector.broadcast %961 : f32 to vector<1x4x128xf32>
    %963 = arith.mulf %962, %960 : vector<1x4x128xf32>
    %964 = arith.addf %959, %963 : vector<1x4x128xf32>
    %c87 = arith.constant 87 : index
    %965 = memref.load %arg1[%c87] : memref<294xf32, #tpu.memory_space<smem>>
    %966 = vector.broadcast %965 : f32 to vector<1x4x128xf32>
    %967 = arith.mulf %966, %949 : vector<1x4x128xf32>
    %968 = arith.addf %964, %967 : vector<1x4x128xf32>
    %c127_i32_176 = arith.constant 127 : i32
    %969 = tpu.dynamic_rotate %949 by %c127_i32_176 dim 2 : vector<1x4x128xf32>, i32 -> vector<1x4x128xf32>
    %c88 = arith.constant 88 : index
    %970 = memref.load %arg1[%c88] : memref<294xf32, #tpu.memory_space<smem>>
    %971 = vector.broadcast %970 : f32 to vector<1x4x128xf32>
    %972 = arith.mulf %971, %969 : vector<1x4x128xf32>
    %973 = arith.addf %968, %972 : vector<1x4x128xf32>
    %c126_i32_177 = arith.constant 126 : i32
    %974 = tpu.dynamic_rotate %949 by %c126_i32_177 dim 2 : vector<1x4x128xf32>, i32 -> vector<1x4x128xf32>
    %c89 = arith.constant 89 : index
    %975 = memref.load %arg1[%c89] : memref<294xf32, #tpu.memory_space<smem>>
    %976 = vector.broadcast %975 : f32 to vector<1x4x128xf32>
    %977 = arith.mulf %976, %974 : vector<1x4x128xf32>
    %978 = arith.addf %973, %977 : vector<1x4x128xf32>
    %c125_i32_178 = arith.constant 125 : i32
    %979 = tpu.dynamic_rotate %949 by %c125_i32_178 dim 2 : vector<1x4x128xf32>, i32 -> vector<1x4x128xf32>
    %c90 = arith.constant 90 : index
    %980 = memref.load %arg1[%c90] : memref<294xf32, #tpu.memory_space<smem>>
    %981 = vector.broadcast %980 : f32 to vector<1x4x128xf32>
    %982 = arith.mulf %981, %979 : vector<1x4x128xf32>
    %983 = arith.addf %978, %982 : vector<1x4x128xf32>
    %984 = vector.extract_strided_slice %773 {offsets = [0, 6, 0], sizes = [1, 4, 128], strides = [1, 1, 1]} : vector<1x10x128xf32> to vector<1x4x128xf32>
    %c3_i32_179 = arith.constant 3 : i32
    %985 = tpu.dynamic_rotate %984 by %c3_i32_179 dim 2 : vector<1x4x128xf32>, i32 -> vector<1x4x128xf32>
    %c91 = arith.constant 91 : index
    %986 = memref.load %arg1[%c91] : memref<294xf32, #tpu.memory_space<smem>>
    %987 = vector.broadcast %986 : f32 to vector<1x4x128xf32>
    %988 = arith.mulf %987, %985 : vector<1x4x128xf32>
    %989 = arith.addf %983, %988 : vector<1x4x128xf32>
    %c2_i32_180 = arith.constant 2 : i32
    %990 = tpu.dynamic_rotate %984 by %c2_i32_180 dim 2 : vector<1x4x128xf32>, i32 -> vector<1x4x128xf32>
    %c92 = arith.constant 92 : index
    %991 = memref.load %arg1[%c92] : memref<294xf32, #tpu.memory_space<smem>>
    %992 = vector.broadcast %991 : f32 to vector<1x4x128xf32>
    %993 = arith.mulf %992, %990 : vector<1x4x128xf32>
    %994 = arith.addf %989, %993 : vector<1x4x128xf32>
    %c1_i32_181 = arith.constant 1 : i32
    %995 = tpu.dynamic_rotate %984 by %c1_i32_181 dim 2 : vector<1x4x128xf32>, i32 -> vector<1x4x128xf32>
    %c93 = arith.constant 93 : index
    %996 = memref.load %arg1[%c93] : memref<294xf32, #tpu.memory_space<smem>>
    %997 = vector.broadcast %996 : f32 to vector<1x4x128xf32>
    %998 = arith.mulf %997, %995 : vector<1x4x128xf32>
    %999 = arith.addf %994, %998 : vector<1x4x128xf32>
    %c94 = arith.constant 94 : index
    %1000 = memref.load %arg1[%c94] : memref<294xf32, #tpu.memory_space<smem>>
    %1001 = vector.broadcast %1000 : f32 to vector<1x4x128xf32>
    %1002 = arith.mulf %1001, %984 : vector<1x4x128xf32>
    %1003 = arith.addf %999, %1002 : vector<1x4x128xf32>
    %c127_i32_182 = arith.constant 127 : i32
    %1004 = tpu.dynamic_rotate %984 by %c127_i32_182 dim 2 : vector<1x4x128xf32>, i32 -> vector<1x4x128xf32>
    %c95 = arith.constant 95 : index
    %1005 = memref.load %arg1[%c95] : memref<294xf32, #tpu.memory_space<smem>>
    %1006 = vector.broadcast %1005 : f32 to vector<1x4x128xf32>
    %1007 = arith.mulf %1006, %1004 : vector<1x4x128xf32>
    %1008 = arith.addf %1003, %1007 : vector<1x4x128xf32>
    %c126_i32_183 = arith.constant 126 : i32
    %1009 = tpu.dynamic_rotate %984 by %c126_i32_183 dim 2 : vector<1x4x128xf32>, i32 -> vector<1x4x128xf32>
    %c96 = arith.constant 96 : index
    %1010 = memref.load %arg1[%c96] : memref<294xf32, #tpu.memory_space<smem>>
    %1011 = vector.broadcast %1010 : f32 to vector<1x4x128xf32>
    %1012 = arith.mulf %1011, %1009 : vector<1x4x128xf32>
    %1013 = arith.addf %1008, %1012 : vector<1x4x128xf32>
    %c125_i32_184 = arith.constant 125 : i32
    %1014 = tpu.dynamic_rotate %984 by %c125_i32_184 dim 2 : vector<1x4x128xf32>, i32 -> vector<1x4x128xf32>
    %c97 = arith.constant 97 : index
    %1015 = memref.load %arg1[%c97] : memref<294xf32, #tpu.memory_space<smem>>
    %1016 = vector.broadcast %1015 : f32 to vector<1x4x128xf32>
    %1017 = arith.mulf %1016, %1014 : vector<1x4x128xf32>
    %1018 = arith.addf %1013, %1017 : vector<1x4x128xf32>
    %1019 = vector.extract_strided_slice %1018 {offsets = [0, 0, 0], sizes = [1, 4, 16], strides = [1, 1, 1]} : vector<1x4x128xf32> to vector<1x4x16xf32>
    %1020 = vector.broadcast %519 : f32 to vector<1x4x16xf32>
    %1021 = arith.addf %1019, %1020 : vector<1x4x16xf32>
    %1022 = arith.negf %1021 : vector<1x4x16xf32>
    %1023 = math.exp %1022 : vector<1x4x16xf32>
    %cst_185 = arith.constant 1.000000e+00 : f32
    %1024 = vector.broadcast %cst_185 : f32 to vector<1x4x16xf32>
    %1025 = arith.addf %1024, %1023 : vector<1x4x16xf32>
    %1026 = arith.divf %1024, %1025 : vector<1x4x16xf32>
    %cst_186 = arith.constant 0.333333343 : f32
    %1027 = vector.broadcast %cst_186 : f32 to vector<1x4x16xf32>
    %1028 = arith.mulf %1026, %1027 : vector<1x4x16xf32>
    %cst_187 = arith.constant dense<0xFF800000> : vector<1x4x16xf32>
    %1029 = vector.multi_reduction <maximumf>, %0, %cst_187 [3] : vector<1x4x16x16xf32> to vector<1x4x16xf32>
    %cst_188 = arith.constant dense<0.000000e+00> : vector<1x4x16xf32>
    %1030 = vector.multi_reduction <add>, %0, %cst_188 [3] : vector<1x4x16x16xf32> to vector<1x4x16xf32>
    %cst_189 = arith.constant 6.250000e-02 : f32
    %1031 = vector.broadcast %cst_189 : f32 to vector<1x4x16xf32>
    %1032 = arith.mulf %1030, %1031 : vector<1x4x16xf32>
    %c1_190 = arith.constant 1 : index
    %1033 = memref.load %arg2[%c1_190] : memref<3xf32, #tpu.memory_space<smem>>
    %cst_191 = arith.constant 0.000000e+00 : f32
    %1034 = vector.broadcast %cst_191 : f32 to vector<1x4x128xf32>
    %cst_192 = arith.constant 0.000000e+00 : f32
    %1035 = vector.broadcast %cst_192 : f32 to vector<1x4x112xf32>
    %1036 = tpu.concatenate %1029, %1035 in 2 : vector<1x4x16xf32>, vector<1x4x112xf32> -> vector<1x4x128xf32>
    %cst_193 = arith.constant 0.000000e+00 : f32
    %1037 = vector.broadcast %cst_193 : f32 to vector<1x3x128xf32>
    %1038 = tpu.concatenate %1037, %1036, %1037 in 1 : vector<1x3x128xf32>, vector<1x4x128xf32>, vector<1x3x128xf32> -> vector<1x10x128xf32>
    %1039 = vector.extract_strided_slice %1038 {offsets = [0, 0, 0], sizes = [1, 4, 128], strides = [1, 1, 1]} : vector<1x10x128xf32> to vector<1x4x128xf32>
    %c3_i32_194 = arith.constant 3 : i32
    %1040 = tpu.dynamic_rotate %1039 by %c3_i32_194 dim 2 : vector<1x4x128xf32>, i32 -> vector<1x4x128xf32>
    %c98 = arith.constant 98 : index
    %1041 = memref.load %arg1[%c98] : memref<294xf32, #tpu.memory_space<smem>>
    %1042 = vector.broadcast %1041 : f32 to vector<1x4x128xf32>
    %1043 = arith.mulf %1042, %1040 : vector<1x4x128xf32>
    %1044 = arith.addf %1034, %1043 : vector<1x4x128xf32>
    %c2_i32_195 = arith.constant 2 : i32
    %1045 = tpu.dynamic_rotate %1039 by %c2_i32_195 dim 2 : vector<1x4x128xf32>, i32 -> vector<1x4x128xf32>
    %c99 = arith.constant 99 : index
    %1046 = memref.load %arg1[%c99] : memref<294xf32, #tpu.memory_space<smem>>
    %1047 = vector.broadcast %1046 : f32 to vector<1x4x128xf32>
    %1048 = arith.mulf %1047, %1045 : vector<1x4x128xf32>
    %1049 = arith.addf %1044, %1048 : vector<1x4x128xf32>
    %c1_i32_196 = arith.constant 1 : i32
    %1050 = tpu.dynamic_rotate %1039 by %c1_i32_196 dim 2 : vector<1x4x128xf32>, i32 -> vector<1x4x128xf32>
    %c100 = arith.constant 100 : index
    %1051 = memref.load %arg1[%c100] : memref<294xf32, #tpu.memory_space<smem>>
    %1052 = vector.broadcast %1051 : f32 to vector<1x4x128xf32>
    %1053 = arith.mulf %1052, %1050 : vector<1x4x128xf32>
    %1054 = arith.addf %1049, %1053 : vector<1x4x128xf32>
    %c101 = arith.constant 101 : index
    %1055 = memref.load %arg1[%c101] : memref<294xf32, #tpu.memory_space<smem>>
    %1056 = vector.broadcast %1055 : f32 to vector<1x4x128xf32>
    %1057 = arith.mulf %1056, %1039 : vector<1x4x128xf32>
    %1058 = arith.addf %1054, %1057 : vector<1x4x128xf32>
    %c127_i32_197 = arith.constant 127 : i32
    %1059 = tpu.dynamic_rotate %1039 by %c127_i32_197 dim 2 : vector<1x4x128xf32>, i32 -> vector<1x4x128xf32>
    %c102 = arith.constant 102 : index
    %1060 = memref.load %arg1[%c102] : memref<294xf32, #tpu.memory_space<smem>>
    %1061 = vector.broadcast %1060 : f32 to vector<1x4x128xf32>
    %1062 = arith.mulf %1061, %1059 : vector<1x4x128xf32>
    %1063 = arith.addf %1058, %1062 : vector<1x4x128xf32>
    %c126_i32_198 = arith.constant 126 : i32
    %1064 = tpu.dynamic_rotate %1039 by %c126_i32_198 dim 2 : vector<1x4x128xf32>, i32 -> vector<1x4x128xf32>
    %c103 = arith.constant 103 : index
    %1065 = memref.load %arg1[%c103] : memref<294xf32, #tpu.memory_space<smem>>
    %1066 = vector.broadcast %1065 : f32 to vector<1x4x128xf32>
    %1067 = arith.mulf %1066, %1064 : vector<1x4x128xf32>
    %1068 = arith.addf %1063, %1067 : vector<1x4x128xf32>
    %c125_i32_199 = arith.constant 125 : i32
    %1069 = tpu.dynamic_rotate %1039 by %c125_i32_199 dim 2 : vector<1x4x128xf32>, i32 -> vector<1x4x128xf32>
    %c104 = arith.constant 104 : index
    %1070 = memref.load %arg1[%c104] : memref<294xf32, #tpu.memory_space<smem>>
    %1071 = vector.broadcast %1070 : f32 to vector<1x4x128xf32>
    %1072 = arith.mulf %1071, %1069 : vector<1x4x128xf32>
    %1073 = arith.addf %1068, %1072 : vector<1x4x128xf32>
    %1074 = vector.extract_strided_slice %1038 {offsets = [0, 1, 0], sizes = [1, 4, 128], strides = [1, 1, 1]} : vector<1x10x128xf32> to vector<1x4x128xf32>
    %c3_i32_200 = arith.constant 3 : i32
    %1075 = tpu.dynamic_rotate %1074 by %c3_i32_200 dim 2 : vector<1x4x128xf32>, i32 -> vector<1x4x128xf32>
    %c105 = arith.constant 105 : index
    %1076 = memref.load %arg1[%c105] : memref<294xf32, #tpu.memory_space<smem>>
    %1077 = vector.broadcast %1076 : f32 to vector<1x4x128xf32>
    %1078 = arith.mulf %1077, %1075 : vector<1x4x128xf32>
    %1079 = arith.addf %1073, %1078 : vector<1x4x128xf32>
    %c2_i32_201 = arith.constant 2 : i32
    %1080 = tpu.dynamic_rotate %1074 by %c2_i32_201 dim 2 : vector<1x4x128xf32>, i32 -> vector<1x4x128xf32>
    %c106 = arith.constant 106 : index
    %1081 = memref.load %arg1[%c106] : memref<294xf32, #tpu.memory_space<smem>>
    %1082 = vector.broadcast %1081 : f32 to vector<1x4x128xf32>
    %1083 = arith.mulf %1082, %1080 : vector<1x4x128xf32>
    %1084 = arith.addf %1079, %1083 : vector<1x4x128xf32>
    %c1_i32_202 = arith.constant 1 : i32
    %1085 = tpu.dynamic_rotate %1074 by %c1_i32_202 dim 2 : vector<1x4x128xf32>, i32 -> vector<1x4x128xf32>
    %c107 = arith.constant 107 : index
    %1086 = memref.load %arg1[%c107] : memref<294xf32, #tpu.memory_space<smem>>
    %1087 = vector.broadcast %1086 : f32 to vector<1x4x128xf32>
    %1088 = arith.mulf %1087, %1085 : vector<1x4x128xf32>
    %1089 = arith.addf %1084, %1088 : vector<1x4x128xf32>
    %c108 = arith.constant 108 : index
    %1090 = memref.load %arg1[%c108] : memref<294xf32, #tpu.memory_space<smem>>
    %1091 = vector.broadcast %1090 : f32 to vector<1x4x128xf32>
    %1092 = arith.mulf %1091, %1074 : vector<1x4x128xf32>
    %1093 = arith.addf %1089, %1092 : vector<1x4x128xf32>
    %c127_i32_203 = arith.constant 127 : i32
    %1094 = tpu.dynamic_rotate %1074 by %c127_i32_203 dim 2 : vector<1x4x128xf32>, i32 -> vector<1x4x128xf32>
    %c109 = arith.constant 109 : index
    %1095 = memref.load %arg1[%c109] : memref<294xf32, #tpu.memory_space<smem>>
    %1096 = vector.broadcast %1095 : f32 to vector<1x4x128xf32>
    %1097 = arith.mulf %1096, %1094 : vector<1x4x128xf32>
    %1098 = arith.addf %1093, %1097 : vector<1x4x128xf32>
    %c126_i32_204 = arith.constant 126 : i32
    %1099 = tpu.dynamic_rotate %1074 by %c126_i32_204 dim 2 : vector<1x4x128xf32>, i32 -> vector<1x4x128xf32>
    %c110 = arith.constant 110 : index
    %1100 = memref.load %arg1[%c110] : memref<294xf32, #tpu.memory_space<smem>>
    %1101 = vector.broadcast %1100 : f32 to vector<1x4x128xf32>
    %1102 = arith.mulf %1101, %1099 : vector<1x4x128xf32>
    %1103 = arith.addf %1098, %1102 : vector<1x4x128xf32>
    %c125_i32_205 = arith.constant 125 : i32
    %1104 = tpu.dynamic_rotate %1074 by %c125_i32_205 dim 2 : vector<1x4x128xf32>, i32 -> vector<1x4x128xf32>
    %c111 = arith.constant 111 : index
    %1105 = memref.load %arg1[%c111] : memref<294xf32, #tpu.memory_space<smem>>
    %1106 = vector.broadcast %1105 : f32 to vector<1x4x128xf32>
    %1107 = arith.mulf %1106, %1104 : vector<1x4x128xf32>
    %1108 = arith.addf %1103, %1107 : vector<1x4x128xf32>
    %1109 = vector.extract_strided_slice %1038 {offsets = [0, 2, 0], sizes = [1, 4, 128], strides = [1, 1, 1]} : vector<1x10x128xf32> to vector<1x4x128xf32>
    %c3_i32_206 = arith.constant 3 : i32
    %1110 = tpu.dynamic_rotate %1109 by %c3_i32_206 dim 2 : vector<1x4x128xf32>, i32 -> vector<1x4x128xf32>
    %c112 = arith.constant 112 : index
    %1111 = memref.load %arg1[%c112] : memref<294xf32, #tpu.memory_space<smem>>
    %1112 = vector.broadcast %1111 : f32 to vector<1x4x128xf32>
    %1113 = arith.mulf %1112, %1110 : vector<1x4x128xf32>
    %1114 = arith.addf %1108, %1113 : vector<1x4x128xf32>
    %c2_i32_207 = arith.constant 2 : i32
    %1115 = tpu.dynamic_rotate %1109 by %c2_i32_207 dim 2 : vector<1x4x128xf32>, i32 -> vector<1x4x128xf32>
    %c113 = arith.constant 113 : index
    %1116 = memref.load %arg1[%c113] : memref<294xf32, #tpu.memory_space<smem>>
    %1117 = vector.broadcast %1116 : f32 to vector<1x4x128xf32>
    %1118 = arith.mulf %1117, %1115 : vector<1x4x128xf32>
    %1119 = arith.addf %1114, %1118 : vector<1x4x128xf32>
    %c1_i32_208 = arith.constant 1 : i32
    %1120 = tpu.dynamic_rotate %1109 by %c1_i32_208 dim 2 : vector<1x4x128xf32>, i32 -> vector<1x4x128xf32>
    %c114 = arith.constant 114 : index
    %1121 = memref.load %arg1[%c114] : memref<294xf32, #tpu.memory_space<smem>>
    %1122 = vector.broadcast %1121 : f32 to vector<1x4x128xf32>
    %1123 = arith.mulf %1122, %1120 : vector<1x4x128xf32>
    %1124 = arith.addf %1119, %1123 : vector<1x4x128xf32>
    %c115 = arith.constant 115 : index
    %1125 = memref.load %arg1[%c115] : memref<294xf32, #tpu.memory_space<smem>>
    %1126 = vector.broadcast %1125 : f32 to vector<1x4x128xf32>
    %1127 = arith.mulf %1126, %1109 : vector<1x4x128xf32>
    %1128 = arith.addf %1124, %1127 : vector<1x4x128xf32>
    %c127_i32_209 = arith.constant 127 : i32
    %1129 = tpu.dynamic_rotate %1109 by %c127_i32_209 dim 2 : vector<1x4x128xf32>, i32 -> vector<1x4x128xf32>
    %c116 = arith.constant 116 : index
    %1130 = memref.load %arg1[%c116] : memref<294xf32, #tpu.memory_space<smem>>
    %1131 = vector.broadcast %1130 : f32 to vector<1x4x128xf32>
    %1132 = arith.mulf %1131, %1129 : vector<1x4x128xf32>
    %1133 = arith.addf %1128, %1132 : vector<1x4x128xf32>
    %c126_i32_210 = arith.constant 126 : i32
    %1134 = tpu.dynamic_rotate %1109 by %c126_i32_210 dim 2 : vector<1x4x128xf32>, i32 -> vector<1x4x128xf32>
    %c117 = arith.constant 117 : index
    %1135 = memref.load %arg1[%c117] : memref<294xf32, #tpu.memory_space<smem>>
    %1136 = vector.broadcast %1135 : f32 to vector<1x4x128xf32>
    %1137 = arith.mulf %1136, %1134 : vector<1x4x128xf32>
    %1138 = arith.addf %1133, %1137 : vector<1x4x128xf32>
    %c125_i32_211 = arith.constant 125 : i32
    %1139 = tpu.dynamic_rotate %1109 by %c125_i32_211 dim 2 : vector<1x4x128xf32>, i32 -> vector<1x4x128xf32>
    %c118 = arith.constant 118 : index
    %1140 = memref.load %arg1[%c118] : memref<294xf32, #tpu.memory_space<smem>>
    %1141 = vector.broadcast %1140 : f32 to vector<1x4x128xf32>
    %1142 = arith.mulf %1141, %1139 : vector<1x4x128xf32>
    %1143 = arith.addf %1138, %1142 : vector<1x4x128xf32>
    %1144 = vector.extract_strided_slice %1038 {offsets = [0, 3, 0], sizes = [1, 4, 128], strides = [1, 1, 1]} : vector<1x10x128xf32> to vector<1x4x128xf32>
    %c3_i32_212 = arith.constant 3 : i32
    %1145 = tpu.dynamic_rotate %1144 by %c3_i32_212 dim 2 : vector<1x4x128xf32>, i32 -> vector<1x4x128xf32>
    %c119 = arith.constant 119 : index
    %1146 = memref.load %arg1[%c119] : memref<294xf32, #tpu.memory_space<smem>>
    %1147 = vector.broadcast %1146 : f32 to vector<1x4x128xf32>
    %1148 = arith.mulf %1147, %1145 : vector<1x4x128xf32>
    %1149 = arith.addf %1143, %1148 : vector<1x4x128xf32>
    %c2_i32_213 = arith.constant 2 : i32
    %1150 = tpu.dynamic_rotate %1144 by %c2_i32_213 dim 2 : vector<1x4x128xf32>, i32 -> vector<1x4x128xf32>
    %c120 = arith.constant 120 : index
    %1151 = memref.load %arg1[%c120] : memref<294xf32, #tpu.memory_space<smem>>
    %1152 = vector.broadcast %1151 : f32 to vector<1x4x128xf32>
    %1153 = arith.mulf %1152, %1150 : vector<1x4x128xf32>
    %1154 = arith.addf %1149, %1153 : vector<1x4x128xf32>
    %c1_i32_214 = arith.constant 1 : i32
    %1155 = tpu.dynamic_rotate %1144 by %c1_i32_214 dim 2 : vector<1x4x128xf32>, i32 -> vector<1x4x128xf32>
    %c121 = arith.constant 121 : index
    %1156 = memref.load %arg1[%c121] : memref<294xf32, #tpu.memory_space<smem>>
    %1157 = vector.broadcast %1156 : f32 to vector<1x4x128xf32>
    %1158 = arith.mulf %1157, %1155 : vector<1x4x128xf32>
    %1159 = arith.addf %1154, %1158 : vector<1x4x128xf32>
    %c122 = arith.constant 122 : index
    %1160 = memref.load %arg1[%c122] : memref<294xf32, #tpu.memory_space<smem>>
    %1161 = vector.broadcast %1160 : f32 to vector<1x4x128xf32>
    %1162 = arith.mulf %1161, %1144 : vector<1x4x128xf32>
    %1163 = arith.addf %1159, %1162 : vector<1x4x128xf32>
    %c127_i32_215 = arith.constant 127 : i32
    %1164 = tpu.dynamic_rotate %1144 by %c127_i32_215 dim 2 : vector<1x4x128xf32>, i32 -> vector<1x4x128xf32>
    %c123 = arith.constant 123 : index
    %1165 = memref.load %arg1[%c123] : memref<294xf32, #tpu.memory_space<smem>>
    %1166 = vector.broadcast %1165 : f32 to vector<1x4x128xf32>
    %1167 = arith.mulf %1166, %1164 : vector<1x4x128xf32>
    %1168 = arith.addf %1163, %1167 : vector<1x4x128xf32>
    %c126_i32_216 = arith.constant 126 : i32
    %1169 = tpu.dynamic_rotate %1144 by %c126_i32_216 dim 2 : vector<1x4x128xf32>, i32 -> vector<1x4x128xf32>
    %c124 = arith.constant 124 : index
    %1170 = memref.load %arg1[%c124] : memref<294xf32, #tpu.memory_space<smem>>
    %1171 = vector.broadcast %1170 : f32 to vector<1x4x128xf32>
    %1172 = arith.mulf %1171, %1169 : vector<1x4x128xf32>
    %1173 = arith.addf %1168, %1172 : vector<1x4x128xf32>
    %c125_i32_217 = arith.constant 125 : i32
    %1174 = tpu.dynamic_rotate %1144 by %c125_i32_217 dim 2 : vector<1x4x128xf32>, i32 -> vector<1x4x128xf32>
    %c125 = arith.constant 125 : index
    %1175 = memref.load %arg1[%c125] : memref<294xf32, #tpu.memory_space<smem>>
    %1176 = vector.broadcast %1175 : f32 to vector<1x4x128xf32>
    %1177 = arith.mulf %1176, %1174 : vector<1x4x128xf32>
    %1178 = arith.addf %1173, %1177 : vector<1x4x128xf32>
    %1179 = vector.extract_strided_slice %1038 {offsets = [0, 4, 0], sizes = [1, 4, 128], strides = [1, 1, 1]} : vector<1x10x128xf32> to vector<1x4x128xf32>
    %c3_i32_218 = arith.constant 3 : i32
    %1180 = tpu.dynamic_rotate %1179 by %c3_i32_218 dim 2 : vector<1x4x128xf32>, i32 -> vector<1x4x128xf32>
    %c126 = arith.constant 126 : index
    %1181 = memref.load %arg1[%c126] : memref<294xf32, #tpu.memory_space<smem>>
    %1182 = vector.broadcast %1181 : f32 to vector<1x4x128xf32>
    %1183 = arith.mulf %1182, %1180 : vector<1x4x128xf32>
    %1184 = arith.addf %1178, %1183 : vector<1x4x128xf32>
    %c2_i32_219 = arith.constant 2 : i32
    %1185 = tpu.dynamic_rotate %1179 by %c2_i32_219 dim 2 : vector<1x4x128xf32>, i32 -> vector<1x4x128xf32>
    %c127 = arith.constant 127 : index
    %1186 = memref.load %arg1[%c127] : memref<294xf32, #tpu.memory_space<smem>>
    %1187 = vector.broadcast %1186 : f32 to vector<1x4x128xf32>
    %1188 = arith.mulf %1187, %1185 : vector<1x4x128xf32>
    %1189 = arith.addf %1184, %1188 : vector<1x4x128xf32>
    %c1_i32_220 = arith.constant 1 : i32
    %1190 = tpu.dynamic_rotate %1179 by %c1_i32_220 dim 2 : vector<1x4x128xf32>, i32 -> vector<1x4x128xf32>
    %c128 = arith.constant 128 : index
    %1191 = memref.load %arg1[%c128] : memref<294xf32, #tpu.memory_space<smem>>
    %1192 = vector.broadcast %1191 : f32 to vector<1x4x128xf32>
    %1193 = arith.mulf %1192, %1190 : vector<1x4x128xf32>
    %1194 = arith.addf %1189, %1193 : vector<1x4x128xf32>
    %c129 = arith.constant 129 : index
    %1195 = memref.load %arg1[%c129] : memref<294xf32, #tpu.memory_space<smem>>
    %1196 = vector.broadcast %1195 : f32 to vector<1x4x128xf32>
    %1197 = arith.mulf %1196, %1179 : vector<1x4x128xf32>
    %1198 = arith.addf %1194, %1197 : vector<1x4x128xf32>
    %c127_i32_221 = arith.constant 127 : i32
    %1199 = tpu.dynamic_rotate %1179 by %c127_i32_221 dim 2 : vector<1x4x128xf32>, i32 -> vector<1x4x128xf32>
    %c130 = arith.constant 130 : index
    %1200 = memref.load %arg1[%c130] : memref<294xf32, #tpu.memory_space<smem>>
    %1201 = vector.broadcast %1200 : f32 to vector<1x4x128xf32>
    %1202 = arith.mulf %1201, %1199 : vector<1x4x128xf32>
    %1203 = arith.addf %1198, %1202 : vector<1x4x128xf32>
    %c126_i32_222 = arith.constant 126 : i32
    %1204 = tpu.dynamic_rotate %1179 by %c126_i32_222 dim 2 : vector<1x4x128xf32>, i32 -> vector<1x4x128xf32>
    %c131 = arith.constant 131 : index
    %1205 = memref.load %arg1[%c131] : memref<294xf32, #tpu.memory_space<smem>>
    %1206 = vector.broadcast %1205 : f32 to vector<1x4x128xf32>
    %1207 = arith.mulf %1206, %1204 : vector<1x4x128xf32>
    %1208 = arith.addf %1203, %1207 : vector<1x4x128xf32>
    %c125_i32_223 = arith.constant 125 : i32
    %1209 = tpu.dynamic_rotate %1179 by %c125_i32_223 dim 2 : vector<1x4x128xf32>, i32 -> vector<1x4x128xf32>
    %c132 = arith.constant 132 : index
    %1210 = memref.load %arg1[%c132] : memref<294xf32, #tpu.memory_space<smem>>
    %1211 = vector.broadcast %1210 : f32 to vector<1x4x128xf32>
    %1212 = arith.mulf %1211, %1209 : vector<1x4x128xf32>
    %1213 = arith.addf %1208, %1212 : vector<1x4x128xf32>
    %1214 = vector.extract_strided_slice %1038 {offsets = [0, 5, 0], sizes = [1, 4, 128], strides = [1, 1, 1]} : vector<1x10x128xf32> to vector<1x4x128xf32>
    %c3_i32_224 = arith.constant 3 : i32
    %1215 = tpu.dynamic_rotate %1214 by %c3_i32_224 dim 2 : vector<1x4x128xf32>, i32 -> vector<1x4x128xf32>
    %c133 = arith.constant 133 : index
    %1216 = memref.load %arg1[%c133] : memref<294xf32, #tpu.memory_space<smem>>
    %1217 = vector.broadcast %1216 : f32 to vector<1x4x128xf32>
    %1218 = arith.mulf %1217, %1215 : vector<1x4x128xf32>
    %1219 = arith.addf %1213, %1218 : vector<1x4x128xf32>
    %c2_i32_225 = arith.constant 2 : i32
    %1220 = tpu.dynamic_rotate %1214 by %c2_i32_225 dim 2 : vector<1x4x128xf32>, i32 -> vector<1x4x128xf32>
    %c134 = arith.constant 134 : index
    %1221 = memref.load %arg1[%c134] : memref<294xf32, #tpu.memory_space<smem>>
    %1222 = vector.broadcast %1221 : f32 to vector<1x4x128xf32>
    %1223 = arith.mulf %1222, %1220 : vector<1x4x128xf32>
    %1224 = arith.addf %1219, %1223 : vector<1x4x128xf32>
    %c1_i32_226 = arith.constant 1 : i32
    %1225 = tpu.dynamic_rotate %1214 by %c1_i32_226 dim 2 : vector<1x4x128xf32>, i32 -> vector<1x4x128xf32>
    %c135 = arith.constant 135 : index
    %1226 = memref.load %arg1[%c135] : memref<294xf32, #tpu.memory_space<smem>>
    %1227 = vector.broadcast %1226 : f32 to vector<1x4x128xf32>
    %1228 = arith.mulf %1227, %1225 : vector<1x4x128xf32>
    %1229 = arith.addf %1224, %1228 : vector<1x4x128xf32>
    %c136 = arith.constant 136 : index
    %1230 = memref.load %arg1[%c136] : memref<294xf32, #tpu.memory_space<smem>>
    %1231 = vector.broadcast %1230 : f32 to vector<1x4x128xf32>
    %1232 = arith.mulf %1231, %1214 : vector<1x4x128xf32>
    %1233 = arith.addf %1229, %1232 : vector<1x4x128xf32>
    %c127_i32_227 = arith.constant 127 : i32
    %1234 = tpu.dynamic_rotate %1214 by %c127_i32_227 dim 2 : vector<1x4x128xf32>, i32 -> vector<1x4x128xf32>
    %c137 = arith.constant 137 : index
    %1235 = memref.load %arg1[%c137] : memref<294xf32, #tpu.memory_space<smem>>
    %1236 = vector.broadcast %1235 : f32 to vector<1x4x128xf32>
    %1237 = arith.mulf %1236, %1234 : vector<1x4x128xf32>
    %1238 = arith.addf %1233, %1237 : vector<1x4x128xf32>
    %c126_i32_228 = arith.constant 126 : i32
    %1239 = tpu.dynamic_rotate %1214 by %c126_i32_228 dim 2 : vector<1x4x128xf32>, i32 -> vector<1x4x128xf32>
    %c138 = arith.constant 138 : index
    %1240 = memref.load %arg1[%c138] : memref<294xf32, #tpu.memory_space<smem>>
    %1241 = vector.broadcast %1240 : f32 to vector<1x4x128xf32>
    %1242 = arith.mulf %1241, %1239 : vector<1x4x128xf32>
    %1243 = arith.addf %1238, %1242 : vector<1x4x128xf32>
    %c125_i32_229 = arith.constant 125 : i32
    %1244 = tpu.dynamic_rotate %1214 by %c125_i32_229 dim 2 : vector<1x4x128xf32>, i32 -> vector<1x4x128xf32>
    %c139 = arith.constant 139 : index
    %1245 = memref.load %arg1[%c139] : memref<294xf32, #tpu.memory_space<smem>>
    %1246 = vector.broadcast %1245 : f32 to vector<1x4x128xf32>
    %1247 = arith.mulf %1246, %1244 : vector<1x4x128xf32>
    %1248 = arith.addf %1243, %1247 : vector<1x4x128xf32>
    %1249 = vector.extract_strided_slice %1038 {offsets = [0, 6, 0], sizes = [1, 4, 128], strides = [1, 1, 1]} : vector<1x10x128xf32> to vector<1x4x128xf32>
    %c3_i32_230 = arith.constant 3 : i32
    %1250 = tpu.dynamic_rotate %1249 by %c3_i32_230 dim 2 : vector<1x4x128xf32>, i32 -> vector<1x4x128xf32>
    %c140 = arith.constant 140 : index
    %1251 = memref.load %arg1[%c140] : memref<294xf32, #tpu.memory_space<smem>>
    %1252 = vector.broadcast %1251 : f32 to vector<1x4x128xf32>
    %1253 = arith.mulf %1252, %1250 : vector<1x4x128xf32>
    %1254 = arith.addf %1248, %1253 : vector<1x4x128xf32>
    %c2_i32_231 = arith.constant 2 : i32
    %1255 = tpu.dynamic_rotate %1249 by %c2_i32_231 dim 2 : vector<1x4x128xf32>, i32 -> vector<1x4x128xf32>
    %c141 = arith.constant 141 : index
    %1256 = memref.load %arg1[%c141] : memref<294xf32, #tpu.memory_space<smem>>
    %1257 = vector.broadcast %1256 : f32 to vector<1x4x128xf32>
    %1258 = arith.mulf %1257, %1255 : vector<1x4x128xf32>
    %1259 = arith.addf %1254, %1258 : vector<1x4x128xf32>
    %c1_i32_232 = arith.constant 1 : i32
    %1260 = tpu.dynamic_rotate %1249 by %c1_i32_232 dim 2 : vector<1x4x128xf32>, i32 -> vector<1x4x128xf32>
    %c142 = arith.constant 142 : index
    %1261 = memref.load %arg1[%c142] : memref<294xf32, #tpu.memory_space<smem>>
    %1262 = vector.broadcast %1261 : f32 to vector<1x4x128xf32>
    %1263 = arith.mulf %1262, %1260 : vector<1x4x128xf32>
    %1264 = arith.addf %1259, %1263 : vector<1x4x128xf32>
    %c143 = arith.constant 143 : index
    %1265 = memref.load %arg1[%c143] : memref<294xf32, #tpu.memory_space<smem>>
    %1266 = vector.broadcast %1265 : f32 to vector<1x4x128xf32>
    %1267 = arith.mulf %1266, %1249 : vector<1x4x128xf32>
    %1268 = arith.addf %1264, %1267 : vector<1x4x128xf32>
    %c127_i32_233 = arith.constant 127 : i32
    %1269 = tpu.dynamic_rotate %1249 by %c127_i32_233 dim 2 : vector<1x4x128xf32>, i32 -> vector<1x4x128xf32>
    %c144 = arith.constant 144 : index
    %1270 = memref.load %arg1[%c144] : memref<294xf32, #tpu.memory_space<smem>>
    %1271 = vector.broadcast %1270 : f32 to vector<1x4x128xf32>
    %1272 = arith.mulf %1271, %1269 : vector<1x4x128xf32>
    %1273 = arith.addf %1268, %1272 : vector<1x4x128xf32>
    %c126_i32_234 = arith.constant 126 : i32
    %1274 = tpu.dynamic_rotate %1249 by %c126_i32_234 dim 2 : vector<1x4x128xf32>, i32 -> vector<1x4x128xf32>
    %c145 = arith.constant 145 : index
    %1275 = memref.load %arg1[%c145] : memref<294xf32, #tpu.memory_space<smem>>
    %1276 = vector.broadcast %1275 : f32 to vector<1x4x128xf32>
    %1277 = arith.mulf %1276, %1274 : vector<1x4x128xf32>
    %1278 = arith.addf %1273, %1277 : vector<1x4x128xf32>
    %c125_i32_235 = arith.constant 125 : i32
    %1279 = tpu.dynamic_rotate %1249 by %c125_i32_235 dim 2 : vector<1x4x128xf32>, i32 -> vector<1x4x128xf32>
    %c146 = arith.constant 146 : index
    %1280 = memref.load %arg1[%c146] : memref<294xf32, #tpu.memory_space<smem>>
    %1281 = vector.broadcast %1280 : f32 to vector<1x4x128xf32>
    %1282 = arith.mulf %1281, %1279 : vector<1x4x128xf32>
    %1283 = arith.addf %1278, %1282 : vector<1x4x128xf32>
    %cst_236 = arith.constant 0.000000e+00 : f32
    %1284 = vector.broadcast %cst_236 : f32 to vector<1x4x112xf32>
    %1285 = tpu.concatenate %1032, %1284 in 2 : vector<1x4x16xf32>, vector<1x4x112xf32> -> vector<1x4x128xf32>
    %cst_237 = arith.constant 0.000000e+00 : f32
    %1286 = vector.broadcast %cst_237 : f32 to vector<1x3x128xf32>
    %1287 = tpu.concatenate %1286, %1285, %1286 in 1 : vector<1x3x128xf32>, vector<1x4x128xf32>, vector<1x3x128xf32> -> vector<1x10x128xf32>
    %1288 = vector.extract_strided_slice %1287 {offsets = [0, 0, 0], sizes = [1, 4, 128], strides = [1, 1, 1]} : vector<1x10x128xf32> to vector<1x4x128xf32>
    %c3_i32_238 = arith.constant 3 : i32
    %1289 = tpu.dynamic_rotate %1288 by %c3_i32_238 dim 2 : vector<1x4x128xf32>, i32 -> vector<1x4x128xf32>
    %c147 = arith.constant 147 : index
    %1290 = memref.load %arg1[%c147] : memref<294xf32, #tpu.memory_space<smem>>
    %1291 = vector.broadcast %1290 : f32 to vector<1x4x128xf32>
    %1292 = arith.mulf %1291, %1289 : vector<1x4x128xf32>
    %1293 = arith.addf %1283, %1292 : vector<1x4x128xf32>
    %c2_i32_239 = arith.constant 2 : i32
    %1294 = tpu.dynamic_rotate %1288 by %c2_i32_239 dim 2 : vector<1x4x128xf32>, i32 -> vector<1x4x128xf32>
    %c148 = arith.constant 148 : index
    %1295 = memref.load %arg1[%c148] : memref<294xf32, #tpu.memory_space<smem>>
    %1296 = vector.broadcast %1295 : f32 to vector<1x4x128xf32>
    %1297 = arith.mulf %1296, %1294 : vector<1x4x128xf32>
    %1298 = arith.addf %1293, %1297 : vector<1x4x128xf32>
    %c1_i32_240 = arith.constant 1 : i32
    %1299 = tpu.dynamic_rotate %1288 by %c1_i32_240 dim 2 : vector<1x4x128xf32>, i32 -> vector<1x4x128xf32>
    %c149 = arith.constant 149 : index
    %1300 = memref.load %arg1[%c149] : memref<294xf32, #tpu.memory_space<smem>>
    %1301 = vector.broadcast %1300 : f32 to vector<1x4x128xf32>
    %1302 = arith.mulf %1301, %1299 : vector<1x4x128xf32>
    %1303 = arith.addf %1298, %1302 : vector<1x4x128xf32>
    %c150 = arith.constant 150 : index
    %1304 = memref.load %arg1[%c150] : memref<294xf32, #tpu.memory_space<smem>>
    %1305 = vector.broadcast %1304 : f32 to vector<1x4x128xf32>
    %1306 = arith.mulf %1305, %1288 : vector<1x4x128xf32>
    %1307 = arith.addf %1303, %1306 : vector<1x4x128xf32>
    %c127_i32_241 = arith.constant 127 : i32
    %1308 = tpu.dynamic_rotate %1288 by %c127_i32_241 dim 2 : vector<1x4x128xf32>, i32 -> vector<1x4x128xf32>
    %c151 = arith.constant 151 : index
    %1309 = memref.load %arg1[%c151] : memref<294xf32, #tpu.memory_space<smem>>
    %1310 = vector.broadcast %1309 : f32 to vector<1x4x128xf32>
    %1311 = arith.mulf %1310, %1308 : vector<1x4x128xf32>
    %1312 = arith.addf %1307, %1311 : vector<1x4x128xf32>
    %c126_i32_242 = arith.constant 126 : i32
    %1313 = tpu.dynamic_rotate %1288 by %c126_i32_242 dim 2 : vector<1x4x128xf32>, i32 -> vector<1x4x128xf32>
    %c152 = arith.constant 152 : index
    %1314 = memref.load %arg1[%c152] : memref<294xf32, #tpu.memory_space<smem>>
    %1315 = vector.broadcast %1314 : f32 to vector<1x4x128xf32>
    %1316 = arith.mulf %1315, %1313 : vector<1x4x128xf32>
    %1317 = arith.addf %1312, %1316 : vector<1x4x128xf32>
    %c125_i32_243 = arith.constant 125 : i32
    %1318 = tpu.dynamic_rotate %1288 by %c125_i32_243 dim 2 : vector<1x4x128xf32>, i32 -> vector<1x4x128xf32>
    %c153 = arith.constant 153 : index
    %1319 = memref.load %arg1[%c153] : memref<294xf32, #tpu.memory_space<smem>>
    %1320 = vector.broadcast %1319 : f32 to vector<1x4x128xf32>
    %1321 = arith.mulf %1320, %1318 : vector<1x4x128xf32>
    %1322 = arith.addf %1317, %1321 : vector<1x4x128xf32>
    %1323 = vector.extract_strided_slice %1287 {offsets = [0, 1, 0], sizes = [1, 4, 128], strides = [1, 1, 1]} : vector<1x10x128xf32> to vector<1x4x128xf32>
    %c3_i32_244 = arith.constant 3 : i32
    %1324 = tpu.dynamic_rotate %1323 by %c3_i32_244 dim 2 : vector<1x4x128xf32>, i32 -> vector<1x4x128xf32>
    %c154 = arith.constant 154 : index
    %1325 = memref.load %arg1[%c154] : memref<294xf32, #tpu.memory_space<smem>>
    %1326 = vector.broadcast %1325 : f32 to vector<1x4x128xf32>
    %1327 = arith.mulf %1326, %1324 : vector<1x4x128xf32>
    %1328 = arith.addf %1322, %1327 : vector<1x4x128xf32>
    %c2_i32_245 = arith.constant 2 : i32
    %1329 = tpu.dynamic_rotate %1323 by %c2_i32_245 dim 2 : vector<1x4x128xf32>, i32 -> vector<1x4x128xf32>
    %c155 = arith.constant 155 : index
    %1330 = memref.load %arg1[%c155] : memref<294xf32, #tpu.memory_space<smem>>
    %1331 = vector.broadcast %1330 : f32 to vector<1x4x128xf32>
    %1332 = arith.mulf %1331, %1329 : vector<1x4x128xf32>
    %1333 = arith.addf %1328, %1332 : vector<1x4x128xf32>
    %c1_i32_246 = arith.constant 1 : i32
    %1334 = tpu.dynamic_rotate %1323 by %c1_i32_246 dim 2 : vector<1x4x128xf32>, i32 -> vector<1x4x128xf32>
    %c156 = arith.constant 156 : index
    %1335 = memref.load %arg1[%c156] : memref<294xf32, #tpu.memory_space<smem>>
    %1336 = vector.broadcast %1335 : f32 to vector<1x4x128xf32>
    %1337 = arith.mulf %1336, %1334 : vector<1x4x128xf32>
    %1338 = arith.addf %1333, %1337 : vector<1x4x128xf32>
    %c157 = arith.constant 157 : index
    %1339 = memref.load %arg1[%c157] : memref<294xf32, #tpu.memory_space<smem>>
    %1340 = vector.broadcast %1339 : f32 to vector<1x4x128xf32>
    %1341 = arith.mulf %1340, %1323 : vector<1x4x128xf32>
    %1342 = arith.addf %1338, %1341 : vector<1x4x128xf32>
    %c127_i32_247 = arith.constant 127 : i32
    %1343 = tpu.dynamic_rotate %1323 by %c127_i32_247 dim 2 : vector<1x4x128xf32>, i32 -> vector<1x4x128xf32>
    %c158 = arith.constant 158 : index
    %1344 = memref.load %arg1[%c158] : memref<294xf32, #tpu.memory_space<smem>>
    %1345 = vector.broadcast %1344 : f32 to vector<1x4x128xf32>
    %1346 = arith.mulf %1345, %1343 : vector<1x4x128xf32>
    %1347 = arith.addf %1342, %1346 : vector<1x4x128xf32>
    %c126_i32_248 = arith.constant 126 : i32
    %1348 = tpu.dynamic_rotate %1323 by %c126_i32_248 dim 2 : vector<1x4x128xf32>, i32 -> vector<1x4x128xf32>
    %c159 = arith.constant 159 : index
    %1349 = memref.load %arg1[%c159] : memref<294xf32, #tpu.memory_space<smem>>
    %1350 = vector.broadcast %1349 : f32 to vector<1x4x128xf32>
    %1351 = arith.mulf %1350, %1348 : vector<1x4x128xf32>
    %1352 = arith.addf %1347, %1351 : vector<1x4x128xf32>
    %c125_i32_249 = arith.constant 125 : i32
    %1353 = tpu.dynamic_rotate %1323 by %c125_i32_249 dim 2 : vector<1x4x128xf32>, i32 -> vector<1x4x128xf32>
    %c160 = arith.constant 160 : index
    %1354 = memref.load %arg1[%c160] : memref<294xf32, #tpu.memory_space<smem>>
    %1355 = vector.broadcast %1354 : f32 to vector<1x4x128xf32>
    %1356 = arith.mulf %1355, %1353 : vector<1x4x128xf32>
    %1357 = arith.addf %1352, %1356 : vector<1x4x128xf32>
    %1358 = vector.extract_strided_slice %1287 {offsets = [0, 2, 0], sizes = [1, 4, 128], strides = [1, 1, 1]} : vector<1x10x128xf32> to vector<1x4x128xf32>
    %c3_i32_250 = arith.constant 3 : i32
    %1359 = tpu.dynamic_rotate %1358 by %c3_i32_250 dim 2 : vector<1x4x128xf32>, i32 -> vector<1x4x128xf32>
    %c161 = arith.constant 161 : index
    %1360 = memref.load %arg1[%c161] : memref<294xf32, #tpu.memory_space<smem>>
    %1361 = vector.broadcast %1360 : f32 to vector<1x4x128xf32>
    %1362 = arith.mulf %1361, %1359 : vector<1x4x128xf32>
    %1363 = arith.addf %1357, %1362 : vector<1x4x128xf32>
    %c2_i32_251 = arith.constant 2 : i32
    %1364 = tpu.dynamic_rotate %1358 by %c2_i32_251 dim 2 : vector<1x4x128xf32>, i32 -> vector<1x4x128xf32>
    %c162 = arith.constant 162 : index
    %1365 = memref.load %arg1[%c162] : memref<294xf32, #tpu.memory_space<smem>>
    %1366 = vector.broadcast %1365 : f32 to vector<1x4x128xf32>
    %1367 = arith.mulf %1366, %1364 : vector<1x4x128xf32>
    %1368 = arith.addf %1363, %1367 : vector<1x4x128xf32>
    %c1_i32_252 = arith.constant 1 : i32
    %1369 = tpu.dynamic_rotate %1358 by %c1_i32_252 dim 2 : vector<1x4x128xf32>, i32 -> vector<1x4x128xf32>
    %c163 = arith.constant 163 : index
    %1370 = memref.load %arg1[%c163] : memref<294xf32, #tpu.memory_space<smem>>
    %1371 = vector.broadcast %1370 : f32 to vector<1x4x128xf32>
    %1372 = arith.mulf %1371, %1369 : vector<1x4x128xf32>
    %1373 = arith.addf %1368, %1372 : vector<1x4x128xf32>
    %c164 = arith.constant 164 : index
    %1374 = memref.load %arg1[%c164] : memref<294xf32, #tpu.memory_space<smem>>
    %1375 = vector.broadcast %1374 : f32 to vector<1x4x128xf32>
    %1376 = arith.mulf %1375, %1358 : vector<1x4x128xf32>
    %1377 = arith.addf %1373, %1376 : vector<1x4x128xf32>
    %c127_i32_253 = arith.constant 127 : i32
    %1378 = tpu.dynamic_rotate %1358 by %c127_i32_253 dim 2 : vector<1x4x128xf32>, i32 -> vector<1x4x128xf32>
    %c165 = arith.constant 165 : index
    %1379 = memref.load %arg1[%c165] : memref<294xf32, #tpu.memory_space<smem>>
    %1380 = vector.broadcast %1379 : f32 to vector<1x4x128xf32>
    %1381 = arith.mulf %1380, %1378 : vector<1x4x128xf32>
    %1382 = arith.addf %1377, %1381 : vector<1x4x128xf32>
    %c126_i32_254 = arith.constant 126 : i32
    %1383 = tpu.dynamic_rotate %1358 by %c126_i32_254 dim 2 : vector<1x4x128xf32>, i32 -> vector<1x4x128xf32>
    %c166 = arith.constant 166 : index
    %1384 = memref.load %arg1[%c166] : memref<294xf32, #tpu.memory_space<smem>>
    %1385 = vector.broadcast %1384 : f32 to vector<1x4x128xf32>
    %1386 = arith.mulf %1385, %1383 : vector<1x4x128xf32>
    %1387 = arith.addf %1382, %1386 : vector<1x4x128xf32>
    %c125_i32_255 = arith.constant 125 : i32
    %1388 = tpu.dynamic_rotate %1358 by %c125_i32_255 dim 2 : vector<1x4x128xf32>, i32 -> vector<1x4x128xf32>
    %c167 = arith.constant 167 : index
    %1389 = memref.load %arg1[%c167] : memref<294xf32, #tpu.memory_space<smem>>
    %1390 = vector.broadcast %1389 : f32 to vector<1x4x128xf32>
    %1391 = arith.mulf %1390, %1388 : vector<1x4x128xf32>
    %1392 = arith.addf %1387, %1391 : vector<1x4x128xf32>
    %1393 = vector.extract_strided_slice %1287 {offsets = [0, 3, 0], sizes = [1, 4, 128], strides = [1, 1, 1]} : vector<1x10x128xf32> to vector<1x4x128xf32>
    %c3_i32_256 = arith.constant 3 : i32
    %1394 = tpu.dynamic_rotate %1393 by %c3_i32_256 dim 2 : vector<1x4x128xf32>, i32 -> vector<1x4x128xf32>
    %c168 = arith.constant 168 : index
    %1395 = memref.load %arg1[%c168] : memref<294xf32, #tpu.memory_space<smem>>
    %1396 = vector.broadcast %1395 : f32 to vector<1x4x128xf32>
    %1397 = arith.mulf %1396, %1394 : vector<1x4x128xf32>
    %1398 = arith.addf %1392, %1397 : vector<1x4x128xf32>
    %c2_i32_257 = arith.constant 2 : i32
    %1399 = tpu.dynamic_rotate %1393 by %c2_i32_257 dim 2 : vector<1x4x128xf32>, i32 -> vector<1x4x128xf32>
    %c169 = arith.constant 169 : index
    %1400 = memref.load %arg1[%c169] : memref<294xf32, #tpu.memory_space<smem>>
    %1401 = vector.broadcast %1400 : f32 to vector<1x4x128xf32>
    %1402 = arith.mulf %1401, %1399 : vector<1x4x128xf32>
    %1403 = arith.addf %1398, %1402 : vector<1x4x128xf32>
    %c1_i32_258 = arith.constant 1 : i32
    %1404 = tpu.dynamic_rotate %1393 by %c1_i32_258 dim 2 : vector<1x4x128xf32>, i32 -> vector<1x4x128xf32>
    %c170 = arith.constant 170 : index
    %1405 = memref.load %arg1[%c170] : memref<294xf32, #tpu.memory_space<smem>>
    %1406 = vector.broadcast %1405 : f32 to vector<1x4x128xf32>
    %1407 = arith.mulf %1406, %1404 : vector<1x4x128xf32>
    %1408 = arith.addf %1403, %1407 : vector<1x4x128xf32>
    %c171 = arith.constant 171 : index
    %1409 = memref.load %arg1[%c171] : memref<294xf32, #tpu.memory_space<smem>>
    %1410 = vector.broadcast %1409 : f32 to vector<1x4x128xf32>
    %1411 = arith.mulf %1410, %1393 : vector<1x4x128xf32>
    %1412 = arith.addf %1408, %1411 : vector<1x4x128xf32>
    %c127_i32_259 = arith.constant 127 : i32
    %1413 = tpu.dynamic_rotate %1393 by %c127_i32_259 dim 2 : vector<1x4x128xf32>, i32 -> vector<1x4x128xf32>
    %c172 = arith.constant 172 : index
    %1414 = memref.load %arg1[%c172] : memref<294xf32, #tpu.memory_space<smem>>
    %1415 = vector.broadcast %1414 : f32 to vector<1x4x128xf32>
    %1416 = arith.mulf %1415, %1413 : vector<1x4x128xf32>
    %1417 = arith.addf %1412, %1416 : vector<1x4x128xf32>
    %c126_i32_260 = arith.constant 126 : i32
    %1418 = tpu.dynamic_rotate %1393 by %c126_i32_260 dim 2 : vector<1x4x128xf32>, i32 -> vector<1x4x128xf32>
    %c173 = arith.constant 173 : index
    %1419 = memref.load %arg1[%c173] : memref<294xf32, #tpu.memory_space<smem>>
    %1420 = vector.broadcast %1419 : f32 to vector<1x4x128xf32>
    %1421 = arith.mulf %1420, %1418 : vector<1x4x128xf32>
    %1422 = arith.addf %1417, %1421 : vector<1x4x128xf32>
    %c125_i32_261 = arith.constant 125 : i32
    %1423 = tpu.dynamic_rotate %1393 by %c125_i32_261 dim 2 : vector<1x4x128xf32>, i32 -> vector<1x4x128xf32>
    %c174 = arith.constant 174 : index
    %1424 = memref.load %arg1[%c174] : memref<294xf32, #tpu.memory_space<smem>>
    %1425 = vector.broadcast %1424 : f32 to vector<1x4x128xf32>
    %1426 = arith.mulf %1425, %1423 : vector<1x4x128xf32>
    %1427 = arith.addf %1422, %1426 : vector<1x4x128xf32>
    %1428 = vector.extract_strided_slice %1287 {offsets = [0, 4, 0], sizes = [1, 4, 128], strides = [1, 1, 1]} : vector<1x10x128xf32> to vector<1x4x128xf32>
    %c3_i32_262 = arith.constant 3 : i32
    %1429 = tpu.dynamic_rotate %1428 by %c3_i32_262 dim 2 : vector<1x4x128xf32>, i32 -> vector<1x4x128xf32>
    %c175 = arith.constant 175 : index
    %1430 = memref.load %arg1[%c175] : memref<294xf32, #tpu.memory_space<smem>>
    %1431 = vector.broadcast %1430 : f32 to vector<1x4x128xf32>
    %1432 = arith.mulf %1431, %1429 : vector<1x4x128xf32>
    %1433 = arith.addf %1427, %1432 : vector<1x4x128xf32>
    %c2_i32_263 = arith.constant 2 : i32
    %1434 = tpu.dynamic_rotate %1428 by %c2_i32_263 dim 2 : vector<1x4x128xf32>, i32 -> vector<1x4x128xf32>
    %c176 = arith.constant 176 : index
    %1435 = memref.load %arg1[%c176] : memref<294xf32, #tpu.memory_space<smem>>
    %1436 = vector.broadcast %1435 : f32 to vector<1x4x128xf32>
    %1437 = arith.mulf %1436, %1434 : vector<1x4x128xf32>
    %1438 = arith.addf %1433, %1437 : vector<1x4x128xf32>
    %c1_i32_264 = arith.constant 1 : i32
    %1439 = tpu.dynamic_rotate %1428 by %c1_i32_264 dim 2 : vector<1x4x128xf32>, i32 -> vector<1x4x128xf32>
    %c177 = arith.constant 177 : index
    %1440 = memref.load %arg1[%c177] : memref<294xf32, #tpu.memory_space<smem>>
    %1441 = vector.broadcast %1440 : f32 to vector<1x4x128xf32>
    %1442 = arith.mulf %1441, %1439 : vector<1x4x128xf32>
    %1443 = arith.addf %1438, %1442 : vector<1x4x128xf32>
    %c178 = arith.constant 178 : index
    %1444 = memref.load %arg1[%c178] : memref<294xf32, #tpu.memory_space<smem>>
    %1445 = vector.broadcast %1444 : f32 to vector<1x4x128xf32>
    %1446 = arith.mulf %1445, %1428 : vector<1x4x128xf32>
    %1447 = arith.addf %1443, %1446 : vector<1x4x128xf32>
    %c127_i32_265 = arith.constant 127 : i32
    %1448 = tpu.dynamic_rotate %1428 by %c127_i32_265 dim 2 : vector<1x4x128xf32>, i32 -> vector<1x4x128xf32>
    %c179 = arith.constant 179 : index
    %1449 = memref.load %arg1[%c179] : memref<294xf32, #tpu.memory_space<smem>>
    %1450 = vector.broadcast %1449 : f32 to vector<1x4x128xf32>
    %1451 = arith.mulf %1450, %1448 : vector<1x4x128xf32>
    %1452 = arith.addf %1447, %1451 : vector<1x4x128xf32>
    %c126_i32_266 = arith.constant 126 : i32
    %1453 = tpu.dynamic_rotate %1428 by %c126_i32_266 dim 2 : vector<1x4x128xf32>, i32 -> vector<1x4x128xf32>
    %c180 = arith.constant 180 : index
    %1454 = memref.load %arg1[%c180] : memref<294xf32, #tpu.memory_space<smem>>
    %1455 = vector.broadcast %1454 : f32 to vector<1x4x128xf32>
    %1456 = arith.mulf %1455, %1453 : vector<1x4x128xf32>
    %1457 = arith.addf %1452, %1456 : vector<1x4x128xf32>
    %c125_i32_267 = arith.constant 125 : i32
    %1458 = tpu.dynamic_rotate %1428 by %c125_i32_267 dim 2 : vector<1x4x128xf32>, i32 -> vector<1x4x128xf32>
    %c181 = arith.constant 181 : index
    %1459 = memref.load %arg1[%c181] : memref<294xf32, #tpu.memory_space<smem>>
    %1460 = vector.broadcast %1459 : f32 to vector<1x4x128xf32>
    %1461 = arith.mulf %1460, %1458 : vector<1x4x128xf32>
    %1462 = arith.addf %1457, %1461 : vector<1x4x128xf32>
    %1463 = vector.extract_strided_slice %1287 {offsets = [0, 5, 0], sizes = [1, 4, 128], strides = [1, 1, 1]} : vector<1x10x128xf32> to vector<1x4x128xf32>
    %c3_i32_268 = arith.constant 3 : i32
    %1464 = tpu.dynamic_rotate %1463 by %c3_i32_268 dim 2 : vector<1x4x128xf32>, i32 -> vector<1x4x128xf32>
    %c182 = arith.constant 182 : index
    %1465 = memref.load %arg1[%c182] : memref<294xf32, #tpu.memory_space<smem>>
    %1466 = vector.broadcast %1465 : f32 to vector<1x4x128xf32>
    %1467 = arith.mulf %1466, %1464 : vector<1x4x128xf32>
    %1468 = arith.addf %1462, %1467 : vector<1x4x128xf32>
    %c2_i32_269 = arith.constant 2 : i32
    %1469 = tpu.dynamic_rotate %1463 by %c2_i32_269 dim 2 : vector<1x4x128xf32>, i32 -> vector<1x4x128xf32>
    %c183 = arith.constant 183 : index
    %1470 = memref.load %arg1[%c183] : memref<294xf32, #tpu.memory_space<smem>>
    %1471 = vector.broadcast %1470 : f32 to vector<1x4x128xf32>
    %1472 = arith.mulf %1471, %1469 : vector<1x4x128xf32>
    %1473 = arith.addf %1468, %1472 : vector<1x4x128xf32>
    %c1_i32_270 = arith.constant 1 : i32
    %1474 = tpu.dynamic_rotate %1463 by %c1_i32_270 dim 2 : vector<1x4x128xf32>, i32 -> vector<1x4x128xf32>
    %c184 = arith.constant 184 : index
    %1475 = memref.load %arg1[%c184] : memref<294xf32, #tpu.memory_space<smem>>
    %1476 = vector.broadcast %1475 : f32 to vector<1x4x128xf32>
    %1477 = arith.mulf %1476, %1474 : vector<1x4x128xf32>
    %1478 = arith.addf %1473, %1477 : vector<1x4x128xf32>
    %c185 = arith.constant 185 : index
    %1479 = memref.load %arg1[%c185] : memref<294xf32, #tpu.memory_space<smem>>
    %1480 = vector.broadcast %1479 : f32 to vector<1x4x128xf32>
    %1481 = arith.mulf %1480, %1463 : vector<1x4x128xf32>
    %1482 = arith.addf %1478, %1481 : vector<1x4x128xf32>
    %c127_i32_271 = arith.constant 127 : i32
    %1483 = tpu.dynamic_rotate %1463 by %c127_i32_271 dim 2 : vector<1x4x128xf32>, i32 -> vector<1x4x128xf32>
    %c186 = arith.constant 186 : index
    %1484 = memref.load %arg1[%c186] : memref<294xf32, #tpu.memory_space<smem>>
    %1485 = vector.broadcast %1484 : f32 to vector<1x4x128xf32>
    %1486 = arith.mulf %1485, %1483 : vector<1x4x128xf32>
    %1487 = arith.addf %1482, %1486 : vector<1x4x128xf32>
    %c126_i32_272 = arith.constant 126 : i32
    %1488 = tpu.dynamic_rotate %1463 by %c126_i32_272 dim 2 : vector<1x4x128xf32>, i32 -> vector<1x4x128xf32>
    %c187 = arith.constant 187 : index
    %1489 = memref.load %arg1[%c187] : memref<294xf32, #tpu.memory_space<smem>>
    %1490 = vector.broadcast %1489 : f32 to vector<1x4x128xf32>
    %1491 = arith.mulf %1490, %1488 : vector<1x4x128xf32>
    %1492 = arith.addf %1487, %1491 : vector<1x4x128xf32>
    %c125_i32_273 = arith.constant 125 : i32
    %1493 = tpu.dynamic_rotate %1463 by %c125_i32_273 dim 2 : vector<1x4x128xf32>, i32 -> vector<1x4x128xf32>
    %c188 = arith.constant 188 : index
    %1494 = memref.load %arg1[%c188] : memref<294xf32, #tpu.memory_space<smem>>
    %1495 = vector.broadcast %1494 : f32 to vector<1x4x128xf32>
    %1496 = arith.mulf %1495, %1493 : vector<1x4x128xf32>
    %1497 = arith.addf %1492, %1496 : vector<1x4x128xf32>
    %1498 = vector.extract_strided_slice %1287 {offsets = [0, 6, 0], sizes = [1, 4, 128], strides = [1, 1, 1]} : vector<1x10x128xf32> to vector<1x4x128xf32>
    %c3_i32_274 = arith.constant 3 : i32
    %1499 = tpu.dynamic_rotate %1498 by %c3_i32_274 dim 2 : vector<1x4x128xf32>, i32 -> vector<1x4x128xf32>
    %c189 = arith.constant 189 : index
    %1500 = memref.load %arg1[%c189] : memref<294xf32, #tpu.memory_space<smem>>
    %1501 = vector.broadcast %1500 : f32 to vector<1x4x128xf32>
    %1502 = arith.mulf %1501, %1499 : vector<1x4x128xf32>
    %1503 = arith.addf %1497, %1502 : vector<1x4x128xf32>
    %c2_i32_275 = arith.constant 2 : i32
    %1504 = tpu.dynamic_rotate %1498 by %c2_i32_275 dim 2 : vector<1x4x128xf32>, i32 -> vector<1x4x128xf32>
    %c190 = arith.constant 190 : index
    %1505 = memref.load %arg1[%c190] : memref<294xf32, #tpu.memory_space<smem>>
    %1506 = vector.broadcast %1505 : f32 to vector<1x4x128xf32>
    %1507 = arith.mulf %1506, %1504 : vector<1x4x128xf32>
    %1508 = arith.addf %1503, %1507 : vector<1x4x128xf32>
    %c1_i32_276 = arith.constant 1 : i32
    %1509 = tpu.dynamic_rotate %1498 by %c1_i32_276 dim 2 : vector<1x4x128xf32>, i32 -> vector<1x4x128xf32>
    %c191 = arith.constant 191 : index
    %1510 = memref.load %arg1[%c191] : memref<294xf32, #tpu.memory_space<smem>>
    %1511 = vector.broadcast %1510 : f32 to vector<1x4x128xf32>
    %1512 = arith.mulf %1511, %1509 : vector<1x4x128xf32>
    %1513 = arith.addf %1508, %1512 : vector<1x4x128xf32>
    %c192 = arith.constant 192 : index
    %1514 = memref.load %arg1[%c192] : memref<294xf32, #tpu.memory_space<smem>>
    %1515 = vector.broadcast %1514 : f32 to vector<1x4x128xf32>
    %1516 = arith.mulf %1515, %1498 : vector<1x4x128xf32>
    %1517 = arith.addf %1513, %1516 : vector<1x4x128xf32>
    %c127_i32_277 = arith.constant 127 : i32
    %1518 = tpu.dynamic_rotate %1498 by %c127_i32_277 dim 2 : vector<1x4x128xf32>, i32 -> vector<1x4x128xf32>
    %c193 = arith.constant 193 : index
    %1519 = memref.load %arg1[%c193] : memref<294xf32, #tpu.memory_space<smem>>
    %1520 = vector.broadcast %1519 : f32 to vector<1x4x128xf32>
    %1521 = arith.mulf %1520, %1518 : vector<1x4x128xf32>
    %1522 = arith.addf %1517, %1521 : vector<1x4x128xf32>
    %c126_i32_278 = arith.constant 126 : i32
    %1523 = tpu.dynamic_rotate %1498 by %c126_i32_278 dim 2 : vector<1x4x128xf32>, i32 -> vector<1x4x128xf32>
    %c194 = arith.constant 194 : index
    %1524 = memref.load %arg1[%c194] : memref<294xf32, #tpu.memory_space<smem>>
    %1525 = vector.broadcast %1524 : f32 to vector<1x4x128xf32>
    %1526 = arith.mulf %1525, %1523 : vector<1x4x128xf32>
    %1527 = arith.addf %1522, %1526 : vector<1x4x128xf32>
    %c125_i32_279 = arith.constant 125 : i32
    %1528 = tpu.dynamic_rotate %1498 by %c125_i32_279 dim 2 : vector<1x4x128xf32>, i32 -> vector<1x4x128xf32>
    %c195 = arith.constant 195 : index
    %1529 = memref.load %arg1[%c195] : memref<294xf32, #tpu.memory_space<smem>>
    %1530 = vector.broadcast %1529 : f32 to vector<1x4x128xf32>
    %1531 = arith.mulf %1530, %1528 : vector<1x4x128xf32>
    %1532 = arith.addf %1527, %1531 : vector<1x4x128xf32>
    %1533 = vector.extract_strided_slice %1532 {offsets = [0, 0, 0], sizes = [1, 4, 16], strides = [1, 1, 1]} : vector<1x4x128xf32> to vector<1x4x16xf32>
    %1534 = vector.broadcast %1033 : f32 to vector<1x4x16xf32>
    %1535 = arith.addf %1533, %1534 : vector<1x4x16xf32>
    %1536 = arith.negf %1535 : vector<1x4x16xf32>
    %1537 = math.exp %1536 : vector<1x4x16xf32>
    %cst_280 = arith.constant 1.000000e+00 : f32
    %1538 = vector.broadcast %cst_280 : f32 to vector<1x4x16xf32>
    %1539 = arith.addf %1538, %1537 : vector<1x4x16xf32>
    %1540 = arith.divf %1538, %1539 : vector<1x4x16xf32>
    %cst_281 = arith.constant 0.333333343 : f32
    %1541 = vector.broadcast %cst_281 : f32 to vector<1x4x16xf32>
    %1542 = arith.mulf %1540, %1541 : vector<1x4x16xf32>
    %1543 = vector.shape_cast %514 : vector<1x16x16xf32> to vector<1x1x16x16xf32>
    %1544 = vector.shape_cast %1028 : vector<1x4x16xf32> to vector<1x4x1x16xf32>
    %1545 = vector.broadcast %1543 : vector<1x1x16x16xf32> to vector<1x4x16x16xf32>
    %1546 = vector.broadcast %1544 : vector<1x4x1x16xf32> to vector<1x4x16x16xf32>
    %1547 = arith.addf %1545, %1546 : vector<1x4x16x16xf32>
    %1548 = vector.shape_cast %1542 : vector<1x4x16xf32> to vector<1x4x16x1xf32>
    %1549 = vector.broadcast %1548 : vector<1x4x16x1xf32> to vector<1x4x16x16xf32>
    %1550 = arith.addf %1547, %1549 : vector<1x4x16x16xf32>
    %1551 = arith.mulf %0, %1550 : vector<1x4x16x16xf32>
    %c0_282 = arith.constant 0 : index
    %c0_283 = arith.constant 0 : index
    %c0_284 = arith.constant 0 : index
    %c0_285 = arith.constant 0 : index
    %1552 = vector.load %arg4[%c0_282, %c0_283, %c0_284, %c0_285] : memref<1x4x16x16xf32, #tpu.memory_space<vmem>>, vector<1x4x16x16xf32>
    tpu.vector_store %arg4[%c0_282, %c0_283, %c0_284, %c0_285], %1551 {strides = array<i32>} : memref<1x4x16x16xf32, #tpu.memory_space<vmem>>, vector<1x4x16x16xf32>,
    return
  }
  func.func @transform_0(%arg0: i32, %arg1: memref<294xf32, #tpu.memory_space<smem>>, %arg2: memref<3xf32, #tpu.memory_space<smem>>) -> (i32, i32, i32, i32) {
    %c0_i32 = arith.constant 0 : i32
    %c0_i32_0 = arith.constant 0 : i32
    %c0_i32_1 = arith.constant 0 : i32
    %c0_i32_2 = arith.constant 0 : i32
    return %arg0, %c0_i32, %c0_i32_0, %c0_i32_1 : i32, i32, i32, i32
  }
  func.func @transform_1(%arg0: i32, %arg1: memref<294xf32, #tpu.memory_space<smem>>, %arg2: memref<3xf32, #tpu.memory_space<smem>>) -> (i32, i32, i32, i32) {
    %c0_i32 = arith.constant 0 : i32
    %c0_i32_0 = arith.constant 0 : i32
    %c0_i32_1 = arith.constant 0 : i32
    %c0_i32_2 = arith.constant 0 : i32
    return %arg0, %c0_i32, %c0_i32_0, %c0_i32_1 : i32, i32, i32, i32
  }
}

</mosaic_0001>

<bundles_post_ra>
// kernel: tpu_custom_call.1
= control target key start
LH: loop header
LB: loop body
LE: loop exit
PB: predicated region body
PF: predicated region fallthrough
CT: control target
= control target key end

     0   :  { %s3649_s12 = smov [#allocation3]   ;;  %s6588_s0 = inlined_call_operand.hbm [shape: f32[294], index: 0, kind: input, shape index: {}]   ;;  %s6589_s2 = inlined_call_operand.hbm [shape: f32[2,4,16,16], index: 2, kind: input, shape index: {}]   ;;  %s6590_s3 = inlined_call_operand.hbm [shape: f32[2,4,16,16], index: 3, kind: output, shape index: {}]   ;;  %s6591_s1 = inlined_call_operand.vmem [shape: f32[3], index: 1, kind: input, shape index: {}]  }
   0x1   :  { %6619 = sst [smem:[#allocation175_spill]] %s6589_s2  ;;  %s10_s17 = sshll.u32 %s6591_s1, 4  ;;  %s11_s17 = int_to_ptr.vmem [resolvable:$true] %s10_s17 }
   0x2   :  { %9 = dma.hbm_to_smem %s6588_s0, 48, %s3649_s12, [#allocation2] }
   0x3   :  { %s3541_s18 = scalar_lea.vmem %s11_s17, 16  ;;  %p3546_p1 = scmp.lt.s32.totalorder %s11_s17, %s11_s17 }
   0x4   :  { %p3542_p0 = scmp.ne.s32.totalorder %s11_s17, %s3541_s18  ;;  %p3547_p2 = scmp.lt.s32.totalorder %s3541_s18, %s3541_s18 }
   0x6   :  { %p3548_p3 = por %p3547_p2, %p3546_p1 }
   0x8   :  { %p3549_p4 = pnand %p3548_p3, %p3542_p0 }
   0xa   :  { %3552 = shalt.err (!%p3549_p4)  }
   0xb   :  { %s3650_s19 = smov [#allocation4]  }
   0xc   :  { %13 = dma.vmem_to_smem %s11_s17, 16, %s3650_s19, [#allocation2] }
   0xd   :  { %3623 = dma.done.wait [#allocation2], 64 }
   0xe   :  { %3624 = vsyncadd [#allocation2], 4294967232 }
   0xf   :  { %15 = sfence }
  0x10   :  { %16 = vsyncpa [#allocation6], 0 }
  0x11   :  { %18 = vsyncpa [#allocation6 + $0x1], 0 }
  0x12   :  { %19 = vsyncpa [#allocation7], 0 }
  0x13   :  { %21 = vsyncpa [#allocation7 + $0x1], 0  ;;  %s3691_s0 = smov 0   ;;  %s3693_s1 = smov 0  }
  0x14   :  { %s3695_s20 = smov 0   ;;  %s3697_s21 = smov 0  }
  0x15 LB: > { %6620 = sst [smem:[#allocation12_spill]] %s3639_s1  ;;  %s3712_s22 = sadd.s32 4294967295, %s3647_s21   ;;  %s3647_s21 = sphi %s3697_s21, %s6959_s21   ;;  %s3643_s20 = sphi %s3695_s20, %s6962_s20   ;;  %s3639_s1 = sphi %s3693_s1, %s6961_s1   ;;  %s3635_s0 = sphi %s3691_s0, %s6960_s0  }
  0x16   : > { %6621 = sst [smem:[#allocation13_spill]] %s3643_s20  ;;  %s3134_s23 = sadd.s32 4294967294, %s3647_s21  }
  0x17   : > { %s3716_s24 = sadd.s32 1, %s3647_s21   ;;  %s34_s25 = sadd.s32 1, %s3643_s20 }
  0x18   : > { %6622 = sst [smem:[#allocation14_spill]] %s3716_s24  ;;  %s31_s26 = ssub.s32 %s3647_s21, %s3716_s24 }
  0x19   : > { %p41_p5 = scmp.ne.s32.totalorder %s3643_s20, %s3639_s1  ;;  %p32_p6 = scmp.eq.s32.totalorder %s31_s26, 0 }
  0x1a   : > { %p42_p7 = scmp.eq.s32.totalorder %s3647_s21, 0  ;;  %p47_p8 = scmp.ne.s32.totalorder %s3639_s1, %s3635_s0 }
  0x1b   : > { %p48_p9 = scmp.eq.s32.totalorder %s3712_s22, 0  ;;  %p71_p12 = scmp.eq.s32.totalorder %s3712_s22, 1 }
  0x1c   : > { %s3728_s27 = scalar_select %p32_p6, %s3643_s20, %s34_s25  }
  0x1d   : > { %p3730_p10 = por %p42_p7, %p41_p5  ;;  %p3734_p11 = por %p48_p9, %p47_p8 }
  0x1e   : > { %6623 = sst [smem:[#allocation15_spill]] %s3728_s27  ;;  %p77_p13 = scmp.eq.s32.totalorder %s3134_s23, 1 }
  0x1f   : > { %s6625_s29 = scalar_select %p3734_p11, 1, 0 }
  0x20   : > { %p3461_p1 = scmp.lt.s32.totalorder %s3647_s21, 2  ;;  %p3741_p2 = por %p71_p12, %p41_p5 }
  0x21   : > { %p3745_p3 = por %p77_p13, %p47_p8  ;;  %s97_s5 = sand.u32 1, %s3643_s20  }
  0x22   : > { %s6626_s30 = scalar_select %p3741_p2, 1, 0 }
  0x23   : > { %s6627_s4 = scalar_select %p3745_p3, 1, 0 }
  0x24   : > { %s3447_s6 = sshll.u32 %s3647_s21, 10  ;;  %s3137_s7 = sshll.u32 %s97_s5, 6 }
  0x25   : > { %s6628_s2 = sld [smem:[#allocation175_spill]]  ;;  %s101_s11 = scalar_lea.vmem [#allocation5], %s3137_s7 }
  0x26   : > { %s108_s12 = sshll.u32 %s101_s11, 4  ;;  %p3758_p4 = pnand %p3461_p1, %p3730_p10  ;;  %s3762_s12 = int_to_ptr.vmem [resolvable:$true] %s108_s12 }
  0x27   : > { %s3764_s14 = scalar_lea.sflag [#allocation6], %s97_s5 }
  0x28   : > { %p3555_p6 = pneg %p3758_p4 }
  0x2b   : > { %s3754_s10 = scalar_lea.hbm %s6628_s2, %s3447_s6  ;;  %s3558_s18 = scalar_lea.hbm %s6628_s2, 2048 }
  0x2c   : > { %s3553_s15 = scalar_lea.hbm %s3754_s10, 1024  ;;  %p3559_p9 = scmp.lt.s32.totalorder %s3754_s10, %s6628_s2 }
  0x2d   : > { %p3554_p5 = scmp.ne.s32.totalorder %s3754_s10, %s3553_s15  ;;  %p3560_p10 = scmp.lt.s32.totalorder %s3558_s18, %s3553_s15 }
  0x2f   : > { %p3556_p7 = pnand %p3555_p6, %p3554_p5  ;;  %p3561_p12 = por %p3560_p10, %p3559_p9 }
  0x31   : > { %p3557_p8 = pneg %p3556_p7 }
  0x33   : > { %p3562_p13 = pnand %p3561_p12, %p3557_p8 }
  0x35   : > { %3565 = shalt.err (!%p3562_p13)
}
  0x36   : > { %s3566_s25 = scalar_lea.vmem %s3762_s12, 1024  ;;  %s3651_s26 = smov [#allocation5]  }
  0x37   : > { %p3567_p1 = scmp.ne.s32.totalorder %s3762_s12, %s3566_s25  ;;  %s3571_s28 = sshll.u32 %s3651_s26, 4  ;;  %s3572_s28 = int_to_ptr.vmem [resolvable:$false] %s3571_s28 }
  0x38   : > { %s3573_s5 = scalar_lea.vmem %s3572_s28, 2048  ;;  %p3574_p7 = scmp.lt.s32.totalorder %s3762_s12, %s3572_s28 }
  0x39   : > { %p3569_p0 = pnand %p3567_p1, %p3555_p6  ;;  %p3575_p3 = scmp.lt.s32.totalorder %s3573_s5, %s3566_s25 }
  0x3b   : > { %p3570_p5 = pneg %p3569_p0  ;;  %p3576_p2 = por %p3575_p3, %p3574_p7 }
  0x3d   : > { %p3577_p11 = pnand %p3576_p2, %p3570_p5 }
  0x3f   : > { %3580 = shalt.err (!%p3577_p11)
}
  0x40   : > { %s3652_s6 = smov 128   ;;  %s3653_s7 = smov 8  }
  0x41   : > { %3456 = dma.hbm_to_vmem [thread:$0]  (!%p3758_p4), %s3754_s10, 1024, %s3762_s12, %s3764_s14, %s3652_s6, %s3652_s6, %s3653_s7  }
  0x42   : > { %p3140_p0 = scmp.ge.s32.totalorder %s3647_s21, 1  ;;  %p116_p6 = scmp.lt.s32.totalorder %s3647_s21, 3 }
  0x44   : > { %p117_p8 = pnand %p3140_p0, %p116_p6 }
  0x46   : > { %120 = sbr.rel (%p117_p8) target bundleno = 1263 (0x4ef), region = 24 }
  0x4b   : > { %s3788_s8 = sand.u32 1, %s3639_s1   ;;  %p6630_p11 = scmp.ne.s32.totalorder %s6625_s29, 0 }
  0x4c   : > { %s6602_s9 = sshll.u32 %s3788_s8, 6  ;;  %s123_s11 = scalar_lea.sflag [#allocation6], %s3788_s8 }
  0x4d   : > { %s3794_s15 = scalar_lea.vmem [#allocation5], %s6602_s9 }
  0x4e   : > { %3626 = dma.done.wait (%p6630_p11), %s123_s11, 1024  }
  0x4f   : > { %3628 = vsyncadd (%p6630_p11), %s123_s11, 4294966272  ;;  %vm153_vm0 = vcmask 130048   ;;  %v3801_v0 = vld [vmem:[%s3794_s15] sm:$0xff]  ;;  %v3804_v1 = vld [vmem:[%s3794_s15 + $0x8] sm:$0xff]  ;;  %vm189_vm1 = vcmask 1042432   ;;  %s6605_s29 = smov 2  }
  0x50   : > { %v3807_v2 = vld [vmem:[%s3794_s15 + $0x10] sm:$0xff]  ;;  %v3810_v3 = vld [vmem:[%s3794_s15 + $0x18] sm:$0xff]  ;;  %v3813_v4 = vld [vmem:[%s3794_s15 + $0x20] sm:$0xff]  ;;  %v3820_v6 = vsel %vm153_vm0, %v3801_v0, -inf  ;;  %v3838_v11 = vsel %vm153_vm0, %v3804_v1, -inf  ;;  %s6613_s10 = smov 3  }
  0x51   : > { %v3816_v5 = vld [vmem:[%s3794_s15 + $0x28] sm:$0xff]  ;;  %v3824_v7 = vsel %vm153_vm0, %v3807_v2, -inf  ;;  %v3827_v8 = vld [vmem:[%s3794_s15 + $0x30] sm:$0xff]  ;;  %v3830_v9 = vld [vmem:[%s3794_s15 + $0x38] sm:$0xff]  ;;  %v3834_v10 = vsel %vm153_vm0, %v3813_v4, -inf  ;;  %v3842_v12 = vsel %vm153_vm0, %v3810_v3, -inf }
  0x52   : > { %v3846_v13 = vsel %vm153_vm0, %v3816_v5, -inf  ;;  %v157_v14 = vmax.f32 %v3820_v6, %v3834_v10  ;;  %v3852_v15 = vsel %vm153_vm0, %v3827_v8, -inf  ;;  %v3856_v16 = vsel %vm153_vm0, %v3830_v9, -inf  ;;  %s6611_s12 = smov 1   ;;  %s6603_s13 = smov 127  }
  0x53   : > { %v159_v17 = vmax.f32 %v3824_v7, %v3852_v15  ;;  %v164_v18 = vmax.f32 %v3838_v11, %v3846_v13  ;;  %v166_v19 = vmax.f32 %v3842_v12, %v3856_v16  ;;  %s6607_s14 = smov 126   ;;  %vm266_vm2 = vcmask 1046528   ;;  %s6609_s16 = smov 125  }
  0x54   : > { %vm351_vm3 = vcmask 1045504   ;;  %vm436_vm4 = vcmask 1044480   ;;  %vm521_vm5 = vcmask 1043456   ;;  %vm690_vm6 = vcmask 1041408   ;;  %s3343_s17 = sld [smem:[#allocation3 + $0x62]]  ;;  %p6956_p3 = scmp.ne.s32.totalorder %s6626_s30, 0 }
  0x55   : > { %v160_v20 = vmax.f32 %v157_v14, %v159_v17  ;;  %v167_v21 = vmax.f32 %v164_v18, %v166_v19  ;;  %vm1441_vm7 = vcmask 1041409   ;;  %vm1443_vm8 = vcmask 1042434   ;;  %s3344_s18 = sld [smem:[#allocation3 + $0x63]] }
  0x56   : > { %vm1445_vm9 = vcmask 1043459   ;;  %vm2182_vm10 = vcmask 130112   ;;  %s3345_s19 = sld [smem:[#allocation3 + $0x64]] }
  0x57   : > { %v185_v22 = vsel %vm153_vm0, %v160_v20, 0.0  ;;  %v186_v24 = vsel %vm153_vm0, %v167_v21, 0.0  ;;  %s3346_s23 = sld [smem:[#allocation3 + $0x65]] }
  0x58   : > { %v190_v23 = vrot.slane %v185_v22, 5  ;;  %v191_v25 = vrot.slane %v186_v24, 5  ;;  %v4019_v24 = vsel %vm153_vm0, %v3807_v2, 0.0  ;;  %s3347_s25 = sld [smem:[#allocation3 + $0x66]] }
  0x59   : > { %s3348_s26 = sld [smem:[#allocation3 + $0x67]] }
  0x5a   : > { %v3867_v26 = vsel %vm189_vm1, 0.0, %v190_v23  ;;  %v3874_v27 = vsel %vm189_vm1, %v190_v23, %v191_v25  ;;  %v3889_v28 = vsel %vm189_vm1, %v191_v25, 0.0  ;;  %v4015_v23 = vsel %vm153_vm0, %v3801_v0, 0.0  ;;  %s3349_s28 = sld [smem:[#allocation3 + $0x68]] }
  0x5b   : > { %208 = vrot.lane.b32.xlu1 %v3867_v26, %s6605_s29  ;;  %198 = vrot.lane.b32.xlu0 %v3867_v26, %s6613_s10  ;;  %v268_v29 = vrot.slane %v3874_v27, 1  ;;  %v270_v30 = vrot.slane %v3889_v28, 1  ;;  %v267_v31 = vrot.slane %v3867_v26, 1  ;;  %v353_v34 = vrot.slane %v3874_v27, 2  ;;  %s4711_s5 = sld [smem:[#allocation3 + $0x69]] }
  0x5c   : > { %v355_v35 = vrot.slane %v3889_v28, 2  ;;  %v352_v36 = vrot.slane %v3867_v26, 2  ;;  %v438_v39 = vrot.slane %v3874_v27, 3  ;;  %v440_v40 = vrot.slane %v3889_v28, 3  ;;  %s4715_s6 = sld [smem:[#allocation3 + $0x6a]] }
  0x5d   : > { %v271_v32 = vsel %vm266_vm2, %v268_v29, %v270_v30  ;;  %v269_v33 = vsel %vm266_vm2, %v267_v31, %v268_v29  ;;  %v437_v41 = vrot.slane %v3867_v26, 3  ;;  %v523_v44 = vrot.slane %v3874_v27, 4  ;;  %s4717_s7 = sld [smem:[#allocation3 + $0x6c]] }
  0x5e   : > { %v356_v37 = vsel %vm351_vm3, %v353_v34, %v355_v35  ;;  %v354_v38 = vsel %vm351_vm3, %v352_v36, %v353_v34  ;;  %v441_v42 = vsel %vm436_vm4, %v438_v39, %v440_v40  ;;  %v525_v45 = vrot.slane %v3889_v28, 4  ;;  %s4719_s11 = sld [smem:[#allocation3 + $0x6b]] }
  0x5f   : > { %210 = vrot.lane.b32.xlu1 %v3874_v27, %s6605_s29  ;;  %200 = vrot.lane.b32.xlu0 %v3874_v27, %s6613_s10  ;;  %v439_v43 = vsel %vm436_vm4, %v437_v41, %v438_v39  ;;  %v522_v46 = vrot.slane %v3867_v26, 4  ;;  %v607_v49 = vrot.slane %v3874_v27, 5  ;;  %v609_v50 = vrot.slane %v3889_v28, 5  ;;  %s5078_s9 = sld [smem:[#allocation3 + $0x10]] }
  0x60   : > { %v526_v47 = vsel %vm521_vm5, %v523_v44, %v525_v45  ;;  %v606_v51 = vrot.slane %v3867_v26, 5  ;;  %v692_v18 = vrot.slane %v3874_v27, 6  ;;  %v694_v19 = vrot.slane %v3889_v28, 6  ;;  %s5239_s2 = sld [smem:[#allocation3 + $0x93]] }
  0x61   : > { %v524_v48 = vsel %vm521_vm5, %v522_v46, %v523_v44  ;;  %v610_v54 = vsel %vm189_vm1, %v607_v49, %v609_v50  ;;  %v691_v20 = vrot.slane %v3867_v26, 6  ;;  %v4023_v25 = vsel %vm153_vm0, %v3804_v1, 0.0  ;;  %s5243_s27 = sld [smem:[#allocation3 + $0x19]] }
  0x62   : > { %v608_v55 = vsel %vm189_vm1, %v606_v51, %v607_v49  ;;  %v4027_v29 = vsel %vm153_vm0, %v3810_v3, 0.0  ;;  %v695_v30 = vsel %vm690_vm6, %v692_v18, %v694_v19  ;;  %v170_v1 = vadd.f32 %v4019_v24, %v4015_v23  ;;  %s5276_s20 = sld [smem:[#allocation3 + $0x1b]] }
  0x63   : > { %220 = vrot.lane.b32.xlu1 %v3874_v27, %s6611_s12  ;;  %218 = vrot.lane.b32.xlu0 %v3867_v26, %s6611_s12  ;;  %v693_v0 = vsel %vm690_vm6, %v691_v20, %v692_v18  ;;  %v4043_v3 = vsel %vm153_vm0, %v3813_v4, 0.0  ;;  %v4059_v4 = vsel %vm153_vm0, %v3827_v8, 0.0  ;;  %s5306_s1 = sld [smem:[#allocation3 + $0x1d]] }
  0x64   : > { %v172_v36 = vadd.f32 %v4043_v3, %v170_v1  ;;  %s5322_s24 = sld [smem:[#allocation3 + $0xd2]] }
  0x66   : > { %v174_v40 = vadd.f32 %v4059_v4, %v172_v36 }
  0x67   : > { %236 = vrot.lane.b32.xlu1 %v3874_v27, %s6603_s13  ;;  %234 = vrot.lane.b32.xlu0 %v3867_v26, %s6603_s13 }
  0x6b   : > { %246 = vrot.lane.b32.xlu1 %v3874_v27, %s6607_s14  ;;  %244 = vrot.lane.b32.xlu0 %v3867_v26, %s6607_s14 }
  0x6f   : > { %256 = vrot.lane.b32.xlu1 %v3874_v27, %s6609_s16  ;;  %254 = vrot.lane.b32.xlu0 %v3867_v26, %s6609_s16 }
  0x73   : > { %276 = vrot.lane.b32.xlu1 %v271_v32, %s6613_s10  ;;  %274 = vrot.lane.b32.xlu0 %v269_v33, %s6613_s10 }
  0x77   : > { %286 = vrot.lane.b32.xlu1 %v271_v32, %s6605_s29  ;;  %284 = vrot.lane.b32.xlu0 %v269_v33, %s6605_s29 }
  0x7b   : > { %296 = vrot.lane.b32.xlu1 %v271_v32, %s6611_s12  ;;  %294 = vrot.lane.b32.xlu0 %v269_v33, %s6611_s12 }
  0x7f   : > { %323 = vrot.lane.b32.xlu1 %v271_v32, %s6603_s13  ;;  %321 = vrot.lane.b32.xlu0 %v269_v33, %s6603_s13 }
  0x83   : > { %333 = vrot.lane.b32.xlu1 %v271_v32, %s6607_s14  ;;  %331 = vrot.lane.b32.xlu0 %v269_v33, %s6607_s14 }
  0x87   : > { %343 = vrot.lane.b32.xlu1 %v271_v32, %s6609_s16  ;;  %341 = vrot.lane.b32.xlu0 %v269_v33, %s6609_s16  ;;  %v177_v32 = vadd.f32 %v4027_v29, %v4023_v25  ;;  %v4047_v33 = vsel %vm153_vm0, %v3816_v5, 0.0  ;;  %v4063_v5 = vsel %vm153_vm0, %v3830_v9, 0.0 }
  0x8b   : > { %361 = vrot.lane.b32.xlu1 %v356_v37, %s6613_s10  ;;  %359 = vrot.lane.b32.xlu0 %v354_v38, %s6613_s10 }
  0x8f   : > { %371 = vrot.lane.b32.xlu1 %v356_v37, %s6605_s29  ;;  %369 = vrot.lane.b32.xlu0 %v354_v38, %s6605_s29 }
  0x93   : > { %381 = vrot.lane.b32.xlu1 %v356_v37, %s6611_s12  ;;  %379 = vrot.lane.b32.xlu0 %v354_v38, %s6611_s12 }
  0x97   : > { %408 = vrot.lane.b32.xlu1 %v356_v37, %s6603_s13  ;;  %406 = vrot.lane.b32.xlu0 %v354_v38, %s6603_s13 }
  0x9b   : > { %418 = vrot.lane.b32.xlu1 %v356_v37, %s6607_s14  ;;  %416 = vrot.lane.b32.xlu0 %v354_v38, %s6607_s14 }
  0x9f   : > { %428 = vrot.lane.b32.xlu1 %v356_v37, %s6609_s16  ;;  %426 = vrot.lane.b32.xlu0 %v354_v38, %s6609_s16  ;;  %v179_v37 = vadd.f32 %v4047_v33, %v177_v32 }
  0xa1   : > { %v181_v41 = vadd.f32 %v4063_v5, %v179_v37 }
  0xa3   : > { %446 = vrot.lane.b32.xlu1 %v441_v42, %s6613_s10  ;;  %444 = vrot.lane.b32.xlu0 %v439_v43, %s6613_s10 }
  0xa7   : > { %456 = vrot.lane.b32.xlu1 %v441_v42, %s6605_s29  ;;  %454 = vrot.lane.b32.xlu0 %v439_v43, %s6605_s29 }
  0xab   : > { %466 = vrot.lane.b32.xlu1 %v441_v42, %s6611_s12  ;;  %464 = vrot.lane.b32.xlu0 %v439_v43, %s6611_s12 }
  0xaf   : > { %493 = vrot.lane.b32.xlu1 %v441_v42, %s6603_s13  ;;  %491 = vrot.lane.b32.xlu0 %v439_v43, %s6603_s13 }
  0xb3   : > { %503 = vrot.lane.b32.xlu1 %v441_v42, %s6607_s14  ;;  %501 = vrot.lane.b32.xlu0 %v439_v43, %s6607_s14 }
  0xb7   : > { %513 = vrot.lane.b32.xlu1 %v441_v42, %s6609_s16  ;;  %511 = vrot.lane.b32.xlu0 %v439_v43, %s6609_s16  ;;  %v182_v42 = vmul.f32 0.25, %v174_v40  ;;  %v183_v43 = vmul.f32 0.25, %v181_v41 }
  0xb9   : > { %v775_v46 = vsel %vm153_vm0, %v182_v42, 0.0 }
  0xbb   : > { %531 = vrot.lane.b32.xlu1 %v526_v47, %s6613_s10  ;;  %529 = vrot.lane.b32.xlu0 %v524_v48, %s6613_s10 }
  0xbf   : > { %541 = vrot.lane.b32.xlu1 %v526_v47, %s6605_s29  ;;  %539 = vrot.lane.b32.xlu0 %v524_v48, %s6605_s29 }
  0xc3   : > { %551 = vrot.lane.b32.xlu1 %v526_v47, %s6611_s12  ;;  %549 = vrot.lane.b32.xlu0 %v524_v48, %s6611_s12 }
  0xc7   : > { %578 = vrot.lane.b32.xlu1 %v526_v47, %s6603_s13  ;;  %576 = vrot.lane.b32.xlu0 %v524_v48, %s6603_s13 }
  0xcb   : > { %588 = vrot.lane.b32.xlu1 %v526_v47, %s6607_s14  ;;  %586 = vrot.lane.b32.xlu0 %v524_v48, %s6607_s14 }
  0xcd   : > { %v3968_v52 = vpop.permute.xlu1 %208  ;;  %v3970_v53 = vpop.permute.xlu0 %198 }
  0xcf   : > { %598 = vrot.lane.b32.xlu1 %v526_v47, %s6609_s16  ;;  %596 = vrot.lane.b32.xlu0 %v524_v48, %s6609_s16  ;;  %v776_v47 = vsel %vm153_vm0, %v183_v43, 0.0  ;;  %v779_v48 = vrot.slane %v775_v46, 5 }
  0xd0   : > { %v780_v49 = vrot.slane %v776_v47, 5 }
  0xd1   : > { %v3976_v56 = vpop.permute.xlu1 %210  ;;  %v3978_v57 = vpop.permute.xlu0 %200 }
  0xd2   : > { %v4138_v41 = vsel %vm189_vm1, %v780_v49, 0.0 }
  0xd3   : > { %615 = vrot.lane.b32.xlu1 %v610_v54, %s6613_s10  ;;  %613 = vrot.lane.b32.xlu0 %v608_v55, %s6613_s10  ;;  %6656 = vst [vmem:[#allocation41_spill] sm:$0xff] %v4138_v41  ;;  %v858_v43 = vrot.slane %v4138_v41, 1 }
  0xd5   : > { %v3982_v58 = vpop.permute.xlu1 %220  ;;  %v3984_v59 = vpop.permute.xlu0 %218 }
  0xd7   : > { %625 = vrot.lane.b32.xlu1 %v610_v54, %s6605_s29  ;;  %623 = vrot.lane.b32.xlu0 %v608_v55, %s6605_s29 }
  0xd9   : > { %v3988_v60 = vpop.permute.xlu1 %236  ;;  %v3990_v61 = vpop.permute.xlu0 %234 }
  0xdb   : > { %635 = vrot.lane.b32.xlu1 %v610_v54, %s6611_s12  ;;  %633 = vrot.lane.b32.xlu0 %v608_v55, %s6611_s12 }
  0xdd   : > { %v3994_v62 = vpop.permute.xlu1 %246  ;;  %v3996_v63 = vpop.permute.xlu0 %244 }
  0xdf   : > { %662 = vrot.lane.b32.xlu1 %v610_v54, %s6603_s13  ;;  %660 = vrot.lane.b32.xlu0 %v608_v55, %s6603_s13 }
  0xe1   : > { %v4000_v14 = vpop.permute.xlu1 %256  ;;  %v4002_v17 = vpop.permute.xlu0 %254 }
  0xe3   : > { %672 = vrot.lane.b32.xlu1 %v610_v54, %s6607_s14  ;;  %670 = vrot.lane.b32.xlu0 %v608_v55, %s6607_s14 }
  0xe5   : > { %v4009_v21 = vpop.permute.xlu1 %276  ;;  %v4011_v22 = vpop.permute.xlu0 %274 }
  0xe6   : > { %6631 = vst [vmem:[#allocation16_spill] sm:$0xff] %v4011_v22 }
  0xe7   : > { %682 = vrot.lane.b32.xlu1 %v610_v54, %s6609_s16  ;;  %680 = vrot.lane.b32.xlu0 %v608_v55, %s6609_s16  ;;  %v4096_v54 = vsel %vm189_vm1, %v779_v48, %v780_v49  ;;  %v4099_v55 = vsel %vm189_vm1, 0.0, %v779_v48 }
  0xe8   : > { %6644 = vst [vmem:[#allocation29_spill] sm:$0xff] %v4096_v54  ;;  %6645 = vst [vmem:[#allocation30_spill] sm:$0xff] %v4099_v55  ;;  %v856_v42 = vrot.slane %v4096_v54, 1  ;;  %v855_v46 = vrot.slane %v4099_v55, 1 }
  0xe9   : > { %v4033_v31 = vpop.permute.xlu1 %286  ;;  %v4035_v2 = vpop.permute.xlu0 %284 }
  0xea   : > { %6632 = vst [vmem:[#allocation17_spill] sm:$0xff] %v4033_v31  ;;  %6633 = vst [vmem:[#allocation18_spill] sm:$0xff] %v4035_v2  ;;  %v859_v49 = vsel %vm266_vm2, %v856_v42, %v858_v43 }
  0xeb   : > { %700 = vrot.lane.b32.xlu1 %v695_v30, %s6613_s10  ;;  %698 = vrot.lane.b32.xlu0 %v693_v0, %s6613_s10 }
  0xed   : > { %v4051_v34 = vpop.permute.xlu1 %296  ;;  %v4053_v35 = vpop.permute.xlu0 %294 }
  0xee   : > { %6634 = vst [vmem:[#allocation19_spill] sm:$0xff] %v4051_v34  ;;  %6635 = vst [vmem:[#allocation20_spill] sm:$0xff] %v4053_v35 }
  0xef   : > { %710 = vrot.lane.b32.xlu1 %v695_v30, %s6605_s29  ;;  %708 = vrot.lane.b32.xlu0 %v693_v0, %s6605_s29 }
  0xf1   : > { %v4067_v38 = vpop.permute.xlu1 %323  ;;  %v4069_v39 = vpop.permute.xlu0 %321 }
  0xf2   : > { %6636 = vst [vmem:[#allocation21_spill] sm:$0xff] %v4067_v38  ;;  %6637 = vst [vmem:[#allocation22_spill] sm:$0xff] %v4069_v39 }
  0xf3   : > { %720 = vrot.lane.b32.xlu1 %v695_v30, %s6611_s12  ;;  %718 = vrot.lane.b32.xlu0 %v693_v0, %s6611_s12 }
  0xf5   : > { %v4075_v8 = vpop.permute.xlu1 %333  ;;  %v4077_v9 = vpop.permute.xlu0 %331 }
  0xf6   : > { %6638 = vst [vmem:[#allocation23_spill] sm:$0xff] %v4075_v8  ;;  %6639 = vst [vmem:[#allocation24_spill] sm:$0xff] %v4077_v9 }
  0xf7   : > { %747 = vrot.lane.b32.xlu1 %v695_v30, %s6603_s13  ;;  %745 = vrot.lane.b32.xlu0 %v693_v0, %s6603_s13 }
  0xf9   : > { %v4081_v44 = vpop.permute.xlu1 %343  ;;  %v4083_v45 = vpop.permute.xlu0 %341 }
  0xfa   : > { %6640 = vst [vmem:[#allocation25_spill] sm:$0xff] %v4081_v44  ;;  %6641 = vst [vmem:[#allocation26_spill] sm:$0xff] %v4083_v45  ;;  %v2240_v45 = vstv %s3346_s23  ;;  %s4743_s23 = sld [smem:[#allocation3 + $0x70]] }
  0xfb   : > { %757 = vrot.lane.b32.xlu1 %v695_v30, %s6607_s14  ;;  %755 = vrot.lane.b32.xlu0 %v693_v0, %s6607_s14 }
  0xfd   : > { %v4089_v50 = vpop.permute.xlu1 %361  ;;  %v4091_v51 = vpop.permute.xlu0 %359 }
  0xfe   : > { %6642 = vst [vmem:[#allocation27_spill] sm:$0xff] %v4089_v50  ;;  %6643 = vst [vmem:[#allocation28_spill] sm:$0xff] %v4091_v51 }
  0xff   : > { %767 = vrot.lane.b32.xlu1 %v695_v30, %s6609_s16  ;;  %765 = vrot.lane.b32.xlu0 %v693_v0, %s6609_s16 }
 0x101   : > { %v4101_v18 = vpop.permute.xlu1 %371  ;;  %v4103_v19 = vpop.permute.xlu0 %369 }
 0x102   : > { %6646 = vst [vmem:[#allocation31_spill] sm:$0xff] %v4101_v18  ;;  %6647 = vst [vmem:[#allocation32_spill] sm:$0xff] %v4103_v19  ;;  %v1275_v18 = vrot.slane %v4099_v55, 6 }
 0x103   : > { %789 = vrot.lane.b32.xlu1 %v4096_v54, %s6613_s10  ;;  %787 = vrot.lane.b32.xlu0 %v4099_v55, %s6613_s10 }
 0x105   : > { %v4109_v20 = vpop.permute.xlu1 %381  ;;  %v4111_v30 = vpop.permute.xlu0 %379 }
 0x106   : > { %6648 = vst [vmem:[#allocation33_spill] sm:$0xff] %v4109_v20  ;;  %6649 = vst [vmem:[#allocation34_spill] sm:$0xff] %v4111_v30 }
 0x107   : > { %799 = vrot.lane.b32.xlu1 %v4096_v54, %s6605_s29  ;;  %797 = vrot.lane.b32.xlu0 %v4099_v55, %s6605_s29 }
 0x109   : > { %v4117_v0 = vpop.permute.xlu1 %408  ;;  %v4119_v1 = vpop.permute.xlu0 %406 }
 0x10a   : > { %6650 = vst [vmem:[#allocation35_spill] sm:$0xff] %v4117_v0  ;;  %6651 = vst [vmem:[#allocation36_spill] sm:$0xff] %v4119_v1 }
 0x10b   : > { %809 = vrot.lane.b32.xlu1 %v4096_v54, %s6611_s12  ;;  %807 = vrot.lane.b32.xlu0 %v4099_v55, %s6611_s12 }
 0x10d   : > { %v4125_v32 = vpop.permute.xlu1 %418  ;;  %v4127_v36 = vpop.permute.xlu0 %416 }
 0x10e   : > { %6652 = vst [vmem:[#allocation37_spill] sm:$0xff] %v4125_v32  ;;  %6653 = vst [vmem:[#allocation38_spill] sm:$0xff] %v4127_v36 }
 0x10f   : > { %825 = vrot.lane.b32.xlu1 %v4096_v54, %s6603_s13  ;;  %823 = vrot.lane.b32.xlu0 %v4099_v55, %s6603_s13 }
 0x111   : > { %v4133_v37 = vpop.permute.xlu1 %428  ;;  %v4135_v40 = vpop.permute.xlu0 %426 }
 0x112   : > { %6654 = vst [vmem:[#allocation39_spill] sm:$0xff] %v4133_v37  ;;  %6655 = vst [vmem:[#allocation40_spill] sm:$0xff] %v4135_v40  ;;  %v857_v40 = vsel %vm266_vm2, %v855_v46, %v856_v42 }
 0x113   : > { %835 = vrot.lane.b32.xlu1 %v4096_v54, %s6607_s14  ;;  %833 = vrot.lane.b32.xlu0 %v4099_v55, %s6607_s14 }
 0x115   : > { %v4147_v47 = vpop.permute.xlu1 %446  ;;  %v4149_v48 = vpop.permute.xlu0 %444 }
 0x116   : > { %6657 = vst [vmem:[#allocation42_spill] sm:$0xff] %v4147_v47  ;;  %6658 = vst [vmem:[#allocation43_spill] sm:$0xff] %v4149_v48 }
 0x117   : > { %845 = vrot.lane.b32.xlu1 %v4096_v54, %s6609_s16  ;;  %843 = vrot.lane.b32.xlu0 %v4099_v55, %s6609_s16 }
 0x119   : > { %v4157_v37 = vpop.permute.xlu1 %456  ;;  %v4159_v36 = vpop.permute.xlu0 %454 }
 0x11a   : > { %6659 = vst [vmem:[#allocation44_spill] sm:$0xff] %v4157_v37  ;;  %6660 = vst [vmem:[#allocation45_spill] sm:$0xff] %v4159_v36 }
 0x11b   : > { %864 = vrot.lane.b32.xlu1 %v859_v49, %s6613_s10  ;;  %862 = vrot.lane.b32.xlu0 %v857_v40, %s6613_s10 }
 0x11d   : > { %v4163_v47 = vpop.permute.xlu1 %466  ;;  %v4165_v48 = vpop.permute.xlu0 %464 }
 0x11e   : > { %6661 = vst [vmem:[#allocation46_spill] sm:$0xff] %v4163_v47  ;;  %6662 = vst [vmem:[#allocation47_spill] sm:$0xff] %v4165_v48 }
 0x11f   : > { %874 = vrot.lane.b32.xlu1 %v859_v49, %s6605_s29  ;;  %872 = vrot.lane.b32.xlu0 %v857_v40, %s6605_s29 }
 0x121   : > { %v4169_v32 = vpop.permute.xlu1 %493  ;;  %v4171_v43 = vpop.permute.xlu0 %491 }
 0x122   : > { %6663 = vst [vmem:[#allocation48_spill] sm:$0xff] %v4169_v32  ;;  %6664 = vst [vmem:[#allocation49_spill] sm:$0xff] %v4171_v43  ;;  %v940_v43 = vrot.slane %v4096_v54, 2  ;;  %v942_v32 = vrot.slane %v4138_v41, 2 }
 0x123   : > { %884 = vrot.lane.b32.xlu1 %v859_v49, %s6611_s12  ;;  %882 = vrot.lane.b32.xlu0 %v857_v40, %s6611_s12 }
 0x125   : > { %v4175_v42 = vpop.permute.xlu1 %503  ;;  %v4177_v46 = vpop.permute.xlu0 %501 }
 0x126   : > { %6665 = vst [vmem:[#allocation50_spill] sm:$0xff] %v4175_v42  ;;  %6666 = vst [vmem:[#allocation51_spill] sm:$0xff] %v4177_v46  ;;  %v939_v42 = vrot.slane %v4099_v55, 2 }
 0x127   : > { %911 = vrot.lane.b32.xlu1 %v859_v49, %s6603_s13  ;;  %909 = vrot.lane.b32.xlu0 %v857_v40, %s6603_s13 }
 0x129   : > { %v4181_v48 = vpop.permute.xlu1 %513  ;;  %v4183_v47 = vpop.permute.xlu0 %511 }
 0x12a   : > { %6667 = vst [vmem:[#allocation52_spill] sm:$0xff] %v4181_v48  ;;  %6668 = vst [vmem:[#allocation53_spill] sm:$0xff] %v4183_v47  ;;  %v943_v47 = vsel %vm351_vm3, %v940_v43, %v942_v32  ;;  %v941_v48 = vsel %vm351_vm3, %v939_v42, %v940_v43 }
 0x12b   : > { %921 = vrot.lane.b32.xlu1 %v859_v49, %s6607_s14  ;;  %919 = vrot.lane.b32.xlu0 %v857_v40, %s6607_s14 }
 0x12d   : > { %v4190_v36 = vpop.permute.xlu1 %531  ;;  %v4192_v46 = vpop.permute.xlu0 %529 }
 0x12e   : > { %6669 = vst [vmem:[#allocation54_spill] sm:$0xff] %v4190_v36  ;;  %6670 = vst [vmem:[#allocation55_spill] sm:$0xff] %v4192_v46 }
 0x12f   : > { %931 = vrot.lane.b32.xlu1 %v859_v49, %s6609_s16  ;;  %929 = vrot.lane.b32.xlu0 %v857_v40, %s6609_s16 }
 0x131   : > { %v4198_v37 = vpop.permute.xlu1 %541  ;;  %v4200_v1 = vpop.permute.xlu0 %539 }
 0x132   : > { %6671 = vst [vmem:[#allocation56_spill] sm:$0xff] %v4198_v37  ;;  %6672 = vst [vmem:[#allocation57_spill] sm:$0xff] %v4200_v1 }
 0x133   : > { %948 = vrot.lane.b32.xlu1 %v943_v47, %s6613_s10  ;;  %946 = vrot.lane.b32.xlu0 %v941_v48, %s6613_s10 }
 0x135   : > { %v4204_v0 = vpop.permute.xlu1 %551  ;;  %v4206_v36 = vpop.permute.xlu0 %549 }
 0x136   : > { %6673 = vst [vmem:[#allocation58_spill] sm:$0xff] %v4204_v0  ;;  %6674 = vst [vmem:[#allocation59_spill] sm:$0xff] %v4206_v36 }
 0x137   : > { %958 = vrot.lane.b32.xlu1 %v943_v47, %s6605_s29  ;;  %956 = vrot.lane.b32.xlu0 %v941_v48, %s6605_s29 }
 0x139   : > { %v4210_v40 = vpop.permute.xlu1 %578  ;;  %v4212_v32 = vpop.permute.xlu0 %576 }
 0x13a   : > { %6675 = vst [vmem:[#allocation60_spill] sm:$0xff] %v4210_v40  ;;  %6676 = vst [vmem:[#allocation61_spill] sm:$0xff] %v4212_v32  ;;  %v1024_v32 = vrot.slane %v4096_v54, 3  ;;  %v1026_v40 = vrot.slane %v4138_v41, 3 }
 0x13b   : > { %968 = vrot.lane.b32.xlu1 %v943_v47, %s6611_s12  ;;  %966 = vrot.lane.b32.xlu0 %v941_v48, %s6611_s12 }
 0x13d   : > { %v4216_v49 = vpop.permute.xlu1 %588  ;;  %v4218_v43 = vpop.permute.xlu0 %586 }
 0x13e   : > { %6677 = vst [vmem:[#allocation62_spill] sm:$0xff] %v4216_v49  ;;  %6678 = vst [vmem:[#allocation63_spill] sm:$0xff] %v4218_v43  ;;  %v1023_v49 = vrot.slane %v4099_v55, 3 }
 0x13f   : > { %995 = vrot.lane.b32.xlu1 %v943_v47, %s6603_s13  ;;  %993 = vrot.lane.b32.xlu0 %v941_v48, %s6603_s13 }
 0x141   : > { %v4222_v42 = vpop.permute.xlu1 %598  ;;  %v4224_v36 = vpop.permute.xlu0 %596 }
 0x142   : > { %6679 = vst [vmem:[#allocation64_spill] sm:$0xff] %v4222_v42  ;;  %6680 = vst [vmem:[#allocation65_spill] sm:$0xff] %v4224_v36  ;;  %v1027_v36 = vsel %vm436_vm4, %v1024_v32, %v1026_v40  ;;  %v1025_v42 = vsel %vm436_vm4, %v1023_v49, %v1024_v32 }
 0x143   : > { %1005 = vrot.lane.b32.xlu1 %v943_v47, %s6607_s14  ;;  %1003 = vrot.lane.b32.xlu0 %v941_v48, %s6607_s14 }
 0x145   : > { %v4231_v0 = vpop.permute.xlu1 %615  ;;  %v4233_v43 = vpop.permute.xlu0 %613 }
 0x146   : > { %6681 = vst [vmem:[#allocation66_spill] sm:$0xff] %v4231_v0  ;;  %6682 = vst [vmem:[#allocation67_spill] sm:$0xff] %v4233_v43 }
 0x147   : > { %1015 = vrot.lane.b32.xlu1 %v943_v47, %s6609_s16  ;;  %1013 = vrot.lane.b32.xlu0 %v941_v48, %s6609_s16 }
 0x149   : > { %v4239_v1 = vpop.permute.xlu1 %625  ;;  %v4241_v37 = vpop.permute.xlu0 %623 }
 0x14a   : > { %6683 = vst [vmem:[#allocation68_spill] sm:$0xff] %v4239_v1  ;;  %6684 = vst [vmem:[#allocation69_spill] sm:$0xff] %v4241_v37 }
 0x14b   : > { %1032 = vrot.lane.b32.xlu1 %v1027_v36, %s6613_s10  ;;  %1030 = vrot.lane.b32.xlu0 %v1025_v42, %s6613_s10 }
 0x14d   : > { %v4245_v46 = vpop.permute.xlu1 %635  ;;  %v4247_v0 = vpop.permute.xlu0 %633 }
 0x14e   : > { %6685 = vst [vmem:[#allocation70_spill] sm:$0xff] %v4245_v46  ;;  %6686 = vst [vmem:[#allocation71_spill] sm:$0xff] %v4247_v0 }
 0x14f   : > { %1042 = vrot.lane.b32.xlu1 %v1027_v36, %s6605_s29  ;;  %1040 = vrot.lane.b32.xlu0 %v1025_v42, %s6605_s29 }
 0x151   : > { %v4251_v47 = vpop.permute.xlu1 %662  ;;  %v4253_v48 = vpop.permute.xlu0 %660 }
 0x152   : > { %6687 = vst [vmem:[#allocation72_spill] sm:$0xff] %v4251_v47  ;;  %6688 = vst [vmem:[#allocation73_spill] sm:$0xff] %v4253_v48  ;;  %v1108_v48 = vrot.slane %v4096_v54, 4  ;;  %v1110_v47 = vrot.slane %v4138_v41, 4 }
 0x153   : > { %1052 = vrot.lane.b32.xlu1 %v1027_v36, %s6611_s12  ;;  %1050 = vrot.lane.b32.xlu0 %v1025_v42, %s6611_s12 }
 0x155   : > { %v4257_v40 = vpop.permute.xlu1 %672  ;;  %v4259_v32 = vpop.permute.xlu0 %670 }
 0x156   : > { %6689 = vst [vmem:[#allocation74_spill] sm:$0xff] %v4257_v40  ;;  %6690 = vst [vmem:[#allocation75_spill] sm:$0xff] %v4259_v32  ;;  %v1107_v40 = vrot.slane %v4099_v55, 4 }
 0x157   : > { %1079 = vrot.lane.b32.xlu1 %v1027_v36, %s6603_s13  ;;  %1077 = vrot.lane.b32.xlu0 %v1025_v42, %s6603_s13 }
 0x159   : > { %v4263_v49 = vpop.permute.xlu1 %682  ;;  %v4265_v0 = vpop.permute.xlu0 %680 }
 0x15a   : > { %6691 = vst [vmem:[#allocation76_spill] sm:$0xff] %v4263_v49  ;;  %6692 = vst [vmem:[#allocation77_spill] sm:$0xff] %v4265_v0  ;;  %v1111_v0 = vsel %vm521_vm5, %v1108_v48, %v1110_v47  ;;  %v1109_v49 = vsel %vm521_vm5, %v1107_v40, %v1108_v48 }
 0x15b   : > { %1089 = vrot.lane.b32.xlu1 %v1027_v36, %s6607_s14  ;;  %1087 = vrot.lane.b32.xlu0 %v1025_v42, %s6607_s14 }
 0x15d   : > { %v4272_v46 = vpop.permute.xlu1 %700  ;;  %v4274_v32 = vpop.permute.xlu0 %698 }
 0x15e   : > { %6693 = vst [vmem:[#allocation78_spill] sm:$0xff] %v4272_v46  ;;  %6694 = vst [vmem:[#allocation79_spill] sm:$0xff] %v4274_v32 }
 0x15f   : > { %1099 = vrot.lane.b32.xlu1 %v1027_v36, %s6609_s16  ;;  %1097 = vrot.lane.b32.xlu0 %v1025_v42, %s6609_s16 }
 0x161   : > { %v4280_v37 = vpop.permute.xlu1 %710  ;;  %v4282_v1 = vpop.permute.xlu0 %708 }
 0x162   : > { %6695 = vst [vmem:[#allocation80_spill] sm:$0xff] %v4280_v37  ;;  %6696 = vst [vmem:[#allocation81_spill] sm:$0xff] %v4282_v1 }
 0x163   : > { %1116 = vrot.lane.b32.xlu1 %v1111_v0, %s6613_s10  ;;  %1114 = vrot.lane.b32.xlu0 %v1109_v49, %s6613_s10 }
 0x165   : > { %v4286_v43 = vpop.permute.xlu1 %720  ;;  %v4288_v46 = vpop.permute.xlu0 %718 }
 0x166   : > { %6697 = vst [vmem:[#allocation82_spill] sm:$0xff] %v4286_v43  ;;  %6698 = vst [vmem:[#allocation83_spill] sm:$0xff] %v4288_v46 }
 0x167   : > { %1126 = vrot.lane.b32.xlu1 %v1111_v0, %s6605_s29  ;;  %1124 = vrot.lane.b32.xlu0 %v1109_v49, %s6605_s29 }
 0x169   : > { %v4292_v36 = vpop.permute.xlu1 %747  ;;  %v4294_v42 = vpop.permute.xlu0 %745 }
 0x16a   : > { %6699 = vst [vmem:[#allocation84_spill] sm:$0xff] %v4292_v36  ;;  %6700 = vst [vmem:[#allocation85_spill] sm:$0xff] %v4294_v42  ;;  %v1192_v42 = vrot.slane %v4096_v54, 5  ;;  %v1194_v36 = vrot.slane %v4138_v41, 5 }
 0x16b   : > { %1136 = vrot.lane.b32.xlu1 %v1111_v0, %s6611_s12  ;;  %1134 = vrot.lane.b32.xlu0 %v1109_v49, %s6611_s12 }
 0x16d   : > { %v4298_v47 = vpop.permute.xlu1 %757  ;;  %v4300_v48 = vpop.permute.xlu0 %755 }
 0x16e   : > { %6701 = vst [vmem:[#allocation86_spill] sm:$0xff] %v4298_v47  ;;  %6702 = vst [vmem:[#allocation87_spill] sm:$0xff] %v4300_v48  ;;  %v1191_v47 = vrot.slane %v4099_v55, 5 }
 0x16f   : > { %1163 = vrot.lane.b32.xlu1 %v1111_v0, %s6603_s13  ;;  %1161 = vrot.lane.b32.xlu0 %v1109_v49, %s6603_s13 }
 0x171   : > { %v4304_v40 = vpop.permute.xlu1 %767  ;;  %v4306_v46 = vpop.permute.xlu0 %765 }
 0x172   : > { %6703 = vst [vmem:[#allocation88_spill] sm:$0xff] %v4304_v40  ;;  %6704 = vst [vmem:[#allocation89_spill] sm:$0xff] %v4306_v46  ;;  %v4320_v46 = vsel %vm189_vm1, %v1192_v42, %v1194_v36  ;;  %v4323_v40 = vsel %vm189_vm1, %v1191_v47, %v1192_v42 }
 0x173   : > { %1173 = vrot.lane.b32.xlu1 %v1111_v0, %s6607_s14  ;;  %1171 = vrot.lane.b32.xlu0 %v1109_v49, %s6607_s14 }
 0x175   : > { %v4313_v43 = vpop.permute.xlu1 %789  ;;  %v4315_v48 = vpop.permute.xlu0 %787 }
 0x176   : > { %6705 = vst [vmem:[#allocation90_spill] sm:$0xff] %v4313_v43  ;;  %6706 = vst [vmem:[#allocation91_spill] sm:$0xff] %v4315_v48 }
 0x177   : > { %1183 = vrot.lane.b32.xlu1 %v1111_v0, %s6609_s16  ;;  %1181 = vrot.lane.b32.xlu0 %v1109_v49, %s6609_s16 }
 0x179   : > { %v4325_v1 = vpop.permute.xlu1 %799  ;;  %v4327_v37 = vpop.permute.xlu0 %797 }
 0x17a   : > { %6707 = vst [vmem:[#allocation92_spill] sm:$0xff] %v4325_v1  ;;  %6708 = vst [vmem:[#allocation93_spill] sm:$0xff] %v4327_v37 }
 0x17b   : > { %1200 = vrot.lane.b32.xlu1 %v4320_v46, %s6613_s10  ;;  %1198 = vrot.lane.b32.xlu0 %v4323_v40, %s6613_s10 }
 0x17d   : > { %v4333_v48 = vpop.permute.xlu1 %809  ;;  %v4335_v0 = vpop.permute.xlu0 %807 }
 0x17e   : > { %6709 = vst [vmem:[#allocation94_spill] sm:$0xff] %v4333_v48  ;;  %6710 = vst [vmem:[#allocation95_spill] sm:$0xff] %v4335_v0 }
 0x17f   : > { %1210 = vrot.lane.b32.xlu1 %v4320_v46, %s6605_s29  ;;  %1208 = vrot.lane.b32.xlu0 %v4323_v40, %s6605_s29 }
 0x181   : > { %v4341_v49 = vpop.permute.xlu1 %825  ;;  %v4343_v36 = vpop.permute.xlu0 %823 }
 0x182   : > { %6711 = vst [vmem:[#allocation96_spill] sm:$0xff] %v4341_v49  ;;  %6712 = vst [vmem:[#allocation97_spill] sm:$0xff] %v4343_v36 }
 0x183   : > { %1220 = vrot.lane.b32.xlu1 %v4320_v46, %s6611_s12  ;;  %1218 = vrot.lane.b32.xlu0 %v4323_v40, %s6611_s12 }
 0x185   : > { %v4349_v42 = vpop.permute.xlu1 %835  ;;  %v4351_v47 = vpop.permute.xlu0 %833 }
 0x186   : > { %6713 = vst [vmem:[#allocation98_spill] sm:$0xff] %v4349_v42  ;;  %6714 = vst [vmem:[#allocation99_spill] sm:$0xff] %v4351_v47 }
 0x187   : > { %1247 = vrot.lane.b32.xlu1 %v4320_v46, %s6603_s13  ;;  %1245 = vrot.lane.b32.xlu0 %v4323_v40, %s6603_s13 }
 0x189   : > { %v4357_v0 = vpop.permute.xlu1 %845  ;;  %v4359_v49 = vpop.permute.xlu0 %843 }
 0x18a   : > { %6715 = vst [vmem:[#allocation100_spill] sm:$0xff] %v4357_v0  ;;  %6716 = vst [vmem:[#allocation101_spill] sm:$0xff] %v4359_v49 }
 0x18b   : > { %1257 = vrot.lane.b32.xlu1 %v4320_v46, %s6607_s14  ;;  %1255 = vrot.lane.b32.xlu0 %v4323_v40, %s6607_s14 }
 0x18d   : > { %v4365_v36 = vpop.permute.xlu1 %864  ;;  %v4367_v42 = vpop.permute.xlu0 %862 }
 0x18e   : > { %6717 = vst [vmem:[#allocation102_spill] sm:$0xff] %v4365_v36  ;;  %6718 = vst [vmem:[#allocation103_spill] sm:$0xff] %v4367_v42 }
 0x191   : > { %v4369_v47 = vpop.permute.xlu0 %872  ;;  %v4371_v48 = vpop.permute.xlu1 %874 }
 0x192   : > { %6719 = vst [vmem:[#allocation104_spill] sm:$0xff] %v4369_v47  ;;  %6720 = vst [vmem:[#allocation105_spill] sm:$0xff] %v4371_v48 }
 0x195   : > { %v4373_v37 = vpop.permute.xlu0 %882  ;;  %v4375_v1 = vpop.permute.xlu1 %884 }
 0x196   : > { %6721 = vst [vmem:[#allocation106_spill] sm:$0xff] %v4373_v37  ;;  %6722 = vst [vmem:[#allocation107_spill] sm:$0xff] %v4375_v1 }
 0x199   : > { %v4377_v0 = vpop.permute.xlu0 %909  ;;  %v4379_v49 = vpop.permute.xlu1 %911 }
 0x19a   : > { %6723 = vst [vmem:[#allocation108_spill] sm:$0xff] %v4377_v0  ;;  %6724 = vst [vmem:[#allocation109_spill] sm:$0xff] %v4379_v49 }
 0x19d   : > { %v4381_v43 = vpop.permute.xlu0 %919  ;;  %v4383_v32 = vpop.permute.xlu1 %921 }
 0x19e   : > { %6725 = vst [vmem:[#allocation110_spill] sm:$0xff] %v4381_v43  ;;  %6726 = vst [vmem:[#allocation111_spill] sm:$0xff] %v4383_v32 }
 0x1a1   : > { %v4385_v30 = vpop.permute.xlu0 %929  ;;  %v4387_v36 = vpop.permute.xlu1 %931 }
 0x1a2   : > { %6727 = vst [vmem:[#allocation112_spill] sm:$0xff] %v4385_v30  ;;  %6728 = vst [vmem:[#allocation113_spill] sm:$0xff] %v4387_v36  ;;  %v1376_v30 = vmax.f32 %v3820_v6, %v3838_v11  ;;  %v1383_v36 = vmax.f32 %v3824_v7, %v3842_v12 }
 0x1a4   : > { %v1384_v32 = vrot.slane %v1383_v36, 4 }
 0x1a5   : > { %v4390_v47 = vpop.permute.xlu0 %946  ;;  %v4394_v37 = vpop.permute.xlu1 %948 }
 0x1a6   : > { %6729 = vst [vmem:[#allocation114_spill] sm:$0xff] %v4390_v47  ;;  %6730 = vst [vmem:[#allocation115_spill] sm:$0xff] %v4394_v37  ;;  %v1377_v37 = vrot.slane %v1376_v30, 4  ;;  %v1385_v49 = vmax.f32 %v1383_v36, %v1384_v32 }
 0x1a8   : > { %v1386_v48 = vrot.slane %v1385_v49, 2 }
 0x1a9   : > { %v4396_v0 = vpop.permute.xlu0 %956  ;;  %v4404_v43 = vpop.permute.xlu1 %958 }
 0x1aa   : > { %2122 = vmax.xlane.f32.xlu0 %v3820_v6  ;;  %6731 = vst [vmem:[#allocation116_spill] sm:$0xff] %v4396_v0  ;;  %6732 = vst [vmem:[#allocation117_spill] sm:$0xff] %v4404_v43  ;;  %v1390_v0 = vmax.f32 %v3834_v10, %v3846_v13  ;;  %v1397_v6 = vmax.f32 %v3852_v15, %v3856_v16  ;;  %v1378_v43 = vmax.f32 %v1376_v30, %v1377_v37 }
 0x1ac   : > { %v1379_v42 = vrot.slane %v1378_v43, 2 }
 0x1ad   : > { %v4407_v47 = vpop.permute.xlu0 %966 }
 0x1ae   : > { %2126 = vmax.xlane.f32.xlu0 %v3824_v7  ;;  %6733 = vst [vmem:[#allocation118_spill] sm:$0xff] %v4407_v47  ;;  %v1391_v7 = vrot.slane %v1390_v0, 4  ;;  %v1398_v47 = vrot.slane %v1397_v6, 4 }
 0x1af   : > { %2124 = vmax.xlane.f32.xlu1 %v3838_v11  ;;  %v4415_v11 = vpop.permute.xlu1 %968 }
 0x1b0   : > { %6734 = vst [vmem:[#allocation119_spill] sm:$0xff] %v4415_v11  ;;  %v1392_v1 = vmax.f32 %v1390_v0, %v1391_v7  ;;  %v1387_v11 = vmax.f32 %v1385_v49, %v1386_v48  ;;  %v1278_v0 = vrot.slane %v4138_v41, 6 }
 0x1b2   : > { %2128 = vmax.xlane.f32.xlu0 %v3842_v12  ;;  %v4417_v12 = vpop.permute.xlu0 %993  ;;  %v1393_v19 = vrot.slane %v1392_v1, 2 }
 0x1b3   : > { %2130 = vmax.xlane.f32.xlu1 %v3834_v10  ;;  %6735 = vst [vmem:[#allocation120_spill] sm:$0xff] %v4417_v12  ;;  %v4419_v20 = vpop.permute.xlu1 %995 }
 0x1b4   : > { %6736 = vst [vmem:[#allocation121_spill] sm:$0xff] %v4419_v20  ;;  %v1394_v36 = vmax.f32 %v1392_v1, %v1393_v19 }
 0x1b6   : > { %2132 = vmax.xlane.f32.xlu0 %v3846_v13  ;;  %v4421_v10 = vpop.permute.xlu0 %1003  ;;  %v1399_v13 = vmax.f32 %v1397_v6, %v1398_v47  ;;  %v1388_v6 = vrot.slane %v1387_v11, 1  ;;  %v1395_v48 = vrot.slane %v1394_v36, 1 }
 0x1b7   : > { %2134 = vmax.xlane.f32.xlu1 %v3852_v15  ;;  %6737 = vst [vmem:[#allocation122_spill] sm:$0xff] %v4421_v10  ;;  %v1276_v15 = vrot.slane %v4096_v54, 6  ;;  %v4425_v51 = vpop.permute.xlu1 %1005 }
 0x1b8   : > { %6738 = vst [vmem:[#allocation123_spill] sm:$0xff] %v4425_v51  ;;  %v1400_v30 = vrot.slane %v1399_v13, 2  ;;  %v1396_v19 = vmax.f32 %v1394_v36, %v1395_v48 }
 0x1b9   : > { %v1277_v32 = vsel %vm690_vm6, %v1275_v18, %v1276_v15 }
 0x1ba   : > { %2136 = vmax.xlane.f32.xlu0 %v3856_v16  ;;  %v1380_v16 = vmax.f32 %v1378_v43, %v1379_v42  ;;  %v4429_v37 = vpop.permute.xlu0 %1013  ;;  %v1401_v7 = vmax.f32 %v1399_v13, %v1400_v30  ;;  %v1279_v43 = vsel %vm690_vm6, %v1276_v15, %v1278_v0 }
 0x1bb   : > { %6739 = vst [vmem:[#allocation124_spill] sm:$0xff] %v4429_v37  ;;  %v4435_v49 = vpop.permute.xlu1 %1015 }
 0x1bc   : > { %v1381_v47 = vrot.slane %v1380_v16, 1  ;;  %6740 = vst [vmem:[#allocation125_spill] sm:$0xff] %v4435_v49  ;;  %v1402_v18 = vrot.slane %v1401_v7, 1 }
 0x1be   : > { %v1382_v42 = vmax.f32 %v1380_v16, %v1381_v47  ;;  %v4437_v51 = vpop.permute.xlu0 %1030 }
 0x1bf   : > { %6741 = vst [vmem:[#allocation126_spill] sm:$0xff] %v4437_v51  ;;  %v4443_v13 = vpop.permute.xlu1 %1032 }
 0x1c0   : > { %6742 = vst [vmem:[#allocation127_spill] sm:$0xff] %v4443_v13 }
 0x1c2   : > { %v4447_v15 = vpop.permute.xlu0 %1040 }
 0x1c3   : > { %6743 = vst [vmem:[#allocation128_spill] sm:$0xff] %v4447_v15  ;;  %v4453_v30 = vpop.permute.xlu1 %1042 }
 0x1c4   : > { %6744 = vst [vmem:[#allocation129_spill] sm:$0xff] %v4453_v30 }
 0x1c6   : > { %v4455_v0 = vpop.permute.xlu0 %1050 }
 0x1c7   : > { %6745 = vst [vmem:[#allocation130_spill] sm:$0xff] %v4455_v0 }
 0x1c8   : > { %1265 = vrot.lane.b32.xlu1 %v4323_v40, %s6609_s16  ;;  %v1389_v40 = vmax.f32 %v1387_v11, %v1388_v6  ;;  %v1403_v11 = vmax.f32 %v1401_v7, %v1402_v18  ;;  %v4460_v6 = vpop.permute.xlu1 %1052 }
 0x1c9   : > { %6746 = vst [vmem:[#allocation131_spill] sm:$0xff] %v4460_v6 }
 0x1ca   : > { %v1442_v1 = vsel %vm1441_vm7, %v1389_v40, %v1382_v42  ;;  %v4464_v7 = vpop.permute.xlu0 %1077 }
 0x1cb   : > { %v1444_v16 = vsel %vm1443_vm8, %v1396_v19, %v1442_v1  ;;  %6747 = vst [vmem:[#allocation132_spill] sm:$0xff] %v4464_v7 }
 0x1cc   : > { %1282 = vrot.lane.b32.xlu1 %v1277_v32, %s6613_s10  ;;  %v4472_v40 = vpop.permute.xlu1 %1079 }
 0x1cd   : > { %6748 = vst [vmem:[#allocation133_spill] sm:$0xff] %v4472_v40 }
 0x1ce   : > { %v4474_v18 = vpop.permute.xlu0 %1087 }
 0x1cf   : > { %6749 = vst [vmem:[#allocation134_spill] sm:$0xff] %v4474_v18 }
 0x1d0   : > { %1267 = vrot.lane.b32.xlu0 %v4320_v46, %s6609_s16  ;;  %1284 = vrot.lane.b32.xlu1 %v1279_v43, %s6613_s10  ;;  %v1446_v46 = vsel %vm1445_vm9, %v1403_v11, %v1444_v16  ;;  %v4480_v19 = vpop.permute.xlu1 %1089 }
 0x1d1   : > { %v1448_v36 = vsel %vm153_vm0, %v1446_v46, 0.0  ;;  %6750 = vst [vmem:[#allocation135_spill] sm:$0xff] %v4480_v19 }
 0x1d2   : > { %v1450_v47 = vrot.slane %v1448_v36, 5 }
 0x1d4   : > { %1292 = vrot.lane.b32.xlu0 %v1277_v32, %s6605_s29  ;;  %1294 = vrot.lane.b32.xlu1 %v1279_v43, %s6605_s29  ;;  %v1452_v48 = vsel %vm189_vm1, 0.0, %v1450_v47  ;;  %v4495_v1 = vpop.permute.xlu1 %1099 }
 0x1d5   : > { %v4470_v42 = vsel %vm266_vm2, %v1452_v48, 0.0  ;;  %6752 = vst [vmem:[#allocation137_spill] sm:$0xff] %v4495_v1 }
 0x1d8   : > { %1302 = vrot.lane.b32.xlu0 %v1277_v32, %s6611_s12  ;;  %1304 = vrot.lane.b32.xlu1 %v1279_v43, %s6611_s12  ;;  %v4501_v16 = vpop.permute.xlu1 %1116 }
 0x1d9   : > { %6754 = vst [vmem:[#allocation139_spill] sm:$0xff] %v4501_v16 }
 0x1dc   : > { %1329 = vrot.lane.b32.xlu0 %v1277_v32, %s6603_s13  ;;  %1331 = vrot.lane.b32.xlu1 %v1279_v43, %s6603_s13  ;;  %v4505_v36 = vpop.permute.xlu1 %1126 }
 0x1dd   : > { %6756 = vst [vmem:[#allocation141_spill] sm:$0xff] %v4505_v36 }
 0x1e0   : > { %1339 = vrot.lane.b32.xlu0 %v1277_v32, %s6607_s14  ;;  %1341 = vrot.lane.b32.xlu1 %v1279_v43, %s6607_s14  ;;  %v4509_v48 = vpop.permute.xlu1 %1136 }
 0x1e1   : > { %6758 = vst [vmem:[#allocation143_spill] sm:$0xff] %v4509_v48 }
 0x1e4   : > { %1349 = vrot.lane.b32.xlu0 %v1277_v32, %s6609_s16  ;;  %1351 = vrot.lane.b32.xlu1 %v1279_v43, %s6609_s16  ;;  %v4486_v32 = vpop.permute.xlu0 %1097  ;;  %v4493_v43 = vrot.slane %v4470_v42, 1 }
 0x1e5   : > { %6751 = vst [vmem:[#allocation136_spill] sm:$0xff] %v4486_v32  ;;  %v4513_v32 = vpop.permute.xlu1 %1163 }
 0x1e6   : > { %6760 = vst [vmem:[#allocation145_spill] sm:$0xff] %v4513_v32 }
 0x1e8   : > { %1454 = vrot.lane.b32.xlu0 %v4470_v42, %s6613_s10  ;;  %1460 = vrot.lane.b32.xlu1 %v4470_v42, %s6605_s29  ;;  %v4497_v11 = vpop.permute.xlu0 %1114 }
 0x1e9   : > { %6753 = vst [vmem:[#allocation138_spill] sm:$0xff] %v4497_v11  ;;  %v4517_v11 = vpop.permute.xlu1 %1173 }
 0x1ea   : > { %6762 = vst [vmem:[#allocation147_spill] sm:$0xff] %v4517_v11 }
 0x1ec   : > { %1466 = vrot.lane.b32.xlu0 %v4470_v42, %s6611_s12  ;;  %1476 = vrot.lane.b32.xlu1 %v4470_v42, %s6603_s13  ;;  %v4503_v46 = vpop.permute.xlu0 %1124 }
 0x1ed   : > { %6755 = vst [vmem:[#allocation140_spill] sm:$0xff] %v4503_v46  ;;  %v4521_v18 = vpop.permute.xlu1 %1183 }
 0x1ee   : > { %6764 = vst [vmem:[#allocation149_spill] sm:$0xff] %v4521_v18 }
 0x1f0   : > { %1482 = vrot.lane.b32.xlu0 %v4470_v42, %s6607_s14  ;;  %1488 = vrot.lane.b32.xlu1 %v4470_v42, %s6609_s16  ;;  %v4507_v47 = vpop.permute.xlu0 %1134 }
 0x1f1   : > { %6757 = vst [vmem:[#allocation142_spill] sm:$0xff] %v4507_v47  ;;  %v4525_v46 = vpop.permute.xlu1 %1200 }
 0x1f2   : > { %6766 = vst [vmem:[#allocation151_spill] sm:$0xff] %v4525_v46 }
 0x1f4   : > { %1497 = vrot.lane.b32.xlu0 %v4493_v43, %s6613_s10  ;;  %v4511_v19 = vpop.permute.xlu0 %1161 }
 0x1f5   : > { %6759 = vst [vmem:[#allocation144_spill] sm:$0xff] %v4511_v19  ;;  %v4529_v47 = vpop.permute.xlu1 %1210 }
 0x1f6   : > { %6768 = vst [vmem:[#allocation153_spill] sm:$0xff] %v4529_v47 }
 0x1f8   : > { %v4515_v1 = vpop.permute.xlu0 %1171 }
 0x1f9   : > { %6761 = vst [vmem:[#allocation146_spill] sm:$0xff] %v4515_v1  ;;  %v4533_v19 = vpop.permute.xlu1 %1220 }
 0x1fa   : > { %6770 = vst [vmem:[#allocation155_spill] sm:$0xff] %v4533_v19 }
 0x1fc   : > { %v4519_v40 = vpop.permute.xlu0 %1181 }
 0x1fd   : > { %6763 = vst [vmem:[#allocation148_spill] sm:$0xff] %v4519_v40  ;;  %v4537_v1 = vpop.permute.xlu1 %1247  ;;  %v2171_v40 = vlaneseq }
 0x1fe   : > { %6772 = vst [vmem:[#allocation157_spill] sm:$0xff] %v4537_v1 }
 0x1ff   : > { %v4543_v30 = vshrl.u32 %v2171_v40, 7 }
 0x200   : > { %v4523_v16 = vpop.permute.xlu0 %1198 }
 0x201   : > { %6765 = vst [vmem:[#allocation150_spill] sm:$0xff] %v4523_v16  ;;  %v4541_v7 = vpop.permute.xlu1 %1257  ;;  %v2172_v16 = vand.u32 127, %v2171_v40  ;;  %6775 = vst [vmem:[#allocation160_spill] sm:$0xff] %v4543_v30 }
 0x202   : > { %6774 = vst [vmem:[#allocation159_spill] sm:$0xff] %v4541_v7 }
 0x203   : > { %v2177_v6 = vadd.s32 4294967288, %v2172_v16 }
 0x204   : > { %v4527_v36 = vpop.permute.xlu0 %1208 }
 0x205   : > { %6767 = vst [vmem:[#allocation152_spill] sm:$0xff] %v4527_v36 }
 0x208   : > { %v4531_v48 = vpop.permute.xlu0 %1218 }
 0x209   : > { %6769 = vst [vmem:[#allocation154_spill] sm:$0xff] %v4531_v48  ;;  %v4546_v48 = vsub.s32 %v2177_v6, %v4543_v30 }
 0x20c   : > { %v4535_v32 = vpop.permute.xlu0 %1245 }
 0x20d   : > { %6771 = vst [vmem:[#allocation156_spill] sm:$0xff] %v4535_v32  ;;  %v4549_v32 = vsub.s32 %v2172_v16, %v4543_v30 }
 0x210   : > { %v4539_v11 = vpop.permute.xlu0 %1255 }
 0x211   : > { %6773 = vst [vmem:[#allocation158_spill] sm:$0xff] %v4539_v11 }
 0x233   : > { %v2123_v18 = vpop.xlane.xlu0 %2122 }
 0x234   : > { %v2176_v6 = vrot.slane %v2123_v18, %v4549_v32 }
 0x237   : > { %v2127_v46 = vpop.xlane.xlu0 %2126 }
 0x238   : > { %v2125_v36 = vpop.xlane.xlu1 %2124  ;;  %v2187_v7 = vrot.slane %v2127_v46, %v4549_v32 }
 0x239   : > { %v2181_v13 = vrot.slane %v2125_v36, %v4546_v48 }
 0x23b   : > { %v2129_v47 = vpop.xlane.xlu0 %2128 }
 0x23c   : > { %v2131_v19 = vpop.xlane.xlu1 %2130  ;;  %v2191_v1 = vrot.slane %v2129_v47, %v4546_v48 }
 0x23d   : > { %v2196_v11 = vrot.slane %v2131_v19, %v4549_v32  ;;  %v2183_v19 = vsel %vm2182_vm10, %v2181_v13, %v2176_v6 }
 0x23e   : > { %v2192_v49 = vsel %vm2182_vm10, %v2191_v1, %v2187_v7 }
 0x23f   : > { %v2133_v0 = vpop.xlane.xlu0 %2132  ;;  %v2211_v46 = vsel %vm1441_vm7, %v2192_v49, %v2183_v19  ;;  %v3660_v19 = vmov 0.0  }
 0x240   : > { %v2200_v40 = vrot.slane %v2133_v0, %v4546_v48  ;;  %v2135_v15 = vpop.xlane.xlu1 %2134 }
 0x241   : > { %v2205_v16 = vrot.slane %v2135_v15, %v4549_v32 }
 0x242   : > { %v2201_v30 = vsel %vm2182_vm10, %v2200_v40, %v2196_v11 }
 0x243   : > { %v2137_v47 = vpop.xlane.xlu0 %2136  ;;  %v2212_v36 = vsel %vm1443_vm8, %v2201_v30, %v2211_v46  ;;  %v4633_v46 = vrot.slane %v3660_v19, 5 }
 0x244   : > { %v2209_v51 = vrot.slane %v2137_v47, %v4546_v48  ;;  %v4610_v13 = vpop.permute.xlu1 %1265 }
 0x245   : > { %6776 = vst [vmem:[#allocation161_spill] sm:$0xff] %v4610_v13  ;;  %v2236_v13 = vstv %s3345_s19  ;;  %s4738_s19 = sld [smem:[#allocation3 + $0x6f]] }
 0x246   : > { %v2210_v0 = vsel %vm2182_vm10, %v2209_v51, %v2205_v16 }
 0x247   : > { %v2213_v37 = vsel %vm1445_vm9, %v2210_v0, %v2212_v36  ;;  %v4612_v30 = vpop.permute.xlu0 %1267 }
 0x248   : > { %v2215_v18 = vsel %vm153_vm0, %v2213_v37, 0.0  ;;  %6777 = vst [vmem:[#allocation162_spill] sm:$0xff] %v4612_v30  ;;  %v4617_v40 = vpop.permute.xlu1 %1282 }
 0x249   : > { %v2217_v7 = vrot.slane %v2215_v18, 5  ;;  %6778 = vst [vmem:[#allocation163_spill] sm:$0xff] %v4617_v40  ;;  %v2230_v40 = vstv %s3344_s18  ;;  %s4732_s18 = sld [smem:[#allocation3 + $0x6e]] }
 0x24b   : > { %v2219_v15 = vsel %vm189_vm1, 0.0, %v2217_v7  ;;  %v4621_v6 = vpop.permute.xlu0 %1292 }
 0x24c   : > { %v4569_v1 = vsel %vm266_vm2, %v2219_v15, 0.0  ;;  %6779 = vst [vmem:[#allocation164_spill] sm:$0xff] %v4621_v6  ;;  %v4626_v16 = vpop.permute.xlu1 %1284 }
 0x24d   : > { %2227 = vrot.lane.b32.xlu0 %v4569_v1, %s6605_s29  ;;  %2221 = vrot.lane.b32.xlu1 %v4569_v1, %s6613_s10  ;;  %v2262_v51 = vrot.slane %v4569_v1, 1  ;;  %v2307_v37 = vrot.slane %v4569_v1, 2  ;;  %v2352_v49 = vrot.slane %v4569_v1, 3  ;;  %v2397_v11 = vrot.slane %v4569_v1, 4  ;;  %6780 = vst [vmem:[#allocation165_spill] sm:$0xff] %v4626_v16 }
 0x24e   : > { %v2442_v36 = vrot.slane %v4569_v1, 5  ;;  %v2241_v9 = vmul.f32 %v2240_v45, %v4569_v1 }
 0x24f   : > { %v4628_v47 = vpop.permute.xlu0 %1302 }
 0x250   : > { %6781 = vst [vmem:[#allocation166_spill] sm:$0xff] %v4628_v47  ;;  %v4636_v0 = vpop.permute.xlu1 %1294  ;;  %v2443_v7 = vsel %vm189_vm1, %v2442_v36, %v4633_v46 }
 0x251   : > { %2243 = vrot.lane.b32.xlu0 %v4569_v1, %s6603_s13  ;;  %2233 = vrot.lane.b32.xlu1 %v4569_v1, %s6611_s12  ;;  %6782 = vst [vmem:[#allocation167_spill] sm:$0xff] %v4636_v0 }
 0x253   : > { %v4640_v18 = vpop.permute.xlu0 %1329 }
 0x254   : > { %6783 = vst [vmem:[#allocation168_spill] sm:$0xff] %v4640_v18  ;;  %v4647_v15 = vpop.permute.xlu1 %1304  ;;  %v4672_v18 = vrot.slane %v3660_v19, 6 }
 0x255   : > { %2255 = vrot.lane.b32.xlu0 %v4569_v1, %s6609_s16  ;;  %2249 = vrot.lane.b32.xlu1 %v4569_v1, %s6607_s14  ;;  %6784 = vst [vmem:[#allocation169_spill] sm:$0xff] %v4647_v15 }
 0x259   : > { %2264 = vrot.lane.b32.xlu1 %v2262_v51, %s6613_s10 }
 0x274   : > { %2138 = vadd.xlane.f32.xlu0 %v4015_v23 }
 0x278   : > { %2142 = vadd.xlane.f32.xlu0 %v4019_v24 }
 0x27c   : > { %2144 = vadd.xlane.f32.xlu0 %v4027_v29 }
 0x27d   : > { %2140 = vadd.xlane.f32.xlu1 %v4023_v25 }
 0x280   : > { %2148 = vadd.xlane.f32.xlu0 %v4047_v33 }
 0x281   : > { %2146 = vadd.xlane.f32.xlu1 %v4043_v3 }
 0x284   : > { %2150 = vadd.xlane.f32.xlu0 %v4059_v4 }
 0x288   : > { %2152 = vadd.xlane.f32.xlu0 %v4063_v5 }
 0x292   : > { %2270 = vrot.lane.b32.xlu1 %v2262_v51, %s6605_s29 }
 0x296   : > { %2289 = vrot.lane.b32.xlu1 %v2262_v51, %s6603_s13 }
 0x29a   : > { %2295 = vrot.lane.b32.xlu1 %v2262_v51, %s6607_s14 }
 0x29e   : > { %2276 = vrot.lane.b32.xlu0 %v2262_v51, %s6611_s12  ;;  %2301 = vrot.lane.b32.xlu1 %v2262_v51, %s6609_s16  ;;  %v4649_v51 = vpop.permute.xlu0 %1339 }
 0x29f   : > { %6785 = vst [vmem:[#allocation170_spill] sm:$0xff] %v4649_v51 }
 0x2a2   : > { %2315 = vrot.lane.b32.xlu0 %v2307_v37, %s6605_s29  ;;  %2309 = vrot.lane.b32.xlu1 %v2307_v37, %s6613_s10 }
 0x2a6   : > { %2334 = vrot.lane.b32.xlu0 %v2307_v37, %s6603_s13  ;;  %2321 = vrot.lane.b32.xlu1 %v2307_v37, %s6611_s12 }
 0x2aa   : > { %2346 = vrot.lane.b32.xlu0 %v2307_v37, %s6609_s16  ;;  %2340 = vrot.lane.b32.xlu1 %v2307_v37, %s6607_s14  ;;  %v4654_v37 = vpop.permute.xlu1 %1331 }
 0x2ab   : > { %6786 = vst [vmem:[#allocation171_spill] sm:$0xff] %v4654_v37 }
 0x2ae   : > { %2360 = vrot.lane.b32.xlu0 %v2352_v49, %s6605_s29  ;;  %2354 = vrot.lane.b32.xlu1 %v2352_v49, %s6613_s10  ;;  %v4666_v51 = vpop.permute.xlu1 %1341 }
 0x2af   : > { %6788 = vst [vmem:[#allocation173_spill] sm:$0xff] %v4666_v51 }
 0x2b2   : > { %2379 = vrot.lane.b32.xlu0 %v2352_v49, %s6603_s13  ;;  %2366 = vrot.lane.b32.xlu1 %v2352_v49, %s6611_s12  ;;  %v4675_v15 = vpop.permute.xlu1 %1351 }
 0x2b3   : > { %6789 = vst [vmem:[#allocation174_spill] sm:$0xff] %v4675_v15 }
 0x2b6   : > { %2391 = vrot.lane.b32.xlu0 %v2352_v49, %s6609_s16  ;;  %2385 = vrot.lane.b32.xlu1 %v2352_v49, %s6607_s14  ;;  %v1540_v49 = vrot.slane %v4470_v42, 2  ;;  %v4683_v47 = vpop.permute.xlu1 %1460 }
 0x2ba   : > { %2405 = vrot.lane.b32.xlu0 %v2397_v11, %s6605_s29  ;;  %2399 = vrot.lane.b32.xlu1 %v2397_v11, %s6613_s10  ;;  %v4687_v19 = vpop.permute.xlu1 %1476 }
 0x2be   : > { %1503 = vrot.lane.b32.xlu0 %v4493_v43, %s6605_s29  ;;  %2411 = vrot.lane.b32.xlu1 %v2397_v11, %s6611_s12 }
 0x2c2   : > { %1509 = vrot.lane.b32.xlu0 %v4493_v43, %s6611_s12  ;;  %2424 = vrot.lane.b32.xlu1 %v2397_v11, %s6603_s13 }
 0x2c6   : > { %2436 = vrot.lane.b32.xlu0 %v2397_v11, %s6609_s16  ;;  %2430 = vrot.lane.b32.xlu1 %v2397_v11, %s6607_s14  ;;  %v4660_v11 = vpop.permute.xlu0 %1349 }
 0x2c7   : > { %6787 = vst [vmem:[#allocation172_spill] sm:$0xff] %v4660_v11 }
 0x2ca   : > { %2445 = vrot.lane.b32.xlu0 %v2443_v7, %s6613_s10  ;;  %1522 = vrot.lane.b32.xlu1 %v4493_v43, %s6603_s13  ;;  %v4664_v36 = vpop.permute.xlu0 %1454 }
 0x2ce   : > { %2451 = vrot.lane.b32.xlu0 %v2443_v7, %s6605_s29  ;;  %1528 = vrot.lane.b32.xlu1 %v4493_v43, %s6607_s14  ;;  %v4670_v37 = vpop.permute.xlu0 %1466 }
 0x2d2   : > { %2457 = vrot.lane.b32.xlu0 %v2443_v7, %s6611_s12  ;;  %1534 = vrot.lane.b32.xlu1 %v4493_v43, %s6609_s16  ;;  %v2492_v43 = vrot.slane %v4569_v1, 6  ;;  %v4679_v11 = vpop.permute.xlu0 %1482 }
 0x2d4   : > { %v2493_v51 = vsel %vm690_vm6, %v2492_v43, %v4672_v18  ;;  %v4696_v43 = vpop.permute.xlu1 %1488 }
 0x2d6   : > { %1548 = vrot.lane.b32.xlu0 %v1540_v49, %s6605_s29  ;;  %1542 = vrot.lane.b32.xlu1 %v1540_v49, %s6613_s10  ;;  %v4691_v15 = vpop.permute.xlu0 %1497 }
 0x2d8   : > { %v2222_v6 = vpop.permute.xlu1 %2221 }
 0x2da   : > { %1554 = vrot.lane.b32.xlu0 %v1540_v49, %s6611_s12  ;;  %2474 = vrot.lane.b32.xlu1 %v2443_v7, %s6603_s13  ;;  %v2228_v0 = vpop.permute.xlu0 %2227 }
 0x2db   : > { %v2231_v12 = vmul.f32 %v2230_v40, %v2228_v0  ;;  %v4709_v40 = vrot.slane %v4470_v42, 4 }
 0x2dc   : > { %v2234_v30 = vpop.permute.xlu1 %2233 }
 0x2dd   : > { %v2237_v41 = vmul.f32 %v2236_v13, %v2234_v30 }
 0x2de   : > { %2486 = vrot.lane.b32.xlu0 %v2443_v7, %s6609_s16  ;;  %2480 = vrot.lane.b32.xlu1 %v2443_v7, %s6607_s14  ;;  %v1585_v7 = vrot.slane %v4470_v42, 3  ;;  %v2244_v16 = vpop.permute.xlu0 %2243 }
 0x2e0   : > { %v2250_v55 = vpop.permute.xlu1 %2249 }
 0x2e2   : > { %2495 = vrot.lane.b32.xlu0 %v2493_v51, %s6613_s10  ;;  %1567 = vrot.lane.b32.xlu1 %v1540_v49, %s6603_s13  ;;  %v2256_v10 = vpop.permute.xlu0 %2255 }
 0x2e4   : > { %v2265_v8 = vpop.permute.xlu1 %2264 }
 0x2e6   : > { %2501 = vrot.lane.b32.xlu0 %v2493_v51, %s6605_s29  ;;  %1573 = vrot.lane.b32.xlu1 %v1540_v49, %s6607_s14 }
 0x2ea   : > { %2507 = vrot.lane.b32.xlu0 %v2493_v51, %s6611_s12  ;;  %1579 = vrot.lane.b32.xlu1 %v1540_v49, %s6609_s16  ;;  %v2224_v49 = vstv %s3343_s17  ;;  %s4727_s17 = sld [smem:[#allocation3 + $0x6d]] }
 0x2eb   : > { %v2225_v20 = vmul.f32 %v2224_v49, %v2222_v6  ;;  %v2246_v6 = vstv %s3347_s25  ;;  %s4748_s25 = sld [smem:[#allocation3 + $0x73]] }
 0x2ec   : > { %v2247_v0 = vmul.f32 %v2246_v6, %v2244_v16 }
 0x2ed   : > { %v2232_v50 = vadd.f32 %v2231_v12, %v2225_v20 }
 0x2ee   : > { %1593 = vrot.lane.b32.xlu0 %v1585_v7, %s6605_s29  ;;  %1587 = vrot.lane.b32.xlu1 %v1585_v7, %s6613_s10 }
 0x2ef   : > { %v2238_v44 = vadd.f32 %v2237_v41, %v2232_v50  ;;  %v2252_v50 = vstv %s3348_s26  ;;  %s4752_s26 = sld [smem:[#allocation3 + $0x71]] }
 0x2f0   : > { %v2253_v12 = vmul.f32 %v2252_v50, %v2250_v55 }
 0x2f1   : > { %v2242_v13 = vadd.f32 %v2241_v9, %v2238_v44  ;;  %v2258_v44 = vstv %s3349_s28  ;;  %s4755_s28 = sld [smem:[#allocation3 + $0x72]] }
 0x2f2   : > { %1599 = vrot.lane.b32.xlu0 %v1585_v7, %s6611_s12  ;;  %2524 = vrot.lane.b32.xlu1 %v2493_v51, %s6603_s13 }
 0x2f3   : > { %v2248_v45 = vadd.f32 %v2247_v0, %v2242_v13  ;;  %v2259_v13 = vmul.f32 %v2258_v44, %v2256_v10  ;;  %v2267_v0 = vstv %s4711_s5  ;;  %s4768_s5 = sld [smem:[#allocation3 + $0x74]] }
 0x2f5   : > { %v2254_v39 = vadd.f32 %v2253_v12, %v2248_v45  ;;  %v2268_v12 = vmul.f32 %v2267_v0, %v2265_v8 }
 0x2f6   : > { %2536 = vrot.lane.b32.xlu0 %v2493_v51, %s6609_s16  ;;  %2530 = vrot.lane.b32.xlu1 %v2493_v51, %s6607_s14 }
 0x2f7   : > { %v2260_v45 = vadd.f32 %v2259_v13, %v2254_v39  ;;  %v2279_v39 = vstv %s4719_s11  ;;  %s4780_s11 = sld [smem:[#allocation3 + $0x77]] }
 0x2fa   : > { %1612 = vrot.lane.b32.xlu1 %v1585_v7, %s6603_s13 }
 0x2fd   : > { %v2139_v54 = vpop.xlane.xlu0 %2138 }
 0x2fe   : > { %1618 = vrot.lane.b32.xlu1 %v1585_v7, %s6607_s14  ;;  %v2154_v38 = vmul.f32 0.0625, %v2139_v54 }
 0x300   : > { %v2553_v54 = vrot.slane %v2154_v38, %v4549_v32 }
 0x301   : > { %v2143_v51 = vpop.xlane.xlu0 %2142 }
 0x302   : > { %1624 = vrot.lane.b32.xlu1 %v1585_v7, %s6609_s16  ;;  %v2156_v35 = vmul.f32 0.0625, %v2143_v51 }
 0x304   : > { %v2562_v51 = vrot.slane %v2156_v35, %v4549_v32  ;;  %v2269_v35 = vadd.f32 %v2268_v12, %v2260_v45 }
 0x305   : > { %v2145_v30 = vpop.xlane.xlu0 %2144 }
 0x306   : > { %v2141_v20 = vpop.xlane.xlu1 %2140  ;;  %1632 = vrot.lane.b32.xlu1 %v4709_v40, %s6613_s10  ;;  %v2157_v7 = vmul.f32 0.0625, %v2145_v30 }
 0x307   : > { %v2155_v49 = vmul.f32 0.0625, %v2141_v20 }
 0x308   : > { %v2566_v2 = vrot.slane %v2157_v7, %v4546_v48  ;;  %v2283_v7 = vstv %s4717_s7  ;;  %s4777_s7 = sld [smem:[#allocation3 + $0x76]] }
 0x309   : > { %v2149_v41 = vpop.xlane.xlu0 %2148  ;;  %v2557_v55 = vrot.slane %v2155_v49, %v4546_v48  ;;  %v2284_v8 = vmul.f32 %v2283_v7, %v4569_v1 }
 0x30a   : > { %v2147_v9 = vpop.xlane.xlu1 %2146  ;;  %v2159_v16 = vmul.f32 0.0625, %v2149_v41  ;;  %v2273_v41 = vstv %s4715_s6  ;;  %v2567_v49 = vsel %vm2182_vm10, %v2566_v2, %v2562_v51  ;;  %v2298_v51 = vstv %s4732_s18  ;;  %s3362_s6 = sld [smem:[#allocation3 + $0x75]] }
 0x30b   : > { %v2158_v6 = vmul.f32 0.0625, %v2147_v9  ;;  %v2558_v44 = vsel %vm2182_vm10, %v2557_v55, %v2553_v54  ;;  %v2286_v45 = vrot.slane %v2284_v8, 1  ;;  %s4796_s18 = sld [smem:[#allocation3 + $0x7a]] }
 0x30c   : > { %v2575_v20 = vrot.slane %v2159_v16, %v4546_v48  ;;  %v2586_v2 = vsel %vm1441_vm7, %v2567_v49, %v2558_v44  ;;  %v2304_v44 = vstv %s4738_s19  ;;  %s4804_s19 = sld [smem:[#allocation3 + $0x79]] }
 0x30d   : > { %v2151_v34 = vpop.xlane.xlu0 %2150  ;;  %v2571_v50 = vrot.slane %v2158_v6, %v4549_v32 }
 0x30e   : > { %v2271_v30 = vpop.permute.xlu1 %2270  ;;  %v2160_v10 = vmul.f32 0.0625, %v2151_v34 }
 0x30f   : > { %v2274_v16 = vmul.f32 %v2273_v41, %v2271_v30  ;;  %v2576_v22 = vsel %vm2182_vm10, %v2575_v20, %v2571_v50 }
 0x310   : > { %v2580_v34 = vrot.slane %v2160_v10, %v4549_v32  ;;  %v2587_v0 = vsel %vm1443_vm8, %v2576_v22, %v2586_v2  ;;  %v2318_v2 = vstv %s4752_s26  ;;  %s4852_s26 = sld [smem:[#allocation3 + $0x7d]] }
 0x311   : > { %v2153_v9 = vpop.xlane.xlu0 %2152  ;;  %v2275_v55 = vadd.f32 %v2274_v16, %v2269_v35  ;;  %v2312_v35 = vstv %s4743_s23  ;;  %s4828_s23 = sld [smem:[#allocation3 + $0x7b]] }
 0x312   : > { %v2161_v6 = vmul.f32 0.0625, %v2153_v9  ;;  %v2290_v31 = vpop.permute.xlu1 %2289 }
 0x314   : > { %v2584_v38 = vrot.slane %v2161_v6, %v4546_v48  ;;  %v2292_v48 = vstv %s4727_s17  ;;  %s4787_s17 = sld [smem:[#allocation3 + $0x78]] }
 0x315   : > { %v2277_v13 = vpop.permute.xlu0 %2276  ;;  %v2293_v12 = vmul.f32 %v2292_v48, %v2290_v31 }
 0x316   : > { %v2585_v30 = vsel %vm2182_vm10, %v2584_v38, %v2580_v34  ;;  %v2280_v20 = vmul.f32 %v2279_v39, %v2277_v13  ;;  %v2296_v50 = vpop.permute.xlu1 %2295 }
 0x317   : > { %v2588_v32 = vsel %vm1445_vm9, %v2585_v30, %v2587_v0  ;;  %v2299_v39 = vmul.f32 %v2298_v51, %v2296_v50  ;;  %v2328_v0 = vstv %s4748_s25  ;;  %v2324_v30 = vstv %s4755_s28  ;;  %s4841_s25 = sld [smem:[#allocation3 + $0x7c]] }
 0x318   : > { %v2590_v41 = vsel %vm153_vm0, %v2588_v32, 0.0  ;;  %v2281_v54 = vadd.f32 %v2280_v20, %v2275_v55  ;;  %v2329_v48 = vmul.f32 %v2328_v0, %v4569_v1  ;;  %s4854_s28 = sld [smem:[#allocation3]] }
 0x319   : > { %v2592_v22 = vrot.slane %v2590_v41, 5  ;;  %v2316_v10 = vpop.permute.xlu0 %2315 }
 0x31a   : > { %v2288_v9 = vadd.f32 %v2286_v45, %v2281_v54  ;;  %v2302_v7 = vpop.permute.xlu1 %2301  ;;  %v2319_v50 = vmul.f32 %v2318_v2, %v2316_v10  ;;  %v1411_v2 = vadd.f32 %v4027_v29, %v4019_v24 }
 0x31b   : > { %v2594_v49 = vsel %vm189_vm1, 0.0, %v2592_v22  ;;  %v2305_v38 = vmul.f32 %v2304_v44, %v2302_v7  ;;  %v2337_v22 = vstv %s4768_s5  ;;  %v2343_v7 = vstv %s3362_s6  ;;  %s4862_s5 = sld [smem:[#allocation3 + $0x1]] }
 0x31c   : > { %v4761_v16 = vsel %vm266_vm2, %v2594_v49, 0.0  ;;  %v2294_v6 = vadd.f32 %v2293_v12, %v2288_v9  ;;  %v2331_v12 = vrot.slane %v2329_v48, 2  ;;  %v2363_v48 = vstv %s4787_s17  ;;  %s4868_s6 = sld [smem:[#allocation3 + $0x7e]] }
 0x31d   : > { %2618 = vrot.lane.b32.xlu1 %v4761_v16, %s6603_s13  ;;  %2596 = vrot.lane.b32.xlu0 %v4761_v16, %s6613_s10  ;;  %v2335_v31 = vpop.permute.xlu0 %2334  ;;  %s4884_s17 = sld [smem:[#allocation3 + $0x81]] }
 0x31e   : > { %v2300_v34 = vadd.f32 %v2299_v39, %v2294_v6  ;;  %v2310_v8 = vpop.permute.xlu1 %2309  ;;  %v2338_v49 = vmul.f32 %v2337_v22, %v2335_v31  ;;  %v2349_v6 = vstv %s4777_s7  ;;  %v1404_v31 = vadd.f32 %v4023_v25, %v4015_v23  ;;  %s4874_s7 = sld [smem:[#allocation3 + $0x2]] }
 0x31f   : > { %v2313_v13 = vmul.f32 %v2312_v35, %v2310_v8  ;;  %v1676_v8 = vrot.slane %v4470_v42, 5  ;;  %v1418_v23 = vadd.f32 %v4047_v33, %v4043_v3 }
 0x320   : > { %v2306_v55 = vadd.f32 %v2305_v38, %v2300_v34 }
 0x321   : > { %2624 = vrot.lane.b32.xlu1 %v4761_v16, %s6607_s14  ;;  %2602 = vrot.lane.b32.xlu0 %v4761_v16, %s6605_s29  ;;  %v2347_v20 = vpop.permute.xlu0 %2346  ;;  %v4816_v29 = vsel %vm189_vm1, %v1676_v8, %v4633_v46  ;;  %v1419_v33 = vrot.slane %v1418_v23, 4 }
 0x322   : > { %v2314_v32 = vadd.f32 %v2313_v13, %v2306_v55  ;;  %v2322_v41 = vpop.permute.xlu1 %2321  ;;  %v2357_v13 = vstv %s4780_s11  ;;  %v2350_v0 = vmul.f32 %v2349_v6, %v2347_v20  ;;  %v1405_v20 = vrot.slane %v1404_v31, 4  ;;  %s4880_s11 = sld [smem:[#allocation3 + $0x7f]] }
 0x323   : > { %v2325_v45 = vmul.f32 %v2324_v30, %v2322_v41  ;;  %v1420_v6 = vadd.f32 %v1419_v33, %v1418_v23 }
 0x324   : > { %v2320_v54 = vadd.f32 %v2319_v50, %v2314_v32  ;;  %v1412_v32 = vrot.slane %v1411_v2, 4 }
 0x325   : > { %1657 = vrot.lane.b32.xlu1 %v4709_v40, %s6603_s13  ;;  %2608 = vrot.lane.b32.xlu0 %v4761_v16, %s6611_s12  ;;  %v2361_v51 = vpop.permute.xlu0 %2360 }
 0x326   : > { %v2326_v9 = vadd.f32 %v2325_v45, %v2320_v54  ;;  %v2341_v10 = vpop.permute.xlu1 %2340  ;;  %v2364_v45 = vmul.f32 %v2363_v48, %v2361_v51  ;;  %v2373_v54 = vstv %s4796_s18  ;;  %s4891_s18 = sld [smem:[#allocation3 + $0x3]] }
 0x327   : > { %v2344_v34 = vmul.f32 %v2343_v7, %v2341_v10  ;;  %v1406_v10 = vadd.f32 %v1405_v20, %v1404_v31  ;;  %v2374_v51 = vmul.f32 %v2373_v54, %v4569_v1 }
 0x328   : > { %v2333_v44 = vadd.f32 %v2331_v12, %v2326_v9  ;;  %v2369_v12 = vstv %s4804_s19  ;;  %v4832_v9 = vrot.slane %v4761_v16, 1  ;;  %s4902_s19 = sld [smem:[#allocation3 + $0x80]] }
 0x329   : > { %1663 = vrot.lane.b32.xlu1 %v4709_v40, %s6607_s14  ;;  %1638 = vrot.lane.b32.xlu0 %v4709_v40, %s6605_s29  ;;  %v4794_v39 = vpop.permute.xlu0 %2379 }
 0x32a   : > { %v2339_v35 = vadd.f32 %v2338_v49, %v2333_v44  ;;  %v2355_v38 = vpop.permute.xlu1 %2354 }
 0x32b   : > { %v2358_v50 = vmul.f32 %v2357_v13, %v2355_v38 }
 0x32c   : > { %v2345_v55 = vadd.f32 %v2344_v34, %v2339_v35  ;;  %v1407_v34 = vrot.slane %v1406_v10, 2 }
 0x32d   : > { %1669 = vrot.lane.b32.xlu1 %v4709_v40, %s6609_s16  ;;  %1644 = vrot.lane.b32.xlu0 %v4709_v40, %s6611_s12  ;;  %v4810_v30 = vpop.permute.xlu0 %2391  ;;  %v1425_v40 = vadd.f32 %v4063_v5, %v4059_v4  ;;  %v1413_v4 = vadd.f32 %v1412_v32, %v1411_v2  ;;  %v2376_v2 = vrot.slane %v2374_v51, 3 }
 0x32e   : > { %v2351_v25 = vadd.f32 %v2350_v0, %v2345_v55  ;;  %v2367_v24 = vpop.permute.xlu1 %2366  ;;  %v1421_v0 = vrot.slane %v1420_v6, 2  ;;  %v2382_v55 = vstv %s4828_s23  ;;  %v1408_v23 = vadd.f32 %v1407_v34, %v1406_v10  ;;  %s4916_s23 = sld [smem:[#allocation3 + $0x4]] }
 0x32f   : > { %v1426_v7 = vrot.slane %v1425_v40, 4  ;;  %v2370_v49 = vmul.f32 %v2369_v12, %v2367_v24  ;;  %v1414_v38 = vrot.slane %v1413_v4, 2  ;;  %v2383_v32 = vmul.f32 %v2382_v55, %v4794_v39 }
 0x330   : > { %v2359_v41 = vadd.f32 %v2358_v50, %v2351_v25  ;;  %v1409_v33 = vrot.slane %v1408_v23, 1  ;;  %v1463_v55 = vstv %s4862_s5  ;;  %s4954_s5 = sld [smem:[#allocation3 + $0x83]] }
 0x331   : > { %1680 = vrot.lane.b32.xlu1 %v4816_v29, %s6613_s10  ;;  %2630 = vrot.lane.b32.xlu0 %v4761_v16, %s6609_s16  ;;  %v4825_v3 = vpop.permute.xlu0 %2405  ;;  %v1427_v31 = vadd.f32 %v1426_v7, %v1425_v40  ;;  %v1415_v25 = vadd.f32 %v1414_v38, %v1413_v4  ;;  %v2388_v40 = vstv %s4841_s25  ;;  %v1727_v4 = vrot.slane %v4470_v42, 6  ;;  %s4928_s25 = sld [smem:[#allocation3 + $0x5]] }
 0x332   : > { %v2386_v22 = vpop.permute.xlu1 %2385  ;;  %v2365_v5 = vadd.f32 %v2364_v45, %v2359_v41  ;;  %v1422_v41 = vadd.f32 %v1421_v0, %v1420_v6  ;;  %v2394_v7 = vstv %s4852_s26  ;;  %v1457_v38 = vstv %s4854_s28  ;;  %s4937_s26 = sld [smem:[#allocation3 + $0x82]] }
 0x333   : > { %v1428_v20 = vrot.slane %v1427_v31, 2  ;;  %v1416_v45 = vrot.slane %v1415_v25, 1  ;;  %v2389_v39 = vmul.f32 %v2388_v40, %v2386_v22  ;;  %s4947_s28 = sld [smem:[#allocation3 + $0x6]] }
 0x334   : > { %v2371_v8 = vadd.f32 %v2370_v49, %v2365_v5  ;;  %v1423_v5 = vrot.slane %v1422_v41, 1  ;;  %v1410_v49 = vadd.f32 %v1409_v33, %v1408_v23  ;;  %v2402_v23 = vstv %s4868_s6  ;;  %s4964_s6 = sld [smem:[#allocation3 + $0x7]] }
 0x335   : > { %2664 = vrot.lane.b32.xlu1 %v4832_v9, %s6603_s13  ;;  %2639 = vrot.lane.b32.xlu0 %v4832_v9, %s6613_s10  ;;  %v4843_v35 = vpop.permute.xlu0 %1503  ;;  %v1429_v12 = vadd.f32 %v1428_v20, %v1427_v31  ;;  %v1417_v6 = vadd.f32 %v1416_v45, %v1415_v25 }
 0x336   : > { %v4839_v44 = vpop.permute.xlu1 %2399  ;;  %v2378_v50 = vadd.f32 %v2376_v2, %v2371_v8  ;;  %v2395_v8 = vmul.f32 %v2394_v7, %v4810_v30  ;;  %v4898_v2 = vsel %vm690_vm6, %v1727_v4, %v4672_v18  ;;  %v1424_v0 = vadd.f32 %v1423_v5, %v1422_v41 }
 0x337   : > { %v1430_v22 = vrot.slane %v1429_v12, 1  ;;  %v1433_v25 = vmul.f32 0.0625, %v1417_v6  ;;  %v1464_v41 = vmul.f32 %v1463_v55, %v4683_v47  ;;  %v2403_v40 = vmul.f32 %v2402_v23, %v4839_v44 }
 0x338   : > { %v2384_v54 = vadd.f32 %v2383_v32, %v2378_v50  ;;  %v1458_v32 = vmul.f32 %v1457_v38, %v4664_v36  ;;  %v1434_v45 = vmul.f32 0.0625, %v1424_v0  ;;  %v4920_v4 = vrot.slane %v4761_v16, 2 }
 0x339   : > { %2670 = vrot.lane.b32.xlu1 %v4832_v9, %s6607_s14  ;;  %2645 = vrot.lane.b32.xlu0 %v4832_v9, %s6605_s29  ;;  %v4856_v24 = vpop.permute.xlu0 %1509  ;;  %v1431_v30 = vadd.f32 %v1430_v22, %v1429_v12  ;;  %v1473_v6 = vstv %s4891_s18  ;;  %v2418_v22 = vstv %s4884_s17  ;;  %s4974_s17 = sld [smem:[#allocation3 + $0x9]] }
 0x33a   : > { %v4849_v13 = vpop.permute.xlu1 %2411  ;;  %v2390_v34 = vadd.f32 %v2389_v39, %v2384_v54  ;;  %v1469_v54 = vstv %s4874_s7  ;;  %v2408_v39 = vstv %s4880_s11  ;;  %v1465_v44 = vadd.f32 %v1464_v41, %v1458_v32  ;;  %s4969_s7 = sld [smem:[#allocation3 + $0x84]] }
 0x33b   : > { %v1435_v47 = vmul.f32 0.0625, %v1431_v30  ;;  %v1470_v12 = vmul.f32 %v1469_v54, %v4670_v37  ;;  %v2409_v5 = vmul.f32 %v2408_v39, %v4825_v3  ;;  %v1474_v3 = vmul.f32 %v1473_v6, %v4470_v42  ;;  %s4972_s11 = sld [smem:[#allocation3 + $0x8]] }
 0x33c   : > { %v2396_v50 = vadd.f32 %v2395_v8, %v2390_v34  ;;  %v2414_v34 = vstv %s4902_s19  ;;  %v2419_v55 = vmul.f32 %v2418_v22, %v4569_v1  ;;  %v1485_v54 = vstv %s4928_s25  ;;  %s4981_s18 = sld [smem:[#allocation3 + $0xa]] }
 0x33d   : > { %1709 = vrot.lane.b32.xlu1 %v4816_v29, %s6603_s13  ;;  %2651 = vrot.lane.b32.xlu0 %v4832_v9, %s6611_s12  ;;  %v4882_v51 = vpop.permute.xlu0 %2436  ;;  %v1471_v0 = vadd.f32 %v1470_v12, %v1465_v44  ;;  %v2415_v23 = vmul.f32 %v2414_v34, %v4849_v13  ;;  %v2427_v39 = vstv %s4937_s26  ;;  %s4987_s19 = sld [smem:[#allocation3 + $0x85]] }
 0x33e   : > { %v4865_v48 = vpop.permute.xlu1 %2424  ;;  %v2404_v36 = vadd.f32 %v2403_v40, %v2396_v50  ;;  %v2421_v40 = vrot.slane %v2419_v55, 4  ;;  %s5008_s25 = sld [smem:[#allocation3 + $0x88]] }
 0x33f   : > { %v1475_v41 = vadd.f32 %v1474_v3, %v1471_v0  ;;  %v2428_v44 = vmul.f32 %v2427_v39, %v4865_v48  ;;  %v1500_v0 = vstv %s4964_s6  ;;  %s5011_s26 = sld [smem:[#allocation3 + $0xb]] }
 0x340   : > { %v2410_v8 = vadd.f32 %v2409_v5, %v2404_v36  ;;  %v1491_v5 = vstv %s4947_s28  ;;  %v2439_v55 = vstv %s4969_s7  ;;  %s5021_s28 = sld [smem:[#allocation3 + $0x87]] }
 0x341   : > { %1715 = vrot.lane.b32.xlu1 %v4816_v29, %s6607_s14  ;;  %1686 = vrot.lane.b32.xlu0 %v4816_v29, %s6605_s29  ;;  %v4904_v20 = vpop.permute.xlu0 %2445  ;;  %v1492_v48 = vmul.f32 %v1491_v5, %v4696_v43  ;;  %s5033_s6 = sld [smem:[#allocation3 + $0xc5]] }
 0x342   : > { %v4876_v10 = vpop.permute.xlu1 %2430  ;;  %v2416_v50 = vadd.f32 %v2415_v23, %v2410_v8  ;;  %s5036_s7 = sld [smem:[#allocation3 + $0xd]] }
 0x344   : > { %v2423_v36 = vadd.f32 %v2421_v40, %v2416_v50  ;;  %v2440_v50 = vmul.f32 %v2439_v55, %v4882_v51  ;;  %v2448_v40 = vstv %s4987_s19  ;;  %s5058_s19 = sld [smem:[#allocation3 + $0x8a]] }
 0x345   : > { %1721 = vrot.lane.b32.xlu1 %v4816_v29, %s6609_s16  ;;  %1692 = vrot.lane.b32.xlu0 %v4816_v29, %s6611_s12  ;;  %v1432_v29 = vmul.f32 0.0625, %v1410_v49  ;;  %v4939_v38 = vpop.permute.xlu0 %2451 }
 0x346   : > { %v4894_v31 = vpop.permute.xlu1 %1522  ;;  %v2429_v22 = vadd.f32 %v2428_v44, %v2423_v36  ;;  %v2449_v36 = vmul.f32 %v2448_v40, %v4904_v20 }
 0x349   : > { %1731 = vrot.lane.b32.xlu1 %v4898_v2, %s6613_s10  ;;  %2676 = vrot.lane.b32.xlu0 %v4832_v9, %s6609_s16  ;;  %v1782_v9 = vsel %vm1441_vm7, %v1433_v25, %v1432_v29  ;;  %v1479_v25 = vstv %s4916_s23  ;;  %v4957_v32 = vpop.permute.xlu0 %2457  ;;  %s5006_s23 = sld [smem:[#allocation3 + $0x86]] }
 0x34a   : > { %v4913_v33 = vpop.permute.xlu1 %1528  ;;  %v1783_v49 = vsel %vm1443_vm8, %v1434_v45, %v1782_v9  ;;  %v1480_v13 = vmul.f32 %v1479_v25, %v4687_v19  ;;  %v1501_v25 = vmul.f32 %v1500_v0, %v4691_v15 }
 0x34b   : > { %v1784_v37 = vsel %vm1445_vm9, %v1435_v47, %v1783_v49  ;;  %v1486_v47 = vmul.f32 %v1485_v54, %v4679_v11  ;;  %v2433_v49 = vstv %s4954_s5  ;;  %s5028_s5 = sld [smem:[#allocation3 + $0xc]]  ;;  %v5031_v54 = vrot.slane %v4761_v16, 3 }
 0x34c   : > { %v1786_v30 = vsel %vm153_vm0, %v1784_v37, 0.0  ;;  %v1481_v19 = vadd.f32 %v1480_v13, %v1475_v41  ;;  %v2434_v8 = vmul.f32 %v2433_v49, %v4876_v10  ;;  %v1512_v41 = vstv %s4974_s17  ;;  %s5052_s17 = sld [smem:[#allocation3 + $0x89]] }
 0x34d   : > { %2709 = vrot.lane.b32.xlu1 %v4920_v4, %s6603_s13  ;;  %2684 = vrot.lane.b32.xlu0 %v4920_v4, %s6613_s10  ;;  %v1788_v9 = vrot.slane %v1786_v30, 5  ;;  %v4990_v6 = vpop.permute.xlu0 %1548  ;;  %v1516_v13 = vstv %s4981_s18  ;;  %s5054_s18 = sld [smem:[#allocation3 + $0xc4]]  ;;  %v2464_v49 = vstv %s5008_s25 }
 0x34e   : > { %v4931_v7 = vpop.permute.xlu1 %1534  ;;  %v1487_v11 = vadd.f32 %v1486_v47, %v1481_v19  ;;  %v2435_v23 = vadd.f32 %v2434_v8, %v2429_v22  ;;  %v1517_v39 = vmul.f32 %v1516_v13, %v4470_v42  ;;  %v2465_v8 = vmul.f32 %v2464_v49, %v4569_v1  ;;  %s5072_s25 = sld [smem:[#allocation3 + $0xf]] }
 0x34f   : > { %v1790_v34 = vsel %vm189_vm1, 0.0, %v1788_v9  ;;  %v1513_v9 = vmul.f32 %v1512_v41, %v4856_v24  ;;  %v2454_v19 = vstv %s5006_s23  ;;  %s5064_s23 = sld [smem:[#allocation3 + $0xc6]]  ;;  %v2466_v0 = vmul.f32 0.0, %v2464_v49 }
 0x350   : > { %v5002_v3 = vsel %vm266_vm2, %v1790_v34, 0.0  ;;  %v1493_v10 = vadd.f32 %v1492_v48, %v1487_v11  ;;  %v2441_v15 = vadd.f32 %v2440_v50, %v2435_v23  ;;  %v1525_v34 = vstv %s5011_s26  ;;  %s5074_s26 = sld [smem:[#allocation3 + $0xc7]] }
 0x351   : > { %2715 = vrot.lane.b32.xlu1 %v4920_v4, %s6607_s14  ;;  %2690 = vrot.lane.b32.xlu0 %v4920_v4, %s6605_s29  ;;  %v5013_v43 = vpop.permute.xlu0 %1554  ;;  %v1519_v24 = vrot.slane %v1517_v39, 1  ;;  %v2455_v22 = vmul.f32 %v2454_v19, %v4939_v38  ;;  %v2460_v48 = vstv %s5021_s28  ;;  %v1531_v55 = vstv %s5028_s5  ;;  %s5088_s28 = sld [smem:[#allocation3 + $0x11]] }
 0x352   : > { %v4951_v29 = vpop.permute.xlu1 %1542  ;;  %v1502_v51 = vadd.f32 %v1501_v25, %v1493_v10  ;;  %v2450_v5 = vadd.f32 %v2449_v36, %v2441_v15  ;;  %v1537_v10 = vstv %s5036_s7  ;;  %v2461_v50 = vmul.f32 %v2460_v48, %v4957_v32  ;;  %s5093_s5 = sld [smem:[#allocation3 + $0x8b]] }
 0x353   : > { %v1532_v41 = vmul.f32 %v1531_v55, %v4913_v33  ;;  %v2469_v13 = vrot.slane %v2465_v8, 5  ;;  %v2470_v40 = vrot.slane %v2466_v0, 5  ;;  %v2477_v15 = vstv %s5052_s17  ;;  %s5096_s7 = sld [smem:[#allocation3 + $0xc8]] }
 0x354   : > { %v2456_v23 = vadd.f32 %v2455_v22, %v2450_v5  ;;  %v2483_v33 = vstv %s5058_s19  ;;  %v1551_v5 = vstv %s5072_s25  ;;  %s5112_s17 = sld [smem:[#allocation3 + $0x8c]]  ;;  %v213_v55 = vstv %s5033_s6 }
 0x355   : > { %1760 = vrot.lane.b32.xlu1 %v4898_v2, %s6603_s13  ;;  %2696 = vrot.lane.b32.xlu0 %v4920_v4, %s6611_s12  ;;  %v5050_v47 = vpop.permute.xlu0 %2486  ;;  %s5119_s19 = sld [smem:[#allocation3 + $0x8f]] }
 0x356   : > { %v4966_v45 = vpop.permute.xlu1 %2474  ;;  %v2462_v39 = vadd.f32 %v2461_v50, %v2456_v23  ;;  %s5131_s25 = sld [smem:[#allocation3 + $0x8d]] }
 0x357   : > { %v2478_v19 = vmul.f32 %v2477_v15, %v4966_v45  ;;  %v1552_v45 = vmul.f32 %v1551_v5, %v4990_v6  ;;  %v1561_v8 = vstv %s5088_s28  ;;  %s5151_s28 = sld [smem:[#allocation3 + $0xca]]  ;;  %v5160_v15 = vrot.slane %v4761_v16, 4 }
 0x358   : > { %v2489_v0 = vstv %s5093_s5  ;;  %s5157_s6 = sld [smem:[#allocation3 + $0x15]]  ;;  %s6791_s5 = smov 127  }
 0x359   : > { %1766 = vrot.lane.b32.xlu1 %v4898_v2, %s6607_s14  ;;  %1737 = vrot.lane.b32.xlu0 %v4898_v2, %s6605_s29  ;;  %v5080_v38 = vpop.permute.xlu0 %2495 }
 0x35a   : > { %v4984_v12 = vpop.permute.xlu1 %2480 }
 0x35c   : > { %v2504_v5 = vstv %s5131_s25  ;;  %s6792_s25 = smov 126  }
 0x35d   : > { %1772 = vrot.lane.b32.xlu1 %v4898_v2, %s6609_s16  ;;  %1743 = vrot.lane.b32.xlu0 %v4898_v2, %s6611_s12  ;;  %v1506_v2 = vstv %s4972_s11  ;;  %s5045_s11 = sld [smem:[#allocation3 + $0xe]] }
 0x35e   : > { %v4999_v37 = vpop.permute.xlu1 %1567 }
 0x361   : > { %1792 = vrot.lane.b32.xlu1 %v5002_v3, %s6613_s10  ;;  %2721 = vrot.lane.b32.xlu0 %v4920_v4, %s6609_s16  ;;  %v1507_v4 = vmul.f32 %v1506_v2, %v4843_v35  ;;  %v1526_v2 = vmul.f32 %v1525_v34, %v4894_v31 }
 0x362   : > { %v5023_v30 = vpop.permute.xlu1 %1573 }
 0x363   : > { %v1508_v44 = vadd.f32 %v1507_v4, %v1502_v51  ;;  %v1545_v4 = vstv %s5045_s11  ;;  %s5106_s11 = sld [smem:[#allocation3 + $0xce]] }
 0x364   : > { %v1546_v36 = vmul.f32 %v1545_v4, %v4951_v29  ;;  %v5128_v29 = vrot.slane %v5002_v3, 1  ;;  %v2498_v4 = vstv %s5112_s17  ;;  %s5194_s17 = sld [smem:[#allocation3 + $0xcd]] }
 0x365   : > { %2754 = vrot.lane.b32.xlu1 %v5031_v54, %s6603_s13  ;;  %2729 = vrot.lane.b32.xlu0 %v5031_v54, %s6613_s10  ;;  %v1514_v20 = vadd.f32 %v1513_v9, %v1508_v44  ;;  %v1538_v9 = vmul.f32 %v1537_v10, %v4931_v7  ;;  %v2471_v44 = vsel %vm189_vm1, %v2469_v13, %v2470_v40  ;;  %v5114_v7 = vpop.permute.xlu0 %2501  ;;  %v229_v10 = vstv %s5074_s26  ;;  %s5171_s26 = sld [smem:[#allocation3 + $0xcc]] }
 0x366   : > { %v5047_v35 = vpop.permute.xlu1 %1579  ;;  %v2473_v34 = vadd.f32 %v2471_v44, %v2462_v39  ;;  %v2490_v40 = vmul.f32 %v2489_v0, %v5050_v47  ;;  %v239_v39 = vstv %s5096_s7  ;;  %s5292_s7 = sld [smem:[#allocation3 + $0x95]] }
 0x367   : > { %v1521_v25 = vadd.f32 %v1519_v24, %v1514_v20  ;;  %v2484_v20 = vmul.f32 %v2483_v33, %v4984_v12  ;;  %v1557_v12 = vstv %s5078_s9  ;;  %s6790_s9 = smov 125   ;;  %v5169_v33 = vmul.f32 %v229_v10, %v3874_v27 }
 0x368   : > { %v2479_v48 = vadd.f32 %v2478_v19, %v2473_v34  ;;  %v1558_v50 = vmul.f32 %v1557_v12, %v5013_v43  ;;  %v214_v43 = vmul.f32 %v213_v55, %v3968_v52  ;;  %v215_v19 = vmul.f32 %v213_v55, %v3976_v56 }
 0x369   : > { %2760 = vrot.lane.b32.xlu1 %v5031_v54, %s6607_s14  ;;  %2735 = vrot.lane.b32.xlu0 %v5031_v54, %s6605_s29  ;;  %v1527_v51 = vadd.f32 %v1526_v2, %v1521_v25  ;;  %v203_v2 = vstv %s5054_s18  ;;  %v2508_v25 = vpop.permute.xlu0 %2507  ;;  %s5164_s18 = sld [smem:[#allocation3 + $0xcb]]  ;;  %v2505_v55 = vmul.f32 %v2504_v5, %v5114_v7  ;;  %v259_v7 = vstv %s5151_s28 }
 0x36a   : > { %v5067_v11 = vpop.permute.xlu1 %1587  ;;  %v2485_v23 = vadd.f32 %v2484_v20, %v2479_v48  ;;  %v205_v44 = vmul.f32 %v203_v2, %v3978_v57  ;;  %v2514_v48 = vstv %s5119_s19  ;;  %s5226_s19 = sld [smem:[#allocation3 + $0xd0]] }
 0x36b   : > { %v1533_v32 = vadd.f32 %v1532_v41, %v1527_v51  ;;  %v1562_v41 = vmul.f32 %v1561_v8, %v4470_v42  ;;  %v223_v51 = vstv %s5064_s23  ;;  %s5182_s23 = sld [smem:[#allocation3 + $0x16]] }
 0x36c   : > { %v225_v56 = vmul.f32 %v223_v51, %v3982_v58  ;;  %v224_v0 = vmul.f32 %v223_v51, %v3984_v59  ;;  %v217_v58 = vadd.f32 %v215_v19, %v205_v44  ;;  %v289_v44 = vstv %s5171_s26  ;;  %s5330_s28 = sld [smem:[#allocation3 + $0xd5]] }
 0x36d   : > { %1814 = vrot.lane.b32.xlu1 %v5002_v3, %s6603_s13  ;;  %2741 = vrot.lane.b32.xlu0 %v5031_v54, %s6611_s12  ;;  %s5099_s13 = sld [smem:[#allocation3 + $0xc9]]  ;;  %v1539_v24 = vadd.f32 %v1538_v9, %v1533_v32  ;;  %v204_v9 = vmul.f32 %v203_v2, %v3970_v53  ;;  %v5179_v32 = vmul.f32 %v229_v10, %v3867_v26  ;;  %v1564_v52 = vrot.slane %v1562_v41, 2 }
 0x36e   : > { %v5090_v31 = vpop.permute.xlu1 %2524  ;;  %v2499_v53 = vmul.f32 %v2498_v4, %v5080_v38  ;;  %v2515_v2 = vmul.f32 %v2514_v48, %v4569_v1  ;;  %v2516_v10 = vmul.f32 0.0, %v2514_v48  ;;  %s5393_s26 = sld [smem:[#allocation3 + $0x99]] }
 0x36f   : > { %v1547_v22 = vadd.f32 %v1546_v36, %v1539_v24  ;;  %v5188_v24 = vpop.permute.xlu0 %1593  ;;  %v216_v12 = vadd.f32 %v214_v43, %v204_v9  ;;  %v279_v19 = vstv %s5164_s18  ;;  %s5376_s18 = sld [smem:[#allocation3 + $0x21]] }
 0x371   : > { %1820 = vrot.lane.b32.xlu1 %v5002_v3, %s6607_s14  ;;  %1798 = vrot.lane.b32.xlu0 %v5002_v3, %s6605_s29  ;;  %s5121_s29 = sld [smem:[#allocation3 + $0x12]]  ;;  %v1553_v13 = vadd.f32 %v1552_v45, %v1547_v22  ;;  %v305_v45 = vstv %s5106_s11 }
 0x372   : > { %v5116_v49 = vpop.permute.xlu1 %2530  ;;  %s5136_s14 = sld [smem:[#allocation3 + $0x13]]  ;;  %v308_v1 = vmul.f32 %v305_v45, %v3889_v28 }
 0x373   : > { %v1559_v36 = vadd.f32 %v1558_v50, %v1553_v13  ;;  %s5211_s11 = sld [smem:[#allocation3 + $0x17]]  ;;  %v1590_v50 = vstv %s5157_s6  ;;  %v249_v4 = vstv %s5099_s13  ;;  %v1600_v51 = vpop.permute.xlu0 %1599  ;;  %s6794_s6 = smov 1  }
 0x374   : > { %v1591_v9 = vmul.f32 %v1590_v50, %v5067_v11  ;;  %s5235_s13 = sld [smem:[#allocation3 + $0x92]]  ;;  %v5247_v11 = vmul.f32 %v305_v45, %v3867_v26 }
 0x375   : > { %1826 = vrot.lane.b32.xlu1 %v5002_v3, %s6609_s16  ;;  %1804 = vrot.lane.b32.xlu0 %v5002_v3, %s6611_s12  ;;  %s5139_s16 = sld [smem:[#allocation3 + $0x8e]] }
 0x376   : > { %s5143_s12 = sld [smem:[#allocation3 + $0x14]]  ;;  %v5145_v6 = vpop.permute.xlu1 %1612  ;;  %v312_v50 = vrot.slane %v5247_v11, 1 }
 0x377   : > { %v1570_v47 = vstv %s5121_s29  ;;  %s5190_s29 = sld [smem:[#allocation3 + $0x90]] }
 0x378   : > { %v1576_v34 = vstv %s5136_s14  ;;  %v1571_v22 = vmul.f32 %v1570_v47, %v4999_v37  ;;  %s5202_s14 = sld [smem:[#allocation3 + $0x91]]  ;;  %v1566_v37 = vadd.f32 %v1564_v52, %v1559_v36  ;;  %v2519_v47 = vrot.slane %v2515_v2, 6 }
 0x379   : > { %1835 = vrot.lane.b32.xlu1 %v5128_v29, %s6613_s10  ;;  %2766 = vrot.lane.b32.xlu0 %v5031_v54, %s6790_s9  ;;  %v2491_v54 = vadd.f32 %v2490_v40, %v2485_v23  ;;  %v1577_v23 = vmul.f32 %v1576_v34, %v5023_v30  ;;  %v5223_v30 = vmul.f32 %v305_v45, %v3874_v27  ;;  %v2520_v52 = vrot.slane %v2516_v10, 6 }
 0x37a   : > { %v5192_v20 = vpop.permute.xlu1 %1618  ;;  %v1572_v13 = vadd.f32 %v1571_v22, %v1566_v37  ;;  %v1596_v36 = vstv %s5182_s23  ;;  %v315_v22 = vrot.slane %v308_v1, 1  ;;  %s5254_s23 = sld [smem:[#allocation3 + $0x94]]  ;;  %v1602_v37 = vstv %s5211_s11 }
 0x37b   : > { %v2500_v38 = vadd.f32 %v2499_v53, %v2491_v54  ;;  %v2510_v57 = vstv %s5139_s16  ;;  %s5217_s16 = sld [smem:[#allocation3 + $0xcf]]  ;;  %v2599_v1 = vstv %s5239_s2 }
 0x37c   : > { %v1582_v8 = vstv %s5143_s12  ;;  %s5215_s12 = sld [smem:[#allocation3 + $0x18]]  ;;  %v2511_v59 = vmul.f32 %v2510_v57, %v2508_v25  ;;  %v226_v25 = vadd.f32 %v224_v0, %v216_v12  ;;  %v1578_v43 = vadd.f32 %v1577_v23, %v1572_v13  ;;  %v2537_v23 = vpop.permute.xlu0 %2536 }
 0x37d   : > { %2799 = vrot.lane.b32.xlu1 %v5160_v15, %s6791_s5  ;;  %2774 = vrot.lane.b32.xlu0 %v5160_v15, %s6613_s10  ;;  %s6793_s10 = smov 2   ;;  %v2506_v41 = vadd.f32 %v2505_v55, %v2500_v38  ;;  %v1583_v40 = vmul.f32 %v1582_v8, %v5047_v35  ;;  %v227_v35 = vadd.f32 %v225_v56, %v217_v58  ;;  %v2527_v53 = vstv %s5190_s29  ;;  %s5257_s29 = sld [smem:[#allocation3 + $0xd1]] }
 0x37e   : > { %v5228_v54 = vpop.permute.xlu1 %1624  ;;  %v313_v38 = vrot.slane %v5223_v30, 1  ;;  %v2533_v48 = vstv %s5202_s14  ;;  %v1597_v56 = vmul.f32 %v1596_v36, %v5188_v24  ;;  %v2528_v57 = vmul.f32 %v2527_v53, %v5090_v31  ;;  %s5265_s14 = sld [smem:[#allocation3 + $0x1a]] }
 0x37f   : > { %v2512_v5 = vadd.f32 %v2511_v59, %v2506_v41  ;;  %v1584_v34 = vadd.f32 %v1583_v40, %v1578_v43  ;;  %v233_v12 = vadd.f32 %v5169_v33, %v227_v35  ;;  %v232_v8 = vadd.f32 %v5179_v32, %v226_v25  ;;  %s5295_s11 = sld [smem:[#allocation3 + $0x96]] }
 0x380   : > { %v2521_v0 = vsel %vm690_vm6, %v2519_v47, %v2520_v52  ;;  %v241_v33 = vmul.f32 %v239_v39, %v3988_v60  ;;  %v240_v24 = vmul.f32 %v239_v39, %v3990_v61  ;;  %v2534_v31 = vmul.f32 %v2533_v48, %v5116_v49  ;;  %s5320_s2 = sld [smem:[#allocation3 + $0x1f]] }
 0x381   : > { %2805 = vrot.lane.b32.xlu1 %v5160_v15, %s6792_s25  ;;  %2780 = vrot.lane.b32.xlu0 %v5160_v15, %s6793_s10  ;;  %v1592_v45 = vadd.f32 %v1591_v9, %v1584_v34  ;;  %v2523_v2 = vadd.f32 %v2521_v0, %v2512_v5  ;;  %v299_v32 = vstv %s5194_s17  ;;  %v5282_v10 = vsel %vm266_vm2, %v313_v38, %v315_v22  ;;  %s5401_s17 = sld [smem:[#allocation3 + $0x23]] }
 0x382   : > { %v1606_v55 = vstv %s5215_s12  ;;  %v5267_v58 = vpop.permute.xlu1 %1632  ;;  %v5290_v60 = vrot.slane %v5002_v3, 2  ;;  %v1603_v61 = vmul.f32 %v1602_v37, %v1600_v51  ;;  %v251_v13 = vmul.f32 %v249_v4, %v3994_v62  ;;  %s5300_s12 = sld [smem:[#allocation3 + $0x1c]] }
 0x383   : > { %v1607_v49 = vmul.f32 %v1606_v55, %v4470_v42  ;;  %v1598_v39 = vadd.f32 %v1597_v56, %v1592_v45  ;;  %v2529_v41 = vadd.f32 %v2528_v57, %v2523_v2  ;;  %v250_v59 = vmul.f32 %v249_v4, %v3996_v63 }
 0x384   : > { %v243_v35 = vadd.f32 %v241_v33, %v233_v12  ;;  %v242_v25 = vadd.f32 %v240_v24, %v232_v8  ;;  %v2817_v9 = vrot.slane %v4761_v16, 5  ;;  %v261_v62 = vmul.f32 %v259_v7, %v4000_v14 }
 0x385   : > { %1860 = vrot.lane.b32.xlu1 %v5128_v29, %s6791_s5  ;;  %2786 = vrot.lane.b32.xlu0 %v5160_v15, %s6794_s6  ;;  %v2535_v43 = vadd.f32 %v2534_v31, %v2529_v41  ;;  %v260_v63 = vmul.f32 %v259_v7, %v4002_v17  ;;  %v1615_v4 = vstv %s5243_s27  ;;  %v2605_v47 = vstv %s5254_s23  ;;  %s5325_s27 = sld [smem:[#allocation3 + $0xd3]]  ;;  %v6798_v41 = vld [vmem:[#allocation18_spill] sm:$0xff] }
 0x386   : > { %v1609_v52 = vrot.slane %v1607_v49, 3  ;;  %v1604_v36 = vadd.f32 %v1603_v61, %v1598_v39  ;;  %v253_v5 = vadd.f32 %v251_v13, %v243_v35  ;;  %v252_v34 = vadd.f32 %v250_v59, %v242_v25  ;;  %s5348_s23 = sld [smem:[#allocation3 + $0x1e]] }
 0x387   : > { %v326_v17 = vstv %s5217_s16  ;;  %v1621_v7 = vstv %s5265_s14  ;;  %v1616_v11 = vmul.f32 %v1615_v4, %v5145_v6  ;;  %v5335_v56 = vsel %vm189_vm1, %v2817_v9, %v4633_v46  ;;  %s5350_s14 = sld [smem:[#allocation3 + $0xd4]] }
 0x388   : > { %v263_v45 = vadd.f32 %v261_v62, %v253_v5  ;;  %v5340_v57 = vsel %vm266_vm2, %v312_v50, %v313_v38  ;;  %v1627_v8 = vstv %s5276_s20  ;;  %v2611_v6 = vstv %s5292_s7  ;;  %s5360_s20 = sld [smem:[#allocation3 + $0x20]]  ;;  %v6800_v62 = vld [vmem:[#allocation20_spill] sm:$0xff] }
 0x389   : > { %1866 = vrot.lane.b32.xlu1 %v5128_v29, %s6792_s25  ;;  %1841 = vrot.lane.b32.xlu0 %v5128_v29, %s6793_s10  ;;  %v262_v0 = vadd.f32 %v260_v63, %v252_v34  ;;  %v1611_v37 = vadd.f32 %v1609_v52, %v1604_v36  ;;  %v1622_v30 = vmul.f32 %v1621_v7, %v5192_v20  ;;  %v1635_v24 = vstv %s5300_s12  ;;  %s5364_s7 = sld [smem:[#allocation3 + $0x97]] }
 0x38a   : > { %v281_v55 = vmul.f32 %v279_v19, %v4009_v21  ;;  %v2615_v31 = vstv %s5295_s11  ;;  %v1628_v49 = vmul.f32 %v1627_v8, %v5228_v54  ;;  %v6797_v21 = vld [vmem:[#allocation17_spill] sm:$0xff]  ;;  %v290_v13 = vmul.f32 %v289_v44, %v6798_v41  ;;  %s5381_s11 = sld [smem:[#allocation3 + $0x98]] }
 0x38b   : > { %v1617_v61 = vadd.f32 %v1616_v11, %v1611_v37  ;;  %v1641_v54 = vstv %s5306_s1  ;;  %v1651_v59 = vstv %s5320_s2  ;;  %v300_v63 = vmul.f32 %v299_v32, %v6800_v62  ;;  %s5390_s1 = sld [smem:[#allocation3 + $0x22]]  ;;  %v6803_v62 = vld [vmem:[#allocation23_spill] sm:$0xff] }
 0x38c   : > { %v336_v34 = vstv %s5226_s19  ;;  %v346_v7 = vstv %s5257_s29  ;;  %v374_v11 = vstv %s5325_s27  ;;  %v390_v8 = vstv %s5330_s28  ;;  %s5408_s12 = sld [smem:[#allocation3 + $0x9a]] }
 0x38d   : > { %1872 = vrot.lane.b32.xlu1 %v5128_v29, %s6790_s9  ;;  %1847 = vrot.lane.b32.xlu0 %v5128_v29, %s6794_s6  ;;  %v2539_v29 = vstv %s5235_s13  ;;  %s6795_s13 = smov 3   ;;  %s5417_s2 = sld [smem:[#allocation3 + $0x9b]] }
 0x38e   : > { %v2540_v53 = vmul.f32 %v2539_v29, %v2537_v23  ;;  %v6796_v23 = vld [vmem:[#allocation16_spill] sm:$0xff]  ;;  %v1623_v29 = vadd.f32 %v1622_v30, %v1617_v61  ;;  %v384_v30 = vstv %s5350_s14  ;;  %s5431_s28 = sld [smem:[#allocation3 + $0x9d]] }
 0x38f   : > { %v5302_v40 = vpop.permute.xlu1 %2618  ;;  %v2597_v51 = vpop.permute.xlu0 %2596  ;;  %v280_v33 = vmul.f32 %v279_v19, %v6796_v23  ;;  %v291_v19 = vmul.f32 %v289_v44, %v6797_v21  ;;  %v283_v44 = vadd.f32 %v281_v55, %v263_v45  ;;  %v5428_v21 = vmul.f32 %v390_v8, %v3867_v26  ;;  %s5466_s16 = sld [smem:[#allocation3 + $0xd7]] }
 0x390   : > { %v2600_v14 = vmul.f32 %v2599_v1, %v2597_v51  ;;  %v2541_v48 = vadd.f32 %v2540_v53, %v2535_v43  ;;  %v1636_v1 = vmul.f32 %v1635_v24, %v5267_v58  ;;  %v2616_v51 = vmul.f32 %v2615_v31, %v4761_v16  ;;  %v6799_v43 = vld [vmem:[#allocation19_spill] sm:$0xff]  ;;  %s5490_s19 = sld [smem:[#allocation3 + $0xd9]] }
 0x391   : > { %1880 = vrot.lane.b32.xlu1 %v5290_v60, %s6795_s13  ;;  %2811 = vrot.lane.b32.xlu0 %v5160_v15, %s6790_s9  ;;  %v282_v25 = vadd.f32 %v280_v33, %v262_v0  ;;  %v301_v9 = vmul.f32 %v299_v32, %v6799_v43  ;;  %v1629_v58 = vadd.f32 %v1628_v49, %v1623_v29  ;;  %v1647_v32 = vstv %s5348_s23  ;;  %s5433_s23 = sld [smem:[#allocation3 + $0xd6]] }
 0x392   : > { %v2601_v38 = vadd.f32 %v2600_v14, %v2541_v48  ;;  %v1652_v53 = vmul.f32 %v1651_v59, %v4470_v42  ;;  %v293_v14 = vadd.f32 %v291_v19, %v283_v44  ;;  %v2621_v33 = vstv %s5364_s7  ;;  %s5454_s7 = sld [smem:[#allocation3 + $0x26]] }
 0x393   : > { %v5328_v22 = vpop.permute.xlu1 %2624  ;;  %v2603_v15 = vpop.permute.xlu0 %2602  ;;  %v292_v5 = vadd.f32 %v290_v13, %v282_v25  ;;  %v1637_v48 = vadd.f32 %v1636_v1, %v1629_v58  ;;  %v1666_v24 = vstv %s5376_s18  ;;  %v5420_v31 = vmul.f32 %v390_v8, %v3874_v27  ;;  %s5460_s18 = sld [smem:[#allocation3 + $0xdc]] }
 0x394   : > { %v2606_v12 = vmul.f32 %v2605_v47, %v2603_v15  ;;  %v364_v15 = vstv %s5322_s24  ;;  %v1654_v55 = vrot.slane %v1652_v53, 4  ;;  %v1672_v19 = vstv %s5390_s1  ;;  %s5482_s1 = sld [smem:[#allocation3 + $0xd8]] }
 0x395   : > { %2849 = vrot.lane.b32.xlu1 %v5335_v56, %s6791_s5  ;;  %2820 = vrot.lane.b32.xlu0 %v5335_v56, %s6795_s13  ;;  %v302_v45 = vadd.f32 %v300_v63, %v292_v5  ;;  %v1683_v1 = vstv %s5401_s17  ;;  %v338_v63 = vmul.f32 %v336_v34, %v6803_v62  ;;  %s5509_s29 = sld [smem:[#allocation3 + $0x25]] }
 0x396   : > { %v2607_v20 = vadd.f32 %v2606_v12, %v2601_v38  ;;  %v303_v12 = vadd.f32 %v301_v9, %v293_v14  ;;  %s5512_s17 = sld [smem:[#allocation3 + $0xdb]] }
 0x397   : > { %v1658_v2 = vpop.permute.xlu1 %1657  ;;  %v2609_v50 = vpop.permute.xlu0 %2608  ;;  %s5518_s24 = sld [smem:[#allocation3 + $0x27]] }
 0x398   : > { %v2612_v39 = vmul.f32 %v2611_v6, %v2609_v50  ;;  %v1660_v6 = vstv %s5360_s20  ;;  %v5423_v50 = vmul.f32 %v390_v8, %v3889_v28  ;;  %s5449_s20 = sld [smem:[#allocation3 + $0x9c]] }
 0x399   : > { %2855 = vrot.lane.b32.xlu1 %v5335_v56, %s6792_s25  ;;  %2826 = vrot.lane.b32.xlu0 %v5335_v56, %s6793_s10  ;;  %v1661_v61 = vmul.f32 %v1660_v6, %v1658_v2  ;;  %v2627_v2 = vstv %s5381_s11  ;;  %s5480_s11 = sld [smem:[#allocation3 + $0x24]] }
 0x39a   : > { %v2613_v35 = vadd.f32 %v2612_v39, %v2607_v20  ;;  %v320_v20 = vadd.f32 %v5282_v10, %v303_v12  ;;  %v319_v39 = vadd.f32 %v5340_v57, %v302_v45  ;;  %v6801_v10 = vld [vmem:[#allocation21_spill] sm:$0xff]  ;;  %s5542_s27 = sld [smem:[#allocation3 + $0x9f]] }
 0x39b   : > { %v1664_v4 = vpop.permute.xlu1 %1663  ;;  %v1639_v47 = vpop.permute.xlu0 %1638  ;;  %v328_v57 = vmul.f32 %v326_v17, %v6801_v10  ;;  %v6805_v12 = vld [vmem:[#allocation25_spill] sm:$0xff]  ;;  %s5553_s14 = sld [smem:[#allocation3 + $0xa0]] }
 0x39c   : > { %v2617_v52 = vadd.f32 %v2616_v51, %v2613_v35  ;;  %v1642_v36 = vmul.f32 %v1641_v54, %v1639_v47  ;;  %v2622_v54 = vmul.f32 %v2621_v33, %v5302_v40  ;;  %v1667_v59 = vmul.f32 %v1666_v24, %v1664_v4  ;;  %v6802_v40 = vld [vmem:[#allocation22_spill] sm:$0xff] }
 0x39d   : > { %1905 = vrot.lane.b32.xlu1 %v5290_v60, %s6791_s5  ;;  %2832 = vrot.lane.b32.xlu0 %v5335_v56, %s6794_s6  ;;  %v2633_v51 = vstv %s5393_s26  ;;  %v5447_v35 = vrot.slane %v5002_v3, 3  ;;  %v327_v44 = vmul.f32 %v326_v17, %v6802_v40  ;;  %v2642_v47 = vstv %s5408_s12  ;;  %s5495_s26 = sld [smem:[#allocation3 + $0xda]] }
 0x39e   : > { %v1643_v38 = vadd.f32 %v1642_v36, %v1637_v48  ;;  %v2623_v9 = vadd.f32 %v2622_v54, %v2617_v52  ;;  %v2867_v17 = vrot.slane %v4761_v16, 6  ;;  %v2628_v52 = vmul.f32 %v2627_v2, %v5328_v22  ;;  %s5526_s12 = sld [smem:[#allocation3 + $0x9e]] }
 0x39f   : > { %v1670_v0 = vpop.permute.xlu1 %1669  ;;  %v1645_v37 = vpop.permute.xlu0 %1644  ;;  %v330_v5 = vadd.f32 %v328_v57, %v320_v20  ;;  %v348_v45 = vmul.f32 %v346_v7, %v6805_v12  ;;  %v2648_v22 = vstv %s5417_s2  ;;  %v329_v8 = vadd.f32 %v327_v44, %v319_v39  ;;  %s5532_s2 = sld [smem:[#allocation3 + $0x28]] }
 0x3a0   : > { %v1648_v23 = vmul.f32 %v1647_v32, %v1645_v37  ;;  %v1673_v25 = vmul.f32 %v1672_v19, %v1670_v0  ;;  %v6804_v32 = vld [vmem:[#allocation24_spill] sm:$0xff]  ;;  %v2629_v0 = vadd.f32 %v2628_v52, %v2623_v9  ;;  %v5499_v19 = vsel %vm690_vm6, %v2867_v17, %v4672_v18 }
 0x3a1   : > { %1911 = vrot.lane.b32.xlu1 %v5290_v60, %s6792_s25  ;;  %1886 = vrot.lane.b32.xlu0 %v5290_v60, %s6793_s10  ;;  %v337_v48 = vmul.f32 %v336_v34, %v6804_v32  ;;  %v340_v37 = vadd.f32 %v338_v63, %v330_v5  ;;  %v2654_v2 = vstv %s5449_s20  ;;  %v1699_v57 = vstv %s5454_s7  ;;  %v6810_v9 = vld [vmem:[#allocation32_spill] sm:$0xff]  ;;  %s5570_s20 = sld [smem:[#allocation3 + $0xa1]] }
 0x3a2   : > { %v1649_v49 = vadd.f32 %v1648_v23, %v1643_v38  ;;  %v6806_v38 = vld [vmem:[#allocation26_spill] sm:$0xff]  ;;  %v6807_v23 = vld [vmem:[#allocation27_spill] sm:$0xff]  ;;  %v475_v40 = vstv %s5460_s18  ;;  %v375_v62 = vmul.f32 %v374_v11, %v6810_v9  ;;  %v1700_v17 = vmul.f32 %v1699_v57, %v4470_v42  ;;  %s5585_s7 = sld [smem:[#allocation3 + $0xa2]]  ;;  %v6814_v9 = vld [vmem:[#allocation36_spill] sm:$0xff] }
 0x3a3   : > { %v1681_v41 = vpop.permute.xlu1 %1680  ;;  %v2631_v13 = vpop.permute.xlu0 %2630  ;;  %v366_v33 = vmul.f32 %v364_v15, %v6807_v23  ;;  %v1701_v52 = vmul.f32 0.0, %v1699_v57  ;;  %s5592_s18 = sld [smem:[#allocation3 + $0xa4]] }
 0x3a4   : > { %v1656_v29 = vadd.f32 %v1654_v55, %v1649_v49  ;;  %v1684_v53 = vmul.f32 %v1683_v1, %v1681_v41  ;;  %v2634_v14 = vmul.f32 %v2633_v51, %v2631_v13  ;;  %v347_v55 = vmul.f32 %v346_v7, %v6806_v38  ;;  %v6808_v13 = vld [vmem:[#allocation28_spill] sm:$0xff] }
 0x3a5   : > { %1917 = vrot.lane.b32.xlu1 %v5290_v60, %s6790_s9  ;;  %1892 = vrot.lane.b32.xlu0 %v5290_v60, %s6794_s6  ;;  %v398_v60 = vrot.slane %v5420_v31, 2  ;;  %v339_v7 = vadd.f32 %v337_v48, %v329_v8  ;;  %v350_v41 = vadd.f32 %v348_v45, %v340_v37  ;;  %v365_v54 = vmul.f32 %v364_v15, %v6808_v13 }
 0x3a6   : > { %v1662_v43 = vadd.f32 %v1661_v61, %v1656_v29  ;;  %v2658_v61 = vstv %s5431_s28  ;;  %v2635_v20 = vadd.f32 %v2634_v14, %v2629_v0  ;;  %v397_v51 = vrot.slane %v5428_v21, 2  ;;  %s5551_s28 = sld [smem:[#allocation3 + $0x29]] }
 0x3a7   : > { %v5462_v4 = vpop.permute.xlu1 %2664  ;;  %v2640_v58 = vpop.permute.xlu0 %2639  ;;  %v2659_v10 = vmul.f32 %v2658_v61, %v4761_v16  ;;  %v349_v15 = vadd.f32 %v347_v55, %v339_v7  ;;  %v368_v1 = vadd.f32 %v366_v33, %v350_v41  ;;  %v1689_v21 = vstv %s5480_s11  ;;  %s5607_s11 = sld [smem:[#allocation3 + $0xa3]] }
 0x3a8   : > { %v1668_v36 = vadd.f32 %v1667_v59, %v1662_v43  ;;  %v2643_v34 = vmul.f32 %v2642_v47, %v2640_v58  ;;  %v400_v59 = vrot.slane %v5423_v50, 2  ;;  %v6809_v43 = vld [vmem:[#allocation31_spill] sm:$0xff]  ;;  %v399_v12 = vsel %vm351_vm3, %v397_v51, %v398_v60 }
 0x3a9   : > { %1925 = vrot.lane.b32.xlu1 %v5447_v35, %s6795_s13  ;;  %2861 = vrot.lane.b32.xlu0 %v5335_v56, %s6790_s9  ;;  %v376_v50 = vmul.f32 %v374_v11, %v6809_v43  ;;  %v367_v58 = vadd.f32 %v365_v54, %v349_v15  ;;  %v2661_v5 = vrot.slane %v2659_v10, 1  ;;  %v411_v45 = vstv %s5433_s23  ;;  %s5561_s23 = sld [smem:[#allocation3 + $0x2a]]  ;;  %v6813_v43 = vld [vmem:[#allocation35_spill] sm:$0xff] }
 0x3aa   : > { %v1674_v6 = vadd.f32 %v1673_v25, %v1668_v36  ;;  %v2644_v29 = vadd.f32 %v2643_v34, %v2635_v20  ;;  %v6811_v36 = vld [vmem:[#allocation33_spill] sm:$0xff]  ;;  %v401_v48 = vsel %vm351_vm3, %v398_v60, %v400_v59  ;;  %v5556_v31 = vmul.f32 %v475_v40, %v3874_v27 }
 0x3ab   : > { %v5492_v56 = vpop.permute.xlu1 %2670  ;;  %v2646_v24 = vpop.permute.xlu0 %2645  ;;  %v386_v11 = vmul.f32 %v384_v30, %v6811_v36  ;;  %v1695_v60 = vstv %s5509_s29  ;;  %v1704_v37 = vrot.slane %v1700_v17, 5  ;;  %v1705_v38 = vrot.slane %v1701_v52, 5  ;;  %s5615_s29 = sld [smem:[#allocation3 + $0xde]] }
 0x3ac   : > { %v1685_v49 = vadd.f32 %v1684_v53, %v1674_v6  ;;  %v2649_v39 = vmul.f32 %v2648_v22, %v2646_v24  ;;  %v6812_v53 = vld [vmem:[#allocation34_spill] sm:$0xff]  ;;  %v377_v6 = vadd.f32 %v375_v62, %v367_v58  ;;  %v421_v33 = vstv %s5466_s16  ;;  %s5597_s16 = sld [smem:[#allocation3 + $0xdd]] }
 0x3ad   : > { %2899 = vrot.lane.b32.xlu1 %v5499_v19, %s6791_s5  ;;  %2870 = vrot.lane.b32.xlu0 %v5499_v19, %s6795_s13  ;;  %v385_v14 = vmul.f32 %v384_v30, %v6812_v53  ;;  %v378_v30 = vadd.f32 %v376_v50, %v368_v1  ;;  %v431_v61 = vstv %s5482_s1  ;;  %v449_v20 = vstv %s5490_s19  ;;  %s5612_s1 = sld [smem:[#allocation3 + $0x2d]] }
 0x3ae   : > { %v2650_v63 = vadd.f32 %v2649_v39, %v2644_v29  ;;  %v459_v39 = vstv %s5495_s26  ;;  %v1712_v7 = vstv %s5518_s24  ;;  %v469_v54 = vstv %s5512_s17  ;;  %s5620_s24 = sld [smem:[#allocation3 + $0xdf]] }
 0x3af   : > { %v1710_v44 = vpop.permute.xlu1 %1709  ;;  %v2652_v25 = vpop.permute.xlu0 %2651  ;;  %v388_v55 = vadd.f32 %v386_v11, %v378_v30  ;;  %v387_v23 = vadd.f32 %v385_v14, %v377_v6  ;;  %v5577_v59 = vmul.f32 %v475_v40, %v3867_v26  ;;  %v483_v10 = vrot.slane %v5556_v31, 3  ;;  %v6815_v11 = vld [vmem:[#allocation37_spill] sm:$0xff]  ;;  %v6817_v6 = vld [vmem:[#allocation39_spill] sm:$0xff]  ;;  %s5656_s19 = sld [smem:[#allocation3 + $0x2c]] }
 0x3b0   : > { %v2655_v47 = vmul.f32 %v2654_v2, %v2652_v25  ;;  %v5574_v2 = vmul.f32 %v475_v40, %v3889_v28  ;;  %v1718_v57 = vstv %s5532_s2  ;;  %v1706_v15 = vsel %vm189_vm1, %v1704_v37, %v1705_v38  ;;  %s5634_s2 = sld [smem:[#allocation3 + $0xe0]] }
 0x3b1   : > { %2905 = vrot.lane.b32.xlu1 %v5499_v19, %s6792_s25  ;;  %2876 = vrot.lane.b32.xlu0 %v5499_v19, %s6793_s10  ;;  %v405_v1 = vadd.f32 %v401_v48, %v388_v55  ;;  %v404_v51 = vadd.f32 %v399_v12, %v387_v23  ;;  %v1713_v40 = vmul.f32 %v1712_v7, %v1710_v44  ;;  %v2673_v44 = vstv %s5542_s27  ;;  %v6816_v48 = vld [vmem:[#allocation38_spill] sm:$0xff]  ;;  %v6818_v7 = vld [vmem:[#allocation40_spill] sm:$0xff]  ;;  %s5642_s27 = sld [smem:[#allocation3 + $0xe1]] }
 0x3b2   : > { %v2656_v32 = vadd.f32 %v2655_v47, %v2650_v63  ;;  %v413_v50 = vmul.f32 %v411_v45, %v6813_v43  ;;  %v412_v62 = vmul.f32 %v411_v45, %v6814_v9  ;;  %v1724_v63 = vstv %s5551_s28  ;;  %s5647_s28 = sld [smem:[#allocation3 + $0xe3]] }
 0x3b3   : > { %v1716_v22 = vpop.permute.xlu1 %1715  ;;  %v1687_v8 = vpop.permute.xlu0 %1686  ;;  %v423_v53 = vmul.f32 %v421_v33, %v6815_v11  ;;  %v485_v14 = vrot.slane %v5574_v2, 3  ;;  %v2687_v37 = vstv %s5570_s20  ;;  %v2674_v55 = vmul.f32 %v2673_v44, %v5492_v56  ;;  %v6822_v44 = vld [vmem:[#allocation45_spill] sm:$0xff]  ;;  %v6823_v11 = vld [vmem:[#allocation46_spill] sm:$0xff]  ;;  %s5671_s26 = sld [smem:[#allocation3 + $0x2e]] }
 0x3b4   : > { %v2663_v0 = vadd.f32 %v2661_v5, %v2656_v32  ;;  %v1690_v34 = vmul.f32 %v1689_v21, %v1687_v8  ;;  %v5595_v21 = vrot.slane %v5002_v3, 4  ;;  %v1719_v52 = vmul.f32 %v1718_v57, %v1716_v22  ;;  %s5683_s17 = sld [smem:[#allocation3 + $0x2f]] }
 0x3b5   : > { %2882 = vrot.lane.b32.xlu0 %v5499_v19, %s6794_s6  ;;  %1950 = vrot.lane.b32.xlu1 %v5447_v35, %s6791_s5  ;;  %v1734_v5 = vstv %s5561_s23  ;;  %v2679_v32 = vstv %s5553_s14  ;;  %v415_v8 = vadd.f32 %v413_v50, %v405_v1  ;;  %v414_v30 = vadd.f32 %v412_v62, %v404_v51  ;;  %v6820_v51 = vld [vmem:[#allocation43_spill] sm:$0xff]  ;;  %s5663_s14 = sld [smem:[#allocation3 + $0xe2]] }
 0x3b6   : > { %v1691_v24 = vadd.f32 %v1690_v34, %v1685_v49  ;;  %v2667_v49 = vstv %s5526_s12  ;;  %v433_v34 = vmul.f32 %v431_v61, %v6817_v6  ;;  %s5630_s12 = sld [smem:[#allocation3 + $0x2b]]  ;;  %v2703_v9 = vstv %s5592_s18 }
 0x3b7   : > { %v1722_v41 = vpop.permute.xlu1 %1721  ;;  %v1693_v13 = vpop.permute.xlu0 %1692  ;;  %v2668_v17 = vmul.f32 %v2667_v49, %v5462_v4  ;;  %v422_v4 = vmul.f32 %v421_v33, %v6816_v48  ;;  %v2693_v49 = vstv %s5585_s7  ;;  %v1750_v48 = vstv %s5612_s1  ;;  %s5675_s23 = sld [smem:[#allocation3 + $0xa5]] }
 0x3b8   : > { %v1696_v29 = vmul.f32 %v1695_v60, %v1693_v13  ;;  %v1725_v12 = vmul.f32 %v1724_v63, %v1722_v41  ;;  %v432_v41 = vmul.f32 %v431_v61, %v6818_v7  ;;  %v6819_v13 = vld [vmem:[#allocation42_spill] sm:$0xff]  ;;  %s5694_s20 = sld [smem:[#allocation3 + $0xa6]]  ;;  %v506_v7 = vstv %s5615_s29 }
 0x3b9   : > { %1931 = vrot.lane.b32.xlu0 %v5447_v35, %s6793_s10  ;;  %1962 = vrot.lane.b32.xlu1 %v5447_v35, %s6790_s9  ;;  %v2669_v22 = vadd.f32 %v2668_v17, %v2663_v0  ;;  %v424_v56 = vadd.f32 %v422_v4, %v414_v30  ;;  %v482_v4 = vrot.slane %v5577_v59, 3  ;;  %s5701_s7 = sld [smem:[#allocation3 + $0x30]]  ;;  %v1746_v31 = vstv %s5656_s19 }
 0x3ba   : > { %v1697_v25 = vadd.f32 %v1696_v29, %v1691_v24  ;;  %v425_v24 = vadd.f32 %v423_v53, %v415_v8  ;;  %v451_v29 = vmul.f32 %v449_v20, %v6819_v13  ;;  %v471_v53 = vmul.f32 %v469_v54, %v6823_v11  ;;  %s5705_s18 = sld [smem:[#allocation3 + $0xa7]] }
 0x3bb   : > { %v1732_v47 = vpop.permute.xlu1 %1731  ;;  %v2677_v58 = vpop.permute.xlu0 %2676  ;;  %v534_v13 = vstv %s5634_s2  ;;  %v1769_v11 = vstv %s5683_s17  ;;  %s5737_s1 = sld [smem:[#allocation3 + $0xa9]] }
 0x3bc   : > { %v1708_v36 = vadd.f32 %v1706_v15, %v1697_v25  ;;  %v1735_v0 = vmul.f32 %v1734_v5, %v1732_v47  ;;  %v2680_v33 = vmul.f32 %v2679_v32, %v2677_v58  ;;  %v2675_v15 = vadd.f32 %v2674_v55, %v2669_v22  ;;  %v6821_v25 = vld [vmem:[#allocation44_spill] sm:$0xff]  ;;  %s5742_s29 = sld [smem:[#allocation3 + $0xe4]] }
 0x3bd   : > { %1937 = vrot.lane.b32.xlu0 %v5447_v35, %s6794_s6  ;;  %1976 = vrot.lane.b32.xlu1 %v5595_v21, %s6793_s10  ;;  %v435_v1 = vadd.f32 %v433_v34, %v425_v24  ;;  %v2013_v58 = vrot.slane %v5002_v3, 5  ;;  %v2704_v32 = vmul.f32 %v2703_v9, %v4761_v16  ;;  %v496_v24 = vstv %s5597_s16  ;;  %s5711_s16 = sld [smem:[#allocation3 + $0x31]] }
 0x3be   : > { %v1714_v45 = vadd.f32 %v1713_v40, %v1708_v36  ;;  %v450_v40 = vmul.f32 %v449_v20, %v6820_v51  ;;  %v2681_v63 = vadd.f32 %v2680_v33, %v2675_v15  ;;  %v434_v20 = vadd.f32 %v432_v41, %v424_v56  ;;  %s5767_s19 = sld [smem:[#allocation3 + $0xe6]] }
 0x3bf   : > { %v5617_v60 = vpop.permute.xlu1 %2709  ;;  %v2685_v38 = vpop.permute.xlu0 %2684  ;;  %v453_v17 = vadd.f32 %v451_v29, %v435_v1  ;;  %v2699_v36 = vstv %s5607_s11  ;;  %v5679_v34 = vsel %vm189_vm1, %v2013_v58, %v4633_v46  ;;  %v486_v46 = vsel %vm436_vm4, %v483_v10, %v485_v14  ;;  %s5720_s11 = sld [smem:[#allocation3 + $0xa8]] }
 0x3c0   : > { %v1720_v23 = vadd.f32 %v1719_v52, %v1714_v45  ;;  %v2688_v61 = vmul.f32 %v2687_v37, %v2685_v38  ;;  %v460_v52 = vmul.f32 %v459_v39, %v6822_v44  ;;  %v1751_v37 = vmul.f32 %v1750_v48, %v4470_v42  ;;  %s5789_s2 = sld [smem:[#allocation3 + $0x32]] }
 0x3c1   : > { %2911 = vrot.lane.b32.xlu0 %v5499_v19, %s6790_s9  ;;  %1995 = vrot.lane.b32.xlu1 %v5595_v21, %s6791_s5  ;;  %v461_v19 = vmul.f32 %v459_v39, %v6821_v25  ;;  %v452_v39 = vadd.f32 %v450_v40, %v434_v20  ;;  %v1752_v38 = vmul.f32 0.0, %v1750_v48  ;;  %v484_v42 = vsel %vm436_vm4, %v482_v4, %v483_v10  ;;  %s5801_s17 = sld [smem:[#allocation3 + $0xe9]] }
 0x3c2   : > { %v1726_v57 = vadd.f32 %v1725_v12, %v1720_v23  ;;  %v2689_v5 = vadd.f32 %v2688_v61, %v2681_v63  ;;  %v2706_v23 = vrot.slane %v2704_v32, 2  ;;  %v516_v14 = vstv %s5620_s24  ;;  %v6825_v61 = vld [vmem:[#allocation48_spill] sm:$0xff]  ;;  %v6827_v32 = vld [vmem:[#allocation50_spill] sm:$0xff]  ;;  %s5748_s24 = sld [smem:[#allocation3 + $0xab]] }
 0x3c3   : > { %v5644_v43 = vpop.permute.xlu1 %2715  ;;  %v2691_v50 = vpop.permute.xlu0 %2690  ;;  %v463_v8 = vadd.f32 %v461_v19, %v453_v17  ;;  %v462_v59 = vadd.f32 %v460_v52, %v452_v39  ;;  %v560_v56 = vstv %s5647_s28  ;;  %v1755_v10 = vrot.slane %v1751_v37, 6  ;;  %v6826_v19 = vld [vmem:[#allocation49_spill] sm:$0xff]  ;;  %s5763_s28 = sld [smem:[#allocation3 + $0xaa]] }
 0x3c4   : > { %v1736_v62 = vadd.f32 %v1735_v0, %v1726_v57  ;;  %v2694_v47 = vmul.f32 %v2693_v49, %v2691_v50  ;;  %v1756_v57 = vrot.slane %v1752_v38, 6  ;;  %v498_v1 = vmul.f32 %v496_v24, %v6825_v61  ;;  %v6829_v38 = vld [vmem:[#allocation52_spill] sm:$0xff] }
 0x3c5   : > { %1956 = vrot.lane.b32.xlu0 %v5447_v35, %s6792_s25  ;;  %2007 = vrot.lane.b32.xlu1 %v5595_v21, %s6790_s9  ;;  %v6824_v35 = vld [vmem:[#allocation47_spill] sm:$0xff]  ;;  %v473_v55 = vadd.f32 %v471_v53, %v463_v8  ;;  %v544_v51 = vstv %s5642_s27  ;;  %v497_v50 = vmul.f32 %v496_v24, %v6826_v19  ;;  %v554_v9 = vstv %s5663_s14  ;;  %s5817_s27 = sld [smem:[#allocation3 + $0x34]] }
 0x3c6   : > { %v470_v12 = vmul.f32 %v469_v54, %v6824_v35  ;;  %v2695_v30 = vadd.f32 %v2694_v47, %v2689_v5  ;;  %v1740_v54 = vstv %s5630_s12  ;;  %v1763_v63 = vstv %s5671_s26  ;;  %s5750_s12 = sld [smem:[#allocation3 + $0xe5]] }
 0x3c7   : > { %v5673_v45 = vpop.permute.xlu1 %1760  ;;  %v2697_v22 = vpop.permute.xlu0 %2696  ;;  %v490_v15 = vadd.f32 %v486_v46, %v473_v55  ;;  %v5723_v20 = vmul.f32 %v560_v56, %v3874_v27  ;;  %v5726_v17 = vmul.f32 %v560_v56, %v3889_v28  ;;  %v2063_v52 = vrot.slane %v5002_v3, 6  ;;  %v6830_v55 = vld [vmem:[#allocation53_spill] sm:$0xff]  ;;  %s5775_s26 = sld [smem:[#allocation3 + $0xea]] }
 0x3c8   : > { %v2700_v6 = vmul.f32 %v2699_v36, %v2697_v22  ;;  %v472_v33 = vadd.f32 %v470_v12, %v462_v59  ;;  %v2712_v36 = vstv %s5675_s23  ;;  %v1757_v53 = vsel %vm690_vm6, %v1755_v10, %v1756_v57  ;;  %v6828_v12 = vld [vmem:[#allocation51_spill] sm:$0xff]  ;;  %s5796_s23 = sld [smem:[#allocation3 + $0xe8]] }
 0x3c9   : > { %1970 = vrot.lane.b32.xlu0 %v5595_v21, %s6795_s13  ;;  %2022 = vrot.lane.b32.xlu1 %v5679_v34, %s6793_s10  ;;  %v500_v5 = vadd.f32 %v498_v1, %v490_v15  ;;  %v508_v48 = vmul.f32 %v506_v7, %v6827_v32  ;;  %v1764_v39 = vmul.f32 %v1763_v63, %v5673_v45  ;;  %v2718_v8 = vstv %s5694_s20  ;;  %s5821_s14 = sld [smem:[#allocation3 + $0xeb]] }
 0x3ca   : > { %v2701_v0 = vadd.f32 %v2700_v6, %v2695_v30  ;;  %v489_v25 = vadd.f32 %v484_v42, %v472_v33  ;;  %v507_v22 = vmul.f32 %v506_v7, %v6828_v12  ;;  %v2713_v59 = vmul.f32 %v2712_v36, %v5617_v60  ;;  %v6835_v36 = vld [vmem:[#allocation58_spill] sm:$0xff]  ;;  %s5825_s20 = sld [smem:[#allocation3 + $0x35]] }
 0x3cb   : > { %v1767_v41 = vpop.permute.xlu1 %1766  ;;  %v1738_v2 = vpop.permute.xlu0 %1737  ;;  %v5755_v45 = vsel %vm690_vm6, %v2063_v52, %v4672_v18  ;;  %v518_v46 = vmul.f32 %v516_v14, %v6829_v38  ;;  %v2724_v42 = vstv %s5705_s18  ;;  %v510_v60 = vadd.f32 %v508_v48, %v500_v5  ;;  %v6836_v48 = vld [vmem:[#allocation59_spill] sm:$0xff]  ;;  %s5837_s18 = sld [smem:[#allocation3 + $0xad]] }
 0x3cc   : > { %v2708_v29 = vadd.f32 %v2706_v23, %v2701_v0  ;;  %v1741_v49 = vmul.f32 %v1740_v54, %v1738_v2  ;;  %v499_v35 = vadd.f32 %v497_v50, %v489_v25  ;;  %v1770_v54 = vmul.f32 %v1769_v11, %v1767_v41  ;;  %v6831_v41 = vld [vmem:[#allocation54_spill] sm:$0xff]  ;;  %v6833_v25 = vld [vmem:[#allocation56_spill] sm:$0xff] }
 0x3cd   : > { %1982 = vrot.lane.b32.xlu0 %v5595_v21, %s6794_s6  ;;  %2045 = vrot.lane.b32.xlu1 %v5679_v34, %s6791_s5  ;;  %v517_v23 = vmul.f32 %v516_v14, %v6830_v55  ;;  %v1795_v0 = vstv %s5711_s16  ;;  %v536_v2 = vmul.f32 %v534_v13, %v6831_v41  ;;  %v6832_v14 = vld [vmem:[#allocation55_spill] sm:$0xff]  ;;  %v2719_v57 = vmul.f32 %v2718_v8, %v5644_v43  ;;  %v6834_v43 = vld [vmem:[#allocation57_spill] sm:$0xff]  ;;  %s5844_s16 = sld [smem:[#allocation3 + $0x37]] }
 0x3ce   : > { %v1742_v40 = vadd.f32 %v1741_v49, %v1736_v62  ;;  %v5730_v62 = vmul.f32 %v560_v56, %v3867_v26  ;;  %v2714_v24 = vadd.f32 %v2713_v59, %v2708_v29  ;;  %v509_v7 = vadd.f32 %v507_v22, %v499_v35 }
 0x3cf   : > { %v1773_v47 = vpop.permute.xlu1 %1772  ;;  %v1744_v58 = vpop.permute.xlu0 %1743  ;;  %v535_v49 = vmul.f32 %v534_v13, %v6832_v14  ;;  %v520_v1 = vadd.f32 %v518_v46, %v510_v60  ;;  %v546_v13 = vmul.f32 %v544_v51, %v6833_v25  ;;  %v2738_v19 = vstv %s5737_s1  ;;  %s5861_s1 = sld [smem:[#allocation3 + $0xec]] }
 0x3d0   : > { %v1747_v44 = vmul.f32 %v1746_v31, %v1744_v58  ;;  %v2732_v31 = vstv %s5720_s11  ;;  %v545_v50 = vmul.f32 %v544_v51, %v6834_v43  ;;  %v556_v11 = vmul.f32 %v554_v9, %v6835_v36  ;;  %s5854_s11 = sld [smem:[#allocation3 + $0x38]]  ;;  %v6839_v43 = vld [vmem:[#allocation62_spill] sm:$0xff] }
 0x3d1   : > { %2001 = vrot.lane.b32.xlu0 %v5595_v21, %s6792_s25  ;;  %2057 = vrot.lane.b32.xlu1 %v5679_v34, %s6790_s9  ;;  %v1775_v21 = vstv %s5701_s7  ;;  %v2748_v32 = vstv %s5748_s24  ;;  %v555_v51 = vmul.f32 %v554_v9, %v6836_v48  ;;  %v568_v12 = vrot.slane %v5723_v20, 4  ;;  %s5827_s7 = sld [smem:[#allocation3 + $0xac]] }
 0x3d2   : > { %v1748_v4 = vadd.f32 %v1747_v44, %v1742_v40  ;;  %v1776_v18 = vmul.f32 %v1775_v21, %v1773_v47  ;;  %v519_v40 = vadd.f32 %v517_v23, %v509_v7  ;;  %v2720_v47 = vadd.f32 %v2719_v57, %v2714_v24  ;;  %s5880_s24 = sld [smem:[#allocation3 + $0xb0]] }
 0x3d3   : > { %v1793_v30 = vpop.permute.xlu1 %1792  ;;  %v2722_v6 = vpop.permute.xlu0 %2721  ;;  %v538_v44 = vadd.f32 %v536_v2, %v520_v1  ;;  %v570_v22 = vrot.slane %v5726_v17, 4  ;;  %v567_v8 = vrot.slane %v5730_v62, 4  ;;  %v2744_v21 = vstv %s5763_s28  ;;  %s5891_s28 = sld [smem:[#allocation3 + $0xef]] }
 0x3d4   : > { %v1759_v37 = vadd.f32 %v1757_v53, %v1748_v4  ;;  %v1796_v15 = vmul.f32 %v1795_v0, %v1793_v30  ;;  %v2725_v61 = vmul.f32 %v2724_v42, %v2722_v6  ;;  %v537_v52 = vadd.f32 %v535_v49, %v519_v40 }
 0x3d5   : > { %2016 = vrot.lane.b32.xlu0 %v5679_v34, %s6795_s13  ;;  %2072 = vrot.lane.b32.xlu1 %v5755_v45, %s6793_s10  ;;  %s5780_s10 = sld [smem:[#allocation3 + $0xe7]]  ;;  %v548_v9 = vadd.f32 %v546_v13, %v538_v44  ;;  %v2749_v20 = vmul.f32 %v2748_v32, %v4761_v16  ;;  %v644_v17 = vstv %s5775_s26  ;;  %v571_v46 = vsel %vm521_vm5, %v568_v12, %v570_v22 }
 0x3d6   : > { %v1765_v33 = vadd.f32 %v1764_v39, %v1759_v37  ;;  %v2726_v4 = vadd.f32 %v2725_v61, %v2720_v47  ;;  %v547_v30 = vadd.f32 %v545_v50, %v537_v52  ;;  %v569_v55 = vsel %vm521_vm5, %v567_v8, %v568_v12  ;;  %v6841_v12 = vld [vmem:[#allocation64_spill] sm:$0xff]  ;;  %s5900_s26 = sld [smem:[#allocation3 + $0xf1]] }
 0x3d7   : > { %v5777_v56 = vpop.permute.xlu1 %2754  ;;  %v2730_v10 = vpop.permute.xlu0 %2729  ;;  %v558_v59 = vadd.f32 %v556_v11, %v548_v9  ;;  %v1801_v23 = vstv %s5789_s2  ;;  %v581_v0 = vstv %s5742_s29  ;;  %v2751_v42 = vrot.slane %v2749_v20, 3  ;;  %s5873_s29 = sld [smem:[#allocation3 + $0xed]]  ;;  %v6842_v20 = vld [vmem:[#allocation65_spill] sm:$0xff] }
 0x3d8   : > { %v1771_v29 = vadd.f32 %v1770_v54, %v1765_v33  ;;  %v2733_v58 = vmul.f32 %v2732_v31, %v2730_v10  ;;  %v557_v54 = vadd.f32 %v555_v51, %v547_v30  ;;  %v601_v33 = vstv %s5767_s19  ;;  %v6837_v10 = vld [vmem:[#allocation60_spill] sm:$0xff]  ;;  %s5898_s19 = sld [smem:[#allocation3 + $0xb1]] }
 0x3d9   : > { %2028 = vrot.lane.b32.xlu0 %v5679_v34, %s6794_s6  ;;  %2095 = vrot.lane.b32.xlu1 %v5755_v45, %s6791_s5  ;;  %s5809_s5 = sld [smem:[#allocation3 + $0x33]]  ;;  %v5842_v24 = vmul.f32 %v644_v17, %v3874_v27  ;;  %v575_v2 = vadd.f32 %v571_v46, %v558_v59  ;;  %v583_v57 = vmul.f32 %v581_v0, %v6837_v10  ;;  %v1811_v1 = vstv %s5817_s27 }
 0x3da   : > { %v1777_v63 = vadd.f32 %v1776_v18, %v1771_v29  ;;  %v2734_v6 = vadd.f32 %v2733_v58, %v2726_v4  ;;  %v591_v18 = vstv %s5750_s12  ;;  %v574_v14 = vadd.f32 %v569_v55, %v557_v54  ;;  %v6838_v29 = vld [vmem:[#allocation61_spill] sm:$0xff]  ;;  %s5884_s12 = sld [smem:[#allocation3 + $0xee]]  ;;  %v6843_v54 = vld [vmem:[#allocation66_spill] sm:$0xff]  ;;  %v6844_v55 = vld [vmem:[#allocation67_spill] sm:$0xff] }
 0x3db   : > { %v5803_v53 = vpop.permute.xlu1 %2760  ;;  %v2736_v5 = vpop.permute.xlu0 %2735  ;;  %v618_v40 = vstv %s5780_s10  ;;  %v628_v25 = vstv %s5796_s23  ;;  %v5859_v13 = vmul.f32 %v644_v17, %v3889_v28  ;;  %v593_v50 = vmul.f32 %v591_v18, %v6839_v43  ;;  %s5904_s10 = sld [smem:[#allocation3 + $0xf0]]  ;;  %v6847_v43 = vld [vmem:[#allocation70_spill] sm:$0xff] }
 0x3dc   : > { %v1797_v39 = vadd.f32 %v1796_v15, %v1777_v63  ;;  %v2739_v35 = vmul.f32 %v2738_v19, %v2736_v5  ;;  %v582_v15 = vmul.f32 %v581_v0, %v6838_v29  ;;  %v6840_v63 = vld [vmem:[#allocation63_spill] sm:$0xff]  ;;  %v638_v58 = vstv %s5801_s17  ;;  %s5910_s2 = sld [smem:[#allocation3 + $0x39]] }
 0x3dd   : > { %2051 = vrot.lane.b32.xlu0 %v5679_v34, %s6792_s25  ;;  %2107 = vrot.lane.b32.xlu1 %v5755_v45, %s6790_s9  ;;  %s5831_s9 = sld [smem:[#allocation3 + $0x36]]  ;;  %v592_v47 = vmul.f32 %v591_v18, %v6840_v63  ;;  %v1817_v44 = vstv %s5825_s20  ;;  %v652_v11 = vrot.slane %v5842_v24, 5  ;;  %v5871_v5 = vmul.f32 %v644_v17, %v3867_v26 }
 0x3de   : > { %v2740_v37 = vadd.f32 %v2739_v35, %v2734_v6  ;;  %v1812_v32 = vmul.f32 %v1811_v1, %v5002_v3  ;;  %v585_v51 = vadd.f32 %v583_v57, %v575_v2  ;;  %v2757_v4 = vstv %s5827_s7  ;;  %s5914_s23 = sld [smem:[#allocation3 + $0x3b]] }
 0x3df   : > { %v1815_v62 = vpop.permute.xlu1 %1814  ;;  %v2742_v34 = vpop.permute.xlu0 %2741  ;;  %v1807_v61 = vstv %s5809_s5  ;;  %v603_v22 = vmul.f32 %v601_v33, %v6841_v12  ;;  %v654_v8 = vrot.slane %v5859_v13, 5  ;;  %v602_v17 = vmul.f32 %v601_v33, %v6842_v20  ;;  %s5917_s17 = sld [smem:[#allocation3 + $0xf2]] }
 0x3e0   : > { %v2745_v38 = vmul.f32 %v2744_v21, %v2742_v34  ;;  %v1818_v21 = vmul.f32 %v1817_v44, %v1815_v62  ;;  %v595_v30 = vadd.f32 %v593_v50, %v585_v51  ;;  %v1829_v34 = vstv %s5844_s16  ;;  %s5920_s5 = sld [smem:[#allocation3 + $0xf3]] }
 0x3e1   : > { %2066 = vrot.lane.b32.xlu0 %v5755_v45, %s6795_s13  ;;  %s5846_s13 = sld [smem:[#allocation3 + $0xae]]  ;;  %v2763_v0 = vstv %s5837_s18  ;;  %v640_v50 = vmul.f32 %v638_v58, %v6847_v43  ;;  %v2783_v63 = vstv %s5880_s24 }
 0x3e2   : > { %v2746_v60 = vadd.f32 %v2745_v38, %v2740_v37  ;;  %v620_v37 = vmul.f32 %v618_v40, %v6843_v54  ;;  %v2758_v38 = vmul.f32 %v2757_v4, %v5777_v56  ;;  %v605_v18 = vadd.f32 %v603_v22, %v595_v30  ;;  %s5925_s27 = sld [smem:[#allocation3 + $0xf4]] }
 0x3e3   : > { %v1821_v7 = vpop.permute.xlu1 %1820  ;;  %v1799_v41 = vpop.permute.xlu0 %1798  ;;  %v1823_v35 = vstv %s5831_s9  ;;  %v655_v22 = vsel %vm189_vm1, %v652_v11, %v654_v8  ;;  %s5931_s20 = sld [smem:[#allocation3 + $0x3a]]  ;;  %v665_v30 = vstv %s5821_s14  ;;  %v685_v8 = vstv %s5873_s29 }
 0x3e4   : > { %v2753_v49 = vadd.f32 %v2751_v42, %v2746_v60  ;;  %v1802_v31 = vmul.f32 %v1801_v23, %v1799_v41  ;;  %v1824_v46 = vmul.f32 %v1823_v35, %v1821_v7  ;;  %v619_v23 = vmul.f32 %v618_v40, %v6844_v55  ;;  %v6846_v7 = vld [vmem:[#allocation69_spill] sm:$0xff]  ;;  %s5934_s7 = sld [smem:[#allocation3 + $0xf5]]  ;;  %v6849_v55 = vld [vmem:[#allocation72_spill] sm:$0xff] }
 0x3e5   : > { %2078 = vrot.lane.b32.xlu0 %v5755_v45, %s6794_s6  ;;  %s5867_s6 = sld [smem:[#allocation3 + $0xaf]]  ;;  %v1838_v42 = vstv %s5854_s11  ;;  %v629_v10 = vmul.f32 %v628_v25, %v6846_v7  ;;  %v703_v54 = vstv %s5884_s12  ;;  %v667_v24 = vmul.f32 %v665_v30, %v6849_v55 }
 0x3e6   : > { %v1803_v19 = vadd.f32 %v1802_v31, %v1797_v39  ;;  %v584_v39 = vadd.f32 %v582_v15, %v574_v14  ;;  %v2759_v2 = vadd.f32 %v2758_v38, %v2753_v49  ;;  %v6845_v31 = vld [vmem:[#allocation68_spill] sm:$0xff]  ;;  %v622_v49 = vadd.f32 %v620_v37, %v605_v18  ;;  %s5942_s9 = sld [smem:[#allocation3 + $0x3c]] }
 0x3e7   : > { %v1827_v52 = vpop.permute.xlu1 %1826  ;;  %v1805_v36 = vpop.permute.xlu0 %1804  ;;  %v2769_v60 = vstv %s5846_s13  ;;  %v630_v56 = vmul.f32 %v628_v25, %v6845_v31  ;;  %v6848_v25 = vld [vmem:[#allocation71_spill] sm:$0xff]  ;;  %v729_v37 = vstv %s5900_s26  ;;  %s5946_s14 = sld [smem:[#allocation3 + $0xb3]]  ;;  %v723_v31 = vstv %s5904_s10 }
 0x3e8   : > { %v1808_v48 = vmul.f32 %v1807_v61, %v1805_v36  ;;  %v594_v6 = vadd.f32 %v592_v47, %v584_v39  ;;  %v1830_v33 = vmul.f32 %v1829_v34, %v1827_v52  ;;  %v2764_v61 = vmul.f32 %v2763_v0, %v5803_v53  ;;  %s5949_s18 = sld [smem:[#allocation3 + $0x3d]] }
 0x3e9   : > { %2101 = vrot.lane.b32.xlu0 %v5755_v45, %s6792_s25  ;;  %s5888_s25 = sld [smem:[#allocation3 + $0xb2]]  ;;  %v639_v47 = vmul.f32 %v638_v58, %v6848_v25  ;;  %v632_v36 = vadd.f32 %v630_v56, %v622_v49  ;;  %v675_v34 = vstv %s5861_s1  ;;  %v5960_v56 = vmul.f32 %v729_v37, %v3874_v27  ;;  %v6853_v49 = vld [vmem:[#allocation76_spill] sm:$0xff] }
 0x3ea   : > { %v1809_v9 = vadd.f32 %v1808_v48, %v1803_v19  ;;  %v604_v14 = vadd.f32 %v602_v17, %v594_v6  ;;  %v2765_v53 = vadd.f32 %v2764_v61, %v2759_v2  ;;  %s5954_s16 = sld [smem:[#allocation3 + $0xb4]]  ;;  %v5970_v43 = vmul.f32 %v729_v37, %v3889_v28 }
 0x3eb   : > { %v1836_v59 = vpop.permute.xlu1 %1835  ;;  %v2767_v45 = vpop.permute.xlu0 %2766  ;;  %v2777_v29 = vstv %s5867_s6  ;;  %s5962_s13 = sld [smem:[#allocation3 + $0x3e]]  ;;  %v1850_v27 = vstv %s5931_s20  ;;  %v737_v28 = vrot.slane %v5960_v56, 6  ;;  %v6861_v56 = vld [vmem:[#allocation84_spill] sm:$0xff] }
 0x3ec   : > { %v1813_v62 = vadd.f32 %v1812_v32, %v1809_v9  ;;  %v1839_v40 = vmul.f32 %v1838_v42, %v1836_v59  ;;  %v2770_v13 = vmul.f32 %v2769_v60, %v2767_v45  ;;  %v621_v19 = vadd.f32 %v619_v23, %v604_v14  ;;  %v6850_v42 = vld [vmem:[#allocation73_spill] sm:$0xff]  ;;  %s5966_s11 = sld [smem:[#allocation3 + $0xb5]] }
 0x3ed   : > { %v651_v32 = vrot.slane %v5871_v5, 5  ;;  %v642_v5 = vadd.f32 %v640_v50, %v632_v36  ;;  %v1854_v23 = vstv %s5914_s23  ;;  %v666_v60 = vmul.f32 %v665_v30, %v6850_v42  ;;  %s5973_s1 = sld [smem:[#allocation3 + $0x3f]] }
 0x3ee   : > { %v1819_v41 = vadd.f32 %v1818_v21, %v1813_v62  ;;  %v631_v4 = vadd.f32 %v629_v10, %v621_v19  ;;  %v2771_v35 = vadd.f32 %v2770_v13, %v2765_v53  ;;  %v2789_v21 = vstv %s5898_s19  ;;  %s5979_s6 = sld [smem:[#allocation3 + $0xb9]] }
 0x3ef   : > { %v5906_v57 = vpop.permute.xlu1 %2799  ;;  %v2775_v15 = vpop.permute.xlu0 %2774  ;;  %v2793_v39 = vstv %s5888_s25  ;;  %v653_v17 = vsel %vm189_vm1, %v651_v32, %v652_v11  ;;  %v659_v62 = vadd.f32 %v655_v22, %v642_v5  ;;  %v1844_v11 = vstv %s5910_s2  ;;  %s5984_s29 = sld [smem:[#allocation3 + $0xb6]] }
 0x3f0   : > { %v1825_v1 = vadd.f32 %v1824_v46, %v1819_v41  ;;  %v2778_v52 = vmul.f32 %v2777_v29, %v2775_v15  ;;  %v641_v9 = vadd.f32 %v639_v47, %v631_v4  ;;  %v2794_v20 = vmul.f32 %v2793_v39, %v4761_v16  ;;  %v6851_v41 = vld [vmem:[#allocation74_spill] sm:$0xff]  ;;  %v6852_v29 = vld [vmem:[#allocation75_spill] sm:$0xff]  ;;  %s5987_s24 = sld [smem:[#allocation3 + $0xf6]] }
 0x3f1   : > { %v677_v2 = vmul.f32 %v675_v34, %v6851_v41  ;;  %v713_v14 = vstv %s5891_s28  ;;  %v676_v15 = vmul.f32 %v675_v34, %v6852_v29  ;;  %v669_v13 = vadd.f32 %v667_v24, %v659_v62  ;;  %s5992_s12 = sld [smem:[#allocation3 + $0xb7]] }
 0x3f2   : > { %v1831_v44 = vadd.f32 %v1830_v33, %v1825_v1  ;;  %v2779_v6 = vadd.f32 %v2778_v52, %v2771_v35  ;;  %v658_v0 = vadd.f32 %v653_v17, %v641_v9  ;;  %v2796_v18 = vrot.slane %v2794_v20, 4  ;;  %v6855_v52 = vld [vmem:[#allocation78_spill] sm:$0xff]  ;;  %v6856_v35 = vld [vmem:[#allocation79_spill] sm:$0xff]  ;;  %s5995_s25 = sld [smem:[#allocation3 + $0xf7]] }
 0x3f3   : > { %v5922_v48 = vpop.permute.xlu1 %2805  ;;  %v2781_v51 = vpop.permute.xlu0 %2780  ;;  %v687_v19 = vmul.f32 %v685_v8, %v6853_v49  ;;  %v5977_v47 = vmul.f32 %v729_v37, %v3867_v26  ;;  %v679_v53 = vadd.f32 %v677_v2, %v669_v13  ;;  %v705_v36 = vmul.f32 %v703_v54, %v6855_v52  ;;  %s5999_s28 = sld [smem:[#allocation3 + $0xf8]] }
 0x3f4   : > { %v1840_v58 = vadd.f32 %v1839_v40, %v1831_v44  ;;  %v2784_v12 = vmul.f32 %v2783_v63, %v2781_v51  ;;  %v1855_v40 = vmul.f32 %v1854_v23, %v5002_v3  ;;  %v668_v50 = vadd.f32 %v666_v60, %v658_v0  ;;  %v6854_v63 = vld [vmem:[#allocation77_spill] sm:$0xff]  ;;  %s6002_s19 = sld [smem:[#allocation3 + $0xf9]]  ;;  %v6859_v23 = vld [vmem:[#allocation82_spill] sm:$0xff] }
 0x3f5   : > { %v686_v25 = vmul.f32 %v685_v8, %v6854_v63  ;;  %v1863_v32 = vstv %s5942_s9  ;;  %v689_v22 = vadd.f32 %v687_v19, %v679_v53  ;;  %v739_v5 = vrot.slane %v5970_v43, 6  ;;  %v6857_v8 = vld [vmem:[#allocation80_spill] sm:$0xff]  ;;  %s6009_s26 = sld [smem:[#allocation3 + $0xb8]] }
 0x3f6   : > { %v2785_v38 = vadd.f32 %v2784_v12, %v2779_v6  ;;  %v678_v4 = vadd.f32 %v676_v15, %v668_v50  ;;  %v704_v12 = vmul.f32 %v703_v54, %v6856_v35  ;;  %v1857_v26 = vrot.slane %v1855_v40, 1  ;;  %v6858_v54 = vld [vmem:[#allocation81_spill] sm:$0xff]  ;;  %s6012_s10 = sld [smem:[#allocation3 + $0xfa]] }
 0x3f7   : > { %v1861_v59 = vpop.permute.xlu1 %1860  ;;  %v2787_v45 = vpop.permute.xlu0 %2786  ;;  %v1869_v9 = vstv %s5949_s18  ;;  %v736_v6 = vrot.slane %v5977_v47, 6  ;;  %v707_v34 = vadd.f32 %v705_v36, %v689_v22  ;;  %v714_v37 = vmul.f32 %v713_v14, %v6858_v54  ;;  %s6014_s2 = sld [smem:[#allocation3 + $0xfb]] }
 0x3f8   : > { %v2790_v46 = vmul.f32 %v2789_v21, %v2787_v45  ;;  %v2802_v21 = vstv %s5946_s14  ;;  %v688_v30 = vadd.f32 %v686_v25, %v678_v4  ;;  %v1864_v20 = vmul.f32 %v1863_v32, %v1861_v59  ;;  %s6021_s23 = sld [smem:[#allocation3 + $0x40]] }
 0x3f9   : > { %v715_v45 = vmul.f32 %v713_v14, %v6857_v8  ;;  %v2803_v24 = vmul.f32 %v2802_v21, %v5906_v57  ;;  %v725_v0 = vmul.f32 %v723_v31, %v6859_v23  ;;  %v2808_v42 = vstv %s5954_s16  ;;  %s6028_s20 = sld [smem:[#allocation3 + $0x42]]  ;;  %v6865_v23 = vld [vmem:[#allocation88_spill] sm:$0xff] }
 0x3fa   : > { %v2791_v33 = vadd.f32 %v2790_v46, %v2785_v38  ;;  %v1875_v38 = vstv %s5962_s13  ;;  %v706_v55 = vadd.f32 %v704_v12, %v688_v30  ;;  %v1883_v60 = vstv %s5973_s1  ;;  %s6030_s9 = sld [smem:[#allocation3 + $0xfc]] }
 0x3fb   : > { %v1867_v7 = vpop.permute.xlu1 %1866  ;;  %v1842_v10 = vpop.permute.xlu0 %1841  ;;  %v717_v57 = vadd.f32 %v715_v45, %v707_v34  ;;  %v2823_v15 = vstv %s5984_s29  ;;  %v2839_v40 = vstv %s5979_s6  ;;  %v2809_v13 = vmul.f32 %v2808_v42, %v5922_v48  ;;  %s6035_s14 = sld [smem:[#allocation3 + $0xfd]] }
 0x3fc   : > { %v2798_v61 = vadd.f32 %v2796_v18, %v2791_v33  ;;  %v1845_v1 = vmul.f32 %v1844_v11, %v1842_v10  ;;  %v1870_v11 = vmul.f32 %v1869_v9, %v1867_v7  ;;  %v2814_v18 = vstv %s5966_s11  ;;  %v6860_v33 = vld [vmem:[#allocation83_spill] sm:$0xff]  ;;  %s6045_s18 = sld [smem:[#allocation3 + $0x41]]  ;;  %v6862_v9 = vld [vmem:[#allocation85_spill] sm:$0xff] }
 0x3fd   : > { %v724_v41 = vmul.f32 %v723_v31, %v6860_v33  ;;  %v716_v7 = vadd.f32 %v714_v37, %v706_v55  ;;  %v727_v43 = vadd.f32 %v725_v0, %v717_v57  ;;  %v2829_v50 = vstv %s5992_s12  ;;  %s6049_s16 = sld [smem:[#allocation3 + $0xfe]]  ;;  %v6864_v55 = vld [vmem:[#allocation87_spill] sm:$0xff] }
 0x3fe   : > { %v1846_v44 = vadd.f32 %v1845_v1, %v1840_v58  ;;  %v2804_v10 = vadd.f32 %v2803_v24, %v2798_v61  ;;  %v740_v61 = vsel %vm690_vm6, %v737_v28, %v739_v5  ;;  %v2840_v36 = vmul.f32 %v2839_v40, %v4761_v16  ;;  %s6060_s13 = sld [smem:[#allocation3 + $0x44]] }
 0x3ff   : > { %v1873_v51 = vpop.permute.xlu1 %1872  ;;  %v1848_v39 = vpop.permute.xlu0 %1847  ;;  %v726_v63 = vadd.f32 %v724_v41, %v716_v7  ;;  %v2841_v32 = vmul.f32 0.0, %v2839_v40  ;;  %v744_v12 = vadd.f32 %v740_v61, %v727_v43  ;;  %v770_v22 = vstv %s5925_s27  ;;  %s6057_s27 = sld [smem:[#allocation3 + $0xba]]  ;;  %v6869_v61 = vld [vmem:[#allocation91_spill] sm:$0xff] }
 0x400   : > { %v1851_v58 = vmul.f32 %v1850_v27, %v1848_v39  ;;  %v1876_v2 = vmul.f32 %v1875_v38, %v1873_v51  ;;  %v750_v27 = vstv %s5917_s17  ;;  %v2810_v48 = vadd.f32 %v2809_v13, %v2804_v10  ;;  %s6041_s17 = sld [smem:[#allocation3 + $0xff]] }
 0x401   : > { %v760_v51 = vstv %s5920_s5  ;;  %v818_v5 = vstv %s5999_s28  ;;  %v751_v30 = vmul.f32 %v750_v27, %v6862_v9  ;;  %s6053_s5 = sld [smem:[#allocation3 + $0x43]]  ;;  %v2844_v34 = vrot.slane %v2840_v36, 5 }
 0x402   : > { %v1852_v17 = vadd.f32 %v1851_v58, %v1846_v44  ;;  %v738_v44 = vsel %vm690_vm6, %v736_v6, %v737_v28  ;;  %v752_v28 = vmul.f32 %v750_v27, %v6861_v56  ;;  %v6863_v6 = vld [vmem:[#allocation86_spill] sm:$0xff]  ;;  %v2845_v8 = vrot.slane %v2841_v32, 5  ;;  %s6069_s11 = sld [smem:[#allocation3 + $0xbb]]  ;;  %v6872_v32 = vld [vmem:[#allocation93_spill] sm:$0xff] }
 0x403   : > { %v1881_v46 = vpop.permute.xlu1 %1880  ;;  %v2812_v62 = vpop.permute.xlu0 %2811  ;;  %v743_v58 = vadd.f32 %v738_v44, %v726_v63  ;;  %v792_v54 = vstv %s5934_s7  ;;  %v802_v37 = vstv %s5987_s24  ;;  %v761_v24 = vmul.f32 %v760_v51, %v6864_v55  ;;  %s6073_s7 = sld [smem:[#allocation3 + $0x45]]  ;;  %v6870_v27 = vld [vmem:[#allocation30_spill] sm:$0xff] }
 0x404   : > { %v1859_v59 = vadd.f32 %v1857_v26, %v1852_v17  ;;  %v1884_v31 = vmul.f32 %v1883_v60, %v1881_v46  ;;  %v2815_v19 = vmul.f32 %v2814_v18, %v2812_v62  ;;  %v2835_v26 = vstv %s6009_s26  ;;  %v6866_v60 = vld [vmem:[#allocation29_spill] sm:$0xff]  ;;  %s6077_s1 = sld [smem:[#allocation3 + $0xbc]] }
 0x405   : > { %v754_v62 = vadd.f32 %v752_v28, %v744_v12  ;;  %v772_v0 = vmul.f32 %v770_v22, %v6865_v23  ;;  %v812_v42 = vstv %s5995_s25  ;;  %v6067_v18 = vmul.f32 %v818_v5, %v6866_v60  ;;  %s6082_s6 = sld [smem:[#allocation3 + $0x46]] }
 0x406   : > { %v1865_v14 = vadd.f32 %v1864_v20, %v1859_v59  ;;  %v2816_v4 = vadd.f32 %v2815_v19, %v2810_v48  ;;  %v762_v20 = vmul.f32 %v760_v51, %v6863_v6  ;;  %v1899_v59 = vstv %s6028_s20  ;;  %v6871_v48 = vld [vmem:[#allocation92_spill] sm:$0xff]  ;;  %s6086_s29 = sld [smem:[#allocation3 + $0xc0]] }
 0x407   : > { %v6016_v29 = vpop.permute.xlu1 %2849  ;;  %v2821_v1 = vpop.permute.xlu0 %2820  ;;  %v753_v41 = vadd.f32 %v751_v30, %v743_v58  ;;  %v2846_v57 = vsel %vm189_vm1, %v2844_v34, %v2845_v8  ;;  %v793_v43 = vmul.f32 %v792_v54, %v6869_v61  ;;  %v1895_v63 = vstv %s6045_s18  ;;  %s6091_s24 = sld [smem:[#allocation3 + $0xbd]] }
 0x408   : > { %v1871_v49 = vadd.f32 %v1870_v11, %v1865_v14  ;;  %v2824_v47 = vmul.f32 %v2823_v15, %v2821_v1  ;;  %v1889_v11 = vstv %s6021_s23  ;;  %v6867_v14 = vld [vmem:[#allocation89_spill] sm:$0xff]  ;;  %v6868_v1 = vld [vmem:[#allocation90_spill] sm:$0xff]  ;;  %v828_v44 = vstv %s6002_s19  ;;  %s6097_s12 = sld [smem:[#allocation3 + $0xbe]] }
 0x409   : > { %v771_v10 = vmul.f32 %v770_v22, %v6867_v14  ;;  %v794_v40 = vmul.f32 %v792_v54, %v6868_v1  ;;  %v763_v19 = vadd.f32 %v761_v24, %v753_v41  ;;  %v803_v51 = vmul.f32 %v802_v37, %v6872_v32  ;;  %s6103_s25 = sld [smem:[#allocation3 + $0x100]] }
 0x40a   : > { %v1877_v25 = vadd.f32 %v1876_v2, %v1871_v49  ;;  %v2825_v21 = vadd.f32 %v2824_v47, %v2816_v4  ;;  %v764_v2 = vadd.f32 %v762_v20, %v754_v62  ;;  %v804_v47 = vmul.f32 %v802_v37, %v6871_v48  ;;  %s6109_s28 = sld [smem:[#allocation3 + $0xbf]] }
 0x40b   : > { %v6037_v53 = vpop.permute.xlu1 %2855  ;;  %v2827_v52 = vpop.permute.xlu0 %2826  ;;  %v773_v36 = vadd.f32 %v771_v10, %v763_v19  ;;  %v838_v4 = vstv %s6012_s10  ;;  %v2852_v30 = vstv %s6057_s27  ;;  %v1914_v6 = vstv %s6060_s13  ;;  %s6112_s19 = sld [smem:[#allocation3 + $0x101]] }
 0x40c   : > { %v1885_v39 = vadd.f32 %v1884_v31, %v1877_v25  ;;  %v2830_v35 = vmul.f32 %v2829_v50, %v2827_v52  ;;  %v1900_v31 = vmul.f32 %v1899_v59, %v5002_v3  ;;  %v819_v50 = vmul.f32 %v818_v5, %v6870_v27  ;;  %s6118_s26 = sld [smem:[#allocation3 + $0x102]] }
 0x40d   : > { %v774_v25 = vadd.f32 %v772_v0, %v764_v2  ;;  %v795_v5 = vadd.f32 %v793_v43, %v773_v36  ;;  %v848_v34 = vstv %s6014_s2  ;;  %v867_v37 = vstv %s6030_s9  ;;  %s6123_s23 = sld [smem:[#allocation3 + $0x47]]  ;;  %v6875_v43 = vld [vmem:[#allocation96_spill] sm:$0xff] }
 0x40e   : > { %v2831_v38 = vadd.f32 %v2830_v35, %v2825_v21  ;;  %v1908_v35 = vstv %s6053_s5  ;;  %v6874_v21 = vld [vmem:[#allocation95_spill] sm:$0xff]  ;;  %v2858_v0 = vstv %s6069_s11  ;;  %v877_v41 = vstv %s6035_s14  ;;  %s6130_s20 = sld [smem:[#allocation3 + $0x49]] }
 0x40f   : > { %v1906_v17 = vpop.permute.xlu1 %1905  ;;  %v2833_v45 = vpop.permute.xlu0 %2832  ;;  %v796_v28 = vadd.f32 %v794_v40, %v774_v25  ;;  %v813_v9 = vmul.f32 %v812_v42, %v6874_v21  ;;  %v805_v54 = vadd.f32 %v803_v51, %v795_v5  ;;  %v2889_v1 = vstv %s6086_s29  ;;  %v6877_v51 = vld [vmem:[#allocation98_spill] sm:$0xff]  ;;  %s6139_s18 = sld [smem:[#allocation3 + $0xc1]]  ;;  %v6880_v21 = vld [vmem:[#allocation100_spill] sm:$0xff] }
 0x410   : > { %v2836_v46 = vmul.f32 %v2835_v26, %v2833_v45  ;;  %v6873_v26 = vld [vmem:[#allocation94_spill] sm:$0xff]  ;;  %v1909_v8 = vmul.f32 %v1908_v35, %v1906_v17  ;;  %v2859_v40 = vmul.f32 %v2858_v0, %v6037_v53  ;;  %v2879_v48 = vstv %s6097_s12  ;;  %s6145_s5 = sld [smem:[#allocation3 + $0x104]] }
 0x411   : > { %v814_v58 = vmul.f32 %v812_v42, %v6873_v26  ;;  %v806_v20 = vadd.f32 %v804_v47, %v796_v28  ;;  %v815_v17 = vadd.f32 %v813_v9, %v805_v54  ;;  %v1928_v42 = vstv %s6082_s6  ;;  %v6876_v47 = vld [vmem:[#allocation97_spill] sm:$0xff]  ;;  %s6152_s27 = sld [smem:[#allocation3 + $0x48]] }
 0x412   : > { %v2837_v33 = vadd.f32 %v2836_v46, %v2831_v38  ;;  %v893_v38 = vstv %s6041_s17  ;;  %v1920_v46 = vstv %s6073_s7  ;;  %s6133_s17 = sld [smem:[#allocation3 + $0x103]]  ;;  %v2891_v28 = vmul.f32 0.0, %v2889_v1 }
 0x413   : > { %v1912_v7 = vpop.permute.xlu1 %1911  ;;  %v1887_v15 = vpop.permute.xlu0 %1886  ;;  %v816_v24 = vadd.f32 %v814_v58, %v806_v20  ;;  %v821_v61 = vadd.f32 %v819_v50, %v815_v17  ;;  %v6878_v50 = vld [vmem:[#allocation41_spill] sm:$0xff]  ;;  %v850_v9 = vmul.f32 %v848_v34, %v6880_v21  ;;  %s6158_s10 = sld [smem:[#allocation3 + $0x106]] }
 0x414   : > { %v2848_v13 = vadd.f32 %v2846_v57, %v2837_v33  ;;  %v1890_v49 = vmul.f32 %v1889_v11, %v1887_v15  ;;  %v2853_v11 = vmul.f32 %v2852_v30, %v6016_v29  ;;  %v1915_v59 = vmul.f32 %v1914_v6, %v1912_v7  ;;  %v6881_v20 = vld [vmem:[#allocation101_spill] sm:$0xff]  ;;  %s6163_s13 = sld [smem:[#allocation3 + $0xc2]] }
 0x415   : > { %v2864_v33 = vstv %s6077_s1  ;;  %v887_v57 = vstv %s6049_s16  ;;  %v6116_v29 = vmul.f32 %v893_v38, %v6866_v60  ;;  %v2873_v7 = vstv %s6091_s24  ;;  %s6165_s2 = sld [smem:[#allocation3 + $0x4a]] }
 0x416   : > { %v1891_v52 = vadd.f32 %v1890_v49, %v1885_v39  ;;  %v1902_v39 = vrot.slane %v1900_v31, 2  ;;  %v2854_v10 = vadd.f32 %v2853_v11, %v2848_v13  ;;  %v822_v13 = vadd.f32 %v6067_v18, %v816_v24  ;;  %s6172_s11 = sld [smem:[#allocation3 + $0xc3]] }
 0x417   : > { %v1918_v12 = vpop.permute.xlu1 %1917  ;;  %v1893_v56 = vpop.permute.xlu0 %1892  ;;  %v840_v18 = vmul.f32 %v838_v4, %v6877_v51  ;;  %v896_v35 = vmul.f32 %v893_v38, %v6878_v50  ;;  %v894_v30 = vmul.f32 %v893_v38, %v6870_v27  ;;  %v2885_v6 = vstv %s6109_s28  ;;  %s6177_s7 = sld [smem:[#allocation3 + $0x105]] }
 0x418   : > { %v1896_v22 = vmul.f32 %v1895_v63, %v1893_v56  ;;  %v1921_v2 = vmul.f32 %v1920_v46, %v1918_v12  ;;  %v830_v63 = vmul.f32 %v828_v44, %v6875_v43  ;;  %v2860_v36 = vadd.f32 %v2859_v40, %v2854_v10  ;;  %v6882_v46 = vld [vmem:[#allocation102_spill] sm:$0xff]  ;;  %s6184_s1 = sld [smem:[#allocation4 + $0x1]] }
 0x419   : > { %v2890_v56 = vmul.f32 %v2889_v1, %v4761_v16  ;;  %v2895_v24 = vrot.slane %v2891_v28, 6  ;;  %s6190_s9 = sld [smem:[#allocation3 + $0x4b]] }
 0x41a   : > { %v1897_v45 = vadd.f32 %v1896_v22, %v1891_v52  ;;  %v829_v52 = vmul.f32 %v828_v44, %v6876_v47  ;;  %v6879_v44 = vld [vmem:[#allocation99_spill] sm:$0xff]  ;;  %v832_v5 = vadd.f32 %v830_v63, %v822_v13  ;;  %v6886_v63 = vld [vmem:[#allocation104_spill] sm:$0xff]  ;;  %s6194_s6 = sld [smem:[#allocation3 + $0x4c]] }
 0x41b   : > { %v1926_v62 = vpop.permute.xlu1 %1925  ;;  %v2862_v55 = vpop.permute.xlu0 %2861  ;;  %v839_v26 = vmul.f32 %v838_v4, %v6879_v44  ;;  %v901_v4 = vrot.slane %v6116_v29, 1  ;;  %v6884_v29 = vld [vmem:[#allocation103_spill] sm:$0xff]  ;;  %v914_v44 = vstv %s6103_s25  ;;  %s6203_s14 = sld [smem:[#allocation3 + $0x50]] }
 0x41c   : > { %v1904_v23 = vadd.f32 %v1902_v39, %v1897_v45  ;;  %v1929_v31 = vmul.f32 %v1928_v42, %v1926_v62  ;;  %v2865_v19 = vmul.f32 %v2864_v33, %v2862_v55  ;;  %v831_v16 = vadd.f32 %v829_v52, %v821_v61  ;;  %v6883_v42 = vld [vmem:[#allocation105_spill] sm:$0xff]  ;;  %s6205_s16 = sld [smem:[#allocation3 + $0x4d]] }
 0x41d   : > { %v842_v54 = vadd.f32 %v840_v18, %v832_v5  ;;  %v869_v62 = vmul.f32 %v867_v37, %v6882_v46  ;;  %v2894_v55 = vrot.slane %v2890_v56, 6  ;;  %v879_v33 = vmul.f32 %v877_v41, %v6883_v42  ;;  %v6887_v18 = vld [vmem:[#allocation106_spill] sm:$0xff]  ;;  %s6211_s29 = sld [smem:[#allocation3 + $0x4e]] }
 0x41e   : > { %v1910_v14 = vadd.f32 %v1909_v8, %v1904_v23  ;;  %v2866_v39 = vadd.f32 %v2865_v19, %v2860_v36  ;;  %v849_v8 = vmul.f32 %v848_v34, %v6881_v20  ;;  %v841_v34 = vadd.f32 %v839_v26, %v831_v16  ;;  %s6217_s24 = sld [smem:[#allocation3 + $0x107]] }
 0x41f   : > { %v2871_v15 = vpop.permute.xlu0 %2870  ;;  %v6127_v25 = vpop.permute.xlu1 %2899  ;;  %v852_v0 = vadd.f32 %v850_v9, %v842_v54  ;;  %v2902_v19 = vstv %s6139_s18  ;;  %v2896_v13 = vsel %vm690_vm6, %v2894_v55, %v2895_v24  ;;  %v2908_v26 = vstv %s6163_s13  ;;  %s6223_s12 = sld [smem:[#allocation3 + $0x4f]] }
 0x420   : > { %v1916_v49 = vadd.f32 %v1915_v59, %v1910_v14  ;;  %v2874_v32 = vmul.f32 %v2873_v7, %v2871_v15  ;;  %v903_v59 = vrot.slane %v896_v35, 1  ;;  %v1944_v14 = vstv %s6130_s20  ;;  %s6229_s25 = sld [smem:[#allocation3 + $0x108]] }
 0x421   : > { %v851_v10 = vadd.f32 %v849_v8, %v841_v34  ;;  %v868_v7 = vmul.f32 %v867_v37, %v6884_v29  ;;  %v900_v15 = vrot.slane %v894_v30, 1  ;;  %v871_v40 = vadd.f32 %v869_v62, %v852_v0  ;;  %s6237_s28 = sld [smem:[#allocation3 + $0x51]] }
 0x422   : > { %v1922_v53 = vadd.f32 %v1921_v2, %v1916_v49  ;;  %v2875_v45 = vadd.f32 %v2874_v32, %v2866_v39  ;;  %v1934_v2 = vstv %s6123_s23  ;;  %v6885_v49 = vld [vmem:[#allocation107_spill] sm:$0xff]  ;;  %v878_v37 = vmul.f32 %v877_v41, %v6886_v63  ;;  %s6247_s23 = sld [smem:[#allocation3 + $0x10d]] }
 0x423   : > { %v2877_v12 = vpop.permute.xlu0 %2876  ;;  %v2906_v38 = vpop.permute.xlu1 %2905  ;;  %v1945_v52 = vmul.f32 %v1944_v14, %v5002_v3  ;;  %v904_v36 = vsel %vm266_vm2, %v901_v4, %v903_v59  ;;  %v1940_v32 = vstv %s6152_s27  ;;  %v870_v51 = vadd.f32 %v868_v7, %v851_v10  ;;  %v6889_v14 = vld [vmem:[#allocation108_spill] sm:$0xff]  ;;  %s6252_s20 = sld [smem:[#allocation3 + $0x53]] }
 0x424   : > { %v1930_v58 = vadd.f32 %v1929_v31, %v1922_v53  ;;  %v2880_v22 = vmul.f32 %v2879_v48, %v2877_v12  ;;  %v889_v31 = vmul.f32 %v887_v57, %v6885_v49  ;;  %v881_v53 = vadd.f32 %v879_v33, %v871_v40  ;;  %s6259_s18 = sld [smem:[#allocation3 + $0x54]] }
 0x425   : > { %v888_v35 = vmul.f32 %v887_v57, %v6887_v18  ;;  %v2903_v41 = vmul.f32 %v2902_v19, %v6127_v25  ;;  %v902_v28 = vsel %vm266_vm2, %v900_v15, %v901_v4  ;;  %v880_v5 = vadd.f32 %v878_v37, %v870_v51  ;;  %v6890_v15 = vld [vmem:[#allocation111_spill] sm:$0xff]  ;;  %v6892_v51 = vld [vmem:[#allocation113_spill] sm:$0xff]  ;;  %s6262_s27 = sld [smem:[#allocation3 + $0x10a]] }
 0x426   : > { %v2881_v23 = vadd.f32 %v2880_v22, %v2875_v45  ;;  %v891_v56 = vadd.f32 %v889_v31, %v881_v53  ;;  %v1947_v21 = vrot.slane %v1945_v52, 3  ;;  %v934_v9 = vstv %s6118_s26  ;;  %s6244_s26 = sld [smem:[#allocation3 + $0x52]] }
 0x427   : > { %v2883_v11 = vpop.permute.xlu0 %2882  ;;  %v1951_v43 = vpop.permute.xlu1 %1950  ;;  %v1953_v30 = vstv %s6165_s2  ;;  %v890_v16 = vadd.f32 %v888_v35, %v880_v5  ;;  %v951_v20 = vstv %s6133_s17  ;;  %v2909_v8 = vmul.f32 %v2908_v26, %v2906_v38  ;;  %s6254_s17 = sld [smem:[#allocation3 + $0x57]] }
 0x428   : > { %v2886_v17 = vmul.f32 %v2885_v6, %v2883_v11  ;;  %v2914_v6 = vstv %s6172_s11  ;;  %v908_v45 = vadd.f32 %v904_v36, %v891_v56  ;;  %v961_v54 = vstv %s6145_s5  ;;  %v6893_v56 = vld [vmem:[#allocation112_spill] sm:$0xff]  ;;  %s6273_s13 = sld [smem:[#allocation3 + $0x10b]] }
 0x429   : > { %v971_v46 = vstv %s6177_s7  ;;  %v977_v62 = vstv %s6158_s10  ;;  %v1954_v11 = vmul.f32 %v1953_v30, %v1951_v43  ;;  %v2917_v0 = vstv %s6184_s1  ;;  %s6271_s10 = sld [smem:[#allocation3 + $0x55]] }
 0x42a   : > { %v2887_v1 = vadd.f32 %v2886_v17, %v2881_v23  ;;  %v6888_v23 = vld [vmem:[#allocation109_spill] sm:$0xff]  ;;  %v1959_v42 = vstv %s6190_s9  ;;  %v1965_v33 = vstv %s6194_s6  ;;  %v907_v38 = vadd.f32 %v902_v28, %v890_v16  ;;  %s6282_s5 = sld [smem:[#allocation3 + $0x56]] }
 0x42b   : > { %v1932_v61 = vpop.permute.xlu0 %1931  ;;  %v1963_v22 = vpop.permute.xlu1 %1962  ;;  %v916_v17 = vmul.f32 %v914_v44, %v6888_v23  ;;  %v915_v10 = vmul.f32 %v914_v44, %v6889_v14  ;;  %v6227_v29 = vmul.f32 %v977_v62, %v6866_v60  ;;  %v980_v40 = vmul.f32 %v977_v62, %v6878_v50  ;;  %v6894_v44 = vld [vmem:[#allocation115_spill] sm:$0xff]  ;;  %s6286_s2 = sld [smem:[#allocation3 + $0x10c]] }
 0x42c   : > { %v2898_v48 = vadd.f32 %v2896_v13, %v2887_v1  ;;  %v1935_v47 = vmul.f32 %v1934_v2, %v1932_v61  ;;  %v6234_v49 = vmul.f32 %v977_v62, %v6870_v27  ;;  %v1989_v19 = vstv %s6203_s14  ;;  %s6293_s11 = sld [smem:[#allocation3 + $0x58]] }
 0x42d   : > { %v1966_v63 = vmul.f32 %v1965_v33, %v1963_v22  ;;  %v918_v37 = vadd.f32 %v916_v17, %v908_v45  ;;  %v1973_v52 = vstv %s6205_s16  ;;  %v1979_v53 = vstv %s6211_s29  ;;  %s6300_s7 = sld [smem:[#allocation3 + $0x59]] }
 0x42e   : > { %v1936_v12 = vadd.f32 %v1935_v47, %v1930_v58  ;;  %v2904_v25 = vadd.f32 %v2903_v41, %v2898_v48  ;;  %v924_v58 = vstv %s6112_s19  ;;  %s6239_s19 = sld [smem:[#allocation3 + $0x109]]  ;;  %v6891_v48 = vld [vmem:[#allocation110_spill] sm:$0xff]  ;;  %v936_v18 = vmul.f32 %v934_v9, %v6892_v51 }
 0x42f   : > { %v1938_v39 = vpop.permute.xlu0 %1937  ;;  %v1977_v2 = vpop.permute.xlu1 %1976  ;;  %v926_v1 = vmul.f32 %v924_v58, %v6890_v15  ;;  %v925_v47 = vmul.f32 %v924_v58, %v6891_v48  ;;  %v935_v28 = vmul.f32 %v934_v9, %v6893_v56  ;;  %v953_v26 = vmul.f32 %v951_v20, %v6894_v44  ;;  %v6895_v58 = vld [vmem:[#allocation114_spill] sm:$0xff]  ;;  %s6308_s1 = sld [smem:[#allocation3 + $0x5a]] }
 0x430   : > { %v1941_v57 = vmul.f32 %v1940_v32, %v1938_v39  ;;  %v2910_v34 = vadd.f32 %v2909_v8, %v2904_v25  ;;  %v917_v32 = vadd.f32 %v915_v10, %v907_v38  ;;  %v1990_v22 = vmul.f32 %v1989_v19, %v5002_v3  ;;  %v6898_v38 = vld [vmem:[#allocation119_spill] sm:$0xff]  ;;  %v6899_v10 = vld [vmem:[#allocation118_spill] sm:$0xff]  ;;  %s6311_s9 = sld [smem:[#allocation3 + $0x5e]] }
 0x431   : > { %v952_v30 = vmul.f32 %v951_v20, %v6895_v58  ;;  %v985_v9 = vrot.slane %v6227_v29, 2  ;;  %v987_v8 = vrot.slane %v980_v40, 2  ;;  %v6897_v20 = vld [vmem:[#allocation116_spill] sm:$0xff]  ;;  %v973_v14 = vmul.f32 %v971_v46, %v6898_v38  ;;  %s6315_s6 = sld [smem:[#allocation3 + $0x5b]] }
 0x432   : > { %v1942_v4 = vadd.f32 %v1941_v57, %v1936_v12  ;;  %v928_v12 = vadd.f32 %v926_v1, %v918_v37  ;;  %v927_v25 = vadd.f32 %v925_v47, %v917_v32  ;;  %v1992_v33 = vrot.slane %v1990_v22, 4  ;;  %s6323_s14 = sld [smem:[#allocation3 + $0x5c]] }
 0x433   : > { %v2912_v55 = vpop.permute.xlu0 %2911  ;;  %v1996_v36 = vpop.permute.xlu1 %1995  ;;  %v2004_v29 = vstv %s6244_s26  ;;  %v1061_v47 = vstv %s6247_s23  ;;  %v1045_v44 = vstv %s6273_s13  ;;  %s6326_s16 = sld [smem:[#allocation3 + $0x10e]] }
 0x434   : > { %v1949_v24 = vadd.f32 %v1947_v21, %v1942_v4  ;;  %v2915_v59 = vmul.f32 %v2914_v6, %v2912_v55  ;;  %v1980_v21 = vmul.f32 %v1979_v53, %v1977_v2  ;;  %v1985_v6 = vstv %s6223_s12  ;;  %v6896_v55 = vld [vmem:[#allocation117_spill] sm:$0xff]  ;;  %s6332_s29 = sld [smem:[#allocation3 + $0x5d]] }
 0x435   : > { %v938_v16 = vadd.f32 %v936_v18, %v928_v12  ;;  %v984_v4 = vrot.slane %v6234_v49, 2  ;;  %v937_v62 = vadd.f32 %v935_v28, %v927_v25  ;;  %v1018_v32 = vstv %s6239_s19  ;;  %v6900_v25 = vld [vmem:[#allocation120_spill] sm:$0xff]  ;;  %s6343_s12 = sld [smem:[#allocation3 + $0x110]] }
 0x436   : > { %v2916_v7 = vadd.f32 %v2915_v59, %v2910_v34  ;;  %v1955_v13 = vadd.f32 %v1954_v11, %v1949_v24  ;;  %v963_v24 = vmul.f32 %v961_v54, %v6896_v55  ;;  %v962_v11 = vmul.f32 %v961_v54, %v6897_v20  ;;  %s6357_s19 = sld [smem:[#allocation3 + $0x60]] }
 0x437   : > { %v1957_v31 = vpop.permute.xlu0 %1956  ;;  %v1998_v59 = vstv %s6237_s28  ;;  %v2008_v23 = vpop.permute.xlu1 %2007  ;;  %v955_v17 = vadd.f32 %v953_v26, %v938_v16  ;;  %v954_v2 = vadd.f32 %v952_v30, %v937_v62  ;;  %v972_v54 = vmul.f32 %v971_v46, %v6899_v10  ;;  %v6902_v62 = vld [vmem:[#allocation122_spill] sm:$0xff]  ;;  %s6353_s28 = sld [smem:[#allocation3 + $0x111]] }
 0x438   : > { %v2918_v61 = vadd.f32 %v2917_v0, %v2916_v7  ;;  %v1960_v43 = vmul.f32 %v1959_v42, %v1957_v31  ;;  %v988_v7 = vsel %vm351_vm3, %v985_v9, %v987_v8  ;;  %v1999_v1 = vmul.f32 %v1998_v59, %v1996_v36  ;;  %s6360_s26 = sld [smem:[#allocation3 + $0x114]] }
 0x439   : > { %v965_v40 = vadd.f32 %v963_v24, %v955_v17  ;;  %v964_v49 = vadd.f32 %v962_v11, %v954_v2  ;;  %v986_v31 = vsel %vm351_vm3, %v984_v4, %v985_v9  ;;  %v2010_v46 = vstv %s6252_s20  ;;  %v6904_v2 = vld [vmem:[#allocation124_spill] sm:$0xff]  ;;  %s6367_s23 = sld [smem:[#allocation3 + $0x61]] }
 0x43a   : > { %v3441_v35 = vmul.f32 -1.442695, %v2918_v61  ;;  %v1961_v41 = vadd.f32 %v1960_v43, %v1955_v13  ;;  %v998_v13 = vstv %s6217_s24  ;;  %v1008_v36 = vstv %s6229_s25  ;;  %s6339_s24 = sld [smem:[#allocation3 + $0x10f]] }
 0x43b   : > { %v1971_v39 = vpop.permute.xlu0 %1970  ;;  %v975_v37 = vadd.f32 %v973_v14, %v965_v40  ;;  %v974_v48 = vadd.f32 %v972_v54, %v964_v49  ;;  %v2023_v53 = vpop.permute.xlu1 %2022  ;;  %v2011_v18 = vmul.f32 %v2010_v46, %v2008_v23  ;;  %v2025_v12 = vstv %s6271_s10  ;;  %s6348_s25 = sld [smem:[#allocation3 + $0x5f]] }
 0x43c   : > { %3509 = vpow2.f32 %v3441_v35  ;;  %v1967_v5 = vadd.f32 %v1966_v63, %v1961_v41  ;;  %v1974_v57 = vmul.f32 %v1973_v52, %v1971_v39  ;;  %v2035_v63 = vstv %s6254_s17  ;;  %s6373_s20 = sld [smem:[#allocation3 + $0x112]] }
 0x43d   : > { %v2019_v52 = vstv %s6259_s18  ;;  %v1035_v35 = vstv %s6262_s27  ;;  %v2036_v56 = vmul.f32 %v2035_v63, %v5002_v3  ;;  %v2037_v28 = vmul.f32 0.0, %v2035_v63  ;;  %s6375_s17 = sld [smem:[#allocation3 + $0x113]] }
 0x43e   : > { %v1975_v45 = vadd.f32 %v1974_v57, %v1967_v5  ;;  %v6304_v26 = vmul.f32 %v1061_v47, %v6866_v60  ;;  %v992_v57 = vadd.f32 %v988_v7, %v975_v37  ;;  %v999_v58 = vmul.f32 %v998_v13, %v6900_v25  ;;  %v6910_v25 = vld [vmem:[#allocation129_spill] sm:$0xff]  ;;  %s6392_s18 = sld [smem:[#allocation4]] }
 0x43f   : > { %v1983_v34 = vpop.permute.xlu0 %1982  ;;  %v2031_v30 = vstv %s6282_s5  ;;  %v2046_v9 = vpop.permute.xlu1 %2045  ;;  %v1009_v55 = vmul.f32 %v1008_v36, %v6902_v62  ;;  %v1055_v24 = vstv %s6286_s2  ;;  %v2040_v11 = vrot.slane %v2036_v56, 5  ;;  %v6911_v62 = vld [vmem:[#allocation131_spill] sm:$0xff]  ;;  %s6406_s27 = sld [smem:[#allocation3 + $0x115]] }
 0x440   : > { %v1981_v0 = vadd.f32 %v1980_v21, %v1975_v45  ;;  %v1986_v42 = vmul.f32 %v1985_v6, %v1983_v34  ;;  %v991_v21 = vadd.f32 %v986_v31, %v974_v48  ;;  %v6901_v6 = vld [vmem:[#allocation121_spill] sm:$0xff]  ;;  %v2026_v45 = vmul.f32 %v2025_v12, %v2023_v53  ;;  %s6414_s10 = sld [smem:[#allocation3 + $0x116]] }
 0x441   : > { %v1000_v16 = vmul.f32 %v998_v13, %v6901_v6  ;;  %v2041_v34 = vrot.slane %v2037_v28, 5  ;;  %v6318_v59 = vmul.f32 %v1061_v47, %v6878_v50  ;;  %v1019_v38 = vmul.f32 %v1018_v32, %v6904_v2  ;;  %v6906_v13 = vld [vmem:[#allocation125_spill] sm:$0xff]  ;;  %v6909_v28 = vld [vmem:[#allocation130_spill] sm:$0xff]  ;;  %s6419_s13 = sld [smem:[#allocation3 + $0x117]] }
 0x442   : > { %v1987_v15 = vadd.f32 %v1986_v42, %v1981_v0  ;;  %v1001_v0 = vadd.f32 %v999_v58, %v991_v21  ;;  %v6903_v42 = vld [vmem:[#allocation123_spill] sm:$0xff]  ;;  %v2048_v14 = vstv %s6293_s11  ;;  %v1069_v54 = vrot.slane %v6304_v26, 3  ;;  %s6423_s5 = sld [smem:[#allocation3 + $0x118]] }
 0x443   : > { %v2002_v19 = vpop.permute.xlu0 %2001  ;;  %v1002_v10 = vadd.f32 %v1000_v16, %v992_v57  ;;  %v2042_v49 = vsel %vm189_vm1, %v2040_v11, %v2041_v34  ;;  %v2054_v31 = vstv %s6300_s7  ;;  %v2058_v46 = vpop.permute.xlu1 %2057  ;;  %v2049_v37 = vmul.f32 %v2048_v14, %v2046_v9  ;;  %s3231_s2 = sld [smem:[#allocation3 + $0x11b]] }
 0x444   : > { %v1994_v61 = vadd.f32 %v1992_v33, %v1987_v15  ;;  %v2005_v43 = vmul.f32 %v2004_v29, %v2002_v19  ;;  %v1010_v33 = vmul.f32 %v1008_v36, %v6903_v42  ;;  %v1062_v29 = vmul.f32 %v1061_v47, %v6870_v27  ;;  %s6427_s11 = sld [smem:[#allocation3 + $0x119]] }
 0x445   : > { %v1011_v15 = vadd.f32 %v1009_v55, %v1001_v0  ;;  %v2060_v36 = vstv %s6308_s1  ;;  %v2085_v12 = vstv %s6311_s9  ;;  %v1047_v58 = vmul.f32 %v1045_v44, %v6910_v25  ;;  %s6429_s7 = sld [smem:[#allocation3 + $0x11a]] }
 0x446   : > { %v2000_v51 = vadd.f32 %v1999_v1, %v1994_v61  ;;  %v6905_v1 = vld [vmem:[#allocation126_spill] sm:$0xff]  ;;  %v1020_v61 = vmul.f32 %v1018_v32, %v6906_v13  ;;  %v1012_v48 = vadd.f32 %v1010_v33, %v1002_v10  ;;  %v2075_v6 = vstv %s6323_s14  ;;  %v6912_v33 = vld [vmem:[#allocation160_spill] sm:$0xff]  ;;  %s6445_s1 = sld [smem:[#allocation3 + $0x11c]] }
 0x447   : > { %v2017_v41 = vpop.permute.xlu0 %2016  ;;  %v1036_v40 = vmul.f32 %v1035_v35, %v6905_v1  ;;  %v1021_v47 = vadd.f32 %v1019_v38, %v1011_v15  ;;  %v2073_v16 = vpop.permute.xlu1 %2072  ;;  %v1057_v55 = vmul.f32 %v1055_v24, %v6911_v62  ;;  %v1082_v34 = vstv %s6326_s16  ;;  %s6450_s9 = sld [smem:[#allocation3 + $0x11d]] }
 0x448   : > { %v2006_v39 = vadd.f32 %v2005_v43, %v2000_v51  ;;  %v2020_v22 = vmul.f32 %v2019_v52, %v2017_v41  ;;  %v1071_v43 = vrot.slane %v6318_v59, 3  ;;  %v6907_v52 = vld [vmem:[#allocation128_spill] sm:$0xff]  ;;  %v6908_v51 = vld [vmem:[#allocation127_spill] sm:$0xff]  ;;  %v1022_v21 = vadd.f32 %v1020_v61, %v1012_v48  ;;  %s6458_s14 = sld [smem:[#allocation3 + $0x11f]] }
 0x449   : > { %v3510_v5 = vpop.eup %3509  ;;  %v1046_v53 = vmul.f32 %v1045_v44, %v6907_v52  ;;  %v1038_v56 = vadd.f32 %v1036_v40, %v1021_v47  ;;  %v2076_v42 = vmul.f32 %v2075_v6, %v2073_v16  ;;  %v1092_v38 = vstv %s6339_s24  ;;  %v6914_v47 = vld [vmem:[#allocation134_spill] sm:$0xff]  ;;  %s3238_s16 = sld [smem:[#allocation3 + $0x122]] }
 0x44a   : > { %v2922_v8 = vadd.f32 1.0, %v3510_v5  ;;  %v2012_v4 = vadd.f32 %v2011_v18, %v2006_v39  ;;  %v1037_v18 = vmul.f32 %v1035_v35, %v6908_v51  ;;  %v1056_v39 = vmul.f32 %v1055_v24, %v6909_v28  ;;  %v6916_v28 = vld [vmem:[#allocation136_spill] sm:$0xff]  ;;  %s6467_s24 = sld [smem:[#allocation3 + $0x121]] }
 0x44b   : > { %v2029_v20 = vpop.permute.xlu0 %2028  ;;  %v2069_v5 = vstv %s6315_s6  ;;  %v1048_v9 = vadd.f32 %v1046_v53, %v1038_v56  ;;  %v6370_v24 = vsub.s32 0, %v6912_v33  ;;  %v2098_v13 = vstv %s6348_s25  ;;  %s6455_s6 = sld [smem:[#allocation3 + $0x11e]] }
 0x44c   : > { %3511 = vrcp.f32 %v2922_v8  ;;  %v2021_v23 = vadd.f32 %v2020_v22, %v2012_v4  ;;  %v2032_v17 = vmul.f32 %v2031_v30, %v2029_v20  ;;  %v1068_v22 = vrot.slane %v1062_v29, 3  ;;  %v2096_v29 = vpop.permute.xlu1 %2095  ;;  %s6488_s25 = sld [smem:[#allocation3 + $0x124]] }
 0x44d   : > { %v2061_v30 = vmul.f32 %v2060_v36, %v2058_v46  ;;  %v2086_v8 = vmul.f32 %v2085_v12, %v5002_v3  ;;  %v2087_v4 = vmul.f32 0.0, %v2085_v12  ;;  %v1058_v11 = vadd.f32 %v1056_v39, %v1048_v9 }
 0x44e   : > { %v2027_v7 = vadd.f32 %v2026_v45, %v2021_v23  ;;  %v1039_v45 = vadd.f32 %v1037_v18, %v1022_v21  ;;  %v1070_v59 = vsel %vm436_vm4, %v1068_v22, %v1069_v54  ;;  %v2081_v23 = vstv %s6332_s29  ;;  %s6463_s29 = sld [smem:[#allocation3 + $0x120]] }
 0x44f   : > { %v2052_v19 = vpop.permute.xlu0 %2051  ;;  %v2090_v14 = vrot.slane %v2086_v8, 6  ;;  %v2091_v10 = vrot.slane %v2087_v4, 6  ;;  %v1102_v61 = vstv %s6343_s12  ;;  %v2992_v48 = vsub.s32 1, %v6912_v33  ;;  %v6918_v8 = vld [vmem:[#allocation138_spill] sm:$0xff]  ;;  %s6483_s12 = sld [smem:[#allocation3 + $0x123]] }
 0x450   : > { %v2033_v63 = vadd.f32 %v2032_v17, %v2027_v7  ;;  %v2055_v41 = vmul.f32 %v2054_v31, %v2052_v19  ;;  %v1049_v3 = vadd.f32 %v1047_v58, %v1039_v45  ;;  %v1075_v31 = vadd.f32 %v1070_v59, %v1058_v11  ;;  %v6913_v19 = vld [vmem:[#allocation132_spill] sm:$0xff] }
 0x451   : > { %v1083_v46 = vmul.f32 %v1082_v34, %v6913_v19  ;;  %v1093_v52 = vmul.f32 %v1092_v38, %v6914_v47  ;;  %v1119_v53 = vstv %s6353_s28  ;;  %v2092_v26 = vsel %vm690_vm6, %v2090_v14, %v2091_v10  ;;  %v6923_v19 = vld [vmem:[#allocation141_spill] sm:$0xff]  ;;  %s3241_s28 = sld [smem:[#allocation3 + $0x125]] }
 0x452   : > { %v2044_v32 = vadd.f32 %v2042_v49, %v2033_v63  ;;  %v1059_v7 = vadd.f32 %v1057_v55, %v1049_v3  ;;  %v1072_v49 = vsel %vm436_vm4, %v1069_v54, %v1071_v43  ;;  %v2104_v36 = vstv %s6357_s19  ;;  %s3143_s19 = sld [smem:[#allocation4 + $0x2]] }
 0x453   : > { %v2067_v57 = vpop.permute.xlu0 %2066  ;;  %v1145_v43 = vstv %s6360_s26  ;;  %v1085_v56 = vadd.f32 %v1083_v46, %v1075_v31  ;;  %v1103_v39 = vmul.f32 %v1102_v61, %v6916_v28  ;;  %v2110_v22 = vstv %s6367_s23  ;;  %s6955_s26 = sshll.u32 %s3788_s8, 6 }
 0x454   : > { %v2050_v35 = vadd.f32 %v2049_v37, %v2044_v32  ;;  %v2070_v20 = vmul.f32 %v2069_v5, %v2067_v57  ;;  %v1076_v54 = vadd.f32 %v1072_v49, %v1059_v7  ;;  %v2099_v32 = vmul.f32 %v2098_v13, %v2096_v29  ;;  %v2108_v5 = vpop.permute.xlu1 %2107  ;;  %s6512_s23 = scalar_lea.vmem [#allocation8], %s6955_s26 }
 0x455   : > { %v3003_v58 = vsub.s32 2, %v6912_v33  ;;  %v1095_v9 = vadd.f32 %v1093_v52, %v1085_v56  ;;  %v1129_v6 = vstv %s6373_s20  ;;  %v1147_v16 = vmul.f32 %v1145_v43, %v6866_v60  ;;  %v6924_v52 = vld [vmem:[#allocation143_spill] sm:$0xff]  ;;  %v6925_v56 = vld [vmem:[#allocation144_spill] sm:$0xff]  ;;  %s3448_s20 = sshll.u32 %s3712_s22, 10  ;;  %s3048_s22 = scalar_lea.sflag [#allocation7], %s3788_s8 }
 0x456   : > { %v2056_v44 = vadd.f32 %v2055_v41, %v2050_v35  ;;  %v6915_v41 = vld [vmem:[#allocation133_spill] sm:$0xff]  ;;  %v6917_v35 = vld [vmem:[#allocation135_spill] sm:$0xff]  ;;  %v1120_v4 = vmul.f32 %v1119_v53, %v6918_v8  ;;  %v1139_v45 = vstv %s6375_s17  ;;  %v2111_v55 = vmul.f32 %v2110_v22, %v2108_v5  ;;  %v6926_v22 = vld [vmem:[#allocation146_spill] sm:$0xff]  ;;  %s3061_s17 = sshll.u32 %s6512_s23, 4  ;;  %s6539_s17 = int_to_ptr.vmem [resolvable:$true] %s3061_s17 }
 0x457   : > { %v2079_v17 = vpop.permute.xlu0 %2078  ;;  %v1084_v12 = vmul.f32 %v1082_v34, %v6915_v41  ;;  %v1105_v34 = vadd.f32 %v1103_v39, %v1095_v9  ;;  %v1146_v59 = vmul.f32 %v1145_v43, %v6870_v27  ;;  %v1148_v10 = vmul.f32 %v1145_v43, %v6878_v50 }
 0x458   : > { %v2062_v0 = vadd.f32 %v2061_v30, %v2056_v44  ;;  %v2082_v1 = vmul.f32 %v2081_v23, %v2079_v17  ;;  %v1094_v30 = vmul.f32 %v1092_v38, %v6917_v35  ;;  %v6920_v23 = vld [vmem:[#allocation140_spill] sm:$0xff]  ;;  %v6921_v38 = vld [vmem:[#allocation139_spill] sm:$0xff]  ;;  %v2113_v29 = vstv %s6392_s18 }
 0x459   : > { %v3512_v2 = vpop.eup %3511  ;;  %v1086_v44 = vadd.f32 %v1084_v12, %v1076_v54  ;;  %v1130_v17 = vmul.f32 %v1129_v6, %v6920_v23  ;;  %v1121_v14 = vmul.f32 %v1119_v53, %v6921_v38  ;;  %v1122_v7 = vadd.f32 %v1120_v4, %v1105_v34 }
 0x45a   : > { %v2071_v15 = vadd.f32 %v2070_v20, %v2062_v0  ;;  %v6377_v40 = vmul.f32 0.33333334, %v3512_v2  ;;  %v6919_v20 = vld [vmem:[#allocation137_spill] sm:$0xff]  ;;  %v1131_v46 = vmul.f32 %v1129_v6, %v6923_v19  ;;  %v1153_v13 = vrot.slane %v1147_v16, 4  ;;  %v6929_v16 = vld [vmem:[#allocation147_spill] sm:$0xff] }
 0x45b   : > { %v2102_v51 = vpop.permute.xlu0 %2101  ;;  %v1104_v11 = vmul.f32 %v1102_v61, %v6919_v20  ;;  %v1096_v2 = vadd.f32 %v1094_v30, %v1086_v44  ;;  %v1152_v61 = vrot.slane %v1146_v59, 4  ;;  %v1141_v53 = vmul.f32 %v1139_v45, %v6924_v52  ;;  %v6928_v30 = vld [vmem:[#allocation148_spill] sm:$0xff] }
 0x45c   : > { %v2077_v63 = vadd.f32 %v2076_v42, %v2071_v15  ;;  %v2982_v37 = vrot.slane %v6377_v40, %v6370_v24  ;;  %v2105_v21 = vmul.f32 %v2104_v36, %v2102_v51  ;;  %v2993_v25 = vrot.slane %v6377_v40, %v2992_v48  ;;  %v6922_v15 = vld [vmem:[#allocation142_spill] sm:$0xff] }
 0x45d   : > { %v3004_v0 = vrot.slane %v6377_v40, %v3003_v58  ;;  %v3014_v42 = vsub.s32 3, %v6912_v33  ;;  %v1106_v31 = vadd.f32 %v1104_v11, %v1096_v2  ;;  %v1166_v43 = vstv %s6406_s27  ;;  %v6931_v11 = vld [vmem:[#allocation149_spill] sm:$0xff]  ;;  %v6933_v2 = vld [vmem:[#allocation151_spill] sm:$0xff] }
 0x45e   : > { %v2083_v18 = vadd.f32 %v2082_v1, %v2077_v63  ;;  %2988 = vbcast.lane.b32.xlu1 %v2982_v37, 264  ;;  %2984 = vbcast.lane.b32.xlu0 %v2982_v37, 256  ;;  %v1140_v1 = vmul.f32 %v1139_v45, %v6922_v15  ;;  %v1132_v63 = vadd.f32 %v1130_v17, %v1122_v7  ;;  %v1186_v39 = vstv %s6419_s13  ;;  %s3581_s13 = scalar_lea.vmem %s6539_s17, 1024 }
 0x45f   : > { %v3015_v48 = vrot.slane %v6377_v40, %v3014_v42  ;;  %v1123_v47 = vadd.f32 %v1121_v14, %v1106_v31  ;;  %v1167_v28 = vmul.f32 %v1166_v43, %v6925_v56  ;;  %v1203_v58 = vstv %s6423_s5  ;;  %p3582_p2 = scmp.ne.s32.totalorder %s6539_s17, %s3581_s13  ;;  %s3662_s5 = smov [#allocation8]  }
 0x460   : > { %v2094_v57 = vadd.f32 %v2092_v26, %v2083_v18  ;;  %v1155_v26 = vrot.slane %v1148_v10, 4  ;;  %v1142_v36 = vadd.f32 %v1140_v1, %v1132_v63  ;;  %v1154_v18 = vsel %vm521_vm5, %v1152_v61, %v1153_v13  ;;  %v6934_v10 = vld [vmem:[#allocation154_spill] sm:$0xff] }
 0x461   : > { %v1133_v54 = vadd.f32 %v1131_v46, %v1123_v47  ;;  %v1187_v9 = vmul.f32 %v1186_v39, %v6928_v30  ;;  %v1229_v6 = vstv %s3231_s2  ;;  %v1213_v4 = vstv %s6427_s11  ;;  %p3583_p4 = pnand %p3582_p2, %p6956_p3  ;;  %s3585_s2 = sshll.u32 %s3662_s5, 4  ;;  %s3586_s2 = int_to_ptr.vmem [resolvable:$false] %s3585_s2 }
 0x462   : > { %v2100_v62 = vadd.f32 %v2099_v32, %v2094_v57  ;;  %2999 = vbcast.lane.b32.xlu1 %v2993_v25, 264  ;;  %2995 = vbcast.lane.b32.xlu0 %v2993_v25, 256  ;;  %v1176_v32 = vstv %s6414_s10  ;;  %v1156_v41 = vsel %vm521_vm5, %v1153_v13, %v1155_v26  ;;  %v1159_v12 = vadd.f32 %v1154_v18, %v1142_v36  ;;  %s6537_s10 = scalar_lea.hbm %s6590_s3, %s3448_s20  ;;  %s3587_s11 = scalar_lea.vmem %s3586_s2, 2048 }
 0x463   : > { %v1143_v40 = vadd.f32 %v1141_v53, %v1133_v54  ;;  %v1177_v5 = vmul.f32 %v1176_v32, %v6926_v22  ;;  %v1178_v8 = vmul.f32 %v1176_v32, %v6929_v16  ;;  %v1223_v44 = vstv %s6429_s7  ;;  %p3584_p9 = pneg %p3583_p4  ;;  %p3588_p10 = scmp.lt.s32.totalorder %s6539_s17, %s3586_s2 }
 0x464   : > { %v2106_v3 = vadd.f32 %v2105_v21, %v2100_v62  ;;  %v6927_v21 = vld [vmem:[#allocation145_spill] sm:$0xff]  ;;  %v1169_v35 = vadd.f32 %v1167_v28, %v1159_v12  ;;  %v6930_v62 = vld [vmem:[#allocation150_spill] sm:$0xff]  ;;  %v1188_v34 = vmul.f32 %v1186_v39, %v6931_v11  ;;  %v1231_v59 = vmul.f32 %v1229_v6, %v6866_v60  ;;  %p3589_p12 = scmp.lt.s32.totalorder %s3587_s11, %s3581_s13 }
 0x465   : > { %v1160_v57 = vadd.f32 %v1156_v41, %v1143_v40  ;;  %v1168_v25 = vmul.f32 %v1166_v43, %v6927_v21  ;;  %v1230_v23 = vmul.f32 %v1229_v6, %v6870_v27  ;;  %v1205_v38 = vmul.f32 %v1203_v58, %v6933_v2  ;;  %v6937_v40 = vld [vmem:[#allocation156_spill] sm:$0xff]  ;;  %v6938_v28 = vld [vmem:[#allocation158_spill] sm:$0xff] }
 0x466   : > { %v2112_v49 = vadd.f32 %v2111_v55, %v2106_v3  ;;  %3010 = vbcast.lane.b32.xlu1 %v3004_v0, 264  ;;  %3006 = vbcast.lane.b32.xlu0 %v3004_v0, 256  ;;  %v1179_v45 = vadd.f32 %v1177_v5, %v1169_v35  ;;  %v1204_v55 = vmul.f32 %v1203_v58, %v6930_v62  ;;  %v6932_v3 = vld [vmem:[#allocation152_spill] sm:$0xff]  ;;  %v1237_v19 = vrot.slane %v1231_v59, 5  ;;  %v6939_v5 = vld [vmem:[#allocation157_spill] sm:$0xff]  ;;  %p3590_p13 = por %p3589_p12, %p3588_p10 }
 0x467   : > { %v1170_v20 = vadd.f32 %v1168_v25, %v1160_v57  ;;  %v1214_v0 = vmul.f32 %v1213_v4, %v6932_v3  ;;  %v1232_v7 = vmul.f32 %v1229_v6, %v6878_v50  ;;  %v1236_v46 = vrot.slane %v1230_v23, 5  ;;  %v6940_v58 = vld [vmem:[#allocation161_spill] sm:$0xff] }
 0x468   : > { %v2114_v37 = vadd.f32 %v2113_v29, %v2112_v49  ;;  %v1189_v17 = vadd.f32 %v1187_v9, %v1179_v45  ;;  %v1224_v29 = vmul.f32 %v1223_v44, %v6934_v10  ;;  %v6935_v49 = vld [vmem:[#allocation153_spill] sm:$0xff]  ;;  %v1250_v26 = vstv %s6445_s1  ;;  %v6941_v9 = vld [vmem:[#allocation159_spill] sm:$0xff]  ;;  %p3591_p1 = pnand %p3590_p13, %p3584_p9 }
 0x469   : > { %v1180_v42 = vadd.f32 %v1178_v8, %v1170_v20  ;;  %v1215_v31 = vmul.f32 %v1213_v4, %v6935_v49  ;;  %v1239_v52 = vrot.slane %v1232_v7, 5  ;;  %v1238_v36 = vsel %vm189_vm1, %v1236_v46, %v1237_v19  ;;  %v6942_v8 = vld [vmem:[#allocation163_spill] sm:$0xff]  ;;  %v6944_v3 = vld [vmem:[#allocation165_spill] sm:$0xff] }
 0x46a   : > { %v3341_v51 = vmul.f32 -1.442695, %v2114_v37  ;;  %3021 = vbcast.lane.b32.xlu1 %v3015_v48, 264  ;;  %3017 = vbcast.lane.b32.xlu0 %v3015_v48, 256  ;;  %v1206_v14 = vadd.f32 %v1204_v55, %v1189_v17  ;;  %v6936_v37 = vld [vmem:[#allocation155_spill] sm:$0xff]  ;;  %v1260_v54 = vstv %s6450_s9  ;;  %v1251_v32 = vmul.f32 %v1250_v26, %v6937_v40  ;;  %v6943_v55 = vld [vmem:[#allocation162_spill] sm:$0xff] }
 0x46b   : > { %v1190_v1 = vadd.f32 %v1188_v34, %v1180_v42  ;;  %v1225_v48 = vmul.f32 %v1223_v44, %v6936_v37  ;;  %v1240_v43 = vsel %vm189_vm1, %v1237_v19, %v1239_v52  ;;  %v3661_v41 = vmov 1966171168  }
 0x46c   : > { %3513 = vpow2.f32 %v3341_v51  ;;  %v1216_v13 = vadd.f32 %v1214_v0, %v1206_v14  ;;  %v2928_v12 = vunpack.c.l.s4 %v3661_v41  ;;  %v1270_v56 = vstv %s6455_s6  ;;  %v6945_v14 = vld [vmem:[#allocation164_spill] sm:$0xff] }
 0x46d   : > { %v1207_v63 = vadd.f32 %v1205_v38, %v1190_v1  ;;  %v1261_v39 = vmul.f32 %v1260_v54, %v6938_v28  ;;  %v1252_v57 = vmul.f32 %v1250_v26, %v6939_v5  ;;  %v1287_v21 = vstv %s6458_s14  ;;  %v6946_v1 = vld [vmem:[#allocation167_spill] sm:$0xff]  ;;  %v6949_v28 = vld [vmem:[#allocation168_spill] sm:$0xff] }
 0x46e   : > { %v1226_v47 = vadd.f32 %v1224_v29, %v1216_v13  ;;  %v1271_v35 = vmul.f32 %v1270_v56, %v6940_v58  ;;  %v2929_v30 = vunpack.c.0.s8 %v2928_v12  ;;  %v1262_v6 = vmul.f32 %v1260_v54, %v6941_v9  ;;  %v6948_v13 = vld [vmem:[#allocation169_spill] sm:$0xff]  ;;  %v6950_v5 = vld [vmem:[#allocation171_spill] sm:$0xff]  ;;  %v6951_v58 = vld [vmem:[#allocation170_spill] sm:$0xff] }
 0x46f   : > { %v1217_v53 = vadd.f32 %v1215_v31, %v1207_v63  ;;  %v1288_v4 = vmul.f32 %v1287_v21, %v6942_v8  ;;  %v1313_v45 = vstv %s3238_s16  ;;  %v1272_v44 = vmul.f32 %v1270_v56, %v6943_v55 }
 0x470   : > { %v1243_v18 = vadd.f32 %v1238_v36, %v1226_v47  ;;  %v1297_v20 = vstv %s6463_s29  ;;  %v1307_v34 = vstv %s6467_s24  ;;  %v2932_v59 = vsub.s32 %v2929_v30, %v6912_v33  ;;  %v6947_v33 = vld [vmem:[#allocation166_spill] sm:$0xff]  ;;  %v6952_v30 = vld [vmem:[#allocation173_spill] sm:$0xff] }
 0x471   : > { %v1227_v51 = vadd.f32 %v1225_v48, %v1217_v53  ;;  %v1289_v0 = vmul.f32 %v1287_v21, %v6944_v3  ;;  %v1314_v42 = vmul.f32 %v1313_v45, %v6870_v27  ;;  %v1315_v2 = vmul.f32 %v1313_v45, %v6866_v60 }
 0x472   : > { %v1253_v25 = vadd.f32 %v1251_v32, %v1243_v18  ;;  %v1298_v10 = vmul.f32 %v1297_v20, %v6945_v14  ;;  %v1316_v29 = vmul.f32 %v1313_v45, %v6878_v50  ;;  %v1299_v49 = vmul.f32 %v1297_v20, %v6946_v1  ;;  %v6954_v45 = vld [vmem:[#allocation174_spill] sm:$0xff] }
 0x473   : > { %v1244_v22 = vadd.f32 %v1240_v43, %v1227_v51  ;;  %v1308_v31 = vmul.f32 %v1307_v34, %v6947_v33  ;;  %v1320_v46 = vrot.slane %v1314_v42, 6  ;;  %v1321_v60 = vrot.slane %v1315_v2, 6 }
 0x474   : > { %v1263_v16 = vadd.f32 %v1261_v39, %v1253_v25  ;;  %v1323_v37 = vrot.slane %v1316_v29, 6  ;;  %v1334_v54 = vstv %s6483_s12  ;;  %v1344_v41 = vstv %s6488_s25 }
 0x475   : > { %v1254_v62 = vadd.f32 %v1252_v57, %v1244_v22  ;;  %v1322_v51 = vsel %vm690_vm6, %v1320_v46, %v1321_v60  ;;  %v1335_v39 = vmul.f32 %v1334_v54, %v6949_v28  ;;  %v1336_v57 = vmul.f32 %v1334_v54, %v6950_v5  ;;  %v3526_v46 = vld [vmem:[%s3794_s15] sm:$0xff] }
 0x476   : > { %v1273_v11 = vadd.f32 %v1271_v35, %v1263_v16  ;;  %v1324_v18 = vsel %vm690_vm6, %v1321_v60, %v1323_v37  ;;  %v1354_v21 = vstv %s3241_s28  ;;  %v1345_v35 = vmul.f32 %v1344_v41, %v6951_v58  ;;  %v6953_v16 = vld [vmem:[#allocation172_spill] sm:$0xff] }
 0x477   : > { %v1264_v17 = vadd.f32 %v1262_v6, %v1254_v62  ;;  %v1346_v9 = vmul.f32 %v1344_v41, %v6952_v30  ;;  %v1355_v8 = vmul.f32 %v1354_v21, %v6953_v16  ;;  %v1356_v62 = vmul.f32 %v1354_v21, %v6954_v45  ;;  %v3529_v41 = vld [vmem:[%s3794_s15 + $0x28] sm:$0xff] }
 0x478   : > { %v1290_v38 = vadd.f32 %v1288_v4, %v1273_v11  ;;  %v1359_v11 = vstv %s3143_s19 }
 0x479   : > { %v3514_v15 = vpop.eup %3513 }
 0x47a   : > { %v2118_v61 = vadd.f32 1.0, %v3514_v15  ;;  %v1274_v15 = vadd.f32 %v1272_v44, %v1264_v17  ;;  %v1300_v63 = vadd.f32 %v1298_v10, %v1290_v38 }
 0x47c   : > { %3515 = vrcp.f32 %v2118_v61  ;;  %v1291_v27 = vadd.f32 %v1289_v0, %v1274_v15  ;;  %v1309_v61 = vmul.f32 %v1307_v34, %v6948_v13  ;;  %v1310_v52 = vadd.f32 %v1308_v31, %v1300_v63 }
 0x47e   : > { %v1301_v47 = vadd.f32 %v1299_v49, %v1291_v27  ;;  %v1327_v56 = vadd.f32 %v1322_v51, %v1310_v52 }
 0x480   : > { %v1311_v43 = vadd.f32 %v1309_v61, %v1301_v47  ;;  %v1337_v6 = vadd.f32 %v1335_v39, %v1327_v56  ;;  %v3527_v47 = vld [vmem:[%s3794_s15 + $0x18] sm:$0xff]  ;;  %v3530_v56 = vld [vmem:[%s3794_s15 + $0x20] sm:$0xff] }
 0x482   : > { %v1328_v22 = vadd.f32 %v1324_v18, %v1311_v43  ;;  %v1347_v55 = vadd.f32 %v1345_v35, %v1337_v6  ;;  %v3532_v35 = vld [vmem:[%s3794_s15 + $0x30] sm:$0xff] }
 0x484   : > { %v1338_v4 = vadd.f32 %v1336_v57, %v1328_v22  ;;  %v1357_v20 = vadd.f32 %v1355_v8, %v1347_v55 }
 0x486   : > { %v1348_v44 = vadd.f32 %v1346_v9, %v1338_v4 }
 0x488   : > { %v1358_v34 = vadd.f32 %v1356_v62, %v1348_v44 }
 0x489   : > { %v3516_v23 = vpop.eup %3515 }
 0x48a   : > { %v2121_v7 = vmul.f32 0.33333334, %v3516_v23  ;;  %v1361_v23 = vadd.f32 %v1359_v11, %v1358_v34 }
 0x48c   : > { %v2933_v19 = vrot.slane %v2121_v7, %v2932_v59 }
 0x48e   : > { %v2941_v50 = vrot.slane %v2933_v19, %v2932_v59  ;;  %v2934_v48 = vcombine.high %v2933_v19, %v2933_v19  ;;  %v3525_v19 = vld [vmem:[%s3794_s15 + $0x8] sm:$0xff] }
 0x490   : > { %v2954_v53 = vrot.slane %v2941_v50, %v6370_v24  ;;  %v2948_v26 = vrot.slane %v2934_v48, %v2932_v59  ;;  %v2949_v36 = vcombine.high %v2941_v50, %v2941_v50  ;;  %v1360_v59 = vadd.f32 %v1359_v11, %v1357_v20 }
 0x492   : > { %v2958_v40 = vrot.slane %v2948_v26, %v6370_v24  ;;  %v2962_v32 = vrot.slane %v2949_v36, %v6370_v24  ;;  %v2950_v12 = vcombine.high %v2948_v26, %v2948_v26  ;;  %v3242_v17 = vmul.f32 -1.442695, %v1360_v59 }
 0x494   : > { %v6502_v25 = vrot.slane %v2950_v12, %v6370_v24  ;;  %v3243_v24 = vmul.f32 -1.442695, %v1361_v23  ;;  %3517 = vpow2.f32 %v3242_v17 }
 0x496   : > { %3519 = vpow2.f32 %v3243_v24 }
 0x4a1   : > { %v3518_v3 = vpop.eup %3517 }
 0x4a2   : > { %v1368_v42 = vadd.f32 1.0, %v3518_v3 }
 0x4a3   : > { %v3520_v0 = vpop.eup %3519 }
 0x4a4   : > { %v1369_v2 = vadd.f32 1.0, %v3520_v0  ;;  %3521 = vrcp.f32 %v1368_v42 }
 0x4a6   : > { %3523 = vrcp.f32 %v1369_v2 }
 0x4b1   : > { %v3522_v38 = vpop.eup %3521 }
 0x4b2   : > { %v1374_v29 = vmul.f32 0.33333334, %v3522_v38 }
 0x4b3   : > { %v3524_v14 = vpop.eup %3523 }
 0x4b4   : > { %v1375_v10 = vmul.f32 0.33333334, %v3524_v14  ;;  %v2971_v15 = vadd.f32 %v2954_v53, %v1374_v29  ;;  %v2973_v61 = vadd.f32 %v2958_v40, %v1374_v29  ;;  %v2975_v51 = vadd.f32 %v2962_v32, %v1374_v29 }
 0x4b6   : > { %v2972_v7 = vadd.f32 %v2954_v53, %v1375_v10  ;;  %v2974_v13 = vadd.f32 %v2958_v40, %v1375_v10  ;;  %v3528_v53 = vld [vmem:[%s3794_s15 + $0x10] sm:$0xff]  ;;  %v2976_v36 = vadd.f32 %v2962_v32, %v1375_v10  ;;  %v2978_v39 = vadd.f32 %v6502_v25, %v1375_v10 }
 0x4b7   : > { %v2977_v32 = vadd.f32 %v6502_v25, %v1374_v29  ;;  %v3531_v25 = vld [vmem:[%s3794_s15 + $0x38] sm:$0xff] }
 0x4d0   : > { %v2989_v1 = vpop.permute.xlu1 %2988  ;;  %v2985_v49 = vpop.permute.xlu0 %2984 }
 0x4d1   : > { %v3024_v33 = vadd.f32 %v2989_v1, %v2972_v7  ;;  %v3023_v31 = vadd.f32 %v2985_v49, %v2971_v15 }
 0x4d3   : > { %v3032_v27 = vmul.f32 %v3525_v19, %v3024_v33  ;;  %v3031_v60 = vmul.f32 %v3526_v46, %v3023_v31 }
 0x4d4   : > { %v3000_v63 = vpop.permute.xlu1 %2999  ;;  %v2996_v37 = vpop.permute.xlu0 %2995 }
 0x4d5   : > { %3040 = vst.msk [vmem:[%s6512_s23 + $0x8] sm:$0xff] %vm153_vm0, %v3032_v27  ;;  %3039 = vst.msk [vmem:[%s6512_s23] sm:$0xff] %vm153_vm0, %v3031_v60  ;;  %v3026_v50 = vadd.f32 %v3000_v63, %v2974_v13  ;;  %v3025_v48 = vadd.f32 %v2996_v37, %v2973_v61 }
 0x4d7   : > { %v3034_v52 = vmul.f32 %v3527_v47, %v3026_v50  ;;  %v3033_v26 = vmul.f32 %v3528_v53, %v3025_v48 }
 0x4d8   : > { %v3011_v54 = vpop.permute.xlu1 %3010  ;;  %v3007_v43 = vpop.permute.xlu0 %3006 }
 0x4d9   : > { %3042 = vst.msk [vmem:[%s6512_s23 + $0x18] sm:$0xff] %vm153_vm0, %v3034_v52  ;;  %3041 = vst.msk [vmem:[%s6512_s23 + $0x10] sm:$0xff] %vm153_vm0, %v3033_v26  ;;  %v3028_v18 = vadd.f32 %v3011_v54, %v2976_v36  ;;  %v3027_v40 = vadd.f32 %v3007_v43, %v2975_v51 }
 0x4db   : > { %v3036_v12 = vmul.f32 %v3529_v41, %v3028_v18  ;;  %v3035_v28 = vmul.f32 %v3530_v56, %v3027_v40 }
 0x4dc   : > { %v3022_v22 = vpop.permute.xlu1 %3021  ;;  %v3018_v5 = vpop.permute.xlu0 %3017 }
 0x4dd   : > { %3044 = vst.msk [vmem:[%s6512_s23 + $0x28] sm:$0xff] %vm153_vm0, %v3036_v12  ;;  %3043 = vst.msk [vmem:[%s6512_s23 + $0x20] sm:$0xff] %vm153_vm0, %v3035_v28  ;;  %v3030_v57 = vadd.f32 %v3022_v22, %v2978_v39  ;;  %v3029_v21 = vadd.f32 %v3018_v5, %v2977_v32 }
 0x4df   : > { %v3038_v58 = vmul.f32 %v3531_v25, %v3030_v57  ;;  %v3037_v30 = vmul.f32 %v3532_v35, %v3029_v21 }
 0x4e1   : > { %3046 = vst.msk [vmem:[%s6512_s23 + $0x38] sm:$0xff] %vm153_vm0, %v3038_v58  ;;  %3045 = vst.msk [vmem:[%s6512_s23 + $0x30] sm:$0xff] %vm153_vm0, %v3037_v30 }
 0x4e2   : > { %3594 = shalt.err (!%p3591_p1)
}
 0x4e3   : > { %s3595_s15 = scalar_lea.hbm %s6537_s10, 1024  ;;  %s3599_s9 = scalar_lea.hbm %s6590_s3, 2048 }
 0x4e4   : > { %p3596_p5 = scmp.ne.s32.totalorder %s6537_s10, %s3595_s15  ;;  %p3600_p6 = scmp.lt.s32.totalorder %s6537_s10, %s6590_s3 }
 0x4e5   : > { %p3601_p8 = scmp.lt.s32.totalorder %s3599_s9, %s3595_s15 }
 0x4e6   : > { %p3597_p7 = pnand %p3596_p5, %p6956_p3 }
 0x4e7   : > { %p3602_p11 = por %p3601_p8, %p3600_p6 }
 0x4e8   : > { %p3598_p0 = pneg %p3597_p7 }
 0x4ea   : > { %p3603_p2 = pnand %p3602_p11, %p3598_p0 }
 0x4ec   : > { %3606 = shalt.err (!%p3603_p2)
}
 0x4ed   : > { %s3663_s16 = smov 128   ;;  %s3664_s29 = smov 8  }
 0x4ee   : > { %3451 = dma.vmem_to_hbm [thread:$0]  (%p6956_p3), %s6539_s17, 1024, %s6537_s10, %s3048_s22, %s3663_s16, %s3663_s16, %s3664_s29  }
 0x4ef PF: > { %s3076_s24 = sand.u32 1, %s3635_s0   ;;  %p6957_p4 = scmp.ne.s32.totalorder %s6627_s4, 0 }
 0x4f0   : > { %p6958_p9 = scmp.ge.s32.totalorder %s3647_s21, 2  ;;  %s3077_s12 = scalar_lea.sflag [#allocation7], %s3076_s24 }
 0x4f2   : > { %p3458_p10 = pnand %p6958_p9, %p6957_p4 }
 0x4f4   : > { %p3459_p12 = pneg %p3458_p10 }
 0x4f6   : > { %3630 = dma.done.wait (%p3459_p12), %s3077_s12, 1024  }
 0x4f7   : > { %3632 = vsyncadd (%p3459_p12), %s3077_s12, 4294966272  ;;  %s6959_s21 = sld [smem:[#allocation14_spill]] }
 0x4f8   : > { %s6960_s0 = sld [smem:[#allocation12_spill]] }
 0x4f9   : > { %s6961_s1 = sld [smem:[#allocation13_spill]] }
 0x4fa   : > { %s6962_s20 = sld [smem:[#allocation15_spill]] }
 0x4fd   : > { %p24_p13 = scmp.ge.s32.totalorder %s6959_s21, 4  }
 0x4ff   :  { %26 = sbr.rel (!%p24_p13) target bundleno = 21 (0x15), region = 69 }
 0x504   :  { %3082 = vsyncpa [#allocation6], 1 }
 0x505   :  { %3084 = vsyncpa [#allocation6 + $0x1], 1 }
 0x506   :  { %3085 = vsyncpa [#allocation7], 1 }
 0x507   :  { %3087 = vsyncpa [#allocation7 + $0x1], 1 }

</bundles_post_ra>
